<compile_context>
chip_gen: v6e
topology: v6e:2x2x1
jax: 0.10.0
libtpu: 0.0.40
codegen_flags: <defaults>
</compile_context>

<pallas_src>
import functools

import jax
import jax.numpy as jnp
from jax.experimental import pallas as pl
from jax.experimental.pallas import tpu as pltpu


# ------------------------------ Pallas kernel --------------------------------

def _netd64_fused_kernel(*refs, num_layers, negative_slope, apply_sigmoid):
    """Whole-network forward.

    refs = (x, [S, M, shift] * num_layers, out)
      x     : (H0, B*W0*C0) bf16 input feature map (rows x lane-folded (b,w,c))
      S     : (4, Ho, Hin)  bf16 0/1 row-selection matrices (padding folded in)
      M     : (4, B*Win*Cin, B*Wo*Cout) bf16 block-banded per-tap-row operator
              (BN scale folded in, batch block-diagonal)
      shift : (1, B*Wo*Cout) f32 folded BatchNorm shift
      out   : (1, B*num_classes) f32
    """
    x_ref = refs[0]
    o_ref = refs[-1]
    layer_refs = refs[1:-1]

    h = x_ref[...]                                      # (Hin, B*Win*Cin) bf16
    for li in range(num_layers):
        s_ref = layer_refs[3 * li]
        m_ref = layer_refs[3 * li + 1]
        b_ref = layer_refs[3 * li + 2]
        taps = s_ref.shape[0]                           # kernel height (4)

        acc = None
        for i in range(taps):
            # Exact row selection (0/1 matrix) on the MXU; also realizes the
            # top/bottom zero padding as all-zero selection rows.
            rows = jnp.dot(s_ref[i], h, preferred_element_type=jnp.float32)
            rows = rows.astype(jnp.bfloat16)            # exact (copies of bf16)
            part = jnp.dot(rows, m_ref[i], preferred_element_type=jnp.float32)
            acc = part if acc is None else acc + part   # (Ho, B*Wo*Cout) f32

        y = acc + b_ref[...]                            # folded BN shift
        if li < num_layers - 1:
            y = jnp.where(y >= 0.0, y, negative_slope * y)   # LeakyReLU(0.2)
            h = y.astype(jnp.bfloat16)
        else:
            if apply_sigmoid:
                y = 1.0 / (1.0 + jnp.exp(-y))           # exact sigmoid (EUP)
            o_ref[...] = y


# ------------------------------ kernel wrapper --------------------------------

def _full_block_spec(arr):
    ndim = arr.ndim
    return pl.BlockSpec(arr.shape, lambda i, _n=ndim: (0,) * _n)


def netd64_fused_call(x2d, layer_arrays, out_cols, *, apply_sigmoid,
                      negative_slope=0.2):
    """Single fused pallas_call for the whole discriminator."""
    num_layers = len(layer_arrays) // 3
    kernel = functools.partial(
        _netd64_fused_kernel, num_layers=num_layers,
        negative_slope=negative_slope, apply_sigmoid=apply_sigmoid)
    operands = [x2d] + list(layer_arrays)
    return pl.pallas_call(
        kernel,
        out_shape=jax.ShapeDtypeStruct((1, out_cols), jnp.float32),
        grid=(1,),
        in_specs=[_full_block_spec(a) for a in operands],
        out_specs=pl.BlockSpec((1, out_cols), lambda i: (0, 0)),
        compiler_params=pltpu.CompilerParams(
            dimension_semantics=("arbitrary",),
            vmem_limit_bytes=48 * 1024 * 1024),
    )(*operands)


# ------------------------- operator construction (JAX) ------------------------

def build_layer_mats(w, scale, shift, batch, h_in, stride, pad):
    """Build (S, M, shift_row) for one conv layer in the lane-folded layout.

    Feature map layout: h[r, (b*W + w)*C + c].
      out[oh, (b,ow,co)] = sum_i (S_i @ h)[oh] @ M_i  + shift_row
    S_i[oh, r]                       = 1  iff r == stride*oh + i - pad
    M_i[(b,w,ci), (b2,ow,co)]        = [b==b2] * w_eff[co,ci,i, w+pad-stride*ow]
                                       (zero when the tap column is out of range)
    Zero padding in H and W is folded into S (all-zero rows) and M (absent rows).
    """
    cout, cin, kh, kw = w.shape
    h_out = (h_in + 2 * pad - kh) // stride + 1
    w_in, w_out = h_in, h_out                               # square maps
    w_eff = (w * scale[:, None, None, None]).astype(jnp.float32)  # fold BN scale

    oh = jnp.arange(h_out)
    rr = jnp.arange(h_in)
    S = jnp.stack(
        [(stride * oh[:, None] + i - pad == rr[None, :]).astype(jnp.bfloat16)
         for i in range(kh)], axis=0)                        # (kh, h_out, h_in)

    wg = jnp.arange(w_in)
    og = jnp.arange(w_out)
    jidx = wg[:, None] + pad - stride * og[None, :]          # (w_in, w_out)
    valid = (jidx >= 0) & (jidx < kw)
    jclip = jnp.clip(jidx, 0, kw - 1)
    eye = jnp.eye(batch, dtype=jnp.float32)

    mats = []
    for i in range(kh):
        core = w_eff[:, :, i, :][:, :, jclip]                # (cout,cin,w_in,w_out)
        core = jnp.where(valid[None, None], core, 0.0)
        core = jnp.transpose(core, (2, 1, 3, 0))             # (w_in,cin,w_out,cout)
        mi = jnp.einsum('ab,wixo->awibxo', eye, core)        # batch block-diagonal
        mi = mi.reshape(batch * w_in * cin, batch * w_out * cout)
        mats.append(mi)
    M = jnp.stack(mats, axis=0).astype(jnp.bfloat16)         # (kh, B*Win*Cin, B*Wo*Cout)

    shift_row = jnp.tile(shift.astype(jnp.float32), batch * w_out)[None, :]
    return S, M, shift_row, h_out


# --------------------------------- model glue ---------------------------------

def init_netD64_params(key, nc=3, ndf=8, num_classes=1):
    """Deterministic synthetic weights; shapes follow _netD64.__init__."""
    bn_eps = 1e-5
    layer_io = [
        (nc, ndf, False),               # Conv2d(nc, ndf, 4, 2, 1)   + LeakyReLU
        (ndf, ndf * 2, True),           # Conv2d -> BN -> LeakyReLU
        (ndf * 2, ndf * 4, True),
        (ndf * 4, ndf * 8, True),
        (ndf * 8, num_classes, False),  # Conv2d(.., 4, 1, 0) [-> Sigmoid]
    ]
    params = []
    for li, (cin, cout, has_bn) in enumerate(layer_io):
        k = jax.random.fold_in(key, li)
        std = 1.0 / jnp.sqrt(jnp.float32(cin * 16))  # keep activations O(1)
        w = std * jax.random.normal(k, (cout, cin, 4, 4), dtype=jnp.float32)
        if has_bn:
            # eval-mode BN, default stats: scale = 1/sqrt(var+eps), shift = 0
            scale = jnp.full((cout,), 1.0 / jnp.sqrt(1.0 + bn_eps), jnp.float32)
        else:
            scale = jnp.ones((cout,), jnp.float32)
        shift = jnp.zeros((cout,), jnp.float32)
        params.append((w, scale, shift))
    return params


def netD64_forward(x_nchw, params, num_classes=1):
    """x: (B, nc, 64, 64) NCHW f32 -> (B,) probs (num_classes==1) else (B, C)."""
    negative_slope = 0.2
    B, nc, H, W = x_nchw.shape
    assert H == 64 and W == 64, "architecture requires 64x64 input"

    # Lane-folded layout (H, B*W*C), bf16 activations (f32 accumulation inside).
    h0 = jnp.transpose(x_nchw, (2, 0, 3, 1)).reshape(H, B * W * nc)
    h0 = h0.astype(jnp.bfloat16)

    layer_cfg = [(2, 1)] * 4 + [(1, 0)]                 # (stride, pad) per conv
    flat_inputs = []
    h_cur = H
    for (w, scale, shift), (stride, pad) in zip(params, layer_cfg):
        S, M, brow, h_cur = build_layer_mats(w, scale, shift, B, h_cur,
                                             stride, pad)
        flat_inputs += [S, M, brow]
    assert h_cur == 1

    out2d = netd64_fused_call(h0, flat_inputs, B * num_classes,
                              apply_sigmoid=(num_classes == 1),
                              negative_slope=negative_slope)   # (1, B*ncls)

    out = out2d.reshape(B, num_classes)                 # output.view(B, ncls)
    if num_classes == 1:
        out = out[:, 0]                                  # .squeeze(1)
    return out


# ------------------------------ pure-JAX reference ----------------------------

def netD64_reference(x, params, num_classes=1):
    h = x
    for li, (w, scale, shift) in enumerate(params):
        stride, pad = (2, 1) if li < 4 else (1, 0)
        h = jax.lax.conv_general_dilated(
            h, w, window_strides=(stride, stride),
            padding=[(pad, pad), (pad, pad)],
            dimension_numbers=('NCHW', 'OIHW', 'NCHW'))
        if li < 4:
            h = h * scale[None, :, None, None] + shift[None, :, None, None]
            h = jnp.where(h >= 0, h, 0.2 * h)
    out = h.reshape(x.shape[0], num_classes)
    if num_classes == 1:
        out = jax.nn.sigmoid(out)[:, 0]
    return out


# ------------------------------------ main ------------------------------------

if __name__ == "__main__":
    key = jax.random.PRNGKey(0)
    k_x, k_w = jax.random.split(key)

    B, NC, NDF = 2, 3, 8            # 64x64 input is required by the architecture
    x = jax.random.normal(k_x, (B, NC, 64, 64), dtype=jnp.float32)
    params = init_netD64_params(k_w, nc=NC, ndf=NDF, num_classes=1)

    fwd = jax.jit(functools.partial(netD64_forward, num_classes=1))
    out = jax.block_until_ready(fwd(x, params))

    assert out.shape == (B,), out.shape
    assert bool(jnp.all(jnp.isfinite(out)))
    assert bool(jnp.all((out >= 0.0) & (out <= 1.0)))   # sigmoid output

    ref = netD64_reference(x, params, num_classes=1)
    err = float(jnp.max(jnp.abs(out - ref.astype(out.dtype))))
    assert err < 5e-2, f"max abs diff vs f32 reference = {err}"

    print("KERNEL_OK")
</pallas_src>

<mosaic_0001>
module attributes {stable_mosaic.version = 11 : i64} {
  func.func @_netd64_fused_kernel(%arg0: i32, %arg1: memref<64x384xbf16, #tpu.memory_space<vmem>>, %arg2: memref<4x32x64xbf16, #tpu.memory_space<vmem>>, %arg3: memref<4x384x512xbf16, #tpu.memory_space<vmem>>, %arg4: memref<1x512xf32, #tpu.memory_space<vmem>>, %arg5: memref<4x16x32xbf16, #tpu.memory_space<vmem>>, %arg6: memref<4x512x512xbf16, #tpu.memory_space<vmem>>, %arg7: memref<1x512xf32, #tpu.memory_space<vmem>>, %arg8: memref<4x8x16xbf16, #tpu.memory_space<vmem>>, %arg9: memref<4x512x512xbf16, #tpu.memory_space<vmem>>, %arg10: memref<1x512xf32, #tpu.memory_space<vmem>>, %arg11: memref<4x4x8xbf16, #tpu.memory_space<vmem>>, %arg12: memref<4x512x512xbf16, #tpu.memory_space<vmem>>, %arg13: memref<1x512xf32, #tpu.memory_space<vmem>>, %arg14: memref<4x1x4xbf16, #tpu.memory_space<vmem>>, %arg15: memref<4x512x2xbf16, #tpu.memory_space<vmem>>, %arg16: memref<1x2xf32, #tpu.memory_space<vmem>>, %arg17: memref<1x2xf32, #tpu.memory_space<vmem>>) attributes {dimension_semantics = [#tpu.dimension_semantics<arbitrary>], iteration_bounds = array<i64: 1>, scalar_prefetch = 0 : i64, scratch_operands = 0 : i64, tpu.core_type = #tpu.core_type<tc>, window_params = [{pipeline_mode = #tpu.pipeline_mode<synchronous>, transform_indices = @transform_0, window_bounds = array<i64: 64, 384>}, {pipeline_mode = #tpu.pipeline_mode<synchronous>, transform_indices = @transform_1, window_bounds = array<i64: 4, 32, 64>}, {pipeline_mode = #tpu.pipeline_mode<synchronous>, transform_indices = @transform_2, window_bounds = array<i64: 4, 384, 512>}, {pipeline_mode = #tpu.pipeline_mode<synchronous>, transform_indices = @transform_3, window_bounds = array<i64: 1, 512>}, {pipeline_mode = #tpu.pipeline_mode<synchronous>, transform_indices = @transform_4, window_bounds = array<i64: 4, 16, 32>}, {pipeline_mode = #tpu.pipeline_mode<synchronous>, transform_indices = @transform_5, window_bounds = array<i64: 4, 512, 512>}, {pipeline_mode = #tpu.pipeline_mode<synchronous>, transform_indices = @transform_6, window_bounds = array<i64: 1, 512>}, {pipeline_mode = #tpu.pipeline_mode<synchronous>, transform_indices = @transform_7, window_bounds = array<i64: 4, 8, 16>}, {pipeline_mode = #tpu.pipeline_mode<synchronous>, transform_indices = @transform_8, window_bounds = array<i64: 4, 512, 512>}, {pipeline_mode = #tpu.pipeline_mode<synchronous>, transform_indices = @transform_9, window_bounds = array<i64: 1, 512>}, {pipeline_mode = #tpu.pipeline_mode<synchronous>, transform_indices = @transform_10, window_bounds = array<i64: 4, 4, 8>}, {pipeline_mode = #tpu.pipeline_mode<synchronous>, transform_indices = @transform_11, window_bounds = array<i64: 4, 512, 512>}, {pipeline_mode = #tpu.pipeline_mode<synchronous>, transform_indices = @transform_12, window_bounds = array<i64: 1, 512>}, {pipeline_mode = #tpu.pipeline_mode<synchronous>, transform_indices = @transform_13, window_bounds = array<i64: 4, 1, 4>}, {pipeline_mode = #tpu.pipeline_mode<synchronous>, transform_indices = @transform_14, window_bounds = array<i64: 4, 512, 2>}, {pipeline_mode = #tpu.pipeline_mode<synchronous>, transform_indices = @transform_15, window_bounds = array<i64: 1, 2>}, {pipeline_mode = #tpu.pipeline_mode<synchronous>, transform_indices = @transform_16, window_bounds = array<i64: 1, 2>}]} {
    %c0 = arith.constant 0 : index
    %c0_0 = arith.constant 0 : index
    %0 = vector.load %arg1[%c0, %c0_0] : memref<64x384xbf16, #tpu.memory_space<vmem>>, vector<64x384xbf16>
    %c0_1 = arith.constant 0 : index
    %c0_2 = arith.constant 0 : index
    %c0_3 = arith.constant 0 : index
    %1 = vector.load %arg2[%c0_1, %c0_2, %c0_3] : memref<4x32x64xbf16, #tpu.memory_space<vmem>>, vector<1x32x64xbf16>
    %2 = vector.shape_cast %1 : vector<1x32x64xbf16> to vector<32x64xbf16>
    %cst = arith.constant dense<0.000000e+00> : vector<32x384xf32>
    %3 = tpu.matmul %2, %0, %cst {dimension_numbers = #tpu.dot_dimension_numbers<[1], [0], [0], [1], [0, 0, 1, 1], [], []>} : vector<32x64xbf16>, vector<64x384xbf16>, vector<32x384xf32> -> vector<32x384xf32>
    %4 = arith.truncf %3 : vector<32x384xf32> to vector<32x384xbf16>
    %c0_4 = arith.constant 0 : index
    %c0_5 = arith.constant 0 : index
    %c0_6 = arith.constant 0 : index
    %5 = vector.load %arg3[%c0_4, %c0_5, %c0_6] : memref<4x384x512xbf16, #tpu.memory_space<vmem>>, vector<1x384x512xbf16>
    %6 = vector.shape_cast %5 : vector<1x384x512xbf16> to vector<384x512xbf16>
    %cst_7 = arith.constant dense<0.000000e+00> : vector<32x512xf32>
    %7 = tpu.matmul %4, %6, %cst_7 {dimension_numbers = #tpu.dot_dimension_numbers<[1], [0], [0], [1], [0, 0, 1, 1], [], []>} : vector<32x384xbf16>, vector<384x512xbf16>, vector<32x512xf32> -> vector<32x512xf32>
    %c1 = arith.constant 1 : index
    %c0_8 = arith.constant 0 : index
    %c0_9 = arith.constant 0 : index
    %8 = vector.load %arg2[%c1, %c0_8, %c0_9] : memref<4x32x64xbf16, #tpu.memory_space<vmem>>, vector<1x32x64xbf16>
    %9 = vector.shape_cast %8 : vector<1x32x64xbf16> to vector<32x64xbf16>
    %cst_10 = arith.constant dense<0.000000e+00> : vector<32x384xf32>
    %10 = tpu.matmul %9, %0, %cst_10 {dimension_numbers = #tpu.dot_dimension_numbers<[1], [0], [0], [1], [0, 0, 1, 1], [], []>} : vector<32x64xbf16>, vector<64x384xbf16>, vector<32x384xf32> -> vector<32x384xf32>
    %11 = arith.truncf %10 : vector<32x384xf32> to vector<32x384xbf16>
    %c1_11 = arith.constant 1 : index
    %c0_12 = arith.constant 0 : index
    %c0_13 = arith.constant 0 : index
    %12 = vector.load %arg3[%c1_11, %c0_12, %c0_13] : memref<4x384x512xbf16, #tpu.memory_space<vmem>>, vector<1x384x512xbf16>
    %13 = vector.shape_cast %12 : vector<1x384x512xbf16> to vector<384x512xbf16>
    %cst_14 = arith.constant dense<0.000000e+00> : vector<32x512xf32>
    %14 = tpu.matmul %11, %13, %cst_14 {dimension_numbers = #tpu.dot_dimension_numbers<[1], [0], [0], [1], [0, 0, 1, 1], [], []>} : vector<32x384xbf16>, vector<384x512xbf16>, vector<32x512xf32> -> vector<32x512xf32>
    %15 = arith.addf %7, %14 : vector<32x512xf32>
    %c2 = arith.constant 2 : index
    %c0_15 = arith.constant 0 : index
    %c0_16 = arith.constant 0 : index
    %16 = vector.load %arg2[%c2, %c0_15, %c0_16] : memref<4x32x64xbf16, #tpu.memory_space<vmem>>, vector<1x32x64xbf16>
    %17 = vector.shape_cast %16 : vector<1x32x64xbf16> to vector<32x64xbf16>
    %cst_17 = arith.constant dense<0.000000e+00> : vector<32x384xf32>
    %18 = tpu.matmul %17, %0, %cst_17 {dimension_numbers = #tpu.dot_dimension_numbers<[1], [0], [0], [1], [0, 0, 1, 1], [], []>} : vector<32x64xbf16>, vector<64x384xbf16>, vector<32x384xf32> -> vector<32x384xf32>
    %19 = arith.truncf %18 : vector<32x384xf32> to vector<32x384xbf16>
    %c2_18 = arith.constant 2 : index
    %c0_19 = arith.constant 0 : index
    %c0_20 = arith.constant 0 : index
    %20 = vector.load %arg3[%c2_18, %c0_19, %c0_20] : memref<4x384x512xbf16, #tpu.memory_space<vmem>>, vector<1x384x512xbf16>
    %21 = vector.shape_cast %20 : vector<1x384x512xbf16> to vector<384x512xbf16>
    %cst_21 = arith.constant dense<0.000000e+00> : vector<32x512xf32>
    %22 = tpu.matmul %19, %21, %cst_21 {dimension_numbers = #tpu.dot_dimension_numbers<[1], [0], [0], [1], [0, 0, 1, 1], [], []>} : vector<32x384xbf16>, vector<384x512xbf16>, vector<32x512xf32> -> vector<32x512xf32>
    %23 = arith.addf %15, %22 : vector<32x512xf32>
    %c3 = arith.constant 3 : index
    %c0_22 = arith.constant 0 : index
    %c0_23 = arith.constant 0 : index
    %24 = vector.load %arg2[%c3, %c0_22, %c0_23] : memref<4x32x64xbf16, #tpu.memory_space<vmem>>, vector<1x32x64xbf16>
    %25 = vector.shape_cast %24 : vector<1x32x64xbf16> to vector<32x64xbf16>
    %cst_24 = arith.constant dense<0.000000e+00> : vector<32x384xf32>
    %26 = tpu.matmul %25, %0, %cst_24 {dimension_numbers = #tpu.dot_dimension_numbers<[1], [0], [0], [1], [0, 0, 1, 1], [], []>} : vector<32x64xbf16>, vector<64x384xbf16>, vector<32x384xf32> -> vector<32x384xf32>
    %27 = arith.truncf %26 : vector<32x384xf32> to vector<32x384xbf16>
    %c3_25 = arith.constant 3 : index
    %c0_26 = arith.constant 0 : index
    %c0_27 = arith.constant 0 : index
    %28 = vector.load %arg3[%c3_25, %c0_26, %c0_27] : memref<4x384x512xbf16, #tpu.memory_space<vmem>>, vector<1x384x512xbf16>
    %29 = vector.shape_cast %28 : vector<1x384x512xbf16> to vector<384x512xbf16>
    %cst_28 = arith.constant dense<0.000000e+00> : vector<32x512xf32>
    %30 = tpu.matmul %27, %29, %cst_28 {dimension_numbers = #tpu.dot_dimension_numbers<[1], [0], [0], [1], [0, 0, 1, 1], [], []>} : vector<32x384xbf16>, vector<384x512xbf16>, vector<32x512xf32> -> vector<32x512xf32>
    %31 = arith.addf %23, %30 : vector<32x512xf32>
    %c0_29 = arith.constant 0 : index
    %c0_30 = arith.constant 0 : index
    %32 = vector.load %arg4[%c0_29, %c0_30] : memref<1x512xf32, #tpu.memory_space<vmem>>, vector<1x512xf32>
    %33 = vector.broadcast %32 : vector<1x512xf32> to vector<32x512xf32>
    %34 = arith.addf %31, %33 : vector<32x512xf32>
    %cst_31 = arith.constant 0.000000e+00 : f32
    %35 = vector.broadcast %cst_31 : f32 to vector<32x512xf32>
    %36 = arith.cmpf oge, %34, %35 : vector<32x512xf32>
    %cst_32 = arith.constant 2.000000e-01 : f32
    %37 = vector.broadcast %cst_32 : f32 to vector<32x512xf32>
    %38 = arith.mulf %37, %34 : vector<32x512xf32>
    %39 = arith.select %36, %34, %38 : vector<32x512xi1>, vector<32x512xf32>
    %40 = arith.truncf %39 : vector<32x512xf32> to vector<32x512xbf16>
    %c0_33 = arith.constant 0 : index
    %c0_34 = arith.constant 0 : index
    %c0_35 = arith.constant 0 : index
    %41 = vector.load %arg5[%c0_33, %c0_34, %c0_35] : memref<4x16x32xbf16, #tpu.memory_space<vmem>>, vector<1x16x32xbf16>
    %42 = vector.shape_cast %41 : vector<1x16x32xbf16> to vector<16x32xbf16>
    %cst_36 = arith.constant dense<0.000000e+00> : vector<16x512xf32>
    %43 = tpu.matmul %42, %40, %cst_36 {dimension_numbers = #tpu.dot_dimension_numbers<[1], [0], [0], [1], [0, 0, 1, 1], [], []>} : vector<16x32xbf16>, vector<32x512xbf16>, vector<16x512xf32> -> vector<16x512xf32>
    %44 = arith.truncf %43 : vector<16x512xf32> to vector<16x512xbf16>
    %c0_37 = arith.constant 0 : index
    %c0_38 = arith.constant 0 : index
    %c0_39 = arith.constant 0 : index
    %45 = vector.load %arg6[%c0_37, %c0_38, %c0_39] : memref<4x512x512xbf16, #tpu.memory_space<vmem>>, vector<1x512x512xbf16>
    %46 = vector.shape_cast %45 : vector<1x512x512xbf16> to vector<512x512xbf16>
    %cst_40 = arith.constant dense<0.000000e+00> : vector<16x512xf32>
    %47 = tpu.matmul %44, %46, %cst_40 {dimension_numbers = #tpu.dot_dimension_numbers<[1], [0], [0], [1], [0, 0, 1, 1], [], []>} : vector<16x512xbf16>, vector<512x512xbf16>, vector<16x512xf32> -> vector<16x512xf32>
    %c1_41 = arith.constant 1 : index
    %c0_42 = arith.constant 0 : index
    %c0_43 = arith.constant 0 : index
    %48 = vector.load %arg5[%c1_41, %c0_42, %c0_43] : memref<4x16x32xbf16, #tpu.memory_space<vmem>>, vector<1x16x32xbf16>
    %49 = vector.shape_cast %48 : vector<1x16x32xbf16> to vector<16x32xbf16>
    %cst_44 = arith.constant dense<0.000000e+00> : vector<16x512xf32>
    %50 = tpu.matmul %49, %40, %cst_44 {dimension_numbers = #tpu.dot_dimension_numbers<[1], [0], [0], [1], [0, 0, 1, 1], [], []>} : vector<16x32xbf16>, vector<32x512xbf16>, vector<16x512xf32> -> vector<16x512xf32>
    %51 = arith.truncf %50 : vector<16x512xf32> to vector<16x512xbf16>
    %c1_45 = arith.constant 1 : index
    %c0_46 = arith.constant 0 : index
    %c0_47 = arith.constant 0 : index
    %52 = vector.load %arg6[%c1_45, %c0_46, %c0_47] : memref<4x512x512xbf16, #tpu.memory_space<vmem>>, vector<1x512x512xbf16>
    %53 = vector.shape_cast %52 : vector<1x512x512xbf16> to vector<512x512xbf16>
    %cst_48 = arith.constant dense<0.000000e+00> : vector<16x512xf32>
    %54 = tpu.matmul %51, %53, %cst_48 {dimension_numbers = #tpu.dot_dimension_numbers<[1], [0], [0], [1], [0, 0, 1, 1], [], []>} : vector<16x512xbf16>, vector<512x512xbf16>, vector<16x512xf32> -> vector<16x512xf32>
    %55 = arith.addf %47, %54 : vector<16x512xf32>
    %c2_49 = arith.constant 2 : index
    %c0_50 = arith.constant 0 : index
    %c0_51 = arith.constant 0 : index
    %56 = vector.load %arg5[%c2_49, %c0_50, %c0_51] : memref<4x16x32xbf16, #tpu.memory_space<vmem>>, vector<1x16x32xbf16>
    %57 = vector.shape_cast %56 : vector<1x16x32xbf16> to vector<16x32xbf16>
    %cst_52 = arith.constant dense<0.000000e+00> : vector<16x512xf32>
    %58 = tpu.matmul %57, %40, %cst_52 {dimension_numbers = #tpu.dot_dimension_numbers<[1], [0], [0], [1], [0, 0, 1, 1], [], []>} : vector<16x32xbf16>, vector<32x512xbf16>, vector<16x512xf32> -> vector<16x512xf32>
    %59 = arith.truncf %58 : vector<16x512xf32> to vector<16x512xbf16>
    %c2_53 = arith.constant 2 : index
    %c0_54 = arith.constant 0 : index
    %c0_55 = arith.constant 0 : index
    %60 = vector.load %arg6[%c2_53, %c0_54, %c0_55] : memref<4x512x512xbf16, #tpu.memory_space<vmem>>, vector<1x512x512xbf16>
    %61 = vector.shape_cast %60 : vector<1x512x512xbf16> to vector<512x512xbf16>
    %cst_56 = arith.constant dense<0.000000e+00> : vector<16x512xf32>
    %62 = tpu.matmul %59, %61, %cst_56 {dimension_numbers = #tpu.dot_dimension_numbers<[1], [0], [0], [1], [0, 0, 1, 1], [], []>} : vector<16x512xbf16>, vector<512x512xbf16>, vector<16x512xf32> -> vector<16x512xf32>
    %63 = arith.addf %55, %62 : vector<16x512xf32>
    %c3_57 = arith.constant 3 : index
    %c0_58 = arith.constant 0 : index
    %c0_59 = arith.constant 0 : index
    %64 = vector.load %arg5[%c3_57, %c0_58, %c0_59] : memref<4x16x32xbf16, #tpu.memory_space<vmem>>, vector<1x16x32xbf16>
    %65 = vector.shape_cast %64 : vector<1x16x32xbf16> to vector<16x32xbf16>
    %cst_60 = arith.constant dense<0.000000e+00> : vector<16x512xf32>
    %66 = tpu.matmul %65, %40, %cst_60 {dimension_numbers = #tpu.dot_dimension_numbers<[1], [0], [0], [1], [0, 0, 1, 1], [], []>} : vector<16x32xbf16>, vector<32x512xbf16>, vector<16x512xf32> -> vector<16x512xf32>
    %67 = arith.truncf %66 : vector<16x512xf32> to vector<16x512xbf16>
    %c3_61 = arith.constant 3 : index
    %c0_62 = arith.constant 0 : index
    %c0_63 = arith.constant 0 : index
    %68 = vector.load %arg6[%c3_61, %c0_62, %c0_63] : memref<4x512x512xbf16, #tpu.memory_space<vmem>>, vector<1x512x512xbf16>
    %69 = vector.shape_cast %68 : vector<1x512x512xbf16> to vector<512x512xbf16>
    %cst_64 = arith.constant dense<0.000000e+00> : vector<16x512xf32>
    %70 = tpu.matmul %67, %69, %cst_64 {dimension_numbers = #tpu.dot_dimension_numbers<[1], [0], [0], [1], [0, 0, 1, 1], [], []>} : vector<16x512xbf16>, vector<512x512xbf16>, vector<16x512xf32> -> vector<16x512xf32>
    %71 = arith.addf %63, %70 : vector<16x512xf32>
    %c0_65 = arith.constant 0 : index
    %c0_66 = arith.constant 0 : index
    %72 = vector.load %arg7[%c0_65, %c0_66] : memref<1x512xf32, #tpu.memory_space<vmem>>, vector<1x512xf32>
    %73 = vector.broadcast %72 : vector<1x512xf32> to vector<16x512xf32>
    %74 = arith.addf %71, %73 : vector<16x512xf32>
    %cst_67 = arith.constant 0.000000e+00 : f32
    %75 = vector.broadcast %cst_67 : f32 to vector<16x512xf32>
    %76 = arith.cmpf oge, %74, %75 : vector<16x512xf32>
    %cst_68 = arith.constant 2.000000e-01 : f32
    %77 = vector.broadcast %cst_68 : f32 to vector<16x512xf32>
    %78 = arith.mulf %77, %74 : vector<16x512xf32>
    %79 = arith.select %76, %74, %78 : vector<16x512xi1>, vector<16x512xf32>
    %80 = arith.truncf %79 : vector<16x512xf32> to vector<16x512xbf16>
    %c0_69 = arith.constant 0 : index
    %c0_70 = arith.constant 0 : index
    %c0_71 = arith.constant 0 : index
    %81 = vector.load %arg8[%c0_69, %c0_70, %c0_71] : memref<4x8x16xbf16, #tpu.memory_space<vmem>>, vector<1x8x16xbf16>
    %82 = vector.shape_cast %81 : vector<1x8x16xbf16> to vector<8x16xbf16>
    %cst_72 = arith.constant dense<0.000000e+00> : vector<8x512xf32>
    %83 = tpu.matmul %82, %80, %cst_72 {dimension_numbers = #tpu.dot_dimension_numbers<[1], [0], [0], [1], [0, 0, 1, 1], [], []>} : vector<8x16xbf16>, vector<16x512xbf16>, vector<8x512xf32> -> vector<8x512xf32>
    %84 = arith.truncf %83 : vector<8x512xf32> to vector<8x512xbf16>
    %c0_73 = arith.constant 0 : index
    %c0_74 = arith.constant 0 : index
    %c0_75 = arith.constant 0 : index
    %85 = vector.load %arg9[%c0_73, %c0_74, %c0_75] : memref<4x512x512xbf16, #tpu.memory_space<vmem>>, vector<1x512x512xbf16>
    %86 = vector.shape_cast %85 : vector<1x512x512xbf16> to vector<512x512xbf16>
    %cst_76 = arith.constant dense<0.000000e+00> : vector<8x512xf32>
    %87 = tpu.matmul %84, %86, %cst_76 {dimension_numbers = #tpu.dot_dimension_numbers<[1], [0], [0], [1], [0, 0, 1, 1], [], []>} : vector<8x512xbf16>, vector<512x512xbf16>, vector<8x512xf32> -> vector<8x512xf32>
    %c1_77 = arith.constant 1 : index
    %c0_78 = arith.constant 0 : index
    %c0_79 = arith.constant 0 : index
    %88 = vector.load %arg8[%c1_77, %c0_78, %c0_79] : memref<4x8x16xbf16, #tpu.memory_space<vmem>>, vector<1x8x16xbf16>
    %89 = vector.shape_cast %88 : vector<1x8x16xbf16> to vector<8x16xbf16>
    %cst_80 = arith.constant dense<0.000000e+00> : vector<8x512xf32>
    %90 = tpu.matmul %89, %80, %cst_80 {dimension_numbers = #tpu.dot_dimension_numbers<[1], [0], [0], [1], [0, 0, 1, 1], [], []>} : vector<8x16xbf16>, vector<16x512xbf16>, vector<8x512xf32> -> vector<8x512xf32>
    %91 = arith.truncf %90 : vector<8x512xf32> to vector<8x512xbf16>
    %c1_81 = arith.constant 1 : index
    %c0_82 = arith.constant 0 : index
    %c0_83 = arith.constant 0 : index
    %92 = vector.load %arg9[%c1_81, %c0_82, %c0_83] : memref<4x512x512xbf16, #tpu.memory_space<vmem>>, vector<1x512x512xbf16>
    %93 = vector.shape_cast %92 : vector<1x512x512xbf16> to vector<512x512xbf16>
    %cst_84 = arith.constant dense<0.000000e+00> : vector<8x512xf32>
    %94 = tpu.matmul %91, %93, %cst_84 {dimension_numbers = #tpu.dot_dimension_numbers<[1], [0], [0], [1], [0, 0, 1, 1], [], []>} : vector<8x512xbf16>, vector<512x512xbf16>, vector<8x512xf32> -> vector<8x512xf32>
    %95 = arith.addf %87, %94 : vector<8x512xf32>
    %c2_85 = arith.constant 2 : index
    %c0_86 = arith.constant 0 : index
    %c0_87 = arith.constant 0 : index
    %96 = vector.load %arg8[%c2_85, %c0_86, %c0_87] : memref<4x8x16xbf16, #tpu.memory_space<vmem>>, vector<1x8x16xbf16>
    %97 = vector.shape_cast %96 : vector<1x8x16xbf16> to vector<8x16xbf16>
    %cst_88 = arith.constant dense<0.000000e+00> : vector<8x512xf32>
    %98 = tpu.matmul %97, %80, %cst_88 {dimension_numbers = #tpu.dot_dimension_numbers<[1], [0], [0], [1], [0, 0, 1, 1], [], []>} : vector<8x16xbf16>, vector<16x512xbf16>, vector<8x512xf32> -> vector<8x512xf32>
    %99 = arith.truncf %98 : vector<8x512xf32> to vector<8x512xbf16>
    %c2_89 = arith.constant 2 : index
    %c0_90 = arith.constant 0 : index
    %c0_91 = arith.constant 0 : index
    %100 = vector.load %arg9[%c2_89, %c0_90, %c0_91] : memref<4x512x512xbf16, #tpu.memory_space<vmem>>, vector<1x512x512xbf16>
    %101 = vector.shape_cast %100 : vector<1x512x512xbf16> to vector<512x512xbf16>
    %cst_92 = arith.constant dense<0.000000e+00> : vector<8x512xf32>
    %102 = tpu.matmul %99, %101, %cst_92 {dimension_numbers = #tpu.dot_dimension_numbers<[1], [0], [0], [1], [0, 0, 1, 1], [], []>} : vector<8x512xbf16>, vector<512x512xbf16>, vector<8x512xf32> -> vector<8x512xf32>
    %103 = arith.addf %95, %102 : vector<8x512xf32>
    %c3_93 = arith.constant 3 : index
    %c0_94 = arith.constant 0 : index
    %c0_95 = arith.constant 0 : index
    %104 = vector.load %arg8[%c3_93, %c0_94, %c0_95] : memref<4x8x16xbf16, #tpu.memory_space<vmem>>, vector<1x8x16xbf16>
    %105 = vector.shape_cast %104 : vector<1x8x16xbf16> to vector<8x16xbf16>
    %cst_96 = arith.constant dense<0.000000e+00> : vector<8x512xf32>
    %106 = tpu.matmul %105, %80, %cst_96 {dimension_numbers = #tpu.dot_dimension_numbers<[1], [0], [0], [1], [0, 0, 1, 1], [], []>} : vector<8x16xbf16>, vector<16x512xbf16>, vector<8x512xf32> -> vector<8x512xf32>
    %107 = arith.truncf %106 : vector<8x512xf32> to vector<8x512xbf16>
    %c3_97 = arith.constant 3 : index
    %c0_98 = arith.constant 0 : index
    %c0_99 = arith.constant 0 : index
    %108 = vector.load %arg9[%c3_97, %c0_98, %c0_99] : memref<4x512x512xbf16, #tpu.memory_space<vmem>>, vector<1x512x512xbf16>
    %109 = vector.shape_cast %108 : vector<1x512x512xbf16> to vector<512x512xbf16>
    %cst_100 = arith.constant dense<0.000000e+00> : vector<8x512xf32>
    %110 = tpu.matmul %107, %109, %cst_100 {dimension_numbers = #tpu.dot_dimension_numbers<[1], [0], [0], [1], [0, 0, 1, 1], [], []>} : vector<8x512xbf16>, vector<512x512xbf16>, vector<8x512xf32> -> vector<8x512xf32>
    %111 = arith.addf %103, %110 : vector<8x512xf32>
    %c0_101 = arith.constant 0 : index
    %c0_102 = arith.constant 0 : index
    %112 = vector.load %arg10[%c0_101, %c0_102] : memref<1x512xf32, #tpu.memory_space<vmem>>, vector<1x512xf32>
    %113 = vector.broadcast %112 : vector<1x512xf32> to vector<8x512xf32>
    %114 = arith.addf %111, %113 : vector<8x512xf32>
    %cst_103 = arith.constant 0.000000e+00 : f32
    %115 = vector.broadcast %cst_103 : f32 to vector<8x512xf32>
    %116 = arith.cmpf oge, %114, %115 : vector<8x512xf32>
    %cst_104 = arith.constant 2.000000e-01 : f32
    %117 = vector.broadcast %cst_104 : f32 to vector<8x512xf32>
    %118 = arith.mulf %117, %114 : vector<8x512xf32>
    %119 = arith.select %116, %114, %118 : vector<8x512xi1>, vector<8x512xf32>
    %120 = arith.truncf %119 : vector<8x512xf32> to vector<8x512xbf16>
    %c0_105 = arith.constant 0 : index
    %c0_106 = arith.constant 0 : index
    %c0_107 = arith.constant 0 : index
    %121 = vector.load %arg11[%c0_105, %c0_106, %c0_107] : memref<4x4x8xbf16, #tpu.memory_space<vmem>>, vector<1x4x8xbf16>
    %122 = vector.shape_cast %121 : vector<1x4x8xbf16> to vector<4x8xbf16>
    %cst_108 = arith.constant dense<0.000000e+00> : vector<4x512xf32>
    %123 = tpu.matmul %122, %120, %cst_108 {dimension_numbers = #tpu.dot_dimension_numbers<[1], [0], [0], [1], [0, 0, 1, 1], [], []>} : vector<4x8xbf16>, vector<8x512xbf16>, vector<4x512xf32> -> vector<4x512xf32>
    %124 = arith.truncf %123 : vector<4x512xf32> to vector<4x512xbf16>
    %c0_109 = arith.constant 0 : index
    %c0_110 = arith.constant 0 : index
    %c0_111 = arith.constant 0 : index
    %125 = vector.load %arg12[%c0_109, %c0_110, %c0_111] : memref<4x512x512xbf16, #tpu.memory_space<vmem>>, vector<1x512x512xbf16>
    %126 = vector.shape_cast %125 : vector<1x512x512xbf16> to vector<512x512xbf16>
    %cst_112 = arith.constant dense<0.000000e+00> : vector<4x512xf32>
    %127 = tpu.matmul %124, %126, %cst_112 {dimension_numbers = #tpu.dot_dimension_numbers<[1], [0], [0], [1], [0, 0, 1, 1], [], []>} : vector<4x512xbf16>, vector<512x512xbf16>, vector<4x512xf32> -> vector<4x512xf32>
    %c1_113 = arith.constant 1 : index
    %c0_114 = arith.constant 0 : index
    %c0_115 = arith.constant 0 : index
    %128 = vector.load %arg11[%c1_113, %c0_114, %c0_115] : memref<4x4x8xbf16, #tpu.memory_space<vmem>>, vector<1x4x8xbf16>
    %129 = vector.shape_cast %128 : vector<1x4x8xbf16> to vector<4x8xbf16>
    %cst_116 = arith.constant dense<0.000000e+00> : vector<4x512xf32>
    %130 = tpu.matmul %129, %120, %cst_116 {dimension_numbers = #tpu.dot_dimension_numbers<[1], [0], [0], [1], [0, 0, 1, 1], [], []>} : vector<4x8xbf16>, vector<8x512xbf16>, vector<4x512xf32> -> vector<4x512xf32>
    %131 = arith.truncf %130 : vector<4x512xf32> to vector<4x512xbf16>
    %c1_117 = arith.constant 1 : index
    %c0_118 = arith.constant 0 : index
    %c0_119 = arith.constant 0 : index
    %132 = vector.load %arg12[%c1_117, %c0_118, %c0_119] : memref<4x512x512xbf16, #tpu.memory_space<vmem>>, vector<1x512x512xbf16>
    %133 = vector.shape_cast %132 : vector<1x512x512xbf16> to vector<512x512xbf16>
    %cst_120 = arith.constant dense<0.000000e+00> : vector<4x512xf32>
    %134 = tpu.matmul %131, %133, %cst_120 {dimension_numbers = #tpu.dot_dimension_numbers<[1], [0], [0], [1], [0, 0, 1, 1], [], []>} : vector<4x512xbf16>, vector<512x512xbf16>, vector<4x512xf32> -> vector<4x512xf32>
    %135 = arith.addf %127, %134 : vector<4x512xf32>
    %c2_121 = arith.constant 2 : index
    %c0_122 = arith.constant 0 : index
    %c0_123 = arith.constant 0 : index
    %136 = vector.load %arg11[%c2_121, %c0_122, %c0_123] : memref<4x4x8xbf16, #tpu.memory_space<vmem>>, vector<1x4x8xbf16>
    %137 = vector.shape_cast %136 : vector<1x4x8xbf16> to vector<4x8xbf16>
    %cst_124 = arith.constant dense<0.000000e+00> : vector<4x512xf32>
    %138 = tpu.matmul %137, %120, %cst_124 {dimension_numbers = #tpu.dot_dimension_numbers<[1], [0], [0], [1], [0, 0, 1, 1], [], []>} : vector<4x8xbf16>, vector<8x512xbf16>, vector<4x512xf32> -> vector<4x512xf32>
    %139 = arith.truncf %138 : vector<4x512xf32> to vector<4x512xbf16>
    %c2_125 = arith.constant 2 : index
    %c0_126 = arith.constant 0 : index
    %c0_127 = arith.constant 0 : index
    %140 = vector.load %arg12[%c2_125, %c0_126, %c0_127] : memref<4x512x512xbf16, #tpu.memory_space<vmem>>, vector<1x512x512xbf16>
    %141 = vector.shape_cast %140 : vector<1x512x512xbf16> to vector<512x512xbf16>
    %cst_128 = arith.constant dense<0.000000e+00> : vector<4x512xf32>
    %142 = tpu.matmul %139, %141, %cst_128 {dimension_numbers = #tpu.dot_dimension_numbers<[1], [0], [0], [1], [0, 0, 1, 1], [], []>} : vector<4x512xbf16>, vector<512x512xbf16>, vector<4x512xf32> -> vector<4x512xf32>
    %143 = arith.addf %135, %142 : vector<4x512xf32>
    %c3_129 = arith.constant 3 : index
    %c0_130 = arith.constant 0 : index
    %c0_131 = arith.constant 0 : index
    %144 = vector.load %arg11[%c3_129, %c0_130, %c0_131] : memref<4x4x8xbf16, #tpu.memory_space<vmem>>, vector<1x4x8xbf16>
    %145 = vector.shape_cast %144 : vector<1x4x8xbf16> to vector<4x8xbf16>
    %cst_132 = arith.constant dense<0.000000e+00> : vector<4x512xf32>
    %146 = tpu.matmul %145, %120, %cst_132 {dimension_numbers = #tpu.dot_dimension_numbers<[1], [0], [0], [1], [0, 0, 1, 1], [], []>} : vector<4x8xbf16>, vector<8x512xbf16>, vector<4x512xf32> -> vector<4x512xf32>
    %147 = arith.truncf %146 : vector<4x512xf32> to vector<4x512xbf16>
    %c3_133 = arith.constant 3 : index
    %c0_134 = arith.constant 0 : index
    %c0_135 = arith.constant 0 : index
    %148 = vector.load %arg12[%c3_133, %c0_134, %c0_135] : memref<4x512x512xbf16, #tpu.memory_space<vmem>>, vector<1x512x512xbf16>
    %149 = vector.shape_cast %148 : vector<1x512x512xbf16> to vector<512x512xbf16>
    %cst_136 = arith.constant dense<0.000000e+00> : vector<4x512xf32>
    %150 = tpu.matmul %147, %149, %cst_136 {dimension_numbers = #tpu.dot_dimension_numbers<[1], [0], [0], [1], [0, 0, 1, 1], [], []>} : vector<4x512xbf16>, vector<512x512xbf16>, vector<4x512xf32> -> vector<4x512xf32>
    %151 = arith.addf %143, %150 : vector<4x512xf32>
    %c0_137 = arith.constant 0 : index
    %c0_138 = arith.constant 0 : index
    %152 = vector.load %arg13[%c0_137, %c0_138] : memref<1x512xf32, #tpu.memory_space<vmem>>, vector<1x512xf32>
    %153 = vector.broadcast %152 : vector<1x512xf32> to vector<4x512xf32>
    %154 = arith.addf %151, %153 : vector<4x512xf32>
    %cst_139 = arith.constant 0.000000e+00 : f32
    %155 = vector.broadcast %cst_139 : f32 to vector<4x512xf32>
    %156 = arith.cmpf oge, %154, %155 : vector<4x512xf32>
    %cst_140 = arith.constant 2.000000e-01 : f32
    %157 = vector.broadcast %cst_140 : f32 to vector<4x512xf32>
    %158 = arith.mulf %157, %154 : vector<4x512xf32>
    %159 = arith.select %156, %154, %158 : vector<4x512xi1>, vector<4x512xf32>
    %160 = arith.truncf %159 : vector<4x512xf32> to vector<4x512xbf16>
    %c0_141 = arith.constant 0 : index
    %c0_142 = arith.constant 0 : index
    %c0_143 = arith.constant 0 : index
    %161 = vector.load %arg14[%c0_141, %c0_142, %c0_143] : memref<4x1x4xbf16, #tpu.memory_space<vmem>>, vector<1x1x4xbf16>
    %162 = vector.shape_cast %161 : vector<1x1x4xbf16> to vector<1x4xbf16>
    %cst_144 = arith.constant dense<0.000000e+00> : vector<1x512xf32>
    %163 = tpu.matmul %162, %160, %cst_144 {dimension_numbers = #tpu.dot_dimension_numbers<[1], [0], [0], [1], [0, 0, 1, 1], [], []>} : vector<1x4xbf16>, vector<4x512xbf16>, vector<1x512xf32> -> vector<1x512xf32>
    %164 = arith.truncf %163 : vector<1x512xf32> to vector<1x512xbf16>
    %c0_145 = arith.constant 0 : index
    %c0_146 = arith.constant 0 : index
    %c0_147 = arith.constant 0 : index
    %165 = vector.load %arg15[%c0_145, %c0_146, %c0_147] : memref<4x512x2xbf16, #tpu.memory_space<vmem>>, vector<1x512x2xbf16>
    %166 = vector.shape_cast %165 : vector<1x512x2xbf16> to vector<512x2xbf16>
    %cst_148 = arith.constant dense<0.000000e+00> : vector<1x2xf32>
    %167 = tpu.matmul %164, %166, %cst_148 {dimension_numbers = #tpu.dot_dimension_numbers<[1], [0], [0], [1], [0, 0, 1, 1], [], []>} : vector<1x512xbf16>, vector<512x2xbf16>, vector<1x2xf32> -> vector<1x2xf32>
    %c1_149 = arith.constant 1 : index
    %c0_150 = arith.constant 0 : index
    %c0_151 = arith.constant 0 : index
    %168 = vector.load %arg14[%c1_149, %c0_150, %c0_151] : memref<4x1x4xbf16, #tpu.memory_space<vmem>>, vector<1x1x4xbf16>
    %169 = vector.shape_cast %168 : vector<1x1x4xbf16> to vector<1x4xbf16>
    %cst_152 = arith.constant dense<0.000000e+00> : vector<1x512xf32>
    %170 = tpu.matmul %169, %160, %cst_152 {dimension_numbers = #tpu.dot_dimension_numbers<[1], [0], [0], [1], [0, 0, 1, 1], [], []>} : vector<1x4xbf16>, vector<4x512xbf16>, vector<1x512xf32> -> vector<1x512xf32>
    %171 = arith.truncf %170 : vector<1x512xf32> to vector<1x512xbf16>
    %c1_153 = arith.constant 1 : index
    %c0_154 = arith.constant 0 : index
    %c0_155 = arith.constant 0 : index
    %172 = vector.load %arg15[%c1_153, %c0_154, %c0_155] : memref<4x512x2xbf16, #tpu.memory_space<vmem>>, vector<1x512x2xbf16>
    %173 = vector.shape_cast %172 : vector<1x512x2xbf16> to vector<512x2xbf16>
    %cst_156 = arith.constant dense<0.000000e+00> : vector<1x2xf32>
    %174 = tpu.matmul %171, %173, %cst_156 {dimension_numbers = #tpu.dot_dimension_numbers<[1], [0], [0], [1], [0, 0, 1, 1], [], []>} : vector<1x512xbf16>, vector<512x2xbf16>, vector<1x2xf32> -> vector<1x2xf32>
    %175 = arith.addf %167, %174 : vector<1x2xf32>
    %c2_157 = arith.constant 2 : index
    %c0_158 = arith.constant 0 : index
    %c0_159 = arith.constant 0 : index
    %176 = vector.load %arg14[%c2_157, %c0_158, %c0_159] : memref<4x1x4xbf16, #tpu.memory_space<vmem>>, vector<1x1x4xbf16>
    %177 = vector.shape_cast %176 : vector<1x1x4xbf16> to vector<1x4xbf16>
    %cst_160 = arith.constant dense<0.000000e+00> : vector<1x512xf32>
    %178 = tpu.matmul %177, %160, %cst_160 {dimension_numbers = #tpu.dot_dimension_numbers<[1], [0], [0], [1], [0, 0, 1, 1], [], []>} : vector<1x4xbf16>, vector<4x512xbf16>, vector<1x512xf32> -> vector<1x512xf32>
    %179 = arith.truncf %178 : vector<1x512xf32> to vector<1x512xbf16>
    %c2_161 = arith.constant 2 : index
    %c0_162 = arith.constant 0 : index
    %c0_163 = arith.constant 0 : index
    %180 = vector.load %arg15[%c2_161, %c0_162, %c0_163] : memref<4x512x2xbf16, #tpu.memory_space<vmem>>, vector<1x512x2xbf16>
    %181 = vector.shape_cast %180 : vector<1x512x2xbf16> to vector<512x2xbf16>
    %cst_164 = arith.constant dense<0.000000e+00> : vector<1x2xf32>
    %182 = tpu.matmul %179, %181, %cst_164 {dimension_numbers = #tpu.dot_dimension_numbers<[1], [0], [0], [1], [0, 0, 1, 1], [], []>} : vector<1x512xbf16>, vector<512x2xbf16>, vector<1x2xf32> -> vector<1x2xf32>
    %183 = arith.addf %175, %182 : vector<1x2xf32>
    %c3_165 = arith.constant 3 : index
    %c0_166 = arith.constant 0 : index
    %c0_167 = arith.constant 0 : index
    %184 = vector.load %arg14[%c3_165, %c0_166, %c0_167] : memref<4x1x4xbf16, #tpu.memory_space<vmem>>, vector<1x1x4xbf16>
    %185 = vector.shape_cast %184 : vector<1x1x4xbf16> to vector<1x4xbf16>
    %cst_168 = arith.constant dense<0.000000e+00> : vector<1x512xf32>
    %186 = tpu.matmul %185, %160, %cst_168 {dimension_numbers = #tpu.dot_dimension_numbers<[1], [0], [0], [1], [0, 0, 1, 1], [], []>} : vector<1x4xbf16>, vector<4x512xbf16>, vector<1x512xf32> -> vector<1x512xf32>
    %187 = arith.truncf %186 : vector<1x512xf32> to vector<1x512xbf16>
    %c3_169 = arith.constant 3 : index
    %c0_170 = arith.constant 0 : index
    %c0_171 = arith.constant 0 : index
    %188 = vector.load %arg15[%c3_169, %c0_170, %c0_171] : memref<4x512x2xbf16, #tpu.memory_space<vmem>>, vector<1x512x2xbf16>
    %189 = vector.shape_cast %188 : vector<1x512x2xbf16> to vector<512x2xbf16>
    %cst_172 = arith.constant dense<0.000000e+00> : vector<1x2xf32>
    %190 = tpu.matmul %187, %189, %cst_172 {dimension_numbers = #tpu.dot_dimension_numbers<[1], [0], [0], [1], [0, 0, 1, 1], [], []>} : vector<1x512xbf16>, vector<512x2xbf16>, vector<1x2xf32> -> vector<1x2xf32>
    %191 = arith.addf %183, %190 : vector<1x2xf32>
    %c0_173 = arith.constant 0 : index
    %c0_174 = arith.constant 0 : index
    %192 = vector.load %arg16[%c0_173, %c0_174] : memref<1x2xf32, #tpu.memory_space<vmem>>, vector<1x2xf32>
    %193 = arith.addf %191, %192 : vector<1x2xf32>
    %cst_175 = arith.constant 0.000000e+00 : f32
    %194 = vector.broadcast %cst_175 : f32 to vector<1x2xf32>
    %195 = arith.subf %194, %193 : vector<1x2xf32>
    %196 = math.exp %195 : vector<1x2xf32>
    %cst_176 = arith.constant 1.000000e+00 : f32
    %197 = vector.broadcast %cst_176 : f32 to vector<1x2xf32>
    %198 = arith.addf %197, %196 : vector<1x2xf32>
    %cst_177 = arith.constant 1.000000e+00 : f32
    %199 = vector.broadcast %cst_177 : f32 to vector<1x2xf32>
    %200 = arith.divf %199, %198 : vector<1x2xf32>
    %c0_178 = arith.constant 0 : index
    %c0_179 = arith.constant 0 : index
    %201 = vector.load %arg17[%c0_178, %c0_179] : memref<1x2xf32, #tpu.memory_space<vmem>>, vector<1x2xf32>
    tpu.vector_store %arg17[%c0_178, %c0_179], %200 {strides = array<i32>} : memref<1x2xf32, #tpu.memory_space<vmem>>, vector<1x2xf32>,
    return
  }
  func.func @transform_0(%arg0: i32) -> (i32, i32) {
    %c0_i32 = arith.constant 0 : i32
    %c0_i32_0 = arith.constant 0 : i32
    %c0_i32_1 = arith.constant 0 : i32
    return %c0_i32, %c0_i32_0 : i32, i32
  }
  func.func @transform_1(%arg0: i32) -> (i32, i32, i32) {
    %c0_i32 = arith.constant 0 : i32
    %c0_i32_0 = arith.constant 0 : i32
    %c0_i32_1 = arith.constant 0 : i32
    %c0_i32_2 = arith.constant 0 : i32
    return %c0_i32, %c0_i32_0, %c0_i32_1 : i32, i32, i32
  }
  func.func @transform_2(%arg0: i32) -> (i32, i32, i32) {
    %c0_i32 = arith.constant 0 : i32
    %c0_i32_0 = arith.constant 0 : i32
    %c0_i32_1 = arith.constant 0 : i32
    %c0_i32_2 = arith.constant 0 : i32
    return %c0_i32, %c0_i32_0, %c0_i32_1 : i32, i32, i32
  }
  func.func @transform_3(%arg0: i32) -> (i32, i32) {
    %c0_i32 = arith.constant 0 : i32
    %c0_i32_0 = arith.constant 0 : i32
    %c0_i32_1 = arith.constant 0 : i32
    return %c0_i32, %c0_i32_0 : i32, i32
  }
  func.func @transform_4(%arg0: i32) -> (i32, i32, i32) {
    %c0_i32 = arith.constant 0 : i32
    %c0_i32_0 = arith.constant 0 : i32
    %c0_i32_1 = arith.constant 0 : i32
    %c0_i32_2 = arith.constant 0 : i32
    return %c0_i32, %c0_i32_0, %c0_i32_1 : i32, i32, i32
  }
  func.func @transform_5(%arg0: i32) -> (i32, i32, i32) {
    %c0_i32 = arith.constant 0 : i32
    %c0_i32_0 = arith.constant 0 : i32
    %c0_i32_1 = arith.constant 0 : i32
    %c0_i32_2 = arith.constant 0 : i32
    return %c0_i32, %c0_i32_0, %c0_i32_1 : i32, i32, i32
  }
  func.func @transform_6(%arg0: i32) -> (i32, i32) {
    %c0_i32 = arith.constant 0 : i32
    %c0_i32_0 = arith.constant 0 : i32
    %c0_i32_1 = arith.constant 0 : i32
    return %c0_i32, %c0_i32_0 : i32, i32
  }
  func.func @transform_7(%arg0: i32) -> (i32, i32, i32) {
    %c0_i32 = arith.constant 0 : i32
    %c0_i32_0 = arith.constant 0 : i32
    %c0_i32_1 = arith.constant 0 : i32
    %c0_i32_2 = arith.constant 0 : i32
    return %c0_i32, %c0_i32_0, %c0_i32_1 : i32, i32, i32
  }
  func.func @transform_8(%arg0: i32) -> (i32, i32, i32) {
    %c0_i32 = arith.constant 0 : i32
    %c0_i32_0 = arith.constant 0 : i32
    %c0_i32_1 = arith.constant 0 : i32
    %c0_i32_2 = arith.constant 0 : i32
    return %c0_i32, %c0_i32_0, %c0_i32_1 : i32, i32, i32
  }
  func.func @transform_9(%arg0: i32) -> (i32, i32) {
    %c0_i32 = arith.constant 0 : i32
    %c0_i32_0 = arith.constant 0 : i32
    %c0_i32_1 = arith.constant 0 : i32
    return %c0_i32, %c0_i32_0 : i32, i32
  }
  func.func @transform_10(%arg0: i32) -> (i32, i32, i32) {
    %c0_i32 = arith.constant 0 : i32
    %c0_i32_0 = arith.constant 0 : i32
    %c0_i32_1 = arith.constant 0 : i32
    %c0_i32_2 = arith.constant 0 : i32
    return %c0_i32, %c0_i32_0, %c0_i32_1 : i32, i32, i32
  }
  func.func @transform_11(%arg0: i32) -> (i32, i32, i32) {
    %c0_i32 = arith.constant 0 : i32
    %c0_i32_0 = arith.constant 0 : i32
    %c0_i32_1 = arith.constant 0 : i32
    %c0_i32_2 = arith.constant 0 : i32
    return %c0_i32, %c0_i32_0, %c0_i32_1 : i32, i32, i32
  }
  func.func @transform_12(%arg0: i32) -> (i32, i32) {
    %c0_i32 = arith.constant 0 : i32
    %c0_i32_0 = arith.constant 0 : i32
    %c0_i32_1 = arith.constant 0 : i32
    return %c0_i32, %c0_i32_0 : i32, i32
  }
  func.func @transform_13(%arg0: i32) -> (i32, i32, i32) {
    %c0_i32 = arith.constant 0 : i32
    %c0_i32_0 = arith.constant 0 : i32
    %c0_i32_1 = arith.constant 0 : i32
    %c0_i32_2 = arith.constant 0 : i32
    return %c0_i32, %c0_i32_0, %c0_i32_1 : i32, i32, i32
  }
  func.func @transform_14(%arg0: i32) -> (i32, i32, i32) {
    %c0_i32 = arith.constant 0 : i32
    %c0_i32_0 = arith.constant 0 : i32
    %c0_i32_1 = arith.constant 0 : i32
    %c0_i32_2 = arith.constant 0 : i32
    return %c0_i32, %c0_i32_0, %c0_i32_1 : i32, i32, i32
  }
  func.func @transform_15(%arg0: i32) -> (i32, i32) {
    %c0_i32 = arith.constant 0 : i32
    %c0_i32_0 = arith.constant 0 : i32
    %c0_i32_1 = arith.constant 0 : i32
    return %c0_i32, %c0_i32_0 : i32, i32
  }
  func.func @transform_16(%arg0: i32) -> (i32, i32) {
    %c0_i32 = arith.constant 0 : i32
    %c0_i32_0 = arith.constant 0 : i32
    %c0_i32_1 = arith.constant 0 : i32
    return %c0_i32, %c0_i32_0 : i32, i32
  }
}

</mosaic_0001>

<bundles_post_ra>
// kernel: tile.28
= control target key start
LH: loop header
LB: loop body
LE: loop exit
PB: predicated region body
PF: predicated region fallthrough
CT: control target
= control target key end

     0   :  { %s64_s0 = inlined_call_operand.vmem [shape: f32[8], index: 0, kind: input, shape index: {}]   ;;  %s65_s1 = inlined_call_operand.vmem [shape: f32[64,8], index: 1, kind: output, shape index: {}]  }
   0x1   :  { %v4_v0 = vld [vmem:[%s64_s0] ss:$0 sm:$0xff] }
   0x2   :  { %5 = vst [vmem:[%s65_s1] sm:$0xff] %v4_v0  ;;  %20 = vst [vmem:[%s65_s1 + $0x8] sm:$0xff] %v4_v0 }
   0x3   :  { %21 = vst [vmem:[%s65_s1 + $0x10] sm:$0xff] %v4_v0  ;;  %22 = vst [vmem:[%s65_s1 + $0x18] sm:$0xff] %v4_v0 }
   0x4   :  { %23 = vst [vmem:[%s65_s1 + $0x20] sm:$0xff] %v4_v0  ;;  %24 = vst [vmem:[%s65_s1 + $0x28] sm:$0xff] %v4_v0 }
   0x5   :  { %25 = vst [vmem:[%s65_s1 + $0x30] sm:$0xff] %v4_v0  ;;  %26 = vst [vmem:[%s65_s1 + $0x38] sm:$0xff] %v4_v0 }

// kernel: tile.29
= control target key start
LH: loop header
LB: loop body
LE: loop exit
PB: predicated region body
PF: predicated region fallthrough
CT: control target
= control target key end

     0   :  { %vm6_vm0 = vcmask 1043458   ;;  %s11_s6 = smov 3  ;;  %s14_s7 = smov 12  ;;  %vm8_vm1 = vcmask 64512   ;;  %vm20_vm2 = vcmask 1048512   ;;  %vm32_vm3 = vcmask 982912   ;;  %s417_s0 = inlined_call_operand.vmem [shape: f32[64,8], index: 0, kind: input, shape index: {}]   ;;  %s418_s1 = inlined_call_operand.vmem [shape: f32[1,512], index: 1, kind: output, shape index: {}]  }
   0x1   :  { %v220_v0 = vld [vmem:[%s417_s0 + $0xf] ss:$16 sm:%s11_s6]   ;;  %s35_s12 = smov 3  ;;  %s38_s15 = smov 12  ;;  %vm44_vm4 = vcmask 917312   ;;  %vm56_vm5 = vcmask 851712  }
   0x2   :  { %v221_v1 = vld [vmem:[%s417_s0 + $0xf] ss:$16 sm:%s14_s7]   ;;  %v224_v3 = vld [vmem:[%s417_s0 + $0xd] ss:$16 sm:%s35_s12]   ;;  %s268_s16 = smov 120   ;;  %s23_s19 = smov 3 }
   0x3   :  { %v17_v2 = vsel %vm6_vm0, %v221_v1, %v220_v0  ;;  %v225_v4 = vld [vmem:[%s417_s0 + $0xd] ss:$16 sm:%s38_s15]   ;;  %s26_s20 = smov 12  ;;  %v222_v6 = vld [vmem:[%s417_s0 + $0xe] ss:$16 sm:%s23_s19]   ;;  %s47_s25 = smov 3 }
   0x4   :  { %18 = vrot.lane.b32.xlu0 %v17_v2, %s268_s16  ;;  %v41_v5 = vsel %vm6_vm0, %v225_v4, %v224_v3  ;;  %v223_v7 = vld [vmem:[%s417_s0 + $0xe] ss:$16 sm:%s26_s20]   ;;  %s269_s26 = smov 104   ;;  %s50_s29 = smov 12  ;;  %vm68_vm6 = vcmask 786112   ;;  %vm80_vm7 = vcmask 720512  }
   0x5   :  { %42 = vrot.lane.b32.xlu1 %v41_v5, %s269_s26  ;;  %v29_v8 = vsel %vm6_vm0, %v223_v7, %v222_v6  ;;  %v226_v9 = vld [vmem:[%s417_s0 + $0xc] ss:$16 sm:%s47_s25]   ;;  %s59_s3 = smov 3  ;;  %s62_s4 = smov 12  ;;  %vm92_vm8 = vcmask 654912   ;;  %vm104_vm9 = vcmask 589312  }
   0x6   :  { %v227_v10 = vld [vmem:[%s417_s0 + $0xc] ss:$16 sm:%s50_s29]   ;;  %s270_s5 = smov 112   ;;  %v228_v12 = vld [vmem:[%s417_s0 + $0xb] ss:$16 sm:%s59_s3]   ;;  %s71_s8 = smov 3 }
   0x7   :  { %v53_v11 = vsel %vm6_vm0, %v227_v10, %v226_v9  ;;  %v229_v13 = vld [vmem:[%s417_s0 + $0xb] ss:$16 sm:%s62_s4]   ;;  %v230_v14 = vld [vmem:[%s417_s0 + $0xa] ss:$16 sm:%s71_s8]   ;;  %s74_s13 = smov 12  ;;  %s271_s14 = smov 96  }
   0x8   :  { %30 = vrot.lane.b32.xlu0 %v29_v8, %s270_s5  ;;  %v65_v15 = vsel %vm6_vm0, %v229_v13, %v228_v12  ;;  %v231_v16 = vld [vmem:[%s417_s0 + $0xa] ss:$16 sm:%s74_s13]   ;;  %s83_s17 = smov 3  ;;  %s86_s18 = smov 12  ;;  %vm116_vm10 = vcmask 523712   ;;  %vm128_vm11 = vcmask 458112  }
   0x9   :  { %54 = vrot.lane.b32.xlu1 %v53_v11, %s271_s14  ;;  %v77_v17 = vsel %vm6_vm0, %v231_v16, %v230_v14  ;;  %v232_v18 = vld [vmem:[%s417_s0 + $0x9] ss:$16 sm:%s83_s17]   ;;  %s95_s23 = smov 3  ;;  %s272_s24 = smov 88   ;;  %vm140_vm12 = vcmask 392512   ;;  %vm152_vm13 = vcmask 326912  }
   0xa   :  { %v233_v19 = vld [vmem:[%s417_s0 + $0x9] ss:$16 sm:%s86_s18]   ;;  %v234_v20 = vld [vmem:[%s417_s0 + $0x8] ss:$16 sm:%s95_s23]   ;;  %s98_s27 = smov 12  ;;  %s107_s30 = smov 3 }
   0xb   :  { %v89_v21 = vsel %vm6_vm0, %v233_v19, %v232_v18  ;;  %v235_v22 = vld [vmem:[%s417_s0 + $0x8] ss:$16 sm:%s98_s27]   ;;  %s110_s2 = smov 12  ;;  %s273_s3 = smov 80   ;;  %v236_v23 = vld [vmem:[%s417_s0 + $0x7] ss:$16 sm:%s107_s30]  }
   0xc   :  { %66 = vrot.lane.b32.xlu0 %v65_v15, %s272_s24  ;;  %s119_s6 = smov 3  ;;  %v101_v24 = vsel %vm6_vm0, %v235_v22, %v234_v20  ;;  %v237_v25 = vld [vmem:[%s417_s0 + $0x7] ss:$16 sm:%s110_s2]   ;;  %s122_s11 = smov 12  ;;  %vm164_vm14 = vcmask 261312   ;;  %vm176_vm15 = vcmask 195712  }
   0xd   :  { %78 = vrot.lane.b32.xlu1 %v77_v17, %s273_s3  ;;  %v238_v26 = vld [vmem:[%s417_s0 + $0x6] ss:$16 sm:%s119_s6]   ;;  %s274_s12 = smov 72   ;;  %s131_s15 = smov 3  ;;  %v113_v28 = vsel %vm6_vm0, %v237_v25, %v236_v23 }
   0xe   :  { %v239_v27 = vld [vmem:[%s417_s0 + $0x6] ss:$16 sm:%s122_s11]   ;;  %s134_s16 = smov 12  ;;  %v240_v29 = vld [vmem:[%s417_s0 + $0x5] ss:$16 sm:%s131_s15]   ;;  %s143_s19 = smov 3 }
   0xf   :  { %s275_s20 = smov 64   ;;  %v241_v30 = vld [vmem:[%s417_s0 + $0x5] ss:$16 sm:%s134_s16]   ;;  %s146_s23 = smov 12  ;;  %v125_v31 = vsel %vm6_vm0, %v239_v27, %v238_v26  ;;  %v242_v32 = vld [vmem:[%s417_s0 + $0x4] ss:$16 sm:%s143_s19]  }
  0x10   :  { %90 = vrot.lane.b32.xlu0 %v89_v21, %s274_s12  ;;  %s155_s26 = smov 3  ;;  %s158_s27 = smov 12  ;;  %v243_v33 = vld [vmem:[%s417_s0 + $0x4] ss:$16 sm:%s146_s23]   ;;  %v137_v34 = vsel %vm6_vm0, %v241_v30, %v240_v29 }
  0x11   :  { %102 = vrot.lane.b32.xlu1 %v101_v24, %s275_s20  ;;  %s276_s28 = smov 56   ;;  %s167_s2 = smov 3  ;;  %v244_v35 = vld [vmem:[%s417_s0 + $0x3] ss:$16 sm:%s155_s26]   ;;  %v149_v37 = vsel %vm6_vm0, %v243_v33, %v242_v32 }
  0x12   :  { %s170_s5 = smov 12  ;;  %s277_s6 = smov 48   ;;  %v245_v36 = vld [vmem:[%s417_s0 + $0x3] ss:$16 sm:%s158_s27]   ;;  %v246_v38 = vld [vmem:[%s417_s0 + $0x2] ss:$16 sm:%s167_s2]  }
  0x13   :  { %s179_s9 = smov 3  ;;  %v247_v39 = vld [vmem:[%s417_s0 + $0x2] ss:$16 sm:%s170_s5]   ;;  %s182_s14 = smov 12  ;;  %v161_v41 = vsel %vm6_vm0, %v245_v36, %v244_v35 }
  0x14   :  { %114 = vrot.lane.b32.xlu0 %v113_v28, %s276_s28  ;;  %s2_s15 = smov 3  ;;  %s278_s16 = smov 40   ;;  %v248_v42 = vld [vmem:[%s417_s0 + $0x1] ss:$16 sm:%s179_s9]   ;;  %v173_v46 = vsel %vm6_vm0, %v247_v39, %v246_v38 }
  0x15   :  { %126 = vrot.lane.b32.xlu1 %v125_v31, %s277_s6  ;;  %v3_v40 = vld [vmem:[%s417_s0] ss:$16 sm:%s2_s15]   ;;  %s4_s19 = smov 12  ;;  %s279_s24 = smov 32  }
  0x16   :  { %v5_v43 = vld [vmem:[%s417_s0] ss:$16 sm:%s4_s19]   ;;  %v249_v44 = vld [vmem:[%s417_s0 + $0x1] ss:$16 sm:%s182_s14]   ;;  %s280_s0 = smov 24   ;;  %s281_s27 = smov 16  }
  0x17   :  { %v7_v45 = vsel %vm6_vm0, %v5_v43, %v3_v40  ;;  %v185_v47 = vsel %vm6_vm0, %v249_v44, %v248_v42  ;;  %s282_s28 = smov 8   ;;  %vm188_vm0 = vcmask 130112  }
  0x18   :  { %138 = vrot.lane.b32.xlu0 %v137_v34, %s278_s16  ;;  %9 = vst.msk [vmem:[#allocation0] ss:$8 sm:$0xf] %vm8_vm1, %v7_v45  }
  0x19   :  { %150 = vrot.lane.b32.xlu1 %v149_v37, %s279_s24 }
  0x1c   :  { %162 = vrot.lane.b32.xlu0 %v161_v41, %s280_s0 }
  0x1d   :  { %174 = vrot.lane.b32.xlu1 %v173_v46, %s281_s27 }
  0x20   :  { %186 = vrot.lane.b32.xlu0 %v185_v47, %s282_s28 }
  0x76   :  { %v19_v48 = vpop.permute.xlu0 %18  }
  0x77   :  { %21 = vst.msk [vmem:[#allocation0] ss:$8 sm:$0xf] %vm20_vm2, %v19_v48   ;;  %v43_v49 = vpop.permute.xlu1 %42  }
  0x7a   :  { %v31_v50 = vpop.permute.xlu0 %30  }
  0x7b   :  { %33 = vst.msk [vmem:[#allocation0] ss:$8 sm:$0xf] %vm32_vm3, %v31_v50   ;;  %v55_v51 = vpop.permute.xlu1 %54  }
  0x7c   :  { %45 = vst.msk [vmem:[#allocation0] ss:$8 sm:$0xf] %vm44_vm4, %v43_v49  }
  0x7d   :  { %57 = vst.msk [vmem:[#allocation0] ss:$8 sm:$0xf] %vm56_vm5, %v55_v51  }
  0x7e   :  { %v67_v52 = vpop.permute.xlu0 %66  }
  0x7f   :  { %69 = vst.msk [vmem:[#allocation0] ss:$8 sm:$0xf] %vm68_vm6, %v67_v52   ;;  %v79_v53 = vpop.permute.xlu1 %78  }
  0x80   :  { %81 = vst.msk [vmem:[#allocation0] ss:$8 sm:$0xf] %vm80_vm7, %v79_v53  }
  0x82   :  { %v91_v54 = vpop.permute.xlu0 %90  }
  0x83   :  { %93 = vst.msk [vmem:[#allocation0] ss:$8 sm:$0xf] %vm92_vm8, %v91_v54   ;;  %v103_v55 = vpop.permute.xlu1 %102  }
  0x84   :  { %105 = vst.msk [vmem:[#allocation0] ss:$8 sm:$0xf] %vm104_vm9, %v103_v55  }
  0x86   :  { %v115_v56 = vpop.permute.xlu0 %114  }
  0x87   :  { %117 = vst.msk [vmem:[#allocation0] ss:$8 sm:$0xf] %vm116_vm10, %v115_v56   ;;  %v127_v57 = vpop.permute.xlu1 %126  }
  0x88   :  { %129 = vst.msk [vmem:[#allocation0] ss:$8 sm:$0xf] %vm128_vm11, %v127_v57  }
  0x8a   :  { %v139_v58 = vpop.permute.xlu0 %138  }
  0x8b   :  { %141 = vst.msk [vmem:[#allocation0] ss:$8 sm:$0xf] %vm140_vm12, %v139_v58   ;;  %v151_v59 = vpop.permute.xlu1 %150  }
  0x8c   :  { %153 = vst.msk [vmem:[#allocation0] ss:$8 sm:$0xf] %vm152_vm13, %v151_v59  }
  0x8e   :  { %v163_v60 = vpop.permute.xlu0 %162  }
  0x8f   :  { %165 = vst.msk [vmem:[#allocation0] ss:$8 sm:$0xf] %vm164_vm14, %v163_v60   ;;  %v175_v61 = vpop.permute.xlu1 %174  }
  0x90   :  { %177 = vst.msk [vmem:[#allocation0] ss:$8 sm:$0xf] %vm176_vm15, %v175_v61  }
  0x92   :  { %v187_v62 = vpop.permute.xlu0 %186  }
  0x93   :  { %189 = vst.msk [vmem:[#allocation0] ss:$8 sm:$0xf] %vm188_vm0, %v187_v62  }
  0x9a   :  { %v194_v63 = vld [vmem:[#allocation0] sm:$0x1]  ;;  %v199_v0 = vld [vmem:[#allocation0 + $0x8] sm:$0x1]  ;;  %v205_v1 = vld [vmem:[#allocation0 + $0x10] sm:$0x1] }
  0x9b   :  { %197 = vst [vmem:[%s418_s1] sm:$0x1] %v194_v63  ;;  %250 = vst [vmem:[%s418_s1 + $0x1] sm:$0x1] %v199_v0  ;;  %v212_v2 = vld [vmem:[#allocation0 + $0x18] sm:$0x1] }
  0x9c   :  { %251 = vst [vmem:[%s418_s1 + $0x2] sm:$0x1] %v205_v1  ;;  %252 = vst [vmem:[%s418_s1 + $0x3] sm:$0x1] %v212_v2 }

// kernel: tile.33
= control target key start
LH: loop header
LB: loop body
LE: loop exit
PB: predicated region body
PF: predicated region fallthrough
CT: control target
= control target key end

     0   :  { %s40_s0 = inlined_call_operand.vmem [shape: f32[16], index: 0, kind: input, shape index: {}]   ;;  %s41_s1 = inlined_call_operand.vmem [shape: f32[32,16], index: 1, kind: output, shape index: {}]  }
   0x1   :  { %v4_v0 = vld [vmem:[%s40_s0] ss:$0 sm:$0xff] }
   0x2   :  { %5 = vst [vmem:[%s41_s1] sm:$0xff] %v4_v0  ;;  %12 = vst [vmem:[%s41_s1 + $0x8] sm:$0xff] %v4_v0 }
   0x3   :  { %13 = vst [vmem:[%s41_s1 + $0x10] sm:$0xff] %v4_v0  ;;  %14 = vst [vmem:[%s41_s1 + $0x18] sm:$0xff] %v4_v0 }

// kernel: tile.34
= control target key start
LH: loop header
LB: loop body
LE: loop exit
PB: predicated region body
PF: predicated region fallthrough
CT: control target
= control target key end

     0   :  { %s94_s8 = smov 112   ;;  %s95_s11 = smov 80   ;;  %vm3_vm0 = vcmask 130048   ;;  %vm9_vm1 = vcmask 1048448   ;;  %vm15_vm2 = vcmask 917248   ;;  %vm21_vm3 = vcmask 786048   ;;  %s147_s0 = inlined_call_operand.vmem [shape: f32[32,16], index: 0, kind: input, shape index: {}]   ;;  %s148_s1 = inlined_call_operand.vmem [shape: f32[1,512], index: 1, kind: output, shape index: {}]  }
   0x1   :  { %v77_v0 = vld [vmem:[%s147_s0 + $0x7] ss:$8 sm:$0xf]   ;;  %v79_v1 = vld [vmem:[%s147_s0 + $0x5] ss:$8 sm:$0xf]  }
   0x2   :  { %7 = vrot.lane.b32.xlu0 %v77_v0, %s94_s8  ;;  %19 = vrot.lane.b32.xlu1 %v79_v1, %s95_s11  ;;  %v78_v2 = vld [vmem:[%s147_s0 + $0x6] ss:$8 sm:$0xf]   ;;  %v80_v3 = vld [vmem:[%s147_s0 + $0x4] ss:$8 sm:$0xf]  }
   0x3   :  { %s96_s16 = smov 96   ;;  %v2_v4 = vld [vmem:[%s147_s0] ss:$8 sm:$0xf]   ;;  %s97_s19 = smov 64   ;;  %vm27_vm4 = vcmask 654848  }
   0x4   :  { %v81_v5 = vld [vmem:[%s147_s0 + $0x3] ss:$8 sm:$0xf]   ;;  %4 = vst.msk [vmem:[#allocation0] ss:$8 sm:$0xf] %vm3_vm0, %v2_v4  }
   0x5   :  { %v82_v6 = vld [vmem:[%s147_s0 + $0x2] ss:$8 sm:$0xf]   ;;  %s98_s24 = smov 48   ;;  %s99_s25 = smov 32   ;;  %vm33_vm5 = vcmask 523648  }
   0x6   :  { %13 = vrot.lane.b32.xlu0 %v78_v2, %s96_s16  ;;  %25 = vrot.lane.b32.xlu1 %v80_v3, %s97_s19  ;;  %v83_v7 = vld [vmem:[%s147_s0 + $0x1] ss:$8 sm:$0xf]   ;;  %s100_s0 = smov 16   ;;  %vm39_vm6 = vcmask 392448   ;;  %vm45_vm7 = vcmask 261248  }
   0xa   :  { %31 = vrot.lane.b32.xlu0 %v81_v5, %s98_s24  ;;  %37 = vrot.lane.b32.xlu1 %v82_v6, %s99_s25 }
   0xe   :  { %43 = vrot.lane.b32.xlu0 %v83_v7, %s100_s0 }
  0x74   :  { %v8_v8 = vpop.permute.xlu0 %7   ;;  %v20_v9 = vpop.permute.xlu1 %19  }
  0x75   :  { %10 = vst.msk [vmem:[#allocation0] ss:$8 sm:$0xf] %vm9_vm1, %v8_v8  }
  0x78   :  { %v14_v10 = vpop.permute.xlu0 %13   ;;  %v26_v11 = vpop.permute.xlu1 %25  }
  0x79   :  { %16 = vst.msk [vmem:[#allocation0] ss:$8 sm:$0xf] %vm15_vm2, %v14_v10  }
  0x7a   :  { %22 = vst.msk [vmem:[#allocation0] ss:$8 sm:$0xf] %vm21_vm3, %v20_v9  }
  0x7b   :  { %28 = vst.msk [vmem:[#allocation0] ss:$8 sm:$0xf] %vm27_vm4, %v26_v11  }
  0x7c   :  { %v32_v12 = vpop.permute.xlu0 %31   ;;  %v38_v13 = vpop.permute.xlu1 %37  }
  0x7d   :  { %34 = vst.msk [vmem:[#allocation0] ss:$8 sm:$0xf] %vm33_vm5, %v32_v12  }
  0x7e   :  { %40 = vst.msk [vmem:[#allocation0] ss:$8 sm:$0xf] %vm39_vm6, %v38_v13  }
  0x80   :  { %v44_v14 = vpop.permute.xlu0 %43  }
  0x81   :  { %46 = vst.msk [vmem:[#allocation0] ss:$8 sm:$0xf] %vm45_vm7, %v44_v14  }
  0x88   :  { %v51_v15 = vld [vmem:[#allocation0] sm:$0x1]  ;;  %v56_v16 = vld [vmem:[#allocation0 + $0x8] sm:$0x1]  ;;  %v62_v17 = vld [vmem:[#allocation0 + $0x10] sm:$0x1] }
  0x89   :  { %54 = vst [vmem:[%s148_s1] sm:$0x1] %v51_v15  ;;  %84 = vst [vmem:[%s148_s1 + $0x1] sm:$0x1] %v56_v16  ;;  %v69_v18 = vld [vmem:[#allocation0 + $0x18] sm:$0x1] }
  0x8a   :  { %85 = vst [vmem:[%s148_s1 + $0x2] sm:$0x1] %v62_v17  ;;  %86 = vst [vmem:[%s148_s1 + $0x3] sm:$0x1] %v69_v18 }

// kernel: tile.38
= control target key start
LH: loop header
LB: loop body
LE: loop exit
PB: predicated region body
PF: predicated region fallthrough
CT: control target
= control target key end

     0   :  { %s28_s0 = inlined_call_operand.vmem [shape: f32[32], index: 0, kind: input, shape index: {}]   ;;  %s29_s1 = inlined_call_operand.vmem [shape: f32[16,32], index: 1, kind: output, shape index: {}]  }
   0x1   :  { %v4_v0 = vld [vmem:[%s28_s0] ss:$0 sm:$0xff] }
   0x2   :  { %5 = vst [vmem:[%s29_s1] sm:$0xff] %v4_v0  ;;  %8 = vst [vmem:[%s29_s1 + $0x8] sm:$0xff] %v4_v0 }

// kernel: tile.39
= control target key start
LH: loop header
LB: loop body
LE: loop exit
PB: predicated region body
PF: predicated region fallthrough
CT: control target
= control target key end

     0   :  { %s62_s8 = smov 96   ;;  %vm3_vm0 = vcmask 261120   ;;  %s64_s15 = smov 64   ;;  %vm9_vm1 = vcmask 1048320   ;;  %vm15_vm2 = vcmask 785920   ;;  %vm21_vm3 = vcmask 523520   ;;  %s99_s0 = inlined_call_operand.vmem [shape: f32[16,32], index: 0, kind: input, shape index: {}]   ;;  %s100_s1 = inlined_call_operand.vmem [shape: f32[1,512], index: 1, kind: output, shape index: {}]  }
   0x1   :  { %v53_v0 = vld [vmem:[%s99_s0 + $0x3] ss:$4 sm:$0xf]   ;;  %v54_v1 = vld [vmem:[%s99_s0 + $0x2] ss:$4 sm:$0xf]  }
   0x2   :  { %7 = vrot.lane.b32.xlu0 %v53_v0, %s62_s8  ;;  %v55_v2 = vld [vmem:[%s99_s0 + $0x1] ss:$4 sm:$0xf]   ;;  %v2_v3 = vld [vmem:[%s99_s0] ss:$4 sm:$0xf]  }
   0x3   :  { %s63_s0 = smov 32   ;;  %4 = vst.msk [vmem:[#allocation0] ss:$8 sm:$0xf] %vm3_vm0, %v2_v3  }
   0x4   :  { %19 = vrot.lane.b32.xlu1 %v55_v2, %s63_s0 }
   0x6   :  { %13 = vrot.lane.b32.xlu0 %v54_v1, %s64_s15 }
  0x74   :  { %v8_v4 = vpop.permute.xlu0 %7  }
  0x75   :  { %10 = vst.msk [vmem:[#allocation0] ss:$8 sm:$0xf] %vm9_vm1, %v8_v4  }
  0x76   :  { %v20_v5 = vpop.permute.xlu1 %19  }
  0x78   :  { %v14_v6 = vpop.permute.xlu0 %13  }
  0x79   :  { %16 = vst.msk [vmem:[#allocation0] ss:$8 sm:$0xf] %vm15_vm2, %v14_v6  }
  0x7a   :  { %22 = vst.msk [vmem:[#allocation0] ss:$8 sm:$0xf] %vm21_vm3, %v20_v5  }
  0x81   :  { %v27_v7 = vld [vmem:[#allocation0] sm:$0x1]  ;;  %v32_v8 = vld [vmem:[#allocation0 + $0x8] sm:$0x1]  ;;  %v38_v9 = vld [vmem:[#allocation0 + $0x10] sm:$0x1] }
  0x82   :  { %30 = vst [vmem:[%s100_s1] sm:$0x1] %v27_v7  ;;  %56 = vst [vmem:[%s100_s1 + $0x1] sm:$0x1] %v32_v8  ;;  %v45_v10 = vld [vmem:[#allocation0 + $0x18] sm:$0x1] }
  0x83   :  { %57 = vst [vmem:[%s100_s1 + $0x2] sm:$0x1] %v38_v9  ;;  %58 = vst [vmem:[%s100_s1 + $0x3] sm:$0x1] %v45_v10 }

// kernel: tile.43
= control target key start
LH: loop header
LB: loop body
LE: loop exit
PB: predicated region body
PF: predicated region fallthrough
CT: control target
= control target key end

     0   :  { %s22_s0 = inlined_call_operand.vmem [shape: f32[64], index: 0, kind: input, shape index: {}]   ;;  %s23_s1 = inlined_call_operand.vmem [shape: f32[8,64], index: 1, kind: output, shape index: {}]  }
   0x1   :  { %v4_v0 = vld [vmem:[%s22_s0] ss:$0 sm:$0xff] }
   0x2   :  { %5 = vst [vmem:[%s23_s1] sm:$0xff] %v4_v0 }

// kernel: tile.44
= control target key start
LH: loop header
LB: loop body
LE: loop exit
PB: predicated region body
PF: predicated region fallthrough
CT: control target
= control target key end

     0   :  { %vm3_vm0 = vcmask 523264   ;;  %s46_s8 = smov 64   ;;  %vm9_vm1 = vcmask 1048064   ;;  %s75_s0 = inlined_call_operand.vmem [shape: f32[8,64], index: 0, kind: input, shape index: {}]   ;;  %s76_s1 = inlined_call_operand.vmem [shape: f32[1,512], index: 1, kind: output, shape index: {}]  }
   0x1   :  { %v41_v0 = vld [vmem:[%s75_s0 + $0x1] ss:$2 sm:$0xf]   ;;  %v2_v1 = vld [vmem:[%s75_s0] ss:$2 sm:$0xf]  }
   0x2   :  { %7 = vrot.lane.b32.xlu0 %v41_v0, %s46_s8  ;;  %4 = vst.msk [vmem:[#allocation0] ss:$8 sm:$0xf] %vm3_vm0, %v2_v1  }
  0x74   :  { %v8_v2 = vpop.permute.xlu0 %7  }
  0x75   :  { %10 = vst.msk [vmem:[#allocation0] ss:$8 sm:$0xf] %vm9_vm1, %v8_v2  }
  0x7c   :  { %v15_v3 = vld [vmem:[#allocation0] sm:$0x1]  ;;  %v20_v4 = vld [vmem:[#allocation0 + $0x8] sm:$0x1]  ;;  %v26_v5 = vld [vmem:[#allocation0 + $0x10] sm:$0x1] }
  0x7d   :  { %18 = vst [vmem:[%s76_s1] sm:$0x1] %v15_v3  ;;  %42 = vst [vmem:[%s76_s1 + $0x1] sm:$0x1] %v20_v4  ;;  %v33_v6 = vld [vmem:[#allocation0 + $0x18] sm:$0x1] }
  0x7e   :  { %43 = vst [vmem:[%s76_s1 + $0x2] sm:$0x1] %v26_v5  ;;  %44 = vst [vmem:[%s76_s1 + $0x3] sm:$0x1] %v33_v6 }

// kernel: netD64_forward.1
= control target key start
LH: loop header
LB: loop body
LE: loop exit
PB: predicated region body
PF: predicated region fallthrough
CT: control target
= control target key end

     0   :  { %s32828_s0 = inlined_call_operand.vmem [shape: bf16[64,384], index: 0, kind: input, shape index: {}]   ;;  %s32829_s1 = inlined_call_operand.vmem [shape: bf16[4,32,64], index: 1, kind: input, shape index: {}]   ;;  %s32830_s2 = inlined_call_operand.vmem [shape: bf16[4,384,512], index: 2, kind: input, shape index: {}]   ;;  %s32831_s3 = inlined_call_operand.vmem [shape: f32[1,512], index: 3, kind: input, shape index: {}]   ;;  %s32832_s4 = inlined_call_operand.vmem [shape: bf16[4,16,32], index: 4, kind: input, shape index: {}]   ;;  %s32833_s5 = inlined_call_operand.vmem [shape: bf16[4,512,512], index: 5, kind: input, shape index: {}]   ;;  %s32834_s6 = inlined_call_operand.vmem [shape: f32[1,512], index: 6, kind: input, shape index: {}]   ;;  %s32835_s7 = inlined_call_operand.vmem [shape: bf16[4,8,16], index: 7, kind: input, shape index: {}]   ;;  %s32836_s8 = inlined_call_operand.vmem [shape: bf16[4,512,512], index: 8, kind: input, shape index: {}]   ;;  %s32837_s9 = inlined_call_operand.vmem [shape: f32[1,512], index: 9, kind: input, shape index: {}]   ;;  %s32838_s10 = inlined_call_operand.vmem [shape: bf16[4,4,8], index: 10, kind: input, shape index: {}]   ;;  %s32839_s11 = inlined_call_operand.vmem [shape: bf16[4,512,512], index: 11, kind: input, shape index: {}]   ;;  %s32840_s12 = inlined_call_operand.vmem [shape: f32[1,512], index: 12, kind: input, shape index: {}]   ;;  %s32841_s13 = inlined_call_operand.vmem [shape: bf16[4,1,4], index: 13, kind: input, shape index: {}]   ;;  %s32842_s14 = inlined_call_operand.vmem [shape: bf16[4,512,2], index: 14, kind: input, shape index: {}]   ;;  %s32843_s15 = inlined_call_operand.vmem [shape: f32[1,2], index: 15, kind: input, shape index: {}]   ;;  %s32844_s16 = inlined_call_operand.hbm [shape: f32[1,2], index: 16, kind: output, shape index: {}]  }
   0x1   :  { %32846 = sst [smem:[#allocation5_spill]] %s32828_s0 }
   0x2   :  { %s32847_s23 = sld [smem:[#allocation5_spill]]  ;;  %v25357_v2 = vmov 0   ;;  %v22287_v12 = vld [vmem:[%s32829_s1] sm:$0xff]   ;;  %vm149_vm0 = vcmask 523264   ;;  %v22288_v14 = vld [vmem:[%s32829_s1 + $0x8] sm:$0xff]   ;;  %v22289_v15 = vld [vmem:[%s32829_s1 + $0x10] sm:$0xff]  }
   0x3   :  { %188 = vmatprep.mubr.bf16.mxu0 %v25357_v2  ;;  %22229 = vmatprep.mubr.msk.bf16.mxu1 %vm149_vm0, %v22287_v12  ;;  %v22293_v16 = vld [vmem:[%s32830_s2 + $0x3e4] ss:$16 sps:$4 sm:$0xff]   ;;  %v22290_v17 = vld [vmem:[%s32829_s1 + $0x18] sm:$0xff]   ;;  %v22291_v19 = vld [vmem:[%s32830_s2 + $0x3e0] ss:$16 sps:$4 sm:$0xff]  }
   0x4   :  { %v22317_v18 = vld [vmem:[%s32830_s2 + $0x5e4] ss:$16 sps:$4 sm:$0xff]   ;;  %v22315_v21 = vld [vmem:[%s32830_s2 + $0x5e0] ss:$16 sps:$4 sm:$0xff]  }
   0x5   :  { %v22296_v20 = vld [vmem:[%s32830_s2 + $0x3c4] ss:$16 sps:$4 sm:$0xff]   ;;  %v22294_v23 = vld [vmem:[%s32830_s2 + $0x3c0] ss:$16 sps:$4 sm:$0xff]  }
   0x6   :  { %v22323_v22 = vld [vmem:[%s32830_s2 + $0x5c4] ss:$16 sps:$4 sm:$0xff]   ;;  %v22321_v25 = vld [vmem:[%s32830_s2 + $0x5c0] ss:$16 sps:$4 sm:$0xff]  }
   0x7   :  { %v22299_v24 = vld [vmem:[%s32830_s2 + $0x3a4] ss:$16 sps:$4 sm:$0xff]   ;;  %v22297_v26 = vld [vmem:[%s32830_s2 + $0x3a0] ss:$16 sps:$4 sm:$0xff]  }
   0x8   :  { %v22271_v0 = vld [vmem:[%s32847_s23 + $0x4c] ss:$12 sps:$4 sm:$0xff]   ;;  %v22273_v1 = vld [vmem:[%s32847_s23 + $0x50] ss:$12 sps:$4 sm:$0xff]   ;;  %v22274_v3 = vld [vmem:[%s32847_s23 + $0x48] ss:$12 sps:$4 sm:$0xff]  }
   0x9   :  { %164 = vmatprep.subr.bf16.mxu0 %v22271_v0  ;;  %22221 = vmatprep.subr.bf16.mxu1 %v22273_v1  ;;  %v22275_v4 = vld [vmem:[%s32847_s23 + $0x34] ss:$12 sps:$4 sm:$0xff]   ;;  %v22277_v5 = vld [vmem:[%s32847_s23 + $0x38] ss:$12 sps:$4 sm:$0xff]   ;;  %v22278_v6 = vld [vmem:[%s32847_s23 + $0x30] ss:$12 sps:$4 sm:$0xff]  }
   0xa   :  { %165 = vmatpush1.bf16.msra.mxu0 %v22274_v3  ;;  %22222 = vmatpush3.bf16.msra.mxu1 %v22273_v1  ;;  %v22279_v7 = vld [vmem:[%s32847_s23 + $0x1c] ss:$12 sps:$4 sm:$0xff]   ;;  %v22281_v8 = vld [vmem:[%s32847_s23 + $0x20] ss:$12 sps:$4 sm:$0xff]   ;;  %v22282_v9 = vld [vmem:[%s32847_s23 + $0x18] ss:$12 sps:$4 sm:$0xff]  }
   0xb   :  { %166 = vmatprep.subr.bf16.mxu0 %v22275_v4  ;;  %22223 = vmatprep.subr.bf16.mxu1 %v22277_v5  ;;  %v22283_v10 = vld [vmem:[%s32847_s23 + $0x4] ss:$12 sps:$4 sm:$0xff]   ;;  %v22285_v11 = vld [vmem:[%s32847_s23 + $0x8] ss:$12 sps:$4 sm:$0xff]   ;;  %v22286_v13 = vld [vmem:[%s32847_s23] ss:$12 sps:$4 sm:$0xff]  }
   0xc   :  { %v22302_v27 = vld [vmem:[%s32830_s2 + $0x384] ss:$16 sps:$4 sm:$0xff]   ;;  %v22300_v28 = vld [vmem:[%s32830_s2 + $0x380] ss:$16 sps:$4 sm:$0xff]  }
   0xd   :  { %v22305_v29 = vld [vmem:[%s32830_s2 + $0x364] ss:$16 sps:$4 sm:$0xff]   ;;  %v22303_v30 = vld [vmem:[%s32830_s2 + $0x360] ss:$16 sps:$4 sm:$0xff]  }
   0xe   :  { %167 = vmatpush1.bf16.msra.mxu0 %v22278_v6  ;;  %22224 = vmatpush3.bf16.msra.mxu1 %v22277_v5  ;;  %v22308_v31 = vld [vmem:[%s32830_s2 + $0x344] ss:$16 sps:$4 sm:$0xff]   ;;  %v22306_v32 = vld [vmem:[%s32830_s2 + $0x340] ss:$16 sps:$4 sm:$0xff]  }
   0xf   :  { %168 = vmatprep.subr.bf16.mxu0 %v22279_v7  ;;  %22225 = vmatprep.subr.bf16.mxu1 %v22281_v8  ;;  %v22311_v33 = vld [vmem:[%s32830_s2 + $0x324] ss:$16 sps:$4 sm:$0xff]   ;;  %v22309_v34 = vld [vmem:[%s32830_s2 + $0x320] ss:$16 sps:$4 sm:$0xff]  }
  0x10   :  { %v22314_v35 = vld [vmem:[%s32830_s2 + $0x304] ss:$16 sps:$4 sm:$0xff]   ;;  %v22312_v36 = vld [vmem:[%s32830_s2 + $0x300] ss:$16 sps:$4 sm:$0xff]  }
  0x11   :  { %v22320_v37 = vld [vmem:[%s32830_s2 + $0x4e4] ss:$16 sps:$4 sm:$0xff]   ;;  %v22318_v38 = vld [vmem:[%s32830_s2 + $0x4e0] ss:$16 sps:$4 sm:$0xff]  }
  0x12   :  { %169 = vmatpush1.bf16.msra.mxu0 %v22282_v9  ;;  %22226 = vmatpush3.bf16.msra.mxu1 %v22281_v8  ;;  %v22326_v39 = vld [vmem:[%s32830_s2 + $0x4c4] ss:$16 sps:$4 sm:$0xff]   ;;  %v22324_v40 = vld [vmem:[%s32830_s2 + $0x4c0] ss:$16 sps:$4 sm:$0xff]  }
  0x13   :  { %170 = vmatprep.subr.bf16.mxu0 %v22283_v10  ;;  %22227 = vmatprep.subr.bf16.mxu1 %v22285_v11  ;;  %v22329_v41 = vld [vmem:[%s32830_s2 + $0x5a4] ss:$16 sps:$4 sm:$0xff]   ;;  %v22327_v42 = vld [vmem:[%s32830_s2 + $0x5a0] ss:$16 sps:$4 sm:$0xff]  }
  0x14   :  { %v22332_v43 = vld [vmem:[%s32830_s2 + $0x4a4] ss:$16 sps:$4 sm:$0xff]   ;;  %v22330_v44 = vld [vmem:[%s32830_s2 + $0x4a0] ss:$16 sps:$4 sm:$0xff]  }
  0x15   :  { %v22335_v45 = vld [vmem:[%s32830_s2 + $0x584] ss:$16 sps:$4 sm:$0xff]   ;;  %v22333_v46 = vld [vmem:[%s32830_s2 + $0x580] ss:$16 sps:$4 sm:$0xff]  }
  0x16   :  { %171 = vmatpush1.bf16.msra.mxu0 %v22286_v13  ;;  %22228 = vmatpush3.bf16.msra.mxu1 %v22285_v11  ;;  %v22338_v47 = vld [vmem:[%s32830_s2 + $0x484] ss:$16 sps:$4 sm:$0xff]   ;;  %v22336_v48 = vld [vmem:[%s32830_s2 + $0x480] ss:$16 sps:$4 sm:$0xff]  }
  0x17   :  { %389 = vmatprep.subr.bf16.mxu0 %v22271_v0  ;;  %22233 = vmatprep.subr.bf16.mxu1 %v22273_v1  ;;  %v22341_v49 = vld [vmem:[%s32830_s2 + $0x564] ss:$16 sps:$4 sm:$0xff]   ;;  %v22339_v50 = vld [vmem:[%s32830_s2 + $0x560] ss:$16 sps:$4 sm:$0xff]  }
  0x18   :  { %v22344_v51 = vld [vmem:[%s32830_s2 + $0x464] ss:$16 sps:$4 sm:$0xff]   ;;  %v22342_v52 = vld [vmem:[%s32830_s2 + $0x460] ss:$16 sps:$4 sm:$0xff]  }
  0x19   :  { %18240 = vmatmul.mubr.msk.bf16.vlgmr.msra.gmra.mxu0 %vm149_vm0, %v22287_v12  ;;  %22230 = vmatmul.mubr.msk.bf16.vlgmr.msra.gmra.mxu1 %vm149_vm0, %v22288_v14  ;;  %v22347_v53 = vld [vmem:[%s32830_s2 + $0x544] ss:$16 sps:$4 sm:$0xff]   ;;  %v22345_v54 = vld [vmem:[%s32830_s2 + $0x540] ss:$16 sps:$4 sm:$0xff]  }
  0x1a   :  { %390 = vmatpush1.bf16.msra.mxu0 %v22274_v3  ;;  %22234 = vmatpush3.bf16.msra.mxu1 %v22273_v1  ;;  %v22350_v55 = vld [vmem:[%s32830_s2 + $0x444] ss:$16 sps:$4 sm:$0xff]   ;;  %v22348_v56 = vld [vmem:[%s32830_s2 + $0x440] ss:$16 sps:$4 sm:$0xff]   ;;  %v22365_v1 = vld [vmem:[%s32830_s2 + $0x3ec] ss:$16 sps:$4 sm:$0xff]  }
  0x1b   :  { %391 = vmatprep.subr.bf16.mxu0 %v22275_v4  ;;  %22235 = vmatprep.subr.bf16.mxu1 %v22277_v5  ;;  %v22353_v57 = vld [vmem:[%s32830_s2 + $0x524] ss:$16 sps:$4 sm:$0xff]   ;;  %v22351_v58 = vld [vmem:[%s32830_s2 + $0x520] ss:$16 sps:$4 sm:$0xff]   ;;  %v22368_v3 = vld [vmem:[%s32830_s2 + $0x5ec] ss:$16 sps:$4 sm:$0xff]  }
  0x1c   :  { %198 = vmatprep.mubr.bf16.mxu0 %v25357_v2  ;;  %22241 = vmatprep.mubr.msk.bf16.mxu1 %vm149_vm0, %v22289_v15  ;;  %v22356_v59 = vld [vmem:[%s32830_s2 + $0x424] ss:$16 sps:$4 sm:$0xff]   ;;  %v22354_v60 = vld [vmem:[%s32830_s2 + $0x420] ss:$16 sps:$4 sm:$0xff]  }
  0x1d   :  { %v22359_v61 = vld [vmem:[%s32830_s2 + $0x504] ss:$16 sps:$4 sm:$0xff]   ;;  %v22357_v62 = vld [vmem:[%s32830_s2 + $0x500] ss:$16 sps:$4 sm:$0xff]  }
  0x1e   :  { %392 = vmatpush1.bf16.msra.mxu0 %v22278_v6  ;;  %22236 = vmatpush3.bf16.msra.mxu1 %v22277_v5  ;;  %v22362_v63 = vld [vmem:[%s32830_s2 + $0x404] ss:$16 sps:$4 sm:$0xff]   ;;  %v22360_v0 = vld [vmem:[%s32830_s2 + $0x400] ss:$16 sps:$4 sm:$0xff]  }
  0x1f   :  { %393 = vmatprep.subr.bf16.mxu0 %v22279_v7  ;;  %22237 = vmatprep.subr.bf16.mxu1 %v22281_v8 }
  0x21   :  { %18241 = vmatmul.mubr.msk.bf16.gmra.mxu0 %vm149_vm0, %v22288_v14 }
  0x22   :  { %394 = vmatpush1.bf16.msra.mxu0 %v22282_v9  ;;  %22238 = vmatpush3.bf16.msra.mxu1 %v22281_v8 }
  0x23   :  { %395 = vmatprep.subr.bf16.mxu0 %v22283_v10  ;;  %22239 = vmatprep.subr.bf16.mxu1 %v22285_v11 }
  0x24   :  { %413 = vmatprep.mubr.bf16.mxu0 %v25357_v2 }
  0x26   :  { %396 = vmatpush1.bf16.msra.mxu0 %v22286_v13  ;;  %22240 = vmatpush3.bf16.msra.mxu1 %v22285_v11 }
  0x27   :  { %1066 = vmatprep.subr.bf16.mxu0 %v22293_v16  ;;  %1119 = vmatprep.subr.bf16.mxu1 %v22317_v18 }
  0x29   :  { %18250 = vmatmul.mubr.msk.bf16.vlgmr.msra.gmra.mxu0 %vm149_vm0, %v22289_v15  ;;  %22242 = vmatmul.mubr.msk.bf16.vlgmr.msra.gmra.mxu1 %vm149_vm0, %v22290_v17 }
  0x2a   :  { %423 = vmatprep.mubr.bf16.mxu0 %v25357_v2  ;;  %1067 = vmatpush1.bf16.msra.mxu0 %v22291_v19 }
  0x2b   :  { %1068 = vmatprep.subr.bf16.mxu0 %v22296_v20  ;;  %1120 = vmatpush1.bf16.msra.mxu1 %v22315_v21 }
  0x2c   :  { %1121 = vmatprep.subr.bf16.mxu1 %v22323_v22  ;;  %1151 = vmatprep.mubr.bf16.mxu1 %v25357_v2 }
  0x2e   :  { %1069 = vmatpush1.bf16.msra.mxu0 %v22294_v23 }
  0x2f   :  { %1070 = vmatprep.subr.bf16.mxu0 %v22299_v24  ;;  %1122 = vmatpush1.bf16.msra.mxu1 %v22321_v25  ;;  %v22363_v25 = vld [vmem:[%s32830_s2 + $0x3e8] ss:$16 sps:$4 sm:$0xff]  }
  0x30   :  { %1123 = vmatprep.subr.bf16.mxu1 %v22329_v41  ;;  %v22375_v41 = vld [vmem:[%s32830_s2 + $0x3a8] ss:$16 sps:$4 sm:$0xff]  }
  0x31   :  { %18251 = vmatmul.mubr.msk.bf16.gmra.mxu0 %vm149_vm0, %v22290_v17 }
  0x32   :  { %1071 = vmatpush1.bf16.msra.mxu0 %v22297_v26 }
  0x33   :  { %1072 = vmatprep.subr.bf16.mxu0 %v22302_v27  ;;  %1124 = vmatpush1.bf16.msra.mxu1 %v22327_v42  ;;  %v22378_v42 = vld [vmem:[%s32830_s2 + $0x5a8] ss:$16 sps:$4 sm:$0xff]  }
  0x34   :  { %1125 = vmatprep.subr.bf16.mxu1 %v22335_v45 }
  0x36   :  { %1073 = vmatpush1.bf16.msra.mxu0 %v22300_v28 }
  0x37   :  { %1074 = vmatprep.subr.bf16.mxu0 %v22305_v29  ;;  %1126 = vmatpush1.bf16.msra.mxu1 %v22333_v46  ;;  %v22366_v29 = vld [vmem:[%s32830_s2 + $0x5e8] ss:$16 sps:$4 sm:$0xff]  }
  0x38   :  { %1127 = vmatprep.subr.bf16.mxu1 %v22341_v49  ;;  %v22381_v49 = vld [vmem:[%s32830_s2 + $0x388] ss:$16 sps:$4 sm:$0xff]  }
  0x3a   :  { %1075 = vmatpush1.bf16.msra.mxu0 %v22303_v30 }
  0x3b   :  { %1076 = vmatprep.subr.bf16.mxu0 %v22308_v31  ;;  %1128 = vmatpush1.bf16.msra.mxu1 %v22339_v50  ;;  %v22384_v50 = vld [vmem:[%s32830_s2 + $0x588] ss:$16 sps:$4 sm:$0xff]  }
  0x3c   :  { %1129 = vmatprep.subr.bf16.mxu1 %v22347_v53  ;;  %v22387_v53 = vld [vmem:[%s32830_s2 + $0x368] ss:$16 sps:$4 sm:$0xff]  }
  0x3e   :  { %1077 = vmatpush1.bf16.msra.mxu0 %v22306_v32  ;;  %v22371_v32 = vld [vmem:[%s32830_s2 + $0x3cc] ss:$16 sps:$4 sm:$0xff]  }
  0x3f   :  { %1078 = vmatprep.subr.bf16.mxu0 %v22311_v33  ;;  %1130 = vmatpush1.bf16.msra.mxu1 %v22345_v54  ;;  %v22374_v33 = vld [vmem:[%s32830_s2 + $0x5cc] ss:$16 sps:$4 sm:$0xff]   ;;  %v22390_v54 = vld [vmem:[%s32830_s2 + $0x568] ss:$16 sps:$4 sm:$0xff]  }
  0x40   :  { %1131 = vmatprep.subr.bf16.mxu1 %v22353_v57  ;;  %v22393_v57 = vld [vmem:[%s32830_s2 + $0x348] ss:$16 sps:$4 sm:$0xff]  }
  0x42   :  { %1079 = vmatpush1.bf16.msra.mxu0 %v22309_v34 }
  0x43   :  { %1080 = vmatprep.subr.bf16.mxu0 %v22314_v35  ;;  %1132 = vmatpush1.bf16.msra.mxu1 %v22351_v58  ;;  %v22369_v35 = vld [vmem:[%s32830_s2 + $0x3c8] ss:$16 sps:$4 sm:$0xff]  }
  0x44   :  { %1133 = vmatprep.subr.bf16.mxu1 %v22359_v61  ;;  %v22396_v58 = vld [vmem:[%s32830_s2 + $0x548] ss:$16 sps:$4 sm:$0xff]  }
  0x45   :  { %v22399_v61 = vld [vmem:[%s32830_s2 + $0x328] ss:$16 sps:$4 sm:$0xff]  }
  0x46   :  { %1081 = vmatpush1.bf16.msra.mxu0 %v22312_v36  ;;  %v22372_v36 = vld [vmem:[%s32830_s2 + $0x5c8] ss:$16 sps:$4 sm:$0xff]  }
  0x47   :  { %1082 = vmatprep.subr.bf16.mxu0 %v22320_v37  ;;  %1134 = vmatpush1.bf16.msra.mxu1 %v22357_v62  ;;  %v22402_v62 = vld [vmem:[%s32830_s2 + $0x528] ss:$16 sps:$4 sm:$0xff]  }
  0x48   :  { %1172 = vmatprep.subr.bf16.mxu1 %v22365_v1  ;;  %v22405_v1 = vld [vmem:[%s32830_s2 + $0x308] ss:$16 sps:$4 sm:$0xff]  }
  0x4a   :  { %1083 = vmatpush2.bf16.msra.mxu0 %v22318_v38  ;;  %v22377_v38 = vld [vmem:[%s32830_s2 + $0x3ac] ss:$16 sps:$4 sm:$0xff]  }
  0x4b   :  { %1084 = vmatprep.subr.bf16.mxu0 %v22326_v39  ;;  %v22380_v39 = vld [vmem:[%s32830_s2 + $0x5ac] ss:$16 sps:$4 sm:$0xff]  }
  0x4e   :  { %1085 = vmatpush2.bf16.msra.mxu0 %v22324_v40 }
  0x4f   :  { %1086 = vmatprep.subr.bf16.mxu0 %v22332_v43 }
  0x52   :  { %1087 = vmatpush2.bf16.msra.mxu0 %v22330_v44 }
  0x53   :  { %1088 = vmatprep.subr.bf16.mxu0 %v22338_v47  ;;  %v22383_v47 = vld [vmem:[%s32830_s2 + $0x38c] ss:$16 sps:$4 sm:$0xff]  }
  0x56   :  { %1089 = vmatpush2.bf16.msra.mxu0 %v22336_v48  ;;  %v22386_v48 = vld [vmem:[%s32830_s2 + $0x58c] ss:$16 sps:$4 sm:$0xff]  }
  0x57   :  { %1090 = vmatprep.subr.bf16.mxu0 %v22344_v51  ;;  %v22389_v51 = vld [vmem:[%s32830_s2 + $0x36c] ss:$16 sps:$4 sm:$0xff]  }
  0x5a   :  { %1091 = vmatpush2.bf16.msra.mxu0 %v22342_v52  ;;  %v22392_v52 = vld [vmem:[%s32830_s2 + $0x56c] ss:$16 sps:$4 sm:$0xff]  }
  0x5b   :  { %1092 = vmatprep.subr.bf16.mxu0 %v22350_v55  ;;  %v22395_v55 = vld [vmem:[%s32830_s2 + $0x34c] ss:$16 sps:$4 sm:$0xff]  }
  0x5e   :  { %1093 = vmatpush2.bf16.msra.mxu0 %v22348_v56  ;;  %v22398_v56 = vld [vmem:[%s32830_s2 + $0x54c] ss:$16 sps:$4 sm:$0xff]  }
  0x5f   :  { %1094 = vmatprep.subr.bf16.mxu0 %v22356_v59  ;;  %v22401_v59 = vld [vmem:[%s32830_s2 + $0x32c] ss:$16 sps:$4 sm:$0xff]  }
  0x62   :  { %1095 = vmatpush2.bf16.msra.mxu0 %v22354_v60  ;;  %v22404_v60 = vld [vmem:[%s32830_s2 + $0x52c] ss:$16 sps:$4 sm:$0xff]  }
  0x63   :  { %1096 = vmatprep.subr.bf16.mxu0 %v22362_v63  ;;  %v22407_v63 = vld [vmem:[%s32830_s2 + $0x30c] ss:$16 sps:$4 sm:$0xff]  }
  0x66   :  { %1097 = vmatpush2.bf16.msra.mxu0 %v22360_v0  ;;  %v22410_v0 = vld [vmem:[%s32830_s2 + $0x50c] ss:$16 sps:$4 sm:$0xff]  }
  0x67   :  { %1225 = vmatprep.subr.bf16.mxu0 %v22368_v3  ;;  %v22408_v3 = vld [vmem:[%s32830_s2 + $0x508] ss:$16 sps:$4 sm:$0xff]  }
  0xd9   :  { %v190_v4 = vpop.f32.mrf.mxu0  ;;  %v22231_v5 = vpop.f32.mrf.mxu1 }
  0xdb   :  { %v25655_v6 = vpop.f32.mrf.mxu0  ;;  %v25657_v7 = vpop.f32.mrf.mxu1 }
  0xdd   :  { %v194_v8 = vpop.f32.mrf.mxu0  ;;  %v22232_v9 = vpop.f32.mrf.mxu1 }
  0xde   :  { %v25659_v10 = vpack.c.bf16 %v194_v8, %v190_v4  ;;  %v25661_v11 = vpack.c.bf16 %v22232_v9, %v22231_v5  ;;  %v22413_v4 = vld [vmem:[%s32830_s2 + $0x4ec] ss:$16 sps:$4 sm:$0xff]   ;;  %v22416_v5 = vld [vmem:[%s32830_s2 + $0xe4] ss:$16 sps:$4 sm:$0xff]   ;;  %v22411_v8 = vld [vmem:[%s32830_s2 + $0x4e8] ss:$16 sps:$4 sm:$0xff]  }
  0xdf   :  { %v25663_v12 = vpop.f32.mrf.mxu0  ;;  %v25669_v17 = vpop.f32.mrf.mxu1  ;;  %v22414_v9 = vld [vmem:[%s32830_s2 + $0xe0] ss:$16 sps:$4 sm:$0xff]  }
  0xe1   :  { %v200_v13 = vpop.f32.mrf.mxu0 }
  0xe3   :  { %v25665_v14 = vpop.f32.mrf.mxu0 }
  0xe5   :  { %v204_v15 = vpop.f32.mrf.mxu0 }
  0xe6   :  { %v25667_v16 = vpack.c.bf16 %v204_v15, %v200_v13  ;;  %v22419_v13 = vld [vmem:[%s32830_s2 + $0x4cc] ss:$16 sps:$4 sm:$0xff]   ;;  %v22422_v15 = vld [vmem:[%s32830_s2 + $0xc4] ss:$16 sps:$4 sm:$0xff]  }
  0xe7   :  { %v25671_v18 = vpop.f32.mrf.mxu0 }
  0xe9   :  { %v415_v19 = vpop.f32.mrf.mxu0  ;;  %v22243_v20 = vpop.f32.mrf.mxu1 }
  0xeb   :  { %v417_v21 = vpop.f32.mrf.mxu0  ;;  %v468_v22 = vpop.f32.mrf.mxu1 }
  0xed   :  { %v419_v23 = vpop.f32.mrf.mxu0  ;;  %v22244_v24 = vpop.f32.mrf.mxu1 }
  0xee   :  { %v25676_v26 = vpack.c.bf16 %v419_v23, %v415_v19  ;;  %v25712_v45 = vpack.c.bf16 %v22244_v24, %v22243_v20  ;;  %v22417_v19 = vld [vmem:[%s32830_s2 + $0x4c8] ss:$16 sps:$4 sm:$0xff]   ;;  %v22420_v20 = vld [vmem:[%s32830_s2 + $0xc0] ss:$16 sps:$4 sm:$0xff]  }
  0xef   :  { %v421_v27 = vpop.f32.mrf.mxu0  ;;  %v471_v28 = vpop.f32.mrf.mxu1  ;;  %v22423_v23 = vld [vmem:[%s32830_s2 + $0x4a8] ss:$16 sps:$4 sm:$0xff]   ;;  %v22426_v24 = vld [vmem:[%s32830_s2 + $0xa0] ss:$16 sps:$4 sm:$0xff]  }
  0xf0   :  { %v484_v30 = vpack.c.bf16 %v421_v27, %v417_v21  ;;  %v25681_v31 = vpack.c.bf16 %v471_v28, %v468_v22  ;;  %v22425_v21 = vld [vmem:[%s32830_s2 + $0x4ac] ss:$16 sps:$4 sm:$0xff]   ;;  %v22428_v22 = vld [vmem:[%s32830_s2 + $0xa4] ss:$16 sps:$4 sm:$0xff]   ;;  %v25823_v27 = vpack.c.bf16 %v25663_v12, %v25655_v6  ;;  %v22429_v28 = vld [vmem:[%s32830_s2 + $0x488] ss:$16 sps:$4 sm:$0xff]  }
  0xf1   :  { %v425_v34 = vpop.f32.mrf.mxu0  ;;  %v22437_v6 = vld [vmem:[%s32830_s2 + $0x46c] ss:$16 sps:$4 sm:$0xff]   ;;  %v22440_v12 = vld [vmem:[%s32830_s2 + $0x64] ss:$16 sps:$4 sm:$0xff]  }
  0xf2   :  { %1098 = vmatprep.mubr.bf16.mxu0 %v484_v30  ;;  %1152 = vmatmul.mubr.bf16.vlgmr.msra.gmra.mxu1 %v25681_v31 }
  0xf3   :  { %1173 = vmatpush1.bf16.msra.mxu1 %v22363_v25  ;;  %v427_v37 = vpop.f32.mrf.mxu0  ;;  %1099 = vmatmul.mubr.bf16.vlgmr.msra.gmra.mxu0 %v25676_v26  ;;  %v22431_v25 = vld [vmem:[%s32830_s2 + $0x48c] ss:$16 sps:$4 sm:$0xff]  }
  0xf4   :  { %1226 = vmatpush1.bf16.msra.mxu0 %v22366_v29  ;;  %1174 = vmatprep.subr.bf16.mxu1 %v22371_v32  ;;  %v22434_v29 = vld [vmem:[%s32830_s2 + $0x84] ss:$16 sps:$4 sm:$0xff]   ;;  %v22438_v32 = vld [vmem:[%s32830_s2 + $0x60] ss:$16 sps:$4 sm:$0xff]  }
  0xf5   :  { %v429_v40 = vpop.f32.mrf.mxu0  ;;  %1227 = vmatprep.subr.bf16.mxu0 %v22374_v33  ;;  %1161 = vmatprep.mubr.bf16.mxu1 %v25357_v2  ;;  %v22443_v33 = vld [vmem:[%s32830_s2 + $0x44c] ss:$16 sps:$4 sm:$0xff]  }
  0xf6   :  { %v25710_v43 = vpack.c.bf16 %v429_v40, %v425_v34  ;;  %v22446_v34 = vld [vmem:[%s32830_s2 + $0x44] ss:$16 sps:$4 sm:$0xff]   ;;  %v22450_v40 = vld [vmem:[%s32830_s2 + $0x20] ss:$16 sps:$4 sm:$0xff]  }
  0xf7   :  { %1175 = vmatpush1.bf16.msra.mxu1 %v22369_v35  ;;  %v431_v44 = vpop.f32.mrf.mxu0  ;;  %v22441_v35 = vld [vmem:[%s32830_s2 + $0x448] ss:$16 sps:$4 sm:$0xff]  }
  0xf8   :  { %v25714_v46 = vpack.c.bf16 %v431_v44, %v427_v37  ;;  %1228 = vmatpush1.bf16.msra.mxu0 %v22372_v36  ;;  %1176 = vmatprep.subr.bf16.mxu1 %v22377_v38  ;;  %v22444_v36 = vld [vmem:[%s32830_s2 + $0x40] ss:$16 sps:$4 sm:$0xff]   ;;  %v22449_v37 = vld [vmem:[%s32830_s2 + $0x42c] ss:$16 sps:$4 sm:$0xff]   ;;  %v22452_v38 = vld [vmem:[%s32830_s2 + $0x24] ss:$16 sps:$4 sm:$0xff]  }
  0xf9   :  { %1229 = vmatprep.subr.bf16.mxu0 %v22380_v39  ;;  %v22447_v39 = vld [vmem:[%s32830_s2 + $0x428] ss:$16 sps:$4 sm:$0xff]  }
  0xfa   :  { %1108 = vmatprep.mubr.bf16.mxu0 %v25714_v46  ;;  %1162 = vmatmul.mubr.bf16.gmra.mxu1 %v25712_v45  ;;  %v22453_v44 = vld [vmem:[%s32830_s2 + $0x408] ss:$16 sps:$4 sm:$0xff]  }
  0xfb   :  { %1177 = vmatpush1.bf16.msra.mxu1 %v22375_v41  ;;  %1109 = vmatmul.mubr.bf16.gmra.mxu0 %v25710_v43  ;;  %v22455_v41 = vld [vmem:[%s32830_s2 + $0x40c] ss:$16 sps:$4 sm:$0xff]  }
  0xfc   :  { %1230 = vmatpush1.bf16.msra.mxu0 %v22378_v42  ;;  %1178 = vmatprep.subr.bf16.mxu1 %v22383_v47  ;;  %v22458_v42 = vld [vmem:[%s32830_s2 + $0x4] ss:$16 sps:$4 sm:$0xff]  }
  0xfd   :  { %1231 = vmatprep.subr.bf16.mxu0 %v22386_v48  ;;  %1257 = vmatprep.mubr.bf16.mxu0 %v25357_v2  ;;  %v22461_v47 = vld [vmem:[%s32830_s2 + $0x2e4] ss:$16 sps:$4 sm:$0xff]  }
  0xfe   :  { %1204 = vmatprep.mubr.bf16.mxu1 %v484_v30  ;;  %v22432_v30 = vld [vmem:[%s32830_s2 + $0x80] ss:$16 sps:$4 sm:$0xff]   ;;  %v22464_v48 = vld [vmem:[%s32830_s2 + $0x1e4] ss:$16 sps:$4 sm:$0xff]  }
  0xff   :  { %1179 = vmatpush1.bf16.msra.mxu1 %v22381_v49  ;;  %v22459_v49 = vld [vmem:[%s32830_s2 + $0x2e0] ss:$16 sps:$4 sm:$0xff]  }
 0x100   :  { %1232 = vmatpush1.bf16.msra.mxu0 %v22384_v50  ;;  %1180 = vmatprep.subr.bf16.mxu1 %v22389_v51  ;;  %v22462_v50 = vld [vmem:[%s32830_s2 + $0x1e0] ss:$16 sps:$4 sm:$0xff]   ;;  %v22467_v51 = vld [vmem:[%s32830_s2 + $0x2c4] ss:$16 sps:$4 sm:$0xff]  }
 0x101   :  { %1233 = vmatprep.subr.bf16.mxu0 %v22392_v52  ;;  %v22470_v52 = vld [vmem:[%s32830_s2 + $0x1c4] ss:$16 sps:$4 sm:$0xff]  }
 0x103   :  { %1181 = vmatpush1.bf16.msra.mxu1 %v22387_v53  ;;  %v22465_v53 = vld [vmem:[%s32830_s2 + $0x2c0] ss:$16 sps:$4 sm:$0xff]  }
 0x104   :  { %1234 = vmatpush1.bf16.msra.mxu0 %v22390_v54  ;;  %1182 = vmatprep.subr.bf16.mxu1 %v22395_v55  ;;  %v22468_v54 = vld [vmem:[%s32830_s2 + $0x1c0] ss:$16 sps:$4 sm:$0xff]   ;;  %v22473_v55 = vld [vmem:[%s32830_s2 + $0x2a4] ss:$16 sps:$4 sm:$0xff]  }
 0x105   :  { %1235 = vmatprep.subr.bf16.mxu0 %v22398_v56  ;;  %v22476_v56 = vld [vmem:[%s32830_s2 + $0x1a4] ss:$16 sps:$4 sm:$0xff]  }
 0x107   :  { %1183 = vmatpush1.bf16.msra.mxu1 %v22393_v57  ;;  %v22474_v57 = vld [vmem:[%s32830_s2 + $0x1a0] ss:$16 sps:$4 sm:$0xff]  }
 0x108   :  { %1236 = vmatpush1.bf16.msra.mxu0 %v22396_v58  ;;  %1184 = vmatprep.subr.bf16.mxu1 %v22401_v59  ;;  %v22479_v58 = vld [vmem:[%s32830_s2 + $0x284] ss:$16 sps:$4 sm:$0xff]   ;;  %v22477_v59 = vld [vmem:[%s32830_s2 + $0x280] ss:$16 sps:$4 sm:$0xff]  }
 0x109   :  { %1237 = vmatprep.subr.bf16.mxu0 %v22404_v60  ;;  %v22480_v60 = vld [vmem:[%s32830_s2 + $0x180] ss:$16 sps:$4 sm:$0xff]  }
 0x10b   :  { %1185 = vmatpush1.bf16.msra.mxu1 %v22399_v61  ;;  %v22485_v61 = vld [vmem:[%s32830_s2 + $0x264] ss:$16 sps:$4 sm:$0xff]  }
 0x10c   :  { %1238 = vmatpush1.bf16.msra.mxu0 %v22402_v62  ;;  %1186 = vmatprep.subr.bf16.mxu1 %v22407_v63  ;;  %v22488_v62 = vld [vmem:[%s32830_s2 + $0x164] ss:$16 sps:$4 sm:$0xff]   ;;  %v22486_v63 = vld [vmem:[%s32830_s2 + $0x160] ss:$16 sps:$4 sm:$0xff]  }
 0x10d   :  { %1239 = vmatprep.subr.bf16.mxu0 %v22410_v0  ;;  %v22491_v0 = vld [vmem:[%s32830_s2 + $0x244] ss:$16 sps:$4 sm:$0xff]  }
 0x10f   :  { %1187 = vmatpush1.bf16.msra.mxu1 %v22405_v1  ;;  %v22494_v1 = vld [vmem:[%s32830_s2 + $0x144] ss:$16 sps:$4 sm:$0xff]  }
 0x110   :  { %1240 = vmatpush1.bf16.msra.mxu0 %v22408_v3  ;;  %1188 = vmatprep.subr.bf16.mxu1 %v22413_v4  ;;  %v22489_v3 = vld [vmem:[%s32830_s2 + $0x240] ss:$16 sps:$4 sm:$0xff]  }
 0x111   :  { %1758 = vmatprep.subr.bf16.mxu0 %v22416_v5  ;;  %v22492_v4 = vld [vmem:[%s32830_s2 + $0x140] ss:$16 sps:$4 sm:$0xff]   ;;  %v22497_v5 = vld [vmem:[%s32830_s2 + $0x224] ss:$16 sps:$4 sm:$0xff]  }
 0x113   :  { %1189 = vmatpush2.bf16.msra.mxu1 %v22411_v8  ;;  %1258 = vmatmul.mubr.bf16.vlgmr.msra.gmra.mxu0 %v25681_v31  ;;  %v22435_v31 = vld [vmem:[%s32830_s2 + $0x468] ss:$16 sps:$4 sm:$0xff]   ;;  %v22500_v8 = vld [vmem:[%s32830_s2 + $0x124] ss:$16 sps:$4 sm:$0xff]  }
 0x114   :  { %1759 = vmatpush1.bf16.msra.mxu0 %v22414_v9  ;;  %1190 = vmatprep.subr.bf16.mxu1 %v22419_v13  ;;  %v22495_v9 = vld [vmem:[%s32830_s2 + $0x220] ss:$16 sps:$4 sm:$0xff]  }
 0x115   :  { %1760 = vmatprep.subr.bf16.mxu0 %v22422_v15  ;;  %1267 = vmatprep.mubr.bf16.mxu0 %v25357_v2  ;;  %v22498_v13 = vld [vmem:[%s32830_s2 + $0x120] ss:$16 sps:$4 sm:$0xff]   ;;  %v22503_v15 = vld [vmem:[%s32830_s2 + $0x204] ss:$16 sps:$4 sm:$0xff]  }
 0x117   :  { %1191 = vmatpush2.bf16.msra.mxu1 %v22417_v19  ;;  %v22506_v19 = vld [vmem:[%s32830_s2 + $0x104] ss:$16 sps:$4 sm:$0xff]  }
 0x118   :  { %1761 = vmatpush1.bf16.msra.mxu0 %v22420_v20  ;;  %1192 = vmatprep.subr.bf16.mxu1 %v22425_v21  ;;  %v22501_v20 = vld [vmem:[%s32830_s2 + $0x200] ss:$16 sps:$4 sm:$0xff]  }
 0x119   :  { %1762 = vmatprep.subr.bf16.mxu0 %v22428_v22  ;;  %v22504_v21 = vld [vmem:[%s32830_s2 + $0x100] ss:$16 sps:$4 sm:$0xff]   ;;  %v22509_v22 = vld [vmem:[%s32830_s2 + $0xec] ss:$16 sps:$4 sm:$0xff]  }
 0x11b   :  { %1193 = vmatpush2.bf16.msra.mxu1 %v22423_v23  ;;  %1268 = vmatmul.mubr.bf16.gmra.mxu0 %v25712_v45  ;;  %v22456_v45 = vld [vmem:[%s32830_s2] ss:$16 sps:$4 sm:$0xff]   ;;  %v22512_v23 = vld [vmem:[%s32830_s2 + $0x2ec] ss:$16 sps:$4 sm:$0xff]  }
 0x11c   :  { %1763 = vmatpush1.bf16.msra.mxu0 %v22426_v24  ;;  %1790 = vmatprep.mubr.bf16.mxu0 %v25823_v27  ;;  %v22507_v24 = vld [vmem:[%s32830_s2 + $0xe8] ss:$16 sps:$4 sm:$0xff]  }
 0x11d   :  { %1194 = vmatprep.subr.bf16.mxu1 %v22431_v25  ;;  %1764 = vmatprep.subr.bf16.mxu0 %v22434_v29  ;;  %v22510_v25 = vld [vmem:[%s32830_s2 + $0x2e8] ss:$16 sps:$4 sm:$0xff]   ;;  %v22518_v29 = vld [vmem:[%s32830_s2 + $0x2cc] ss:$16 sps:$4 sm:$0xff]  }
 0x11f   :  { %1195 = vmatpush2.bf16.msra.mxu1 %v22429_v28  ;;  %v22515_v28 = vld [vmem:[%s32830_s2 + $0xcc] ss:$16 sps:$4 sm:$0xff]  }
 0x120   :  { %1765 = vmatpush1.bf16.msra.mxu0 %v22432_v30  ;;  %1196 = vmatprep.subr.bf16.mxu1 %v22437_v6  ;;  %v26004_v30 = vpack.c.bf16 %v25669_v17, %v25657_v7  ;;  %v22513_v6 = vld [vmem:[%s32830_s2 + $0xc8] ss:$16 sps:$4 sm:$0xff]   ;;  %v22521_v7 = vld [vmem:[%s32830_s2 + $0xac] ss:$16 sps:$4 sm:$0xff]  }
 0x121   :  { %1766 = vmatprep.subr.bf16.mxu0 %v22440_v12  ;;  %v26011_v12 = vpack.c.bf16 %v25671_v18, %v25665_v14  ;;  %v22524_v17 = vld [vmem:[%s32830_s2 + $0x2ac] ss:$16 sps:$4 sm:$0xff]   ;;  %v22519_v14 = vld [vmem:[%s32830_s2 + $0xa8] ss:$16 sps:$4 sm:$0xff]  }
 0x122   :  { %v22522_v18 = vld [vmem:[%s32830_s2 + $0x2a8] ss:$16 sps:$4 sm:$0xff]  }
 0x123   :  { %1197 = vmatpush2.bf16.msra.mxu1 %v22435_v31  ;;  %v22516_v31 = vld [vmem:[%s32830_s2 + $0x2c8] ss:$16 sps:$4 sm:$0xff]  }
 0x124   :  { %1767 = vmatpush1.bf16.msra.mxu0 %v22438_v32  ;;  %1198 = vmatprep.subr.bf16.mxu1 %v22443_v33  ;;  %v22527_v32 = vld [vmem:[%s32830_s2 + $0x8c] ss:$16 sps:$4 sm:$0xff]  }
 0x125   :  { %1768 = vmatprep.subr.bf16.mxu0 %v22446_v34  ;;  %v22530_v33 = vld [vmem:[%s32830_s2 + $0x28c] ss:$16 sps:$4 sm:$0xff]   ;;  %v22525_v34 = vld [vmem:[%s32830_s2 + $0x88] ss:$16 sps:$4 sm:$0xff]  }
 0x127   :  { %1199 = vmatpush2.bf16.msra.mxu1 %v22441_v35  ;;  %v22528_v35 = vld [vmem:[%s32830_s2 + $0x288] ss:$16 sps:$4 sm:$0xff]  }
 0x128   :  { %1769 = vmatpush1.bf16.msra.mxu0 %v22444_v36  ;;  %1200 = vmatprep.subr.bf16.mxu1 %v22449_v37  ;;  %v22533_v36 = vld [vmem:[%s32830_s2 + $0x6c] ss:$16 sps:$4 sm:$0xff]  }
 0x129   :  { %1770 = vmatprep.subr.bf16.mxu0 %v22452_v38  ;;  %v22536_v37 = vld [vmem:[%s32830_s2 + $0x26c] ss:$16 sps:$4 sm:$0xff]   ;;  %v22531_v38 = vld [vmem:[%s32830_s2 + $0x68] ss:$16 sps:$4 sm:$0xff]  }
 0x12b   :  { %1201 = vmatpush2.bf16.msra.mxu1 %v22447_v39  ;;  %v22534_v39 = vld [vmem:[%s32830_s2 + $0x268] ss:$16 sps:$4 sm:$0xff]  }
 0x12c   :  { %1771 = vmatpush1.bf16.msra.mxu0 %v22450_v40  ;;  %1202 = vmatprep.subr.bf16.mxu1 %v22455_v41  ;;  %v22539_v40 = vld [vmem:[%s32830_s2 + $0x4c] ss:$16 sps:$4 sm:$0xff]   ;;  %v22537_v41 = vld [vmem:[%s32830_s2 + $0x48] ss:$16 sps:$4 sm:$0xff]  }
 0x12d   :  { %1772 = vmatprep.subr.bf16.mxu0 %v22458_v42  ;;  %v22540_v42 = vld [vmem:[%s32830_s2 + $0x248] ss:$16 sps:$4 sm:$0xff]  }
 0x12f   :  { %1203 = vmatpush2.bf16.msra.mxu1 %v22453_v44  ;;  %v22545_v44 = vld [vmem:[%s32830_s2 + $0x2c] ss:$16 sps:$4 sm:$0xff]  }
 0x130   :  { %1773 = vmatpush1.bf16.msra.mxu0 %v22456_v45  ;;  %1811 = vmatprep.subr.bf16.mxu1 %v22461_v47  ;;  %v22548_v45 = vld [vmem:[%s32830_s2 + $0x22c] ss:$16 sps:$4 sm:$0xff]   ;;  %v22543_v47 = vld [vmem:[%s32830_s2 + $0x28] ss:$16 sps:$4 sm:$0xff]  }
 0x131   :  { %1774 = vmatprep.subr.bf16.mxu0 %v22464_v48  ;;  %v22546_v48 = vld [vmem:[%s32830_s2 + $0x228] ss:$16 sps:$4 sm:$0xff]  }
 0x132   :  { %1205 = vmatmul.mubr.bf16.vlgmr.msra.gmra.mxu1 %v25676_v26  ;;  %v22471_v26 = vld [vmem:[%s32830_s2 + $0x2a0] ss:$16 sps:$4 sm:$0xff]  }
 0x133   :  { %1812 = vmatpush1.bf16.msra.mxu1 %v22459_v49  ;;  %1214 = vmatprep.mubr.bf16.mxu1 %v25714_v46  ;;  %v22482_v46 = vld [vmem:[%s32830_s2 + $0x184] ss:$16 sps:$4 sm:$0xff]   ;;  %v22551_v49 = vld [vmem:[%s32830_s2 + $0xc] ss:$16 sps:$4 sm:$0xff]  }
 0x134   :  { %1775 = vmatpush2.bf16.msra.mxu0 %v22462_v50  ;;  %1813 = vmatprep.subr.bf16.mxu1 %v22467_v51  ;;  %v22554_v50 = vld [vmem:[%s32830_s2 + $0x20c] ss:$16 sps:$4 sm:$0xff]   ;;  %v22549_v51 = vld [vmem:[%s32830_s2 + $0x8] ss:$16 sps:$4 sm:$0xff]  }
 0x135   :  { %1776 = vmatprep.subr.bf16.mxu0 %v22470_v52  ;;  %v22552_v52 = vld [vmem:[%s32830_s2 + $0x208] ss:$16 sps:$4 sm:$0xff]  }
 0x137   :  { %1814 = vmatpush1.bf16.msra.mxu1 %v22465_v53  ;;  %v22557_v53 = vld [vmem:[%s32830_s2 + $0x1ec] ss:$16 sps:$4 sm:$0xff]  }
 0x138   :  { %1777 = vmatpush2.bf16.msra.mxu0 %v22468_v54  ;;  %1815 = vmatprep.subr.bf16.mxu1 %v22473_v55  ;;  %v22555_v54 = vld [vmem:[%s32830_s2 + $0x1e8] ss:$16 sps:$4 sm:$0xff]   ;;  %v22560_v55 = vld [vmem:[%s32830_s2 + $0x1cc] ss:$16 sps:$4 sm:$0xff]  }
 0x139   :  { %1778 = vmatprep.subr.bf16.mxu0 %v22476_v56  ;;  %v25311_v56 = vld [vmem:[%s32847_s23 + $0x4c] ss:$12 sps:$4 sm:$0xff]  }
 0x13a   :  { %1215 = vmatmul.mubr.bf16.gmra.mxu1 %v25710_v43  ;;  %v22483_v43 = vld [vmem:[%s32830_s2 + $0x260] ss:$16 sps:$4 sm:$0xff]  }
 0x13b   :  { %1816 = vmatpush1.bf16.msra.mxu1 %v22471_v26  ;;  %1843 = vmatprep.mubr.bf16.mxu1 %v25357_v2  ;;  %v22558_v26 = vld [vmem:[%s32830_s2 + $0x1c8] ss:$16 sps:$4 sm:$0xff]  }
 0x13c   :  { %1779 = vmatpush2.bf16.msra.mxu0 %v22474_v57  ;;  %1817 = vmatprep.subr.bf16.mxu1 %v22479_v58  ;;  %v22563_v57 = vld [vmem:[%s32830_s2 + $0x1ac] ss:$16 sps:$4 sm:$0xff]   ;;  %v25312_v58 = vld [vmem:[%s32847_s23 + $0x48] ss:$12 sps:$4 sm:$0xff]  }
 0x13d   :  { %1780 = vmatprep.subr.bf16.mxu0 %v22482_v46  ;;  %v25313_v46 = vld [vmem:[%s32847_s23 + $0x34] ss:$12 sps:$4 sm:$0xff]  }
 0x13f   :  { %1818 = vmatpush1.bf16.msra.mxu1 %v22477_v59  ;;  %v22561_v59 = vld [vmem:[%s32830_s2 + $0x1a8] ss:$16 sps:$4 sm:$0xff]  }
 0x140   :  { %1781 = vmatpush2.bf16.msra.mxu0 %v22480_v60  ;;  %1819 = vmatprep.subr.bf16.mxu1 %v22485_v61  ;;  %v22566_v60 = vld [vmem:[%s32830_s2 + $0x18c] ss:$16 sps:$4 sm:$0xff]  }
 0x141   :  { %1782 = vmatprep.subr.bf16.mxu0 %v22488_v62  ;;  %v25314_v61 = vld [vmem:[%s32847_s23 + $0x30] ss:$12 sps:$4 sm:$0xff]  }
 0x142   :  { %v25315_v62 = vld [vmem:[%s32847_s23 + $0x1c] ss:$12 sps:$4 sm:$0xff]  }
 0x143   :  { %1820 = vmatpush1.bf16.msra.mxu1 %v22483_v43  ;;  %v22564_v43 = vld [vmem:[%s32830_s2 + $0x188] ss:$16 sps:$4 sm:$0xff]  }
 0x144   :  { %1783 = vmatpush2.bf16.msra.mxu0 %v22486_v63  ;;  %1821 = vmatprep.subr.bf16.mxu1 %v22491_v0  ;;  %v22569_v63 = vld [vmem:[%s32830_s2 + $0x16c] ss:$16 sps:$4 sm:$0xff]   ;;  %v25316_v0 = vld [vmem:[%s32847_s23 + $0x18] ss:$12 sps:$4 sm:$0xff]  }
 0x145   :  { %1784 = vmatprep.subr.bf16.mxu0 %v22494_v1  ;;  %v25317_v1 = vld [vmem:[%s32847_s23 + $0x4] ss:$12 sps:$4 sm:$0xff]  }
 0x147   :  { %1822 = vmatpush1.bf16.msra.mxu1 %v22489_v3  ;;  %v22567_v3 = vld [vmem:[%s32830_s2 + $0x168] ss:$16 sps:$4 sm:$0xff]  }
 0x148   :  { %1785 = vmatpush2.bf16.msra.mxu0 %v22492_v4  ;;  %1823 = vmatprep.subr.bf16.mxu1 %v22497_v5  ;;  %v22573_v4 = vld [vmem:[%s32830_s2 + $0x14c] ss:$16 sps:$4 sm:$0xff]  }
 0x149   :  { %1786 = vmatprep.subr.bf16.mxu0 %v22500_v8  ;;  %v25318_v5 = vld [vmem:[%s32847_s23] ss:$12 sps:$4 sm:$0xff]   ;;  %v22571_v8 = vld [vmem:[%s32830_s2 + $0x148] ss:$16 sps:$4 sm:$0xff]  }
 0x14b   :  { %1824 = vmatpush1.bf16.msra.mxu1 %v22495_v9  ;;  %v22581_v9 = vld [vmem:[%s32830_s2 + $0x6e0] ss:$16 sps:$4 sm:$0xff]  }
 0x14c   :  { %1787 = vmatpush2.bf16.msra.mxu0 %v22498_v13  ;;  %1825 = vmatprep.subr.bf16.mxu1 %v22503_v15  ;;  %v22583_v13 = vld [vmem:[%s32830_s2 + $0x6e4] ss:$16 sps:$4 sm:$0xff]   ;;  %v22576_v15 = vld [vmem:[%s32830_s2 + $0x12c] ss:$16 sps:$4 sm:$0xff]  }
 0x14d   :  { %1788 = vmatprep.subr.bf16.mxu0 %v22506_v19  ;;  %v22586_v19 = vld [vmem:[%s32830_s2 + $0x6c4] ss:$16 sps:$4 sm:$0xff]  }
 0x14f   :  { %1826 = vmatpush1.bf16.msra.mxu1 %v22501_v20  ;;  %v22584_v20 = vld [vmem:[%s32830_s2 + $0x6c0] ss:$16 sps:$4 sm:$0xff]  }
 0x150   :  { %1789 = vmatpush2.bf16.msra.mxu0 %v22504_v21  ;;  %1864 = vmatprep.subr.bf16.mxu1 %v22509_v22  ;;  %v22574_v21 = vld [vmem:[%s32830_s2 + $0x128] ss:$16 sps:$4 sm:$0xff]  }
 0x151   :  { %1917 = vmatprep.subr.bf16.mxu0 %v22512_v23  ;;  %v22580_v22 = vld [vmem:[%s32829_s1 + $0x28] sm:$0xff]  }
 0x152   :  { %1844 = vmatmul.mubr.bf16.vlgmr.msra.gmra.mxu1 %v26004_v30  ;;  %v22579_v23 = vld [vmem:[%s32830_s2 + $0x10c] ss:$16 sps:$4 sm:$0xff]  }
 0x153   :  { %1791 = vmatmul.mubr.bf16.vlgmr.msra.gmra.mxu0 %v25659_v10  ;;  %1865 = vmatpush1.bf16.msra.mxu1 %v22507_v24  ;;  %v22577_v24 = vld [vmem:[%s32830_s2 + $0x108] ss:$16 sps:$4 sm:$0xff]  }
 0x154   :  { %1800 = vmatprep.mubr.bf16.mxu0 %v26011_v12  ;;  %1918 = vmatpush1.bf16.msra.mxu0 %v22510_v25  ;;  %v25319_v25 = vld [vmem:[%s32847_s23 + $0x50] ss:$12 sps:$4 sm:$0xff]  }
 0x155   :  { %1866 = vmatprep.subr.bf16.mxu1 %v22515_v28  ;;  %1919 = vmatprep.subr.bf16.mxu0 %v22518_v29  ;;  %v22589_v28 = vld [vmem:[%s32830_s2 + $0x6a4] ss:$16 sps:$4 sm:$0xff]  }
 0x156   :  { %1853 = vmatprep.mubr.bf16.mxu1 %v25357_v2  ;;  %v25320_v29 = vld [vmem:[%s32847_s23 + $0x38] ss:$12 sps:$4 sm:$0xff]  }
 0x157   :  { %1867 = vmatpush1.bf16.msra.mxu1 %v22513_v6  ;;  %v25321_v6 = vld [vmem:[%s32847_s23 + $0x20] ss:$12 sps:$4 sm:$0xff]  }
 0x158   :  { %1920 = vmatpush1.bf16.msra.mxu0 %v22516_v31  ;;  %1868 = vmatprep.subr.bf16.mxu1 %v22521_v7  ;;  %v22595_v31 = vld [vmem:[%s32830_s2 + $0x664] ss:$16 sps:$4 sm:$0xff]  }
 0x159   :  { %1921 = vmatprep.subr.bf16.mxu0 %v22524_v17  ;;  %v25322_v7 = vld [vmem:[%s32847_s23 + $0x8] ss:$12 sps:$4 sm:$0xff]   ;;  %v22593_v17 = vld [vmem:[%s32830_s2 + $0x660] ss:$16 sps:$4 sm:$0xff]  }
 0x15a   :  { %1854 = vmatmul.mubr.bf16.gmra.mxu1 %v25661_v11 }
 0x15b   :  { %1801 = vmatmul.mubr.bf16.gmra.mxu0 %v25667_v16  ;;  %1869 = vmatpush1.bf16.msra.mxu1 %v22519_v14  ;;  %v22596_v14 = vld [vmem:[%s32830_s2 + $0x640] ss:$16 sps:$4 sm:$0xff]  }
 0x15c   :  { %1896 = vmatprep.mubr.bf16.mxu1 %v25823_v27  ;;  %1922 = vmatpush1.bf16.msra.mxu0 %v22522_v18  ;;  %v22542_v27 = vld [vmem:[%s32830_s2 + $0x24c] ss:$16 sps:$4 sm:$0xff]   ;;  %v22601_v18 = vld [vmem:[%s32830_s2 + $0x624] ss:$16 sps:$4 sm:$0xff]  }
 0x15d   :  { %1870 = vmatprep.subr.bf16.mxu1 %v22527_v32  ;;  %1923 = vmatprep.subr.bf16.mxu0 %v22530_v33  ;;  %v22599_v32 = vld [vmem:[%s32830_s2 + $0x620] ss:$16 sps:$4 sm:$0xff]   ;;  %v22604_v33 = vld [vmem:[%s32830_s2 + $0x604] ss:$16 sps:$4 sm:$0xff]  }
 0x15e   :  { %1949 = vmatprep.mubr.bf16.mxu0 %v25357_v2 }
 0x15f   :  { %1871 = vmatpush1.bf16.msra.mxu1 %v22525_v34  ;;  %v22602_v34 = vld [vmem:[%s32830_s2 + $0x600] ss:$16 sps:$4 sm:$0xff]  }
 0x160   :  { %1924 = vmatpush1.bf16.msra.mxu0 %v22528_v35  ;;  %1872 = vmatprep.subr.bf16.mxu1 %v22533_v36  ;;  %v22607_v35 = vld [vmem:[%s32830_s2 + $0x7e4] ss:$16 sps:$4 sm:$0xff]   ;;  %v22605_v36 = vld [vmem:[%s32830_s2 + $0x7e0] ss:$16 sps:$4 sm:$0xff]  }
 0x161   :  { %1925 = vmatprep.subr.bf16.mxu0 %v22536_v37  ;;  %v22610_v37 = vld [vmem:[%s32830_s2 + $0x7c4] ss:$16 sps:$4 sm:$0xff]  }
 0x163   :  { %1873 = vmatpush1.bf16.msra.mxu1 %v22531_v38  ;;  %v22608_v38 = vld [vmem:[%s32830_s2 + $0x7c0] ss:$16 sps:$4 sm:$0xff]  }
 0x164   :  { %1926 = vmatpush1.bf16.msra.mxu0 %v22534_v39  ;;  %1874 = vmatprep.subr.bf16.mxu1 %v22539_v40 }
 0x165   :  { %1927 = vmatprep.subr.bf16.mxu0 %v22542_v27  ;;  %v22611_v27 = vld [vmem:[%s32830_s2 + $0x7a0] ss:$16 sps:$4 sm:$0xff]  }
 0x167   :  { %1875 = vmatpush1.bf16.msra.mxu1 %v22537_v41  ;;  %v22613_v41 = vld [vmem:[%s32830_s2 + $0x7a4] ss:$16 sps:$4 sm:$0xff]  }
 0x168   :  { %1928 = vmatpush1.bf16.msra.mxu0 %v22540_v42  ;;  %1876 = vmatprep.subr.bf16.mxu1 %v22545_v44 }
 0x169   :  { %1929 = vmatprep.subr.bf16.mxu0 %v22548_v45 }
 0x16b   :  { %1877 = vmatpush1.bf16.msra.mxu1 %v22543_v47 }
 0x16c   :  { %1930 = vmatpush1.bf16.msra.mxu0 %v22546_v48  ;;  %1878 = vmatprep.subr.bf16.mxu1 %v22551_v49 }
 0x16d   :  { %1931 = vmatprep.subr.bf16.mxu0 %v22554_v50  ;;  %v22614_v50 = vld [vmem:[%s32830_s2 + $0x780] ss:$16 sps:$4 sm:$0xff]  }
 0x16f   :  { %1879 = vmatpush1.bf16.msra.mxu1 %v22549_v51  ;;  %v22616_v51 = vld [vmem:[%s32830_s2 + $0x784] ss:$16 sps:$4 sm:$0xff]  }
 0x170   :  { %1932 = vmatpush1.bf16.msra.mxu0 %v22552_v52  ;;  %1880 = vmatprep.subr.bf16.mxu1 %v22557_v53 }
 0x171   :  { %1999 = vmatprep.subr.bf16.mxu0 %v25311_v56 }
 0x173   :  { %1881 = vmatpush2.bf16.msra.mxu1 %v22555_v54  ;;  %1950 = vmatmul.mubr.bf16.vlgmr.msra.gmra.mxu0 %v26004_v30  ;;  %v22587_v30 = vld [vmem:[%s32830_s2 + $0x6a0] ss:$16 sps:$4 sm:$0xff]  }
 0x174   :  { %2000 = vmatpush1.bf16.msra.mxu0 %v25312_v58  ;;  %1882 = vmatprep.subr.bf16.mxu1 %v22560_v55 }
 0x175   :  { %2001 = vmatprep.subr.bf16.mxu0 %v25313_v46  ;;  %1959 = vmatprep.mubr.bf16.mxu0 %v25357_v2 }
 0x177   :  { %1883 = vmatpush2.bf16.msra.mxu1 %v22558_v26  ;;  %v22617_v26 = vld [vmem:[%s32830_s2 + $0x760] ss:$16 sps:$4 sm:$0xff]  }
 0x178   :  { %2002 = vmatpush1.bf16.msra.mxu0 %v25314_v61  ;;  %1884 = vmatprep.subr.bf16.mxu1 %v22563_v57  ;;  %v22619_v57 = vld [vmem:[%s32830_s2 + $0x764] ss:$16 sps:$4 sm:$0xff]  }
 0x179   :  { %2003 = vmatprep.subr.bf16.mxu0 %v25315_v62 }
 0x17b   :  { %1885 = vmatpush2.bf16.msra.mxu1 %v22561_v59  ;;  %1960 = vmatmul.mubr.bf16.gmra.mxu0 %v25661_v11  ;;  %v22570_v11 = vld [vmem:[%s32829_s1 + $0x20] sm:$0xff]  }
 0x17c   :  { %2004 = vmatpush1.bf16.msra.mxu0 %v25316_v0  ;;  %1886 = vmatprep.subr.bf16.mxu1 %v22566_v60 }
 0x17d   :  { %2005 = vmatprep.subr.bf16.mxu0 %v25317_v1  ;;  %2023 = vmatprep.mubr.bf16.mxu0 %v25357_v2  ;;  %v22623_v1 = vld [vmem:[%s32830_s2 + $0x720] ss:$16 sps:$4 sm:$0xff]  }
 0x17f   :  { %1887 = vmatpush2.bf16.msra.mxu1 %v22564_v43  ;;  %v22620_v43 = vld [vmem:[%s32830_s2 + $0x740] ss:$16 sps:$4 sm:$0xff]  }
 0x180   :  { %2006 = vmatpush1.bf16.msra.mxu0 %v25318_v5  ;;  %1888 = vmatprep.subr.bf16.mxu1 %v22569_v63  ;;  %v22622_v63 = vld [vmem:[%s32830_s2 + $0x744] ss:$16 sps:$4 sm:$0xff]  }
 0x181   :  { %2676 = vmatprep.subr.bf16.mxu0 %v22583_v13  ;;  %v22631_v5 = vld [vmem:[%s32830_s2 + $0x8e4] ss:$16 sps:$4 sm:$0xff]  }
 0x182   :  { %v22637_v13 = vld [vmem:[%s32830_s2 + $0x8c4] ss:$16 sps:$4 sm:$0xff]  }
 0x183   :  { %1889 = vmatpush2.bf16.msra.mxu1 %v22567_v3  ;;  %18548 = vmatmul.mubr.msk.bf16.vlgmr.msra.gmra.mxu0 %vm149_vm0, %v22570_v11  ;;  %v22625_v3 = vld [vmem:[%s32830_s2 + $0x724] ss:$16 sps:$4 sm:$0xff]  }
 0x184   :  { %1890 = vmatprep.subr.bf16.mxu1 %v22573_v4  ;;  %2033 = vmatprep.mubr.bf16.mxu0 %v25357_v2  ;;  %v22626_v4 = vld [vmem:[%s32830_s2 + $0x700] ss:$16 sps:$4 sm:$0xff]  }
 0x185   :  { %2677 = vmatpush1.bf16.msra.mxu0 %v22581_v9  ;;  %v22634_v9 = vld [vmem:[%s32830_s2 + $0x8ec] ss:$16 sps:$4 sm:$0xff]  }
 0x186   :  { %2678 = vmatprep.subr.bf16.mxu0 %v22586_v19  ;;  %v22643_v19 = vld [vmem:[%s32830_s2 + $0x8a4] ss:$16 sps:$4 sm:$0xff]  }
 0x187   :  { %1891 = vmatpush2.bf16.msra.mxu1 %v22571_v8  ;;  %v22629_v8 = vld [vmem:[%s32830_s2 + $0x8e0] ss:$16 sps:$4 sm:$0xff]  }
 0x188   :  { %1892 = vmatprep.subr.bf16.mxu1 %v22576_v15  ;;  %v22635_v15 = vld [vmem:[%s32830_s2 + $0x8c0] ss:$16 sps:$4 sm:$0xff]  }
 0x189   :  { %2679 = vmatpush1.bf16.msra.mxu0 %v22584_v20  ;;  %v22641_v20 = vld [vmem:[%s32830_s2 + $0x8a0] ss:$16 sps:$4 sm:$0xff]  }
 0x18a   :  { %2680 = vmatprep.subr.bf16.mxu0 %v22589_v28  ;;  %v22659_v28 = vld [vmem:[%s32830_s2 + $0x840] ss:$16 sps:$4 sm:$0xff]  }
 0x18b   :  { %1893 = vmatpush2.bf16.msra.mxu1 %v22574_v21  ;;  %18549 = vmatmul.mubr.msk.bf16.gmra.mxu0 %vm149_vm0, %v22580_v22  ;;  %v22649_v21 = vld [vmem:[%s32830_s2 + $0x884] ss:$16 sps:$4 sm:$0xff]  }
 0x18c   :  { %1894 = vmatprep.subr.bf16.mxu1 %v22579_v23  ;;  %v22655_v23 = vld [vmem:[%s32830_s2 + $0x864] ss:$16 sps:$4 sm:$0xff]  }
 0x18d   :  { %2681 = vmatpush1.bf16.msra.mxu0 %v22587_v30  ;;  %v22665_v30 = vld [vmem:[%s32830_s2 + $0x820] ss:$16 sps:$4 sm:$0xff]  }
 0x18f   :  { %1895 = vmatpush2.bf16.msra.mxu1 %v22577_v24  ;;  %v22653_v24 = vld [vmem:[%s32830_s2 + $0x860] ss:$16 sps:$4 sm:$0xff]  }
 0x190   :  { %22245 = vmatprep.subr.bf16.mxu1 %v25319_v25 }
 0x192   :  { %1897 = vmatmul.mubr.bf16.vlgmr.msra.gmra.mxu1 %v25659_v10  ;;  %v22592_v10 = vld [vmem:[%s32830_s2 + $0x684] ss:$16 sps:$4 sm:$0xff]  }
 0x193   :  { %1906 = vmatprep.mubr.bf16.mxu1 %v26011_v12  ;;  %22246 = vmatpush3.bf16.msra.mxu1 %v25319_v25  ;;  %v22590_v12 = vld [vmem:[%s32830_s2 + $0x680] ss:$16 sps:$4 sm:$0xff]   ;;  %v22661_v25 = vld [vmem:[%s32830_s2 + $0x844] ss:$16 sps:$4 sm:$0xff]  }
 0x194   :  { %22247 = vmatprep.subr.bf16.mxu1 %v25320_v29  ;;  %2682 = vmatprep.subr.bf16.mxu0 %v22592_v10 }
 0x195   :  { %2683 = vmatpush1.bf16.msra.mxu0 %v22590_v12 }
 0x196   :  { %2684 = vmatprep.subr.bf16.mxu0 %v22595_v31  ;;  %v22671_v31 = vld [vmem:[%s32830_s2 + $0x800] ss:$16 sps:$4 sm:$0xff]  }
 0x197   :  { %22248 = vmatpush3.bf16.msra.mxu1 %v25320_v29  ;;  %v22667_v29 = vld [vmem:[%s32830_s2 + $0x824] ss:$16 sps:$4 sm:$0xff]  }
 0x198   :  { %22249 = vmatprep.subr.bf16.mxu1 %v25321_v6 }
 0x199   :  { %2685 = vmatpush1.bf16.msra.mxu0 %v22593_v17 }
 0x19a   :  { %1907 = vmatmul.mubr.bf16.gmra.mxu1 %v25667_v16  ;;  %v22598_v16 = vld [vmem:[%s32830_s2 + $0x644] ss:$16 sps:$4 sm:$0xff]  }
 0x19b   :  { %22250 = vmatpush3.bf16.msra.mxu1 %v25321_v6  ;;  %22253 = vmatprep.mubr.msk.bf16.mxu1 %vm149_vm0, %v22570_v11  ;;  %v22628_v11 = vld [vmem:[%s32830_s2 + $0x704] ss:$16 sps:$4 sm:$0xff]  }
 0x19c   :  { %22251 = vmatprep.subr.bf16.mxu1 %v25322_v7  ;;  %2686 = vmatprep.subr.bf16.mxu0 %v22598_v16  ;;  %v22673_v6 = vld [vmem:[%s32830_s2 + $0x804] ss:$16 sps:$4 sm:$0xff]  }
 0x19d   :  { %2687 = vmatpush1.bf16.msra.mxu0 %v22596_v14 }
 0x19e   :  { %2688 = vmatprep.subr.bf16.mxu0 %v22601_v18 }
 0x19f   :  { %22252 = vmatpush3.bf16.msra.mxu1 %v25322_v7  ;;  %v22679_v7 = vld [vmem:[%s32830_s2 + $0x6ec] ss:$16 sps:$4 sm:$0xff]  }
 0x1a0   :  { %2729 = vmatprep.subr.bf16.mxu1 %v22631_v5 }
 0x1a1   :  { %2689 = vmatpush1.bf16.msra.mxu0 %v22599_v32 }
 0x1a2   :  { %22254 = vmatmul.mubr.msk.bf16.vlgmr.msra.gmra.mxu1 %vm149_vm0, %v22580_v22  ;;  %2690 = vmatprep.subr.bf16.mxu0 %v22604_v33  ;;  %v22647_v22 = vld [vmem:[%s32830_s2 + $0x880] ss:$16 sps:$4 sm:$0xff]  }
 0x1a3   :  { %2761 = vmatprep.mubr.bf16.mxu1 %v25357_v2  ;;  %2730 = vmatpush1.bf16.msra.mxu1 %v22629_v8 }
 0x1a4   :  { %2731 = vmatprep.subr.bf16.mxu1 %v22637_v13 }
 0x1a5   :  { %2691 = vmatpush1.bf16.msra.mxu0 %v22602_v34 }
 0x1a6   :  { %2692 = vmatprep.subr.bf16.mxu0 %v22607_v35 }
 0x1a7   :  { %2732 = vmatpush1.bf16.msra.mxu1 %v22635_v15 }
 0x1a8   :  { %2733 = vmatprep.subr.bf16.mxu1 %v22643_v19 }
 0x1a9   :  { %2693 = vmatpush2.bf16.msra.mxu0 %v22605_v36 }
 0x1aa   :  { %2694 = vmatprep.subr.bf16.mxu0 %v22610_v37 }
 0x1ab   :  { %2734 = vmatpush1.bf16.msra.mxu1 %v22641_v20 }
 0x1ac   :  { %2735 = vmatprep.subr.bf16.mxu1 %v22649_v21 }
 0x1ad   :  { %2695 = vmatpush2.bf16.msra.mxu0 %v22608_v38 }
 0x1ae   :  { %2696 = vmatprep.subr.bf16.mxu0 %v22613_v41 }
 0x1af   :  { %2736 = vmatpush1.bf16.msra.mxu1 %v22647_v22 }
 0x1b0   :  { %2737 = vmatprep.subr.bf16.mxu1 %v22655_v23 }
 0x1b1   :  { %2697 = vmatpush2.bf16.msra.mxu0 %v22611_v27 }
 0x1b2   :  { %v1153_v39 = vpop.f32.mrf.mxu1  ;;  %2698 = vmatprep.subr.bf16.mxu0 %v22616_v51 }
 0x1b3   :  { %v1100_v40 = vpop.f32.mrf.mxu0  ;;  %2738 = vmatpush1.bf16.msra.mxu1 %v22653_v24 }
 0x1b4   :  { %v26265_v42 = vadd.f32 %v1153_v39, %v1100_v40  ;;  %v1155_v44 = vpop.f32.mrf.mxu1  ;;  %2739 = vmatprep.subr.bf16.mxu1 %v22661_v25 }
 0x1b5   :  { %v1102_v45 = vpop.f32.mrf.mxu0  ;;  %2699 = vmatpush2.bf16.msra.mxu0 %v22614_v50 }
 0x1b6   :  { %v26267_v47 = vadd.f32 %v1155_v44, %v1102_v45  ;;  %v1157_v48 = vpop.f32.mrf.mxu1  ;;  %2700 = vmatprep.subr.bf16.mxu0 %v22619_v57 }
 0x1b7   :  { %v1104_v49 = vpop.f32.mrf.mxu0  ;;  %2740 = vmatpush1.bf16.msra.mxu1 %v22659_v28 }
 0x1b8   :  { %v26275_v52 = vadd.f32 %v1157_v48, %v1104_v49  ;;  %v26277_v53 = vpop.f32.mrf.mxu1  ;;  %2741 = vmatprep.subr.bf16.mxu1 %v22667_v29 }
 0x1b9   :  { %v26279_v54 = vpop.f32.mrf.mxu0  ;;  %2701 = vmatpush2.bf16.msra.mxu0 %v22617_v26 }
 0x1ba   :  { %v1163_v55 = vpop.f32.mrf.mxu1  ;;  %2702 = vmatprep.subr.bf16.mxu0 %v22622_v63 }
 0x1bb   :  { %v1110_v56 = vpop.f32.mrf.mxu0  ;;  %2742 = vmatpush1.bf16.msra.mxu1 %v22665_v30 }
 0x1bc   :  { %v26287_v58 = vadd.f32 %v1163_v55, %v1110_v56  ;;  %v1165_v46 = vpop.f32.mrf.mxu1  ;;  %2743 = vmatprep.subr.bf16.mxu1 %v22673_v6 }
 0x1bd   :  { %v1112_v59 = vpop.f32.mrf.mxu0  ;;  %2703 = vmatpush2.bf16.msra.mxu0 %v22620_v43 }
 0x1be   :  { %v26289_v60 = vadd.f32 %v1165_v46, %v1112_v59  ;;  %v1167_v61 = vpop.f32.mrf.mxu1  ;;  %2704 = vmatprep.subr.bf16.mxu0 %v22625_v3 }
 0x1bf   :  { %v1114_v62 = vpop.f32.mrf.mxu0  ;;  %2744 = vmatpush1.bf16.msra.mxu1 %v22671_v31 }
 0x1c0   :  { %v26297_v0 = vadd.f32 %v1167_v61, %v1114_v62  ;;  %2782 = vmatprep.subr.bf16.mxu1 %v22679_v7  ;;  %v26367_v14 = vpop.f32.mrf.mxu1 }
 0x1c1   :  { %2705 = vmatpush2.bf16.msra.mxu0 %v22623_v1  ;;  %v26356_v10 = vpop.f32.mrf.mxu0 }
 0x1c2   :  { %2706 = vmatprep.subr.bf16.mxu0 %v22628_v11 }
 0x1c5   :  { %2707 = vmatpush2.bf16.msra.mxu0 %v22626_v4 }
 0x1c6   :  { %2835 = vmatprep.subr.bf16.mxu0 %v22634_v9 }
 0x1d3   :  { %v1259_v12 = vpop.f32.mrf.mxu0 }
 0x1d5   :  { %v1261_v17 = vpop.f32.mrf.mxu0 }
 0x1d7   :  { %v1263_v16 = vpop.f32.mrf.mxu0 }
 0x1d9   :  { %v26369_v18 = vpop.f32.mrf.mxu0 }
 0x1db   :  { %v1269_v36 = vpop.f32.mrf.mxu0 }
 0x1dd   :  { %v1271_v40 = vpop.f32.mrf.mxu0 }
 0x1df   :  { %v1273_v48 = vpop.f32.mrf.mxu0 }
 0x1e1   :  { %v26387_v55 = vpop.f32.mrf.mxu0 }
 0x1f2   :  { %v1206_v32 = vpop.f32.mrf.mxu1 }
 0x1f3   :  { %v26371_v33 = vadd.f32 %v1259_v12, %v1206_v32 }
 0x1f4   :  { %v1208_v34 = vpop.f32.mrf.mxu1 }
 0x1f5   :  { %v26373_v35 = vadd.f32 %v1261_v17, %v1208_v34  ;;  %v22640_v34 = vld [vmem:[%s32830_s2 + $0x8cc] ss:$16 sps:$4 sm:$0xff]  }
 0x1f6   :  { %v1210_v37 = vpop.f32.mrf.mxu1 }
 0x1f7   :  { %v26375_v38 = vadd.f32 %v1263_v16, %v1210_v37 }
 0x1f8   :  { %v26377_v39 = vpop.f32.mrf.mxu1 }
 0x1fa   :  { %v1216_v27 = vpop.f32.mrf.mxu1 }
 0x1fb   :  { %v26379_v41 = vadd.f32 %v1269_v36, %v1216_v27  ;;  %v22646_v27 = vld [vmem:[%s32830_s2 + $0x8ac] ss:$16 sps:$4 sm:$0xff]  }
 0x1fc   :  { %v1218_v44 = vpop.f32.mrf.mxu1 }
 0x1fd   :  { %v26381_v45 = vadd.f32 %v1271_v40, %v1218_v44  ;;  %v22638_v40 = vld [vmem:[%s32830_s2 + $0x8c8] ss:$16 sps:$4 sm:$0xff]  }
 0x1fe   :  { %v1220_v49 = vpop.f32.mrf.mxu1 }
 0x1ff   :  { %v26383_v50 = vadd.f32 %v1273_v48, %v1220_v49 }
 0x200   :  { %v26385_v51 = vpop.f32.mrf.mxu1 }
 0x212   :  { %v1845_v56 = vpop.f32.mrf.mxu1 }
 0x213   :  { %v1792_v26 = vpop.f32.mrf.mxu0 }
 0x214   :  { %v1793_v57 = vadd.f32 %v1792_v26, %v26265_v42  ;;  %v1847_v46 = vpop.f32.mrf.mxu1  ;;  %v22652_v26 = vld [vmem:[%s32830_s2 + $0x88c] ss:$16 sps:$4 sm:$0xff]  }
 0x215   :  { %v1794_v59 = vpop.f32.mrf.mxu0 }
 0x216   :  { %v26390_v61 = vadd.f32 %v1845_v56, %v1793_v57  ;;  %v1795_v62 = vadd.f32 %v1794_v59, %v26267_v47  ;;  %v1849_v43 = vpop.f32.mrf.mxu1  ;;  %v22644_v56 = vld [vmem:[%s32830_s2 + $0x8a8] ss:$16 sps:$4 sm:$0xff]  }
 0x217   :  { %v1796_v63 = vpop.f32.mrf.mxu0 }
 0x218   :  { %v26393_v1 = vadd.f32 %v1847_v46, %v1795_v62  ;;  %v1797_v3 = vadd.f32 %v1796_v63, %v26275_v52  ;;  %v26396_v11 = vpop.f32.mrf.mxu1 }
 0x219   :  { %v26398_v4 = vpop.f32.mrf.mxu0 }
 0x21a   :  { %v26400_v5 = vadd.f32 %v1849_v43, %v1797_v3  ;;  %v1855_v8 = vpop.f32.mrf.mxu1  ;;  %v22650_v3 = vld [vmem:[%s32830_s2 + $0x888] ss:$16 sps:$4 sm:$0xff]  }
 0x21b   :  { %v1802_v42 = vpop.f32.mrf.mxu0 }
 0x21c   :  { %v1803_v9 = vadd.f32 %v1802_v42, %v26287_v58  ;;  %v1857_v13 = vpop.f32.mrf.mxu1 }
 0x21d   :  { %v1804_v15 = vpop.f32.mrf.mxu0 }
 0x21e   :  { %v26403_v19 = vadd.f32 %v1855_v8, %v1803_v9  ;;  %v1805_v47 = vadd.f32 %v1804_v15, %v26289_v60  ;;  %v1859_v22 = vpop.f32.mrf.mxu1  ;;  %v22658_v9 = vld [vmem:[%s32830_s2 + $0x86c] ss:$16 sps:$4 sm:$0xff]  }
 0x21f   :  { %v1806_v20 = vpop.f32.mrf.mxu0 }
 0x220   :  { %v26406_v21 = vadd.f32 %v1857_v13, %v1805_v47  ;;  %v1807_v52 = vadd.f32 %v1806_v20, %v26297_v0  ;;  %v22632_v0 = vld [vmem:[%s32830_s2 + $0x8e8] ss:$16 sps:$4 sm:$0xff]   ;;  %v26435_v49 = vpop.f32.mrf.mxu1 }
 0x221   :  { %v26411_v24 = vpop.f32.mrf.mxu0 }
 0x222   :  { %v26409_v23 = vadd.f32 %v1859_v22, %v1807_v52  ;;  %v22664_v52 = vld [vmem:[%s32830_s2 + $0x84c] ss:$16 sps:$4 sm:$0xff]  }
 0x233   :  { %v1951_v25 = vpop.f32.mrf.mxu0 }
 0x235   :  { %v1953_v28 = vpop.f32.mrf.mxu0 }
 0x237   :  { %v1955_v29 = vpop.f32.mrf.mxu0 }
 0x239   :  { %v26413_v58 = vpop.f32.mrf.mxu0 }
 0x23b   :  { %v1961_v30 = vpop.f32.mrf.mxu0 }
 0x23d   :  { %v1963_v6 = vpop.f32.mrf.mxu0 }
 0x23f   :  { %v1965_v12 = vpop.f32.mrf.mxu0 }
 0x241   :  { %v26415_v31 = vpop.f32.mrf.mxu0 }
 0x243   :  { %v2025_v60 = vpop.f32.mrf.mxu0 }
 0x245   :  { %v2027_v7 = vpop.f32.mrf.mxu0 }
 0x247   :  { %v2029_v17 = vpop.f32.mrf.mxu0 }
 0x248   :  { %v26420_v16 = vpack.c.bf16 %v2029_v17, %v2025_v60 }
 0x249   :  { %v2031_v32 = vpop.f32.mrf.mxu0 }
 0x24a   :  { %v26425_v36 = vpack.c.bf16 %v2031_v32, %v2027_v7 }
 0x24b   :  { %v2035_v37 = vpop.f32.mrf.mxu0 }
 0x24c   :  { %2708 = vmatprep.mubr.bf16.mxu0 %v26425_v36 }
 0x24d   :  { %2709 = vmatmul.mubr.bf16.vlgmr.msra.gmra.mxu0 %v26420_v16  ;;  %v2037_v44 = vpop.f32.mrf.mxu0 }
 0x24e   :  { %2836 = vmatpush1.bf16.msra.mxu0 %v22632_v0 }
 0x24f   :  { %2837 = vmatprep.subr.bf16.mxu0 %v22640_v34  ;;  %v2039_v48 = vpop.f32.mrf.mxu0 }
 0x250   :  { %v26443_v57 = vpack.c.bf16 %v2039_v48, %v2035_v37 }
 0x251   :  { %v2041_v46 = vpop.f32.mrf.mxu0 }
 0x252   :  { %2838 = vmatpush1.bf16.msra.mxu0 %v22638_v40  ;;  %v1898_v59 = vpop.f32.mrf.mxu1  ;;  %v26445_v62 = vpack.c.bf16 %v2041_v46, %v2037_v44  ;;  %v25323_v46 = vld [vmem:[%s32847_s23 + $0x4c] ss:$12 sps:$4 sm:$0xff]  }
 0x253   :  { %v1899_v43 = vadd.f32 %v1898_v59, %v26371_v33  ;;  %2839 = vmatprep.subr.bf16.mxu0 %v22646_v27  ;;  %v22677_v27 = vld [vmem:[%s32830_s2 + $0x6e8] ss:$16 sps:$4 sm:$0xff]  }
 0x254   :  { %v1900_v63 = vpop.f32.mrf.mxu1  ;;  %2718 = vmatprep.mubr.bf16.mxu0 %v26445_v62  ;;  %v22683_v59 = vld [vmem:[%s32830_s2 + $0x6a8] ss:$16 sps:$4 sm:$0xff]  }
 0x255   :  { %v26452_v8 = vadd.f32 %v1951_v25, %v1899_v43  ;;  %v1901_v42 = vadd.f32 %v1900_v63, %v26373_v35  ;;  %2719 = vmatmul.mubr.bf16.gmra.mxu0 %v26443_v57  ;;  %v22656_v35 = vld [vmem:[%s32830_s2 + $0x868] ss:$16 sps:$4 sm:$0xff]   ;;  %v22688_v63 = vld [vmem:[%s32830_s2 + $0x68c] ss:$16 sps:$4 sm:$0xff]  }
 0x256   :  { %2840 = vmatpush1.bf16.msra.mxu0 %v22644_v56  ;;  %v1902_v33 = vpop.f32.mrf.mxu1  ;;  %2867 = vmatprep.mubr.bf16.mxu0 %v25357_v2  ;;  %v22680_v56 = vld [vmem:[%s32830_s2 + $0x6c8] ss:$16 sps:$4 sm:$0xff]  }
 0x257   :  { %v26460_v13 = vadd.f32 %v1953_v28, %v1901_v42  ;;  %v1903_v15 = vadd.f32 %v1902_v33, %v26375_v38  ;;  %2841 = vmatprep.subr.bf16.mxu0 %v22652_v26  ;;  %v22662_v38 = vld [vmem:[%s32830_s2 + $0x848] ss:$16 sps:$4 sm:$0xff]   ;;  %v22685_v26 = vld [vmem:[%s32830_s2 + $0x6ac] ss:$16 sps:$4 sm:$0xff]  }
 0x258   :  { %v26463_v47 = vpop.f32.mrf.mxu1  ;;  %v25324_v43 = vld [vmem:[%s32847_s23 + $0x48] ss:$12 sps:$4 sm:$0xff]   ;;  %v25326_v33 = vld [vmem:[%s32847_s23 + $0x30] ss:$12 sps:$4 sm:$0xff]  }
 0x259   :  { %v26468_v20 = vadd.f32 %v1955_v29, %v1903_v15  ;;  %v22670_v29 = vld [vmem:[%s32830_s2 + $0x82c] ss:$16 sps:$4 sm:$0xff]  }
 0x25a   :  { %2842 = vmatpush1.bf16.msra.mxu0 %v22650_v3  ;;  %v1908_v22 = vpop.f32.mrf.mxu1  ;;  %v25325_v3 = vld [vmem:[%s32847_s23 + $0x34] ss:$12 sps:$4 sm:$0xff]   ;;  %v22691_v15 = vld [vmem:[%s32830_s2 + $0x66c] ss:$16 sps:$4 sm:$0xff]  }
 0x25b   :  { %v1909_v25 = vadd.f32 %v1908_v22, %v26379_v41  ;;  %2843 = vmatprep.subr.bf16.mxu0 %v22658_v9  ;;  %v22686_v9 = vld [vmem:[%s32830_s2 + $0x688] ss:$16 sps:$4 sm:$0xff]  }
 0x25c   :  { %v1910_v28 = vpop.f32.mrf.mxu1  ;;  %v25328_v22 = vld [vmem:[%s32847_s23 + $0x18] ss:$12 sps:$4 sm:$0xff]  }
 0x25d   :  { %v26477_v60 = vadd.f32 %v1961_v30, %v1909_v25  ;;  %v1911_v7 = vadd.f32 %v1910_v28, %v26381_v45  ;;  %v22668_v30 = vld [vmem:[%s32830_s2 + $0x828] ss:$16 sps:$4 sm:$0xff]   ;;  %v22676_v45 = vld [vmem:[%s32830_s2 + $0x80c] ss:$16 sps:$4 sm:$0xff]   ;;  %v26557_v28 = vld [vmem:[%s32829_s1 + $0x30] sm:$0xff]  }
 0x25e   :  { %2844 = vmatpush1.bf16.msra.mxu0 %v22656_v35  ;;  %v1912_v17 = vpop.f32.mrf.mxu1  ;;  %v25327_v35 = vld [vmem:[%s32847_s23 + $0x1c] ss:$12 sps:$4 sm:$0xff]  }
 0x25f   :  { %v26483_v0 = vadd.f32 %v1963_v6, %v1911_v7  ;;  %v1913_v41 = vadd.f32 %v1912_v17, %v26383_v50  ;;  %2845 = vmatprep.subr.bf16.mxu0 %v22664_v52  ;;  %v22674_v50 = vld [vmem:[%s32830_s2 + $0x808] ss:$16 sps:$4 sm:$0xff]   ;;  %v22694_v25 = vld [vmem:[%s32830_s2 + $0x64c] ss:$16 sps:$4 sm:$0xff]  }
 0x260   :  { %v26486_v32 = vpop.f32.mrf.mxu1  ;;  %v22689_v52 = vld [vmem:[%s32830_s2 + $0x668] ss:$16 sps:$4 sm:$0xff]   ;;  %v25330_v7 = vld [vmem:[%s32847_s23] ss:$12 sps:$4 sm:$0xff]  }
 0x261   :  { %v26491_v34 = vadd.f32 %v1965_v12, %v1913_v41  ;;  %v22682_v12 = vld [vmem:[%s32830_s2 + $0x6cc] ss:$16 sps:$4 sm:$0xff]   ;;  %v22695_v17 = vld [vmem:[%s32830_s2 + $0x628] ss:$16 sps:$4 sm:$0xff]  }
 0x262   :  { %2846 = vmatpush1.bf16.msra.mxu0 %v22662_v38  ;;  %v22255_v37 = vpop.f32.mrf.mxu1  ;;  %v22692_v38 = vld [vmem:[%s32830_s2 + $0x648] ss:$16 sps:$4 sm:$0xff]   ;;  %v22700_v41 = vld [vmem:[%s32830_s2 + $0x60c] ss:$16 sps:$4 sm:$0xff]  }
 0x263   :  { %2847 = vmatprep.subr.bf16.mxu0 %v22670_v29  ;;  %v22697_v29 = vld [vmem:[%s32830_s2 + $0x62c] ss:$16 sps:$4 sm:$0xff]  }
 0x264   :  { %v2078_v6 = vpop.f32.mrf.mxu1 }
 0x266   :  { %2848 = vmatpush1.bf16.msra.mxu0 %v22668_v30  ;;  %v22256_v40 = vpop.f32.mrf.mxu1  ;;  %v26580_v30 = vld [vmem:[%s32829_s1 + $0x38] sm:$0xff]  }
 0x267   :  { %2849 = vmatprep.subr.bf16.mxu0 %v22676_v45  ;;  %v2098_v42 = vpack.c.bf16 %v22256_v40, %v22255_v37  ;;  %v22698_v45 = vld [vmem:[%s32830_s2 + $0x608] ss:$16 sps:$4 sm:$0xff]   ;;  %v22703_v37 = vld [vmem:[%s32830_s2 + $0x7ec] ss:$16 sps:$4 sm:$0xff]  }
 0x268   :  { %v2081_v44 = vpop.f32.mrf.mxu1  ;;  %v22704_v40 = vld [vmem:[%s32830_s2 + $0x7c8] ss:$16 sps:$4 sm:$0xff]  }
 0x269   :  { %v2095_v48 = vpack.c.bf16 %v2081_v44, %v2078_v6  ;;  %v22701_v6 = vld [vmem:[%s32830_s2 + $0x7e8] ss:$16 sps:$4 sm:$0xff]   ;;  %v22712_v44 = vld [vmem:[%s32830_s2 + $0x78c] ss:$16 sps:$4 sm:$0xff]  }
 0x26a   :  { %2850 = vmatpush1.bf16.msra.mxu0 %v22674_v50  ;;  %v22706_v50 = vld [vmem:[%s32830_s2 + $0x7cc] ss:$16 sps:$4 sm:$0xff]  }
 0x26b   :  { %2762 = vmatmul.mubr.bf16.vlgmr.msra.gmra.mxu1 %v2095_v48  ;;  %2933 = vmatprep.subr.bf16.mxu0 %v25323_v46  ;;  %v22729_v46 = vld [vmem:[%s32830_s2 + $0x9e4] ss:$16 sps:$4 sm:$0xff]  }
 0x26c   :  { %2783 = vmatpush1.bf16.msra.mxu1 %v22677_v27  ;;  %2771 = vmatprep.mubr.bf16.mxu1 %v25357_v2  ;;  %v22709_v27 = vld [vmem:[%s32830_s2 + $0x7ac] ss:$16 sps:$4 sm:$0xff]  }
 0x26d   :  { %2868 = vmatmul.mubr.bf16.vlgmr.msra.gmra.mxu0 %v2095_v48  ;;  %2784 = vmatprep.subr.bf16.mxu1 %v22682_v12  ;;  %v22707_v12 = vld [vmem:[%s32830_s2 + $0x7a8] ss:$16 sps:$4 sm:$0xff]  }
 0x26e   :  { %2877 = vmatprep.mubr.bf16.mxu0 %v25357_v2  ;;  %2934 = vmatpush1.bf16.msra.mxu0 %v25324_v43  ;;  %v22710_v48 = vld [vmem:[%s32830_s2 + $0x788] ss:$16 sps:$4 sm:$0xff]   ;;  %v22719_v43 = vld [vmem:[%s32830_s2 + $0x74c] ss:$16 sps:$4 sm:$0xff]  }
 0x26f   :  { %2935 = vmatprep.subr.bf16.mxu0 %v25325_v3  ;;  %v22732_v3 = vld [vmem:[%s32830_s2 + $0x9c4] ss:$16 sps:$4 sm:$0xff]  }
 0x270   :  { %2785 = vmatpush1.bf16.msra.mxu1 %v22680_v56  ;;  %v22715_v56 = vld [vmem:[%s32830_s2 + $0x76c] ss:$16 sps:$4 sm:$0xff]  }
 0x271   :  { %2786 = vmatprep.subr.bf16.mxu1 %v22685_v26  ;;  %v22727_v26 = vld [vmem:[%s32830_s2 + $0x9e0] ss:$16 sps:$4 sm:$0xff]  }
 0x272   :  { %2936 = vmatpush1.bf16.msra.mxu0 %v25326_v33  ;;  %v22720_v33 = vld [vmem:[%s32830_s2 + $0x728] ss:$16 sps:$4 sm:$0xff]  }
 0x273   :  { %2772 = vmatmul.mubr.bf16.gmra.mxu1 %v2098_v42  ;;  %2937 = vmatprep.subr.bf16.mxu0 %v25327_v35  ;;  %v22723_v35 = vld [vmem:[%s32830_s2 + $0x708] ss:$16 sps:$4 sm:$0xff]  }
 0x274   :  { %2787 = vmatpush1.bf16.msra.mxu1 %v22683_v59  ;;  %2814 = vmatprep.mubr.bf16.mxu1 %v26425_v36  ;;  %v25329_v36 = vld [vmem:[%s32847_s23 + $0x4] ss:$12 sps:$4 sm:$0xff]   ;;  %v22713_v59 = vld [vmem:[%s32830_s2 + $0x768] ss:$16 sps:$4 sm:$0xff]  }
 0x275   :  { %2878 = vmatmul.mubr.bf16.gmra.mxu0 %v2098_v42  ;;  %2788 = vmatprep.subr.bf16.mxu1 %v22688_v63  ;;  %v22730_v63 = vld [vmem:[%s32830_s2 + $0x9c0] ss:$16 sps:$4 sm:$0xff]   ;;  %v22717_v42 = vld [vmem:[%s32830_s2 + $0x748] ss:$16 sps:$4 sm:$0xff]  }
 0x276   :  { %2938 = vmatpush1.bf16.msra.mxu0 %v25328_v22  ;;  %2957 = vmatprep.mubr.bf16.mxu0 %v25357_v2  ;;  %v22735_v22 = vld [vmem:[%s32830_s2 + $0x9a4] ss:$16 sps:$4 sm:$0xff]  }
 0x277   :  { %2939 = vmatprep.subr.bf16.mxu0 %v25329_v36  ;;  %v25332_v36 = vld [vmem:[%s32847_s23 + $0x38] ss:$12 sps:$4 sm:$0xff]  }
 0x278   :  { %2789 = vmatpush1.bf16.msra.mxu1 %v22686_v9  ;;  %v22722_v9 = vld [vmem:[%s32830_s2 + $0x72c] ss:$16 sps:$4 sm:$0xff]  }
 0x279   :  { %2790 = vmatprep.subr.bf16.mxu1 %v22691_v15  ;;  %v22725_v15 = vld [vmem:[%s32830_s2 + $0x70c] ss:$16 sps:$4 sm:$0xff]  }
 0x27a   :  { %2940 = vmatpush1.bf16.msra.mxu0 %v25330_v7  ;;  %v22741_v7 = vld [vmem:[%s32830_s2 + $0x964] ss:$16 sps:$4 sm:$0xff]  }
 0x27b   :  { %3610 = vmatprep.subr.bf16.mxu0 %v22729_v46  ;;  %v22783_v46 = vld [vmem:[%s32830_s2 + $0xbc4] ss:$16 sps:$4 sm:$0xff]  }
 0x27c   :  { %2791 = vmatpush1.bf16.msra.mxu1 %v22689_v52  ;;  %v25331_v52 = vld [vmem:[%s32847_s23 + $0x50] ss:$12 sps:$4 sm:$0xff]  }
 0x27d   :  { %2792 = vmatprep.subr.bf16.mxu1 %v22694_v25  ;;  %18750 = vmatmul.mubr.msk.bf16.vlgmr.msra.gmra.mxu0 %vm149_vm0, %v26557_v28  ;;  %v22733_v25 = vld [vmem:[%s32830_s2 + $0x9a0] ss:$16 sps:$4 sm:$0xff]  }
 0x27e   :  { %2967 = vmatprep.mubr.bf16.mxu0 %v25357_v2  ;;  %3611 = vmatpush1.bf16.msra.mxu0 %v22727_v26  ;;  %v22781_v26 = vld [vmem:[%s32830_s2 + $0xbc0] ss:$16 sps:$4 sm:$0xff]  }
 0x27f   :  { %3612 = vmatprep.subr.bf16.mxu0 %v22732_v3  ;;  %v22763_v3 = vld [vmem:[%s32830_s2 + $0xa60] ss:$16 sps:$4 sm:$0xff]  }
 0x280   :  { %2793 = vmatpush1.bf16.msra.mxu1 %v22692_v38  ;;  %v22738_v38 = vld [vmem:[%s32830_s2 + $0x984] ss:$16 sps:$4 sm:$0xff]  }
 0x281   :  { %2794 = vmatprep.subr.bf16.mxu1 %v22697_v29  ;;  %v22739_v29 = vld [vmem:[%s32830_s2 + $0x960] ss:$16 sps:$4 sm:$0xff]  }
 0x282   :  { %3613 = vmatpush1.bf16.msra.mxu0 %v22730_v63  ;;  %v22765_v63 = vld [vmem:[%s32830_s2 + $0xa64] ss:$16 sps:$4 sm:$0xff]  }
 0x283   :  { %3614 = vmatprep.subr.bf16.mxu0 %v22735_v22  ;;  %v22780_v22 = vld [vmem:[%s32830_s2 + $0xbec] ss:$16 sps:$4 sm:$0xff]  }
 0x284   :  { %2795 = vmatpush1.bf16.msra.mxu1 %v22695_v17  ;;  %v25334_v17 = vld [vmem:[%s32847_s23 + $0x8] ss:$12 sps:$4 sm:$0xff]  }
 0x285   :  { %2796 = vmatprep.subr.bf16.mxu1 %v22700_v41  ;;  %18751 = vmatmul.mubr.msk.bf16.gmra.mxu0 %vm149_vm0, %v26580_v30  ;;  %v22744_v41 = vld [vmem:[%s32830_s2 + $0x944] ss:$16 sps:$4 sm:$0xff]  }
 0x286   :  { %3615 = vmatpush1.bf16.msra.mxu0 %v22733_v25  ;;  %v22789_v25 = vld [vmem:[%s32830_s2 + $0xba4] ss:$16 sps:$4 sm:$0xff]  }
 0x287   :  { %3616 = vmatprep.subr.bf16.mxu0 %v22738_v38  ;;  %v22795_v38 = vld [vmem:[%s32830_s2 + $0xb84] ss:$16 sps:$4 sm:$0xff]  }
 0x288   :  { %2797 = vmatpush1.bf16.msra.mxu1 %v22698_v45  ;;  %v22745_v45 = vld [vmem:[%s32830_s2 + $0x920] ss:$16 sps:$4 sm:$0xff]  }
 0x289   :  { %2798 = vmatprep.subr.bf16.mxu1 %v22703_v37  ;;  %v22750_v37 = vld [vmem:[%s32830_s2 + $0x904] ss:$16 sps:$4 sm:$0xff]  }
 0x28c   :  { %2799 = vmatpush2.bf16.msra.mxu1 %v22701_v6  ;;  %v22748_v6 = vld [vmem:[%s32830_s2 + $0x900] ss:$16 sps:$4 sm:$0xff]  }
 0x28d   :  { %2800 = vmatprep.subr.bf16.mxu1 %v22706_v50  ;;  %v22751_v50 = vld [vmem:[%s32830_s2 + $0xae0] ss:$16 sps:$4 sm:$0xff]  }
 0x290   :  { %2801 = vmatpush2.bf16.msra.mxu1 %v22704_v40  ;;  %v22756_v40 = vld [vmem:[%s32830_s2 + $0xac4] ss:$16 sps:$4 sm:$0xff]  }
 0x291   :  { %2802 = vmatprep.subr.bf16.mxu1 %v22709_v27  ;;  %v22775_v27 = vld [vmem:[%s32830_s2 + $0xbe0] ss:$16 sps:$4 sm:$0xff]  }
 0x294   :  { %2803 = vmatpush2.bf16.msra.mxu1 %v22707_v12  ;;  %v22777_v12 = vld [vmem:[%s32830_s2 + $0xbe4] ss:$16 sps:$4 sm:$0xff]  }
 0x295   :  { %2804 = vmatprep.subr.bf16.mxu1 %v22712_v44  ;;  %v22754_v44 = vld [vmem:[%s32830_s2 + $0xac0] ss:$16 sps:$4 sm:$0xff]  }
 0x298   :  { %2805 = vmatpush2.bf16.msra.mxu1 %v22710_v48  ;;  %v22759_v48 = vld [vmem:[%s32830_s2 + $0xaa4] ss:$16 sps:$4 sm:$0xff]  }
 0x299   :  { %2806 = vmatprep.subr.bf16.mxu1 %v22715_v56  ;;  %v22757_v56 = vld [vmem:[%s32830_s2 + $0xaa0] ss:$16 sps:$4 sm:$0xff]  }
 0x29c   :  { %2807 = vmatpush2.bf16.msra.mxu1 %v22713_v59  ;;  %v22762_v59 = vld [vmem:[%s32830_s2 + $0xa84] ss:$16 sps:$4 sm:$0xff]  }
 0x29d   :  { %2808 = vmatprep.subr.bf16.mxu1 %v22719_v43  ;;  %v22760_v43 = vld [vmem:[%s32830_s2 + $0xa80] ss:$16 sps:$4 sm:$0xff]  }
 0x2a0   :  { %2809 = vmatpush2.bf16.msra.mxu1 %v22717_v42  ;;  %v22768_v42 = vld [vmem:[%s32830_s2 + $0xa44] ss:$16 sps:$4 sm:$0xff]  }
 0x2a1   :  { %2810 = vmatprep.subr.bf16.mxu1 %v22722_v9  ;;  %v22766_v9 = vld [vmem:[%s32830_s2 + $0xa40] ss:$16 sps:$4 sm:$0xff]  }
 0x2a4   :  { %2811 = vmatpush2.bf16.msra.mxu1 %v22720_v33  ;;  %v22771_v33 = vld [vmem:[%s32830_s2 + $0xa24] ss:$16 sps:$4 sm:$0xff]  }
 0x2a5   :  { %2812 = vmatprep.subr.bf16.mxu1 %v22725_v15  ;;  %v22769_v15 = vld [vmem:[%s32830_s2 + $0xa20] ss:$16 sps:$4 sm:$0xff]  }
 0x2a8   :  { %2813 = vmatpush2.bf16.msra.mxu1 %v22723_v35  ;;  %v22774_v35 = vld [vmem:[%s32830_s2 + $0xa04] ss:$16 sps:$4 sm:$0xff]  }
 0x2a9   :  { %22257 = vmatprep.subr.bf16.mxu1 %v25331_v52 }
 0x2ab   :  { %2815 = vmatmul.mubr.bf16.vlgmr.msra.gmra.mxu1 %v26420_v16  ;;  %v22736_v16 = vld [vmem:[%s32830_s2 + $0x980] ss:$16 sps:$4 sm:$0xff]  }
 0x2ac   :  { %2824 = vmatprep.mubr.bf16.mxu1 %v26445_v62  ;;  %22258 = vmatpush3.bf16.msra.mxu1 %v25331_v52  ;;  %v25333_v62 = vld [vmem:[%s32847_s23 + $0x20] ss:$12 sps:$4 sm:$0xff]  }
 0x2ad   :  { %22259 = vmatprep.subr.bf16.mxu1 %v25332_v36  ;;  %3617 = vmatpush1.bf16.msra.mxu0 %v22736_v16  ;;  %v22772_v52 = vld [vmem:[%s32830_s2 + $0xa00] ss:$16 sps:$4 sm:$0xff]  }
 0x2ae   :  { %3618 = vmatprep.subr.bf16.mxu0 %v22741_v7  ;;  %v22793_v16 = vld [vmem:[%s32830_s2 + $0xb80] ss:$16 sps:$4 sm:$0xff]  }
 0x2af   :  { %v22799_v7 = vld [vmem:[%s32830_s2 + $0xb60] ss:$16 sps:$4 sm:$0xff]  }
 0x2b0   :  { %22260 = vmatpush3.bf16.msra.mxu1 %v25332_v36  ;;  %v22787_v36 = vld [vmem:[%s32830_s2 + $0xba0] ss:$16 sps:$4 sm:$0xff]  }
 0x2b1   :  { %22261 = vmatprep.subr.bf16.mxu1 %v25333_v62  ;;  %3619 = vmatpush1.bf16.msra.mxu0 %v22739_v29  ;;  %v22807_v29 = vld [vmem:[%s32830_s2 + $0xb44] ss:$16 sps:$4 sm:$0xff]  }
 0x2b2   :  { %3620 = vmatprep.subr.bf16.mxu0 %v22744_v41  ;;  %v22813_v41 = vld [vmem:[%s32830_s2 + $0xb24] ss:$16 sps:$4 sm:$0xff]  }
 0x2b3   :  { %2825 = vmatmul.mubr.bf16.gmra.mxu1 %v26443_v57  ;;  %v22742_v57 = vld [vmem:[%s32830_s2 + $0x940] ss:$16 sps:$4 sm:$0xff]  }
 0x2b4   :  { %22262 = vmatpush3.bf16.msra.mxu1 %v25333_v62  ;;  %22265 = vmatprep.mubr.msk.bf16.mxu1 %vm149_vm0, %v26557_v28  ;;  %v22747_v28 = vld [vmem:[%s32830_s2 + $0x924] ss:$16 sps:$4 sm:$0xff]  }
 0x2b5   :  { %22263 = vmatprep.subr.bf16.mxu1 %v25334_v17  ;;  %3621 = vmatpush1.bf16.msra.mxu0 %v22742_v57  ;;  %v22801_v62 = vld [vmem:[%s32830_s2 + $0xb64] ss:$16 sps:$4 sm:$0xff]   ;;  %v22811_v57 = vld [vmem:[%s32830_s2 + $0xb20] ss:$16 sps:$4 sm:$0xff]  }
 0x2b6   :  { %3622 = vmatprep.subr.bf16.mxu0 %v22747_v28  ;;  %v22819_v28 = vld [vmem:[%s32830_s2 + $0xb04] ss:$16 sps:$4 sm:$0xff]  }
 0x2b8   :  { %22264 = vmatpush3.bf16.msra.mxu1 %v25334_v17  ;;  %v22805_v17 = vld [vmem:[%s32830_s2 + $0xb40] ss:$16 sps:$4 sm:$0xff]  }
 0x2b9   :  { %3623 = vmatpush1.bf16.msra.mxu0 %v22745_v45  ;;  %3663 = vmatprep.subr.bf16.mxu1 %v22777_v12  ;;  %v22817_v45 = vld [vmem:[%s32830_s2 + $0xb00] ss:$16 sps:$4 sm:$0xff]  }
 0x2ba   :  { %3624 = vmatprep.subr.bf16.mxu0 %v22750_v37  ;;  %v22825_v37 = vld [vmem:[%s32830_s2 + $0x9ec] ss:$16 sps:$4 sm:$0xff]  }
 0x2bb   :  { %22266 = vmatmul.mubr.msk.bf16.vlgmr.msra.gmra.mxu1 %vm149_vm0, %v26580_v30  ;;  %v22753_v30 = vld [vmem:[%s32830_s2 + $0xae4] ss:$16 sps:$4 sm:$0xff]  }
 0x2bc   :  { %3695 = vmatprep.mubr.bf16.mxu1 %v25357_v2  ;;  %3664 = vmatpush1.bf16.msra.mxu1 %v22775_v27 }
 0x2bd   :  { %3625 = vmatpush1.bf16.msra.mxu0 %v22748_v6  ;;  %3665 = vmatprep.subr.bf16.mxu1 %v22783_v46 }
 0x2be   :  { %3626 = vmatprep.subr.bf16.mxu0 %v22753_v30 }
 0x2c0   :  { %3666 = vmatpush1.bf16.msra.mxu1 %v22781_v26 }
 0x2c1   :  { %3627 = vmatpush2.bf16.msra.mxu0 %v22751_v50  ;;  %3667 = vmatprep.subr.bf16.mxu1 %v22789_v25 }
 0x2c2   :  { %3628 = vmatprep.subr.bf16.mxu0 %v22756_v40 }
 0x2c4   :  { %3668 = vmatpush1.bf16.msra.mxu1 %v22787_v36 }
 0x2c5   :  { %3629 = vmatpush2.bf16.msra.mxu0 %v22754_v44  ;;  %3669 = vmatprep.subr.bf16.mxu1 %v22795_v38 }
 0x2c6   :  { %3630 = vmatprep.subr.bf16.mxu0 %v22759_v48 }
 0x2c8   :  { %3670 = vmatpush1.bf16.msra.mxu1 %v22793_v16 }
 0x2c9   :  { %3631 = vmatpush2.bf16.msra.mxu0 %v22757_v56  ;;  %3671 = vmatprep.subr.bf16.mxu1 %v22801_v62 }
 0x2ca   :  { %3632 = vmatprep.subr.bf16.mxu0 %v22762_v59 }
 0x2cc   :  { %3672 = vmatpush1.bf16.msra.mxu1 %v22799_v7 }
 0x2cd   :  { %3633 = vmatpush2.bf16.msra.mxu0 %v22760_v43  ;;  %3673 = vmatprep.subr.bf16.mxu1 %v22807_v29 }
 0x2ce   :  { %3634 = vmatprep.subr.bf16.mxu0 %v22765_v63 }
 0x2d0   :  { %3674 = vmatpush1.bf16.msra.mxu1 %v22805_v17 }
 0x2d1   :  { %3635 = vmatpush2.bf16.msra.mxu0 %v22763_v3  ;;  %3675 = vmatprep.subr.bf16.mxu1 %v22813_v41 }
 0x2d2   :  { %3636 = vmatprep.subr.bf16.mxu0 %v22768_v42 }
 0x2d4   :  { %3676 = vmatpush1.bf16.msra.mxu1 %v22811_v57 }
 0x2d5   :  { %3637 = vmatpush2.bf16.msra.mxu0 %v22766_v9  ;;  %3677 = vmatprep.subr.bf16.mxu1 %v22819_v28 }
 0x2d6   :  { %3638 = vmatprep.subr.bf16.mxu0 %v22771_v33 }
 0x2d8   :  { %3678 = vmatpush1.bf16.msra.mxu1 %v22817_v45 }
 0x2d9   :  { %3639 = vmatpush2.bf16.msra.mxu0 %v22769_v15  ;;  %3716 = vmatprep.subr.bf16.mxu1 %v22825_v37 }
 0x2da   :  { %3640 = vmatprep.subr.bf16.mxu0 %v22774_v35 }
 0x2dd   :  { %3641 = vmatpush2.bf16.msra.mxu0 %v22772_v52 }
 0x2de   :  { %3769 = vmatprep.subr.bf16.mxu0 %v22780_v22 }
 0x30d   :  { %v2710_v6 = vpop.f32.mrf.mxu0 }
 0x30f   :  { %v2712_v30 = vpop.f32.mrf.mxu0 }
 0x311   :  { %v2714_v50 = vpop.f32.mrf.mxu0 }
 0x313   :  { %v26805_v40 = vpop.f32.mrf.mxu0 }
 0x315   :  { %v2720_v27 = vpop.f32.mrf.mxu0 }
 0x317   :  { %v2722_v12 = vpop.f32.mrf.mxu0 }
 0x319   :  { %v2724_v44 = vpop.f32.mrf.mxu0 }
 0x31b   :  { %v26807_v48 = vpop.f32.mrf.mxu0 }
 0x32b   :  { %v2763_v56 = vpop.f32.mrf.mxu1 }
 0x32c   :  { %v2764_v26 = vadd.f32 %v2763_v56, %v2710_v6 }
 0x32d   :  { %v26809_v46 = vpop.f32.mrf.mxu0  ;;  %v2765_v59 = vpop.f32.mrf.mxu1 }
 0x32e   :  { %v26812_v43 = vadd.f32 %v2764_v26, %v26390_v61  ;;  %v2766_v63 = vadd.f32 %v2765_v59, %v2712_v30  ;;  %v22790_v26 = vld [vmem:[%s32830_s2 + $0xba8] ss:$16 sps:$4 sm:$0xff]   ;;  %v22798_v59 = vld [vmem:[%s32830_s2 + $0xb8c] ss:$16 sps:$4 sm:$0xff]  }
 0x32f   :  { %v26814_v3 = vpop.f32.mrf.mxu0  ;;  %v2767_v42 = vpop.f32.mrf.mxu1 }
 0x330   :  { %v26817_v9 = vadd.f32 %v2766_v63, %v26393_v1  ;;  %v2768_v33 = vadd.f32 %v2767_v42, %v2714_v50 }
 0x331   :  { %v26819_v15 = vpop.f32.mrf.mxu0  ;;  %v26821_v35 = vpop.f32.mrf.mxu1 }
 0x332   :  { %v26824_v52 = vadd.f32 %v2768_v33, %v26400_v5 }
 0x333   :  { %v26826_v22 = vpop.f32.mrf.mxu0  ;;  %v2773_v25 = vpop.f32.mrf.mxu1 }
 0x334   :  { %v2774_v61 = vadd.f32 %v2773_v25, %v2720_v27  ;;  %v22784_v27 = vld [vmem:[%s32830_s2 + $0xbc8] ss:$16 sps:$4 sm:$0xff]  }
 0x335   :  { %v26828_v36 = vpop.f32.mrf.mxu0  ;;  %v2775_v38 = vpop.f32.mrf.mxu1  ;;  %v22796_v25 = vld [vmem:[%s32830_s2 + $0xb88] ss:$16 sps:$4 sm:$0xff]  }
 0x336   :  { %v26831_v16 = vadd.f32 %v2774_v61, %v26403_v19  ;;  %v2776_v1 = vadd.f32 %v2775_v38, %v2722_v12  ;;  %v22778_v19 = vld [vmem:[%s32830_s2 + $0xbe8] ss:$16 sps:$4 sm:$0xff]   ;;  %v22792_v12 = vld [vmem:[%s32830_s2 + $0xbac] ss:$16 sps:$4 sm:$0xff]  }
 0x337   :  { %v26833_v62 = vpop.f32.mrf.mxu0  ;;  %v2777_v7 = vpop.f32.mrf.mxu1  ;;  %v22804_v61 = vld [vmem:[%s32830_s2 + $0xb6c] ss:$16 sps:$4 sm:$0xff]   ;;  %v22802_v38 = vld [vmem:[%s32830_s2 + $0xb68] ss:$16 sps:$4 sm:$0xff]  }
 0x338   :  { %v26836_v29 = vadd.f32 %v2776_v1, %v26406_v21  ;;  %v2778_v17 = vadd.f32 %v2777_v7, %v2724_v44  ;;  %v22786_v21 = vld [vmem:[%s32830_s2 + $0xbcc] ss:$16 sps:$4 sm:$0xff]   ;;  %v22808_v7 = vld [vmem:[%s32830_s2 + $0xb48] ss:$16 sps:$4 sm:$0xff]  }
 0x339   :  { %v26838_v5 = vpop.f32.mrf.mxu0  ;;  %v22810_v1 = vld [vmem:[%s32830_s2 + $0xb4c] ss:$16 sps:$4 sm:$0xff]  }
 0x33a   :  { %v26841_v41 = vadd.f32 %v2778_v17, %v26409_v23  ;;  %v22816_v17 = vld [vmem:[%s32830_s2 + $0xb2c] ss:$16 sps:$4 sm:$0xff]  }
 0x33b   :  { %v26843_v57 = vpop.f32.mrf.mxu0 }
 0x33d   :  { %v2959_v28 = vpop.f32.mrf.mxu0 }
 0x33f   :  { %v2961_v45 = vpop.f32.mrf.mxu0 }
 0x341   :  { %v2963_v37 = vpop.f32.mrf.mxu0 }
 0x342   :  { %v26848_v6 = vpack.c.bf16 %v2963_v37, %v2959_v28  ;;  %v22814_v28 = vld [vmem:[%s32830_s2 + $0xb28] ss:$16 sps:$4 sm:$0xff]  }
 0x343   :  { %v2965_v30 = vpop.f32.mrf.mxu0  ;;  %v22820_v37 = vld [vmem:[%s32830_s2 + $0xb08] ss:$16 sps:$4 sm:$0xff]  }
 0x344   :  { %v26853_v50 = vpack.c.bf16 %v2965_v30, %v2961_v45  ;;  %v22822_v45 = vld [vmem:[%s32830_s2 + $0xb0c] ss:$16 sps:$4 sm:$0xff]  }
 0x345   :  { %v2969_v23 = vpop.f32.mrf.mxu0 }
 0x346   :  { %3642 = vmatprep.mubr.bf16.mxu0 %v26853_v50 }
 0x347   :  { %3643 = vmatmul.mubr.bf16.vlgmr.msra.gmra.mxu0 %v26848_v6  ;;  %v2971_v44 = vpop.f32.mrf.mxu0 }
 0x348   :  { %3770 = vmatpush1.bf16.msra.mxu0 %v22778_v19  ;;  %v26903_v19 = vpop.f32.mrf.mxu1 }
 0x349   :  { %3771 = vmatprep.subr.bf16.mxu0 %v22786_v21  ;;  %v2973_v56 = vpop.f32.mrf.mxu0 }
 0x34a   :  { %v26869_v63 = vpack.c.bf16 %v2973_v56, %v2969_v23 }
 0x34b   :  { %v2975_v42 = vpop.f32.mrf.mxu0 }
 0x34c   :  { %3772 = vmatpush1.bf16.msra.mxu0 %v22784_v27  ;;  %v26871_v33 = vpack.c.bf16 %v2975_v42, %v2971_v44 }
 0x34d   :  { %3773 = vmatprep.subr.bf16.mxu0 %v22792_v12 }
 0x34e   :  { %3652 = vmatprep.mubr.bf16.mxu0 %v26871_v33 }
 0x34f   :  { %3653 = vmatmul.mubr.bf16.gmra.mxu0 %v26869_v63 }
 0x350   :  { %3774 = vmatpush1.bf16.msra.mxu0 %v22790_v26  ;;  %3801 = vmatprep.mubr.bf16.mxu0 %v25357_v2 }
 0x351   :  { %3775 = vmatprep.subr.bf16.mxu0 %v22798_v59 }
 0x354   :  { %3776 = vmatpush1.bf16.msra.mxu0 %v22796_v25 }
 0x355   :  { %3777 = vmatprep.subr.bf16.mxu0 %v22804_v61 }
 0x358   :  { %3778 = vmatpush1.bf16.msra.mxu0 %v22802_v38 }
 0x359   :  { %3779 = vmatprep.subr.bf16.mxu0 %v22810_v1 }
 0x35c   :  { %3780 = vmatpush1.bf16.msra.mxu0 %v22808_v7 }
 0x35d   :  { %3781 = vmatprep.subr.bf16.mxu0 %v22816_v17 }
 0x360   :  { %3782 = vmatpush1.bf16.msra.mxu0 %v22814_v28 }
 0x361   :  { %3783 = vmatprep.subr.bf16.mxu0 %v22822_v45 }
 0x364   :  { %3784 = vmatpush1.bf16.msra.mxu0 %v22820_v37 }
 0x36b   :  { %v2816_v30 = vpop.f32.mrf.mxu1 }
 0x36c   :  { %v2870_v21 = vadd.f32 %v26809_v46, %v2816_v30 }
 0x36d   :  { %v2818_v23 = vpop.f32.mrf.mxu1 }
 0x36e   :  { %v26907_v27 = vadd.f32 %v2870_v21, %v26452_v8  ;;  %v2872_v12 = vadd.f32 %v26814_v3, %v2818_v23 }
 0x36f   :  { %v2820_v44 = vpop.f32.mrf.mxu1 }
 0x370   :  { %21 = vsyncpa [#allocation3], 0  ;;  %v26911_v56 = vadd.f32 %v2872_v12, %v26460_v13  ;;  %v2874_v26 = vadd.f32 %v26819_v15, %v2820_v44  ;;  %v22829_v45 = vld [vmem:[%s32830_s2 + $0x9a8] ss:$16 sps:$4 sm:$0xff]   ;;  %v22834_v30 = vld [vmem:[%s32830_s2 + $0x98c] ss:$16 sps:$4 sm:$0xff]  }
 0x371   :  { %v26914_v59 = vpop.f32.mrf.mxu1  ;;  %v22832_v21 = vld [vmem:[%s32830_s2 + $0x988] ss:$16 sps:$4 sm:$0xff]   ;;  %v22837_v23 = vld [vmem:[%s32830_s2 + $0x96c] ss:$16 sps:$4 sm:$0xff]   ;;  %vm3939_vm9 = vcmask 261120   ;;  %s25358_s17 = smov [#allocation2]  }
 0x372   :  { %v26917_v42 = vadd.f32 %v2874_v26, %v26468_v20  ;;  %v22835_v12 = vld [vmem:[%s32830_s2 + $0x968] ss:$16 sps:$4 sm:$0xff]   ;;  %v22840_v44 = vld [vmem:[%s32830_s2 + $0x94c] ss:$16 sps:$4 sm:$0xff]  }
 0x373   :  { %v2826_v25 = vpop.f32.mrf.mxu1  ;;  %v22843_v26 = vld [vmem:[%s32830_s2 + $0x92c] ss:$16 sps:$4 sm:$0xff]  }
 0x374   :  { %v2880_v46 = vadd.f32 %v26828_v36, %v2826_v25  ;;  %v22841_v25 = vld [vmem:[%s32830_s2 + $0x928] ss:$16 sps:$4 sm:$0xff]  }
 0x375   :  { %v2828_v61 = vpop.f32.mrf.mxu1 }
 0x376   :  { %v26921_v8 = vadd.f32 %v2880_v46, %v26477_v60  ;;  %v2882_v3 = vadd.f32 %v26833_v62, %v2828_v61  ;;  %v22823_v60 = vld [vmem:[%s32830_s2 + $0x9e8] ss:$16 sps:$4 sm:$0xff]   ;;  %v22846_v46 = vld [vmem:[%s32830_s2 + $0x90c] ss:$16 sps:$4 sm:$0xff]  }
 0x377   :  { %v2830_v38 = vpop.f32.mrf.mxu1  ;;  %v22844_v61 = vld [vmem:[%s32830_s2 + $0x908] ss:$16 sps:$4 sm:$0xff]  }
 0x378   :  { %v26925_v13 = vadd.f32 %v2882_v3, %v26483_v0  ;;  %v2884_v15 = vadd.f32 %v26838_v5, %v2830_v38  ;;  %v22828_v0 = vld [vmem:[%s32830_s2 + $0x9cc] ss:$16 sps:$4 sm:$0xff]   ;;  %v22847_v38 = vld [vmem:[%s32830_s2 + $0xae8] ss:$16 sps:$4 sm:$0xff]  }
 0x379   :  { %v26928_v1 = vpop.f32.mrf.mxu1  ;;  %v22831_v5 = vld [vmem:[%s32830_s2 + $0x9ac] ss:$16 sps:$4 sm:$0xff]  }
 0x37a   :  { %v26931_v20 = vadd.f32 %v2884_v15, %v26491_v34  ;;  %v22826_v34 = vld [vmem:[%s32830_s2 + $0x9c8] ss:$16 sps:$4 sm:$0xff]   ;;  %v22849_v3 = vld [vmem:[%s32830_s2 + $0xaec] ss:$16 sps:$4 sm:$0xff]  }
 0x37b   :  { %v22267_v7 = vpop.f32.mrf.mxu1  ;;  %v22852_v15 = vld [vmem:[%s32830_s2 + $0xacc] ss:$16 sps:$4 sm:$0xff]  }
 0x37d   :  { %v3012_v17 = vpop.f32.mrf.mxu1 }
 0x37f   :  { %v22268_v36 = vpop.f32.mrf.mxu1 }
 0x380   :  { %v3032_v37 = vpack.c.bf16 %v22268_v36, %v22267_v7  ;;  %v22850_v7 = vld [vmem:[%s32830_s2 + $0xac8] ss:$16 sps:$4 sm:$0xff]  }
 0x381   :  { %v3015_v28 = vpop.f32.mrf.mxu1  ;;  %v22853_v36 = vld [vmem:[%s32830_s2 + $0xaa8] ss:$16 sps:$4 sm:$0xff]  }
 0x382   :  { %v3029_v62 = vpack.c.bf16 %v3015_v28, %v3012_v17  ;;  %v22855_v17 = vld [vmem:[%s32830_s2 + $0xaac] ss:$16 sps:$4 sm:$0xff]  }
 0x383   :  { %v22858_v28 = vld [vmem:[%s32830_s2 + $0xa8c] ss:$16 sps:$4 sm:$0xff]  }
 0x384   :  { %3696 = vmatmul.mubr.bf16.vlgmr.msra.gmra.mxu1 %v3029_v62  ;;  %3802 = vmatmul.mubr.bf16.vlgmr.msra.gmra.mxu0 %v3029_v62  ;;  %v22861_v62 = vld [vmem:[%s32830_s2 + $0xa6c] ss:$16 sps:$4 sm:$0xff]  }
 0x385   :  { %3717 = vmatpush1.bf16.msra.mxu1 %v22823_v60  ;;  %3705 = vmatprep.mubr.bf16.mxu1 %v25357_v2  ;;  %v22856_v60 = vld [vmem:[%s32830_s2 + $0xa88] ss:$16 sps:$4 sm:$0xff]  }
 0x386   :  { %3718 = vmatprep.subr.bf16.mxu1 %v22828_v0  ;;  %3811 = vmatprep.mubr.bf16.mxu0 %v25357_v2  ;;  %v22859_v0 = vld [vmem:[%s32830_s2 + $0xa68] ss:$16 sps:$4 sm:$0xff]  }
 0x389   :  { %3719 = vmatpush1.bf16.msra.mxu1 %v22826_v34  ;;  %v22864_v34 = vld [vmem:[%s32830_s2 + $0xa4c] ss:$16 sps:$4 sm:$0xff]  }
 0x38a   :  { %3720 = vmatprep.subr.bf16.mxu1 %v22831_v5  ;;  %v22862_v5 = vld [vmem:[%s32830_s2 + $0xa48] ss:$16 sps:$4 sm:$0xff]  }
 0x38c   :  { %3706 = vmatmul.mubr.bf16.gmra.mxu1 %v3032_v37  ;;  %3812 = vmatmul.mubr.bf16.gmra.mxu0 %v3032_v37  ;;  %v22865_v37 = vld [vmem:[%s32830_s2 + $0xa28] ss:$16 sps:$4 sm:$0xff]  }
 0x38d   :  { %3721 = vmatpush1.bf16.msra.mxu1 %v22829_v45  ;;  %3748 = vmatprep.mubr.bf16.mxu1 %v26853_v50  ;;  %v22838_v50 = vld [vmem:[%s32830_s2 + $0x948] ss:$16 sps:$4 sm:$0xff]   ;;  %v22867_v45 = vld [vmem:[%s32830_s2 + $0xa2c] ss:$16 sps:$4 sm:$0xff]  }
 0x38e   :  { %3722 = vmatprep.subr.bf16.mxu1 %v22834_v30  ;;  %3975 = vmatprep.mubr.bf16.mxu0 %v25357_v2  ;;  %v22870_v30 = vld [vmem:[%s32830_s2 + $0xa0c] ss:$16 sps:$4 sm:$0xff]  }
 0x391   :  { %3723 = vmatpush1.bf16.msra.mxu1 %v22832_v21  ;;  %v22868_v21 = vld [vmem:[%s32830_s2 + $0xa08] ss:$16 sps:$4 sm:$0xff]  }
 0x392   :  { %3724 = vmatprep.subr.bf16.mxu1 %v22837_v23 }
 0x395   :  { %3725 = vmatpush1.bf16.msra.mxu1 %v22835_v12  ;;  %v3840_v12 = vlaneseq }
 0x396   :  { %3726 = vmatprep.subr.bf16.mxu1 %v22840_v44 }
 0x399   :  { %3727 = vmatpush1.bf16.msra.mxu1 %v22838_v50  ;;  %v27034_v50 = vshrl.u32 %v3840_v12, 7 }
 0x39a   :  { %3728 = vmatprep.subr.bf16.mxu1 %v22843_v26 }
 0x39d   :  { %3729 = vmatpush1.bf16.msra.mxu1 %v22841_v25  ;;  %v27037_v25 = vsub.s32 0, %v27034_v50 }
 0x39e   :  { %3730 = vmatprep.subr.bf16.mxu1 %v22846_v46  ;;  %v27042_v46 = vld [vmem:[%s32831_s3] sm:$0xf] }
 0x3a1   :  { %3731 = vmatpush1.bf16.msra.mxu1 %v22844_v61 }
 0x3a2   :  { %3732 = vmatprep.subr.bf16.mxu1 %v22849_v3  ;;  %v1160_v3 = vadd.f32 %v26277_v53, %v26279_v54 }
 0x3a5   :  { %3733 = vmatpush2.bf16.msra.mxu1 %v22847_v38 }
 0x3a6   :  { %3734 = vmatprep.subr.bf16.mxu1 %v22852_v15 }
 0x3a9   :  { %3735 = vmatpush2.bf16.msra.mxu1 %v22850_v7 }
 0x3aa   :  { %3736 = vmatprep.subr.bf16.mxu1 %v22855_v17  ;;  %v1799_v17 = vadd.f32 %v26398_v4, %v1160_v3 }
 0x3ac   :  { %v1852_v53 = vadd.f32 %v26396_v11, %v1799_v17  ;;  %v2780_v11 = vadd.f32 %v26903_v19, %v26807_v48 }
 0x3ad   :  { %3737 = vmatpush2.bf16.msra.mxu1 %v22853_v36 }
 0x3ae   :  { %3738 = vmatprep.subr.bf16.mxu1 %v22858_v28 }
 0x3b1   :  { %3739 = vmatpush2.bf16.msra.mxu1 %v22856_v60 }
 0x3b2   :  { %3740 = vmatprep.subr.bf16.mxu1 %v22861_v62  ;;  %v2770_v62 = vadd.f32 %v26821_v35, %v26805_v40  ;;  %v27058_v40 = vsub.s32 1, %v27034_v50 }
 0x3b5   :  { %3741 = vmatpush2.bf16.msra.mxu1 %v22859_v0 }
 0x3b6   :  { %3742 = vmatprep.subr.bf16.mxu1 %v22864_v34 }
 0x3b9   :  { %3743 = vmatpush2.bf16.msra.mxu1 %v22862_v5 }
 0x3ba   :  { %3744 = vmatprep.subr.bf16.mxu1 %v22867_v45  ;;  %v1170_v45 = vadd.f32 %v26367_v14, %v26356_v10 }
 0x3bd   :  { %3745 = vmatpush2.bf16.msra.mxu1 %v22865_v37 }
 0x3be   :  { %3746 = vmatprep.subr.bf16.mxu1 %v22870_v30 }
 0x3c1   :  { %3747 = vmatpush2.bf16.msra.mxu1 %v22868_v21  ;;  %v1809_v21 = vadd.f32 %v26411_v24, %v1170_v45 }
 0x3c4   :  { %3749 = vmatmul.mubr.bf16.vlgmr.msra.gmra.mxu1 %v26848_v6 }
 0x3c5   :  { %3758 = vmatprep.mubr.bf16.mxu1 %v26871_v33 }
 0x3cc   :  { %3759 = vmatmul.mubr.bf16.gmra.mxu1 %v26869_v63  ;;  %v3843_v63 = vrot.slane %v27042_v46, %v27037_v25 }
 0x3cd   :  { %4018 = vmatprep.mubr.bf16.mxu1 %v25357_v2 }
 0x407   :  { %v3644_v23 = vpop.f32.mrf.mxu0 }
 0x409   :  { %v3646_v44 = vpop.f32.mrf.mxu0 }
 0x40b   :  { %v3648_v26 = vpop.f32.mrf.mxu0 }
 0x40d   :  { %v3650_v6 = vpop.f32.mrf.mxu0 }
 0x40f   :  { %v3654_v15 = vpop.f32.mrf.mxu0 }
 0x411   :  { %v3656_v34 = vpop.f32.mrf.mxu0 }
 0x444   :  { %v3697_v33 = vpop.f32.mrf.mxu1 }
 0x445   :  { %v3698_v61 = vadd.f32 %v3697_v33, %v3644_v23  ;;  %v2893_v23 = vadd.f32 %v2770_v62, %v1852_v53 }
 0x446   :  { %v3699_v38 = vpop.f32.mrf.mxu1 }
 0x447   :  { %v3822_v7 = vadd.f32 %v3698_v61, %v26812_v43  ;;  %v3700_v12 = vadd.f32 %v3699_v38, %v3646_v44 }
 0x448   :  { %v3701_v36 = vpop.f32.mrf.mxu1 }
 0x449   :  { %v3860_v28 = vadd.f32 %v3843_v63, %v3822_v7  ;;  %v3702_v60 = vadd.f32 %v3701_v36, %v3648_v26  ;;  %v3823_v7 = vadd.f32 %v3700_v12, %v26817_v9 }
 0x44a   :  { %v3703_v0 = vpop.f32.mrf.mxu1 }
 0x44b   :  { %v3826_v5 = vadd.f32 %v3702_v60, %v26824_v52  ;;  %v3892_v54 = vmul.f32 0.2, %v3860_v28  ;;  %v3704_v37 = vadd.f32 %v3703_v0, %v3650_v6  ;;  %vm3876_vm1 = vcmp.ge.f32.partialorder %v3860_v28, 0.0  ;;  %v3658_v52 = vpop.f32.mrf.mxu0 }
 0x44c   :  { %v3707_v43 = vpop.f32.mrf.mxu1 }
 0x44d   :  { %v3864_v4 = vadd.f32 %v3843_v63, %v3826_v5  ;;  %v3708_v30 = vadd.f32 %v3707_v43, %v3654_v15  ;;  %v3827_v6 = vadd.f32 %v3704_v37, %v2893_v23  ;;  %v3908_v61 = vsel %vm3876_vm1, %v3860_v28, %v3892_v54  ;;  %v3660_v48 = vpop.f32.mrf.mxu0 }
 0x44e   :  { %v3709_v35 = vpop.f32.mrf.mxu1  ;;  %v1862_v15 = vadd.f32 %v26435_v49, %v1809_v21 }
 0x44f   :  { %vm3880_vm2 = vcmp.ge.f32.partialorder %v3864_v4, 0.0  ;;  %v3896_v26 = vmul.f32 0.2, %v3864_v4  ;;  %v3830_v10 = vadd.f32 %v3708_v30, %v26831_v16  ;;  %v3710_v14 = vadd.f32 %v3709_v35, %v3656_v34 }
 0x450   :  { %v3711_v33 = vpop.f32.mrf.mxu1  ;;  %v3847_v16 = vrot.slane %v27042_v46, %v27058_v40  ;;  %v2901_v60 = vadd.f32 %v2780_v11, %v1862_v15  ;;  %v22873_v11 = vld [vmem:[%s32833_s5 + $0x4e0] ss:$16 sps:$4 sm:$0xff]   ;;  %v22887_v15 = vld [vmem:[%s32833_s5 + $0x464] ss:$16 sps:$4 sm:$0xff]  }
 0x451   :  { %v3868_v24 = vadd.f32 %v3843_v63, %v3830_v10  ;;  %v3831_v44 = vadd.f32 %v3710_v14, %v26836_v29  ;;  %v3712_v3 = vadd.f32 %v3711_v33, %v3658_v52  ;;  %v3912_v38 = vsel %vm3880_vm2, %v3864_v4, %v3896_v26  ;;  %v27084_v26 = vld [vmem:[%s32832_s4] sm:$0xff]   ;;  %v27099_v14 = vld [vmem:[%s32832_s4 + $0x8] sm:$0xff]  }
 0x452   :  { %v3713_v17 = vpop.f32.mrf.mxu1  ;;  %v27069_v36 = vpack.c.bf16 %v3912_v38, %v3908_v61  ;;  %v3865_v28 = vadd.f32 %v3847_v16, %v3827_v6  ;;  %v3861_v5 = vadd.f32 %v3847_v16, %v3823_v7  ;;  %v22875_v10 = vld [vmem:[%s32833_s5 + $0x4e4] ss:$16 sps:$4 sm:$0xff]   ;;  %v22876_v33 = vld [vmem:[%s32833_s5 + $0x4c0] ss:$16 sps:$4 sm:$0xff]  }
 0x453   :  { %v3834_v19 = vadd.f32 %v3712_v3, %v26841_v41  ;;  %v3869_v62 = vadd.f32 %v3847_v16, %v3831_v44  ;;  %v3714_v0 = vadd.f32 %v3713_v17, %v3660_v48  ;;  %v3900_v29 = vmul.f32 0.2, %v3868_v24  ;;  %v22878_v6 = vld [vmem:[%s32833_s5 + $0x4c4] ss:$16 sps:$4 sm:$0xff]   ;;  %v3803_v3 = vpop.f32.mrf.mxu0  ;;  %v22882_v38 = vld [vmem:[%s32833_s5 + $0x480] ss:$16 sps:$4 sm:$0xff]  }
 0x454   :  { %vm3884_vm3 = vcmp.ge.f32.partialorder %v3868_v24, 0.0  ;;  %v3897_v45 = vmul.f32 0.2, %v3865_v28  ;;  %vm3881_vm5 = vcmp.ge.f32.partialorder %v3865_v28, 0.0  ;;  %v3893_v4 = vmul.f32 0.2, %v3861_v5 }
 0x455   :  { %v3872_v34 = vadd.f32 %v3843_v63, %v3834_v19  ;;  %v3835_v49 = vadd.f32 %v3714_v0, %v2901_v60  ;;  %v3901_v53 = vmul.f32 0.2, %v3869_v62  ;;  %vm3885_vm6 = vcmp.ge.f32.partialorder %v3869_v62, 0.0  ;;  %v22881_v61 = vld [vmem:[%s32833_s5 + $0x4a4] ss:$16 sps:$4 sm:$0xff]   ;;  %v3805_v7 = vpop.f32.mrf.mxu0 }
 0x456   :  { %v3916_v37 = vsel %vm3884_vm3, %v3868_v24, %v3900_v29  ;;  %vm3877_vm8 = vcmp.ge.f32.partialorder %v3861_v5, 0.0  ;;  %v3913_v23 = vsel %vm3881_vm5, %v3865_v28, %v3897_v45  ;;  %v22879_v24 = vld [vmem:[%s32833_s5 + $0x4a0] ss:$16 sps:$4 sm:$0xff]   ;;  %v22884_v44 = vld [vmem:[%s32833_s5 + $0x484] ss:$16 sps:$4 sm:$0xff]   ;;  %v27138_v60 = vsub.s32 2, %v27034_v50 }
 0x457   :  { %vm3888_vm4 = vcmp.ge.f32.partialorder %v3872_v34, 0.0  ;;  %v3904_v9 = vmul.f32 0.2, %v3872_v34  ;;  %v3873_v54 = vadd.f32 %v3847_v16, %v3835_v49  ;;  %v3917_v21 = vsel %vm3885_vm6, %v3869_v62, %v3901_v53  ;;  %v22885_v16 = vld [vmem:[%s32833_s5 + $0x460] ss:$16 sps:$4 sm:$0xff]   ;;  %v3807_v48 = vpop.f32.mrf.mxu0 }
 0x458   :  { %v3909_v35 = vsel %vm3877_vm8, %v3861_v5, %v3893_v4  ;;  %v22890_v17 = vld [vmem:[%s32833_s5 + $0x444] ss:$16 sps:$4 sm:$0xff]   ;;  %v22888_v19 = vld [vmem:[%s32833_s5 + $0x440] ss:$16 sps:$4 sm:$0xff]   ;;  %v27148_v5 = vrot.slane %v27042_v46, %v27138_v60  ;;  %vm8174_vm6 = vcmask 130048  }
 0x459   :  { %v3920_v43 = vsel %vm3888_vm4, %v3872_v34, %v3904_v9  ;;  %vm3889_vm7 = vcmp.ge.f32.partialorder %v3873_v54, 0.0  ;;  %v3905_v41 = vmul.f32 0.2, %v3873_v54  ;;  %v27077_v52 = vpack.c.bf16 %v3913_v23, %v3909_v35  ;;  %v22893_v28 = vld [vmem:[%s32833_s5 + $0x424] ss:$16 sps:$4 sm:$0xff]   ;;  %v3809_v62 = vpop.f32.mrf.mxu0 }
 0x45a   :  { %v27072_v30 = vpack.c.bf16 %v3920_v43, %v3916_v37  ;;  %v22891_v29 = vld [vmem:[%s32833_s5 + $0x420] ss:$16 sps:$4 sm:$0xff]   ;;  %v22896_v49 = vld [vmem:[%s32833_s5 + $0x404] ss:$16 sps:$4 sm:$0xff]   ;;  %v1266_v9 = vadd.f32 %v26369_v18, %v26377_v39  ;;  %v2876_v39 = vadd.f32 %v26826_v22, %v26914_v59  ;;  %v1276_v23 = vadd.f32 %v26387_v55, %v26385_v51 }
 0x45b   :  { %v3921_v63 = vsel %vm3889_vm7, %v3873_v54, %v3905_v41  ;;  %v3813_v53 = vpop.f32.mrf.mxu0  ;;  %v22894_v4 = vld [vmem:[%s32833_s5 + $0x400] ss:$16 sps:$4 sm:$0xff]   ;;  %v22899_v18 = vld [vmem:[%s32833_s5 + $0x5e4] ss:$16 sps:$4 sm:$0xff]  }
 0x45c   :  { %v27074_v12 = vpack.c.bf16 %v3921_v63, %v3917_v21  ;;  %v1905_v37 = vadd.f32 %v26463_v47, %v1266_v9  ;;  %v1915_v51 = vadd.f32 %v26486_v32, %v1276_v23  ;;  %v22900_v32 = vld [vmem:[%s32833_s5 + $0x5c0] ss:$16 sps:$4 sm:$0xff]  }
 0x45d   :  { %v3815_v63 = vpop.f32.mrf.mxu0 }
 0x45e   :  { %3955 = vmatprep.subr.bf16.mxu0 %v27074_v12  ;;  %v1958_v35 = vadd.f32 %v26413_v58, %v1905_v37 }
 0x45f   :  { %3956 = vmatpush1.bf16.msra.mxu0 %v27072_v30 }
 0x460   :  { %3957 = vmatprep.subr.bf16.mxu0 %v27077_v52  ;;  %v2895_v55 = vadd.f32 %v2876_v39, %v1958_v35  ;;  %v22906_v39 = vld [vmem:[%s32833_s5 + $0x580] ss:$16 sps:$4 sm:$0xff]  }
 0x463   :  { %3958 = vmatpush1.bf16.msra.mxu0 %v27069_v36 }
 0x464   :  { %4184 = vmatprep.subr.bf16.mxu0 %v27074_v12 }
 0x466   :  { %18947 = vmatmul.mubr.msk.bf16.vlgmr.msra.gmra.mxu0 %vm3939_vm9, %v27084_v26 }
 0x467   :  { %4185 = vmatpush1.bf16.msra.mxu0 %v27072_v30  ;;  %4204 = vmatprep.mubr.bf16.mxu0 %v25357_v2 }
 0x468   :  { %4186 = vmatprep.subr.bf16.mxu0 %v27077_v52 }
 0x46b   :  { %4187 = vmatpush1.bf16.msra.mxu0 %v27069_v36 }
 0x46c   :  { %5031 = vmatprep.subr.bf16.mxu0 %v22875_v10 }
 0x46e   :  { %18952 = vmatmul.mubr.msk.bf16.vlgmr.msra.gmra.mxu0 %vm3939_vm9, %v27099_v14 }
 0x46f   :  { %5032 = vmatpush1.bf16.msra.mxu0 %v22873_v11 }
 0x470   :  { %5033 = vmatprep.subr.bf16.mxu0 %v22878_v6 }
 0x473   :  { %5034 = vmatpush1.bf16.msra.mxu0 %v22876_v33  ;;  %v22897_v33 = vld [vmem:[%s32833_s5 + $0x5e0] ss:$16 sps:$4 sm:$0xff]  }
 0x474   :  { %5035 = vmatprep.subr.bf16.mxu0 %v22881_v61  ;;  %v27179_v61 = vsub.s32 3, %v27034_v50 }
 0x477   :  { %5036 = vmatpush1.bf16.msra.mxu0 %v22879_v24 }
 0x478   :  { %5037 = vmatprep.subr.bf16.mxu0 %v22884_v44  ;;  %v3817_v44 = vpop.f32.mrf.mxu0 }
 0x47b   :  { %5038 = vmatpush1.bf16.msra.mxu0 %v22882_v38 }
 0x47c   :  { %5039 = vmatprep.subr.bf16.mxu0 %v22887_v15 }
 0x47f   :  { %5040 = vmatpush1.bf16.msra.mxu0 %v22885_v16  ;;  %v2886_v16 = vadd.f32 %v26843_v57, %v26928_v1  ;;  %v22905_v57 = vld [vmem:[%s32833_s5 + $0x5a4] ss:$16 sps:$4 sm:$0xff]  }
 0x480   :  { %5041 = vmatprep.subr.bf16.mxu0 %v22890_v17 }
 0x483   :  { %5042 = vmatpush1.bf16.msra.mxu0 %v22888_v19 }
 0x484   :  { %v3750_v0 = vpop.f32.mrf.mxu1  ;;  %5043 = vmatprep.subr.bf16.mxu0 %v22893_v28 }
 0x485   :  { %v3804_v34 = vadd.f32 %v3803_v3, %v3750_v0  ;;  %v3855_v0 = vrot.slane %v27042_v46, %v27179_v61  ;;  %v22908_v46 = vld [vmem:[%s32833_s5 + $0x584] ss:$16 sps:$4 sm:$0xff]  }
 0x486   :  { %v3752_v45 = vpop.f32.mrf.mxu1 }
 0x487   :  { %v3824_v54 = vadd.f32 %v3804_v34, %v26907_v27  ;;  %5044 = vmatpush1.bf16.msra.mxu0 %v22891_v29  ;;  %v3806_v58 = vadd.f32 %v3805_v7, %v3752_v45 }
 0x488   :  { %v3754_v43 = vpop.f32.mrf.mxu1  ;;  %5045 = vmatprep.subr.bf16.mxu0 %v22896_v49  ;;  %v3819_v49 = vpop.f32.mrf.mxu0 }
 0x489   :  { %v3862_v41 = vadd.f32 %v27148_v5, %v3824_v54  ;;  %v3808_v21 = vadd.f32 %v3807_v48, %v3754_v43  ;;  %v3825_v1 = vadd.f32 %v3806_v58, %v26911_v56  ;;  %v22917_v58 = vld [vmem:[%s32833_s5 + $0x524] ss:$16 sps:$4 sm:$0xff]  }
 0x48a   :  { %v3756_v27 = vpop.f32.mrf.mxu1 }
 0x48b   :  { %v3828_v47 = vadd.f32 %v3808_v21, %v26917_v42  ;;  %v3894_v10 = vmul.f32 0.2, %v3862_v41  ;;  %v3810_v11 = vadd.f32 %v3809_v62, %v3756_v27  ;;  %5046 = vmatpush1.bf16.msra.mxu0 %v22894_v4  ;;  %vm3878_vm10 = vcmp.ge.f32.partialorder %v3862_v41, 0.0  ;;  %v22902_v42 = vld [vmem:[%s32833_s5 + $0x5c4] ss:$16 sps:$4 sm:$0xff]  }
 0x48c   :  { %v3760_v6 = vpop.f32.mrf.mxu1  ;;  %5047 = vmatprep.subr.bf16.mxu0 %v22899_v18  ;;  %v3863_v43 = vadd.f32 %v3855_v0, %v3825_v1  ;;  %v22963_v1 = vld [vmem:[%s32833_s5 + $0x600] ss:$16 sps:$4 sm:$0xff]  }
 0x48d   :  { %v3866_v22 = vadd.f32 %v27148_v5, %v3828_v47  ;;  %v3814_v59 = vadd.f32 %v3813_v53, %v3760_v6  ;;  %v3829_v17 = vadd.f32 %v3810_v11, %v2895_v55  ;;  %v3910_v19 = vsel %vm3878_vm10, %v3862_v41, %v3894_v10  ;;  %v22915_v55 = vld [vmem:[%s32833_s5 + $0x520] ss:$16 sps:$4 sm:$0xff]  }
 0x48e   :  { %v3762_v24 = vpop.f32.mrf.mxu1  ;;  %vm3879_vm1 = vcmp.ge.f32.partialorder %v3863_v43, 0.0 }
 0x48f   :  { %vm3882_vm11 = vcmp.ge.f32.partialorder %v3866_v22, 0.0  ;;  %v3898_v3 = vmul.f32 0.2, %v3866_v22  ;;  %v3832_v38 = vadd.f32 %v3814_v59, %v26921_v8  ;;  %v3816_v15 = vadd.f32 %v3815_v63, %v3762_v24  ;;  %5048 = vmatpush2.bf16.msra.mxu0 %v22897_v33  ;;  %v22909_v59 = vld [vmem:[%s32833_s5 + $0x560] ss:$16 sps:$4 sm:$0xff]  }
 0x490   :  { %v3764_v48 = vpop.f32.mrf.mxu1  ;;  %5049 = vmatprep.subr.bf16.mxu0 %v22902_v42  ;;  %v1968_v8 = vadd.f32 %v26415_v31, %v1915_v51  ;;  %v3867_v45 = vadd.f32 %v3855_v0, %v3829_v17  ;;  %v22903_v31 = vld [vmem:[%s32833_s5 + $0x5a0] ss:$16 sps:$4 sm:$0xff]   ;;  %v3895_v63 = vmul.f32 0.2, %v3863_v43  ;;  %v22911_v42 = vld [vmem:[%s32833_s5 + $0x564] ss:$16 sps:$4 sm:$0xff]  }
 0x491   :  { %v3870_v50 = vadd.f32 %v27148_v5, %v3832_v38  ;;  %v3833_v7 = vadd.f32 %v3816_v15, %v26925_v13  ;;  %v3818_v28 = vadd.f32 %v3817_v44, %v3764_v48  ;;  %v3914_v62 = vsel %vm3882_vm11, %v3866_v22, %v3898_v3  ;;  %v22914_v51 = vld [vmem:[%s32833_s5 + $0x544] ss:$16 sps:$4 sm:$0xff]   ;;  %v22918_v24 = vld [vmem:[%s32833_s5 + $0x500] ss:$16 sps:$4 sm:$0xff]   ;;  %v22926_v38 = vld [vmem:[%s32833_s5 + $0x4ec] ss:$16 sps:$4 sm:$0xff]  }
 0x492   :  { %v3766_v29 = vpop.f32.mrf.mxu1  ;;  %v27197_v34 = vpack.c.bf16 %v3914_v62, %v3910_v19  ;;  %v2903_v9 = vadd.f32 %v2886_v16, %v1968_v8  ;;  %v3899_v41 = vmul.f32 0.2, %v3867_v45  ;;  %vm3883_vm14 = vcmp.ge.f32.partialorder %v3867_v45, 0.0  ;;  %v22920_v44 = vld [vmem:[%s32833_s5 + $0x504] ss:$16 sps:$4 sm:$0xff]  }
 0x493   :  { %v3836_v13 = vadd.f32 %v3818_v28, %v26931_v20  ;;  %v3871_v53 = vadd.f32 %v3855_v0, %v3833_v7  ;;  %v3820_v54 = vadd.f32 %v3819_v49, %v3766_v29  ;;  %5050 = vmatpush2.bf16.msra.mxu0 %v22900_v32  ;;  %v3902_v37 = vmul.f32 0.2, %v3870_v50  ;;  %v22923_v3 = vld [vmem:[%s32833_s5 + $0x6e4] ss:$16 sps:$4 sm:$0xff]   ;;  %v22927_v15 = vld [vmem:[%s32833_s5 + $0x6c0] ss:$16 sps:$4 sm:$0xff]  }
 0x494   :  { %5051 = vmatprep.subr.bf16.mxu0 %v22905_v57  ;;  %vm3886_vm12 = vcmp.ge.f32.partialorder %v3870_v50, 0.0  ;;  %v3915_v11 = vsel %vm3883_vm14, %v3867_v45, %v3899_v41  ;;  %v3911_v33 = vsel %vm3879_vm1, %v3863_v43, %v3895_v63  ;;  %v22929_v16 = vld [vmem:[%s32833_s5 + $0x6c4] ss:$16 sps:$4 sm:$0xff]   ;;  %v22933_v17 = vld [vmem:[%s32833_s5 + $0x6a0] ss:$16 sps:$4 sm:$0xff]   ;;  %vm12319_vm14 = vcmask 64512  }
 0x495   :  { %v3874_v56 = vadd.f32 %v27148_v5, %v3836_v13  ;;  %v3837_v20 = vadd.f32 %v3820_v54, %v2903_v9  ;;  %v3903_v21 = vmul.f32 0.2, %v3871_v53  ;;  %vm3887_vm15 = vcmp.ge.f32.partialorder %v3871_v53, 0.0  ;;  %v22935_v48 = vld [vmem:[%s32833_s5 + $0x6a4] ss:$16 sps:$4 sm:$0xff]  }
 0x496   :  { %v3918_v5 = vsel %vm3886_vm12, %v3870_v50, %v3902_v37  ;;  %v27215_v22 = vpack.c.bf16 %v3915_v11, %v3911_v33  ;;  %v22939_v19 = vld [vmem:[%s32833_s5 + $0x680] ss:$16 sps:$4 sm:$0xff]   ;;  %v22941_v32 = vld [vmem:[%s32833_s5 + $0x684] ss:$16 sps:$4 sm:$0xff]  }
 0x497   :  { %vm3890_vm13 = vcmp.ge.f32.partialorder %v3874_v56, 0.0  ;;  %v3906_v4 = vmul.f32 0.2, %v3874_v56  ;;  %v3875_v18 = vadd.f32 %v3855_v0, %v3837_v20  ;;  %5052 = vmatpush2.bf16.msra.mxu0 %v22903_v31  ;;  %v3919_v35 = vsel %vm3887_vm15, %v3871_v53, %v3903_v21  ;;  %v22945_v50 = vld [vmem:[%s32833_s5 + $0x660] ss:$16 sps:$4 sm:$0xff]  }
 0x498   :  { %5053 = vmatprep.subr.bf16.mxu0 %v22908_v46  ;;  %v22947_v7 = vld [vmem:[%s32833_s5 + $0x664] ss:$16 sps:$4 sm:$0xff]   ;;  %v22951_v28 = vld [vmem:[%s32833_s5 + $0x640] ss:$16 sps:$4 sm:$0xff]  }
 0x499   :  { %v3922_v27 = vsel %vm3890_vm13, %v3874_v56, %v3906_v4  ;;  %vm3891_vm0 = vcmp.ge.f32.partialorder %v3875_v18, 0.0  ;;  %v3907_v47 = vmul.f32 0.2, %v3875_v18  ;;  %v22953_v62 = vld [vmem:[%s32833_s5 + $0x644] ss:$16 sps:$4 sm:$0xff]   ;;  %vm12323_vm13 = vcmask 1043456  }
 0x49a   :  { %v27210_v23 = vpack.c.bf16 %v3922_v27, %v3918_v5  ;;  %v22957_v57 = vld [vmem:[%s32833_s5 + $0x620] ss:$16 sps:$4 sm:$0xff]   ;;  %v22959_v8 = vld [vmem:[%s32833_s5 + $0x624] ss:$16 sps:$4 sm:$0xff]  }
 0x49b   :  { %v3923_v10 = vsel %vm3891_vm0, %v3875_v18, %v3907_v47  ;;  %5054 = vmatpush2.bf16.msra.mxu0 %v22906_v39  ;;  %v22965_v0 = vld [vmem:[%s32833_s5 + $0x604] ss:$16 sps:$4 sm:$0xff]   ;;  %v22969_v29 = vld [vmem:[%s32833_s5 + $0x7e0] ss:$16 sps:$4 sm:$0xff]   ;;  %v23019_v18 = vld [vmem:[%s32833_s5 + $0x6ec] ss:$16 sps:$4 sm:$0xff]  }
 0x49c   :  { %v27212_v6 = vpack.c.bf16 %v3923_v10, %v3919_v35  ;;  %5055 = vmatprep.subr.bf16.mxu0 %v22911_v42  ;;  %v22971_v49 = vld [vmem:[%s32833_s5 + $0x7e4] ss:$16 sps:$4 sm:$0xff]   ;;  %v22975_v13 = vld [vmem:[%s32833_s5 + $0x7c0] ss:$16 sps:$4 sm:$0xff]  }
 0x49d   :  { %v22977_v9 = vld [vmem:[%s32833_s5 + $0x7c4] ss:$16 sps:$4 sm:$0xff]   ;;  %v22981_v45 = vld [vmem:[%s32833_s5 + $0x7a0] ss:$16 sps:$4 sm:$0xff]  }
 0x49e   :  { %3998 = vmatprep.subr.bf16.mxu1 %v27212_v6  ;;  %v22983_v53 = vld [vmem:[%s32833_s5 + $0x7a4] ss:$16 sps:$4 sm:$0xff]   ;;  %v22987_v54 = vld [vmem:[%s32833_s5 + $0x780] ss:$16 sps:$4 sm:$0xff]  }
 0x49f   :  { %3999 = vmatpush1.bf16.msra.mxu1 %v27210_v23  ;;  %5056 = vmatpush2.bf16.msra.mxu0 %v22909_v59  ;;  %v22989_v31 = vld [vmem:[%s32833_s5 + $0x784] ss:$16 sps:$4 sm:$0xff]   ;;  %v22993_v37 = vld [vmem:[%s32833_s5 + $0x760] ss:$16 sps:$4 sm:$0xff]  }
 0x4a0   :  { %4000 = vmatprep.subr.bf16.mxu1 %v27215_v22  ;;  %5057 = vmatprep.subr.bf16.mxu0 %v22914_v51  ;;  %v22995_v56 = vld [vmem:[%s32833_s5 + $0x764] ss:$16 sps:$4 sm:$0xff]   ;;  %v22999_v43 = vld [vmem:[%s32833_s5 + $0x740] ss:$16 sps:$4 sm:$0xff]   ;;  %v22932_v51 = vld [vmem:[%s32833_s5 + $0x4cc] ss:$16 sps:$4 sm:$0xff]  }
 0x4a1   :  { %v23001_v46 = vld [vmem:[%s32833_s5 + $0x744] ss:$16 sps:$4 sm:$0xff]   ;;  %v23005_v20 = vld [vmem:[%s32833_s5 + $0x720] ss:$16 sps:$4 sm:$0xff]  }
 0x4a2   :  { %v23007_v4 = vld [vmem:[%s32833_s5 + $0x724] ss:$16 sps:$4 sm:$0xff]   ;;  %v23011_v21 = vld [vmem:[%s32833_s5 + $0x700] ss:$16 sps:$4 sm:$0xff]  }
 0x4a3   :  { %4001 = vmatpush1.bf16.msra.mxu1 %v27197_v34  ;;  %v23013_v41 = vld [vmem:[%s32833_s5 + $0x704] ss:$16 sps:$4 sm:$0xff]  }
 0x4a4   :  { %4227 = vmatprep.subr.bf16.mxu1 %v27212_v6 }
 0x4a6   :  { %18948 = vmatmul.mubr.msk.bf16.vlgmr.msra.gmra.mxu1 %vm3939_vm9, %v27084_v26  ;;  %v22912_v26 = vld [vmem:[%s32833_s5 + $0x540] ss:$16 sps:$4 sm:$0xff]  }
 0x4a7   :  { %4228 = vmatpush1.bf16.msra.mxu1 %v27210_v23  ;;  %4247 = vmatprep.mubr.bf16.mxu1 %v25357_v2 }
 0x4a8   :  { %4229 = vmatprep.subr.bf16.mxu1 %v27215_v22  ;;  %5058 = vmatpush2.bf16.msra.mxu0 %v22912_v26  ;;  %v22924_v26 = vld [vmem:[%s32833_s5 + $0x4e8] ss:$16 sps:$4 sm:$0xff]  }
 0x4a9   :  { %5059 = vmatprep.subr.bf16.mxu0 %v22917_v58  ;;  %v22938_v58 = vld [vmem:[%s32833_s5 + $0x4ac] ss:$16 sps:$4 sm:$0xff]  }
 0x4ab   :  { %4230 = vmatpush1.bf16.msra.mxu1 %v27197_v34 }
 0x4ac   :  { %5060 = vmatpush2.bf16.msra.mxu0 %v22915_v55  ;;  %5074 = vmatprep.subr.bf16.mxu1 %v22923_v3  ;;  %v22930_v55 = vld [vmem:[%s32833_s5 + $0x4c8] ss:$16 sps:$4 sm:$0xff]   ;;  %v22950_v3 = vld [vmem:[%s32833_s5 + $0x46c] ss:$16 sps:$4 sm:$0xff]  }
 0x4ad   :  { %5061 = vmatprep.subr.bf16.mxu0 %v22920_v44  ;;  %v22944_v44 = vld [vmem:[%s32833_s5 + $0x48c] ss:$16 sps:$4 sm:$0xff]  }
 0x4ae   :  { %18953 = vmatmul.mubr.msk.bf16.vlgmr.msra.gmra.mxu1 %vm3939_vm9, %v27099_v14  ;;  %v22921_v14 = vld [vmem:[%s32833_s5 + $0x6e0] ss:$16 sps:$4 sm:$0xff]  }
 0x4af   :  { %5075 = vmatpush1.bf16.msra.mxu1 %v22921_v14  ;;  %v22942_v14 = vld [vmem:[%s32833_s5 + $0x488] ss:$16 sps:$4 sm:$0xff]  }
 0x4b0   :  { %5062 = vmatpush2.bf16.msra.mxu0 %v22918_v24  ;;  %5076 = vmatprep.subr.bf16.mxu1 %v22929_v16  ;;  %v22936_v24 = vld [vmem:[%s32833_s5 + $0x4a8] ss:$16 sps:$4 sm:$0xff]  }
 0x4b1   :  { %5117 = vmatprep.subr.bf16.mxu0 %v22926_v38  ;;  %v22948_v38 = vld [vmem:[%s32833_s5 + $0x468] ss:$16 sps:$4 sm:$0xff]  }
 0x4b2   :  { %v22954_v16 = vld [vmem:[%s32833_s5 + $0x448] ss:$16 sps:$4 sm:$0xff]  }
 0x4b3   :  { %5077 = vmatpush1.bf16.msra.mxu1 %v22927_v15  ;;  %v22956_v15 = vld [vmem:[%s32833_s5 + $0x44c] ss:$16 sps:$4 sm:$0xff]  }
 0x4b4   :  { %5078 = vmatprep.subr.bf16.mxu1 %v22935_v48  ;;  %v22960_v48 = vld [vmem:[%s32833_s5 + $0x428] ss:$16 sps:$4 sm:$0xff]  }
 0x4b7   :  { %5079 = vmatpush1.bf16.msra.mxu1 %v22933_v17  ;;  %v22962_v17 = vld [vmem:[%s32833_s5 + $0x42c] ss:$16 sps:$4 sm:$0xff]  }
 0x4b8   :  { %5080 = vmatprep.subr.bf16.mxu1 %v22941_v32  ;;  %v22966_v32 = vld [vmem:[%s32833_s5 + $0x408] ss:$16 sps:$4 sm:$0xff]  }
 0x4bb   :  { %5081 = vmatpush1.bf16.msra.mxu1 %v22939_v19  ;;  %v22968_v19 = vld [vmem:[%s32833_s5 + $0x40c] ss:$16 sps:$4 sm:$0xff]  }
 0x4bc   :  { %5082 = vmatprep.subr.bf16.mxu1 %v22947_v7  ;;  %v22972_v7 = vld [vmem:[%s32833_s5 + $0x5e8] ss:$16 sps:$4 sm:$0xff]  }
 0x4bf   :  { %5083 = vmatpush1.bf16.msra.mxu1 %v22945_v50  ;;  %v22974_v50 = vld [vmem:[%s32833_s5 + $0x5ec] ss:$16 sps:$4 sm:$0xff]  }
 0x4c0   :  { %5084 = vmatprep.subr.bf16.mxu1 %v22953_v62  ;;  %v22978_v62 = vld [vmem:[%s32833_s5 + $0x5c8] ss:$16 sps:$4 sm:$0xff]  }
 0x4c3   :  { %5085 = vmatpush1.bf16.msra.mxu1 %v22951_v28  ;;  %v22980_v28 = vld [vmem:[%s32833_s5 + $0x5cc] ss:$16 sps:$4 sm:$0xff]  }
 0x4c4   :  { %5086 = vmatprep.subr.bf16.mxu1 %v22959_v8  ;;  %v22984_v8 = vld [vmem:[%s32833_s5 + $0x5a8] ss:$16 sps:$4 sm:$0xff]  }
 0x4c7   :  { %5087 = vmatpush1.bf16.msra.mxu1 %v22957_v57  ;;  %v22986_v57 = vld [vmem:[%s32833_s5 + $0x5ac] ss:$16 sps:$4 sm:$0xff]  }
 0x4c8   :  { %5088 = vmatprep.subr.bf16.mxu1 %v22965_v0  ;;  %v22990_v0 = vld [vmem:[%s32833_s5 + $0x588] ss:$16 sps:$4 sm:$0xff]  }
 0x4cb   :  { %5089 = vmatpush1.bf16.msra.mxu1 %v22963_v1  ;;  %v22992_v1 = vld [vmem:[%s32833_s5 + $0x58c] ss:$16 sps:$4 sm:$0xff]  }
 0x4cc   :  { %5090 = vmatprep.subr.bf16.mxu1 %v22971_v49  ;;  %v22996_v49 = vld [vmem:[%s32833_s5 + $0x568] ss:$16 sps:$4 sm:$0xff]  }
 0x4cf   :  { %5091 = vmatpush2.bf16.msra.mxu1 %v22969_v29  ;;  %v22998_v29 = vld [vmem:[%s32833_s5 + $0x56c] ss:$16 sps:$4 sm:$0xff]  }
 0x4d0   :  { %5092 = vmatprep.subr.bf16.mxu1 %v22977_v9  ;;  %v23004_v9 = vld [vmem:[%s32833_s5 + $0x54c] ss:$16 sps:$4 sm:$0xff]  }
 0x4d3   :  { %5093 = vmatpush2.bf16.msra.mxu1 %v22975_v13 }
 0x4d4   :  { %5094 = vmatprep.subr.bf16.mxu1 %v22983_v53  ;;  %v23002_v53 = vld [vmem:[%s32833_s5 + $0x548] ss:$16 sps:$4 sm:$0xff]  }
 0x4d7   :  { %5095 = vmatpush2.bf16.msra.mxu1 %v22981_v45 }
 0x4d8   :  { %5096 = vmatprep.subr.bf16.mxu1 %v22989_v31  ;;  %v23010_v31 = vld [vmem:[%s32833_s5 + $0x52c] ss:$16 sps:$4 sm:$0xff]  }
 0x4db   :  { %5097 = vmatpush2.bf16.msra.mxu1 %v22987_v54 }
 0x4dc   :  { %5098 = vmatprep.subr.bf16.mxu1 %v22995_v56 }
 0x4df   :  { %5099 = vmatpush2.bf16.msra.mxu1 %v22993_v37 }
 0x4e0   :  { %5100 = vmatprep.subr.bf16.mxu1 %v23001_v46  ;;  %v23008_v46 = vld [vmem:[%s32833_s5 + $0x528] ss:$16 sps:$4 sm:$0xff]  }
 0x4e3   :  { %5101 = vmatpush2.bf16.msra.mxu1 %v22999_v43 }
 0x4e4   :  { %5102 = vmatprep.subr.bf16.mxu1 %v23007_v4 }
 0x4e7   :  { %5103 = vmatpush2.bf16.msra.mxu1 %v23005_v20  ;;  %v23016_v20 = vld [vmem:[%s32833_s5 + $0x50c] ss:$16 sps:$4 sm:$0xff]  }
 0x4e8   :  { %5104 = vmatprep.subr.bf16.mxu1 %v23013_v41  ;;  %v23014_v41 = vld [vmem:[%s32833_s5 + $0x508] ss:$16 sps:$4 sm:$0xff]  }
 0x4eb   :  { %5105 = vmatpush2.bf16.msra.mxu1 %v23011_v21 }
 0x4ec   :  { %5160 = vmatprep.subr.bf16.mxu1 %v23019_v18  ;;  %v23022_v18 = vld [vmem:[%s32833_s5 + $0xe4] ss:$16 sps:$4 sm:$0xff]  }
 0x526   :  { %v3977_v39 = vpop.f32.mrf.mxu0 }
 0x528   :  { %v27355_v5 = vpop.f32.mrf.mxu0 }
 0x52a   :  { %v3981_v27 = vpop.f32.mrf.mxu0 }
 0x52b   :  { %v27357_v63 = vpack.c.bf16 %v3981_v27, %v3977_v39 }
 0x52c   :  { %v27359_v47 = vpop.f32.mrf.mxu0 }
 0x52e   :  { %v4206_v35 = vpop.f32.mrf.mxu0 }
 0x530   :  { %v4208_v10 = vpop.f32.mrf.mxu0 }
 0x532   :  { %v4210_v11 = vpop.f32.mrf.mxu0 }
 0x533   :  { %v27361_v33 = vpack.c.bf16 %v4210_v11, %v4206_v35  ;;  %v23017_v35 = vld [vmem:[%s32833_s5 + $0x6e8] ss:$16 sps:$4 sm:$0xff]   ;;  %v23020_v11 = vld [vmem:[%s32833_s5 + $0xe0] ss:$16 sps:$4 sm:$0xff]  }
 0x534   :  { %v4212_v59 = vpop.f32.mrf.mxu0 }
 0x535   :  { %v4259_v42 = vpack.c.bf16 %v4212_v59, %v4208_v10  ;;  %v23025_v59 = vld [vmem:[%s32833_s5 + $0x6cc] ss:$16 sps:$4 sm:$0xff]  }
 0x537   :  { %5063 = vmatprep.mubr.bf16.mxu0 %v4259_v42 }
 0x538   :  { %5064 = vmatmul.mubr.bf16.vlgmr.msra.gmra.mxu0 %v27361_v33 }
 0x539   :  { %5118 = vmatpush1.bf16.msra.mxu0 %v22924_v26  ;;  %5149 = vmatprep.mubr.bf16.mxu0 %v4259_v42  ;;  %v23028_v42 = vld [vmem:[%s32833_s5 + $0xc4] ss:$16 sps:$4 sm:$0xff]   ;;  %v27482_v26 = vpack.c.bf16 %v27359_v47, %v27355_v5  ;;  %v23031_v5 = vld [vmem:[%s32833_s5 + $0x6ac] ss:$16 sps:$4 sm:$0xff]  }
 0x53a   :  { %5119 = vmatprep.subr.bf16.mxu0 %v22932_v51  ;;  %v23023_v51 = vld [vmem:[%s32833_s5 + $0x6c8] ss:$16 sps:$4 sm:$0xff]   ;;  %v23034_v47 = vld [vmem:[%s32833_s5 + $0xa4] ss:$16 sps:$4 sm:$0xff]  }
 0x53d   :  { %5120 = vmatpush1.bf16.msra.mxu0 %v22930_v55  ;;  %v23026_v55 = vld [vmem:[%s32833_s5 + $0xc0] ss:$16 sps:$4 sm:$0xff]  }
 0x53e   :  { %5121 = vmatprep.subr.bf16.mxu0 %v22938_v58  ;;  %v23032_v58 = vld [vmem:[%s32833_s5 + $0xa0] ss:$16 sps:$4 sm:$0xff]  }
 0x541   :  { %5122 = vmatpush1.bf16.msra.mxu0 %v22936_v24  ;;  %v23037_v24 = vld [vmem:[%s32833_s5 + $0x68c] ss:$16 sps:$4 sm:$0xff]  }
 0x542   :  { %5123 = vmatprep.subr.bf16.mxu0 %v22944_v44  ;;  %v23040_v44 = vld [vmem:[%s32833_s5 + $0x84] ss:$16 sps:$4 sm:$0xff]  }
 0x545   :  { %5124 = vmatpush1.bf16.msra.mxu0 %v22942_v14  ;;  %v23035_v14 = vld [vmem:[%s32833_s5 + $0x688] ss:$16 sps:$4 sm:$0xff]  }
 0x546   :  { %5125 = vmatprep.subr.bf16.mxu0 %v22950_v3  ;;  %v23038_v3 = vld [vmem:[%s32833_s5 + $0x80] ss:$16 sps:$4 sm:$0xff]  }
 0x549   :  { %5126 = vmatpush1.bf16.msra.mxu0 %v22948_v38  ;;  %v23043_v38 = vld [vmem:[%s32833_s5 + $0x66c] ss:$16 sps:$4 sm:$0xff]  }
 0x54a   :  { %5127 = vmatprep.subr.bf16.mxu0 %v22956_v15  ;;  %v23046_v15 = vld [vmem:[%s32833_s5 + $0x64] ss:$16 sps:$4 sm:$0xff]  }
 0x54d   :  { %5128 = vmatpush1.bf16.msra.mxu0 %v22954_v16  ;;  %v23041_v16 = vld [vmem:[%s32833_s5 + $0x668] ss:$16 sps:$4 sm:$0xff]  }
 0x54e   :  { %5129 = vmatprep.subr.bf16.mxu0 %v22962_v17  ;;  %v23044_v17 = vld [vmem:[%s32833_s5 + $0x60] ss:$16 sps:$4 sm:$0xff]  }
 0x551   :  { %5130 = vmatpush1.bf16.msra.mxu0 %v22960_v48  ;;  %v23049_v48 = vld [vmem:[%s32833_s5 + $0x64c] ss:$16 sps:$4 sm:$0xff]  }
 0x552   :  { %5131 = vmatprep.subr.bf16.mxu0 %v22968_v19  ;;  %v23052_v19 = vld [vmem:[%s32833_s5 + $0x44] ss:$16 sps:$4 sm:$0xff]  }
 0x555   :  { %5132 = vmatpush1.bf16.msra.mxu0 %v22966_v32  ;;  %v23047_v32 = vld [vmem:[%s32833_s5 + $0x648] ss:$16 sps:$4 sm:$0xff]  }
 0x556   :  { %5133 = vmatprep.subr.bf16.mxu0 %v22974_v50  ;;  %v23050_v50 = vld [vmem:[%s32833_s5 + $0x40] ss:$16 sps:$4 sm:$0xff]  }
 0x559   :  { %5134 = vmatpush2.bf16.msra.mxu0 %v22972_v7  ;;  %v23055_v7 = vld [vmem:[%s32833_s5 + $0x62c] ss:$16 sps:$4 sm:$0xff]  }
 0x55a   :  { %5135 = vmatprep.subr.bf16.mxu0 %v22980_v28  ;;  %v23058_v28 = vld [vmem:[%s32833_s5 + $0x24] ss:$16 sps:$4 sm:$0xff]  }
 0x55d   :  { %5136 = vmatpush2.bf16.msra.mxu0 %v22978_v62  ;;  %v23053_v62 = vld [vmem:[%s32833_s5 + $0x628] ss:$16 sps:$4 sm:$0xff]  }
 0x55e   :  { %5137 = vmatprep.subr.bf16.mxu0 %v22986_v57  ;;  %v23056_v57 = vld [vmem:[%s32833_s5 + $0x20] ss:$16 sps:$4 sm:$0xff]  }
 0x561   :  { %5138 = vmatpush2.bf16.msra.mxu0 %v22984_v8  ;;  %v23061_v8 = vld [vmem:[%s32833_s5 + $0x60c] ss:$16 sps:$4 sm:$0xff]  }
 0x562   :  { %5139 = vmatprep.subr.bf16.mxu0 %v22992_v1  ;;  %v23064_v1 = vld [vmem:[%s32833_s5 + $0x4] ss:$16 sps:$4 sm:$0xff]  }
 0x565   :  { %5140 = vmatpush2.bf16.msra.mxu0 %v22990_v0  ;;  %v23059_v0 = vld [vmem:[%s32833_s5 + $0x608] ss:$16 sps:$4 sm:$0xff]  }
 0x566   :  { %v4020_v13 = vpop.f32.mrf.mxu1  ;;  %5141 = vmatprep.subr.bf16.mxu0 %v22998_v29  ;;  %v23062_v29 = vld [vmem:[%s32833_s5] ss:$16 sps:$4 sm:$0xff]  }
 0x568   :  { %v27442_v45 = vpop.f32.mrf.mxu1 }
 0x569   :  { %5142 = vmatpush2.bf16.msra.mxu0 %v22996_v49  ;;  %v23067_v49 = vld [vmem:[%s32833_s5 + $0x7ec] ss:$16 sps:$4 sm:$0xff]  }
 0x56a   :  { %v4024_v54 = vpop.f32.mrf.mxu1  ;;  %5143 = vmatprep.subr.bf16.mxu0 %v23004_v9  ;;  %v23065_v9 = vld [vmem:[%s32833_s5 + $0x7e8] ss:$16 sps:$4 sm:$0xff]  }
 0x56b   :  { %v27450_v37 = vpack.c.bf16 %v4024_v54, %v4020_v13  ;;  %v23070_v13 = vld [vmem:[%s32833_s5 + $0x1e4] ss:$16 sps:$4 sm:$0xff]   ;;  %v23073_v54 = vld [vmem:[%s32833_s5 + $0x7cc] ss:$16 sps:$4 sm:$0xff]  }
 0x56c   :  { %v27452_v56 = vpop.f32.mrf.mxu1 }
 0x56d   :  { %5144 = vmatpush2.bf16.msra.mxu0 %v23002_v53  ;;  %v23068_v53 = vld [vmem:[%s32833_s5 + $0x1e0] ss:$16 sps:$4 sm:$0xff]  }
 0x56e   :  { %v4249_v43 = vpop.f32.mrf.mxu1  ;;  %5145 = vmatprep.subr.bf16.mxu0 %v23010_v31  ;;  %v23076_v31 = vld [vmem:[%s32833_s5 + $0x1c4] ss:$16 sps:$4 sm:$0xff]  }
 0x570   :  { %v4251_v4 = vpop.f32.mrf.mxu1 }
 0x571   :  { %5146 = vmatpush2.bf16.msra.mxu0 %v23008_v46  ;;  %v23071_v46 = vld [vmem:[%s32833_s5 + $0x7c8] ss:$16 sps:$4 sm:$0xff]  }
 0x572   :  { %v4253_v21 = vpop.f32.mrf.mxu1  ;;  %5147 = vmatprep.subr.bf16.mxu0 %v23016_v20  ;;  %v23079_v20 = vld [vmem:[%s32833_s5 + $0x7ac] ss:$16 sps:$4 sm:$0xff]  }
 0x573   :  { %v27469_v10 = vpack.c.bf16 %v4253_v21, %v4249_v43  ;;  %v23074_v43 = vld [vmem:[%s32833_s5 + $0x1c0] ss:$16 sps:$4 sm:$0xff]  }
 0x574   :  { %v4255_v39 = vpop.f32.mrf.mxu1  ;;  %v23080_v21 = vld [vmem:[%s32833_s5 + $0x1a0] ss:$16 sps:$4 sm:$0xff]  }
 0x575   :  { %v4261_v27 = vpack.c.bf16 %v4255_v39, %v4251_v4  ;;  %5148 = vmatpush2.bf16.msra.mxu0 %v23014_v41  ;;  %v23082_v4 = vld [vmem:[%s32833_s5 + $0x1a4] ss:$16 sps:$4 sm:$0xff]   ;;  %v23077_v41 = vld [vmem:[%s32833_s5 + $0x7a8] ss:$16 sps:$4 sm:$0xff]  }
 0x576   :  { %5843 = vmatprep.subr.bf16.mxu0 %v23022_v18  ;;  %v23085_v18 = vld [vmem:[%s32833_s5 + $0x78c] ss:$16 sps:$4 sm:$0xff]   ;;  %v23088_v39 = vld [vmem:[%s32833_s5 + $0x184] ss:$16 sps:$4 sm:$0xff]  }
 0x577   :  { %5106 = vmatprep.mubr.bf16.mxu1 %v4261_v27 }
 0x578   :  { %5107 = vmatmul.mubr.bf16.vlgmr.msra.gmra.mxu1 %v27469_v10  ;;  %5150 = vmatmul.mubr.bf16.vlgmr.msra.gmra.mxu0 %v27361_v33  ;;  %v23029_v33 = vld [vmem:[%s32833_s5 + $0x6a8] ss:$16 sps:$4 sm:$0xff]  }
 0x579   :  { %5161 = vmatpush1.bf16.msra.mxu1 %v23017_v35  ;;  %5192 = vmatprep.mubr.bf16.mxu1 %v4261_v27  ;;  %v23083_v27 = vld [vmem:[%s32833_s5 + $0x788] ss:$16 sps:$4 sm:$0xff]   ;;  %v23086_v35 = vld [vmem:[%s32833_s5 + $0x180] ss:$16 sps:$4 sm:$0xff]  }
 0x57a   :  { %5844 = vmatpush1.bf16.msra.mxu0 %v23020_v11  ;;  %5875 = vmatprep.mubr.bf16.mxu0 %v27482_v26  ;;  %v23091_v11 = vld [vmem:[%s32833_s5 + $0x76c] ss:$16 sps:$4 sm:$0xff]  }
 0x57b   :  { %5162 = vmatprep.subr.bf16.mxu1 %v23025_v59  ;;  %5845 = vmatprep.subr.bf16.mxu0 %v23028_v42  ;;  %v23094_v59 = vld [vmem:[%s32833_s5 + $0x164] ss:$16 sps:$4 sm:$0xff]   ;;  %v23089_v42 = vld [vmem:[%s32833_s5 + $0x768] ss:$16 sps:$4 sm:$0xff]  }
 0x57d   :  { %5163 = vmatpush1.bf16.msra.mxu1 %v23023_v51  ;;  %v23092_v51 = vld [vmem:[%s32833_s5 + $0x160] ss:$16 sps:$4 sm:$0xff]  }
 0x57e   :  { %5846 = vmatpush1.bf16.msra.mxu0 %v23026_v55  ;;  %5164 = vmatprep.subr.bf16.mxu1 %v23031_v5  ;;  %v23097_v55 = vld [vmem:[%s32833_s5 + $0x74c] ss:$16 sps:$4 sm:$0xff]   ;;  %v23100_v5 = vld [vmem:[%s32833_s5 + $0x144] ss:$16 sps:$4 sm:$0xff]  }
 0x57f   :  { %5847 = vmatprep.subr.bf16.mxu0 %v23034_v47  ;;  %v23095_v47 = vld [vmem:[%s32833_s5 + $0x748] ss:$16 sps:$4 sm:$0xff]  }
 0x581   :  { %5165 = vmatpush1.bf16.msra.mxu1 %v23029_v33  ;;  %v23098_v33 = vld [vmem:[%s32833_s5 + $0x140] ss:$16 sps:$4 sm:$0xff]  }
 0x582   :  { %5848 = vmatpush1.bf16.msra.mxu0 %v23032_v58  ;;  %5166 = vmatprep.subr.bf16.mxu1 %v23037_v24  ;;  %v23103_v58 = vld [vmem:[%s32833_s5 + $0x72c] ss:$16 sps:$4 sm:$0xff]   ;;  %v23106_v24 = vld [vmem:[%s32833_s5 + $0x124] ss:$16 sps:$4 sm:$0xff]  }
 0x583   :  { %5849 = vmatprep.subr.bf16.mxu0 %v23040_v44  ;;  %v23101_v44 = vld [vmem:[%s32833_s5 + $0x728] ss:$16 sps:$4 sm:$0xff]  }
 0x585   :  { %5167 = vmatpush1.bf16.msra.mxu1 %v23035_v14  ;;  %v23104_v14 = vld [vmem:[%s32833_s5 + $0x120] ss:$16 sps:$4 sm:$0xff]  }
 0x586   :  { %5850 = vmatpush1.bf16.msra.mxu0 %v23038_v3  ;;  %5168 = vmatprep.subr.bf16.mxu1 %v23043_v38  ;;  %v23109_v3 = vld [vmem:[%s32833_s5 + $0x70c] ss:$16 sps:$4 sm:$0xff]   ;;  %v23112_v38 = vld [vmem:[%s32833_s5 + $0x104] ss:$16 sps:$4 sm:$0xff]  }
 0x587   :  { %5851 = vmatprep.subr.bf16.mxu0 %v23046_v15  ;;  %v23107_v15 = vld [vmem:[%s32833_s5 + $0x708] ss:$16 sps:$4 sm:$0xff]  }
 0x589   :  { %5169 = vmatpush1.bf16.msra.mxu1 %v23041_v16  ;;  %v23110_v16 = vld [vmem:[%s32833_s5 + $0x100] ss:$16 sps:$4 sm:$0xff]  }
 0x58a   :  { %5852 = vmatpush1.bf16.msra.mxu0 %v23044_v17  ;;  %5170 = vmatprep.subr.bf16.mxu1 %v23049_v48  ;;  %v23115_v17 = vld [vmem:[%s32833_s5 + $0x2e4] ss:$16 sps:$4 sm:$0xff]   ;;  %v23118_v48 = vld [vmem:[%s32833_s5 + $0xec] ss:$16 sps:$4 sm:$0xff]  }
 0x58b   :  { %5853 = vmatprep.subr.bf16.mxu0 %v23052_v19  ;;  %v23113_v19 = vld [vmem:[%s32833_s5 + $0x2e0] ss:$16 sps:$4 sm:$0xff]  }
 0x58d   :  { %5171 = vmatpush1.bf16.msra.mxu1 %v23047_v32  ;;  %v23116_v32 = vld [vmem:[%s32833_s5 + $0xe8] ss:$16 sps:$4 sm:$0xff]  }
 0x58e   :  { %5854 = vmatpush1.bf16.msra.mxu0 %v23050_v50  ;;  %5172 = vmatprep.subr.bf16.mxu1 %v23055_v7  ;;  %v23121_v50 = vld [vmem:[%s32833_s5 + $0x2c4] ss:$16 sps:$4 sm:$0xff]   ;;  %v27678_v7 = vpack.c.bf16 %v27452_v56, %v27442_v45  ;;  %v23122_v45 = vld [vmem:[%s32833_s5 + $0xc8] ss:$16 sps:$4 sm:$0xff]  }
 0x58f   :  { %5855 = vmatprep.subr.bf16.mxu0 %v23058_v28  ;;  %v23124_v28 = vld [vmem:[%s32833_s5 + $0xcc] ss:$16 sps:$4 sm:$0xff]   ;;  %v23127_v56 = vld [vmem:[%s32833_s5 + $0x2a4] ss:$16 sps:$4 sm:$0xff]  }
 0x591   :  { %5173 = vmatpush1.bf16.msra.mxu1 %v23053_v62  ;;  %v23119_v62 = vld [vmem:[%s32833_s5 + $0x2c0] ss:$16 sps:$4 sm:$0xff]  }
 0x592   :  { %5856 = vmatpush1.bf16.msra.mxu0 %v23056_v57  ;;  %5174 = vmatprep.subr.bf16.mxu1 %v23061_v8  ;;  %v23125_v57 = vld [vmem:[%s32833_s5 + $0x2a0] ss:$16 sps:$4 sm:$0xff]   ;;  %v23128_v8 = vld [vmem:[%s32833_s5 + $0xa8] ss:$16 sps:$4 sm:$0xff]  }
 0x593   :  { %5857 = vmatprep.subr.bf16.mxu0 %v23064_v1  ;;  %v23136_v1 = vld [vmem:[%s32833_s5 + $0x8c] ss:$16 sps:$4 sm:$0xff]  }
 0x595   :  { %5175 = vmatpush1.bf16.msra.mxu1 %v23059_v0  ;;  %v23131_v0 = vld [vmem:[%s32833_s5 + $0x280] ss:$16 sps:$4 sm:$0xff]  }
 0x596   :  { %5858 = vmatpush1.bf16.msra.mxu0 %v23062_v29  ;;  %5176 = vmatprep.subr.bf16.mxu1 %v23067_v49  ;;  %v23134_v29 = vld [vmem:[%s32833_s5 + $0x88] ss:$16 sps:$4 sm:$0xff]   ;;  %v23139_v49 = vld [vmem:[%s32833_s5 + $0x264] ss:$16 sps:$4 sm:$0xff]  }
 0x597   :  { %5859 = vmatprep.subr.bf16.mxu0 %v23070_v13  ;;  %v23142_v13 = vld [vmem:[%s32833_s5 + $0x6c] ss:$16 sps:$4 sm:$0xff]  }
 0x599   :  { %5177 = vmatpush2.bf16.msra.mxu1 %v23065_v9  ;;  %v23137_v9 = vld [vmem:[%s32833_s5 + $0x260] ss:$16 sps:$4 sm:$0xff]  }
 0x59a   :  { %5860 = vmatpush2.bf16.msra.mxu0 %v23068_v53  ;;  %5178 = vmatprep.subr.bf16.mxu1 %v23073_v54  ;;  %v23140_v53 = vld [vmem:[%s32833_s5 + $0x68] ss:$16 sps:$4 sm:$0xff]   ;;  %v23145_v54 = vld [vmem:[%s32833_s5 + $0x244] ss:$16 sps:$4 sm:$0xff]  }
 0x59b   :  { %5861 = vmatprep.subr.bf16.mxu0 %v23076_v31  ;;  %v23148_v31 = vld [vmem:[%s32833_s5 + $0x4c] ss:$16 sps:$4 sm:$0xff]  }
 0x59d   :  { %5179 = vmatpush2.bf16.msra.mxu1 %v23071_v46  ;;  %v23143_v46 = vld [vmem:[%s32833_s5 + $0x240] ss:$16 sps:$4 sm:$0xff]  }
 0x59e   :  { %5862 = vmatpush2.bf16.msra.mxu0 %v23074_v43  ;;  %5180 = vmatprep.subr.bf16.mxu1 %v23079_v20  ;;  %v23146_v43 = vld [vmem:[%s32833_s5 + $0x48] ss:$16 sps:$4 sm:$0xff]   ;;  %v23151_v20 = vld [vmem:[%s32833_s5 + $0x224] ss:$16 sps:$4 sm:$0xff]  }
 0x59f   :  { %5863 = vmatprep.subr.bf16.mxu0 %v23082_v4  ;;  %v23154_v4 = vld [vmem:[%s32833_s5 + $0x2c] ss:$16 sps:$4 sm:$0xff]  }
 0x5a1   :  { %5181 = vmatpush2.bf16.msra.mxu1 %v23077_v41  ;;  %v23149_v41 = vld [vmem:[%s32833_s5 + $0x220] ss:$16 sps:$4 sm:$0xff]  }
 0x5a2   :  { %5864 = vmatpush2.bf16.msra.mxu0 %v23080_v21  ;;  %5182 = vmatprep.subr.bf16.mxu1 %v23085_v18  ;;  %v23152_v21 = vld [vmem:[%s32833_s5 + $0x28] ss:$16 sps:$4 sm:$0xff]   ;;  %v23157_v18 = vld [vmem:[%s32833_s5 + $0x204] ss:$16 sps:$4 sm:$0xff]  }
 0x5a3   :  { %5865 = vmatprep.subr.bf16.mxu0 %v23088_v39  ;;  %v23160_v39 = vld [vmem:[%s32833_s5 + $0xc] ss:$16 sps:$4 sm:$0xff]  }
 0x5a5   :  { %5183 = vmatpush2.bf16.msra.mxu1 %v23083_v27  ;;  %v23155_v27 = vld [vmem:[%s32833_s5 + $0x200] ss:$16 sps:$4 sm:$0xff]  }
 0x5a6   :  { %5866 = vmatpush2.bf16.msra.mxu0 %v23086_v35  ;;  %5184 = vmatprep.subr.bf16.mxu1 %v23091_v11  ;;  %v23158_v35 = vld [vmem:[%s32833_s5 + $0x8] ss:$16 sps:$4 sm:$0xff]   ;;  %v23163_v11 = vld [vmem:[%s32833_s5 + $0x3e4] ss:$16 sps:$4 sm:$0xff]  }
 0x5a7   :  { %5867 = vmatprep.subr.bf16.mxu0 %v23094_v59  ;;  %v23166_v59 = vld [vmem:[%s32833_s5 + $0x1ec] ss:$16 sps:$4 sm:$0xff]  }
 0x5a9   :  { %5185 = vmatpush2.bf16.msra.mxu1 %v23089_v42  ;;  %v23161_v42 = vld [vmem:[%s32833_s5 + $0x3e0] ss:$16 sps:$4 sm:$0xff]  }
 0x5aa   :  { %5868 = vmatpush2.bf16.msra.mxu0 %v23092_v51  ;;  %5186 = vmatprep.subr.bf16.mxu1 %v23097_v55  ;;  %v23164_v51 = vld [vmem:[%s32833_s5 + $0x1e8] ss:$16 sps:$4 sm:$0xff]   ;;  %v23169_v55 = vld [vmem:[%s32833_s5 + $0x3c4] ss:$16 sps:$4 sm:$0xff]  }
 0x5ab   :  { %5869 = vmatprep.subr.bf16.mxu0 %v23100_v5  ;;  %v23172_v5 = vld [vmem:[%s32833_s5 + $0x1cc] ss:$16 sps:$4 sm:$0xff]  }
 0x5ad   :  { %5187 = vmatpush2.bf16.msra.mxu1 %v23095_v47  ;;  %v23167_v47 = vld [vmem:[%s32833_s5 + $0x3c0] ss:$16 sps:$4 sm:$0xff]  }
 0x5ae   :  { %5870 = vmatpush2.bf16.msra.mxu0 %v23098_v33  ;;  %5188 = vmatprep.subr.bf16.mxu1 %v23103_v58  ;;  %v23170_v33 = vld [vmem:[%s32833_s5 + $0x1c8] ss:$16 sps:$4 sm:$0xff]   ;;  %v23175_v58 = vld [vmem:[%s32833_s5 + $0x3a4] ss:$16 sps:$4 sm:$0xff]  }
 0x5af   :  { %5871 = vmatprep.subr.bf16.mxu0 %v23106_v24  ;;  %v23178_v24 = vld [vmem:[%s32833_s5 + $0x1ac] ss:$16 sps:$4 sm:$0xff]  }
 0x5b1   :  { %5189 = vmatpush2.bf16.msra.mxu1 %v23101_v44  ;;  %v23173_v44 = vld [vmem:[%s32833_s5 + $0x3a0] ss:$16 sps:$4 sm:$0xff]  }
 0x5b2   :  { %5872 = vmatpush2.bf16.msra.mxu0 %v23104_v14  ;;  %5190 = vmatprep.subr.bf16.mxu1 %v23109_v3  ;;  %v23176_v14 = vld [vmem:[%s32833_s5 + $0x1a8] ss:$16 sps:$4 sm:$0xff]   ;;  %v23181_v3 = vld [vmem:[%s32833_s5 + $0x384] ss:$16 sps:$4 sm:$0xff]  }
 0x5b3   :  { %5873 = vmatprep.subr.bf16.mxu0 %v23112_v38  ;;  %v23184_v38 = vld [vmem:[%s32833_s5 + $0x18c] ss:$16 sps:$4 sm:$0xff]  }
 0x5b5   :  { %5191 = vmatpush2.bf16.msra.mxu1 %v23107_v15  ;;  %v23179_v15 = vld [vmem:[%s32833_s5 + $0x380] ss:$16 sps:$4 sm:$0xff]  }
 0x5b6   :  { %5874 = vmatpush2.bf16.msra.mxu0 %v23110_v16  ;;  %5886 = vmatprep.subr.bf16.mxu1 %v23115_v17  ;;  %v23182_v16 = vld [vmem:[%s32833_s5 + $0x188] ss:$16 sps:$4 sm:$0xff]   ;;  %v23187_v17 = vld [vmem:[%s32833_s5 + $0x364] ss:$16 sps:$4 sm:$0xff]  }
 0x5b7   :  { %5929 = vmatprep.subr.bf16.mxu0 %v23118_v48  ;;  %v23190_v48 = vld [vmem:[%s32833_s5 + $0x16c] ss:$16 sps:$4 sm:$0xff]  }
 0x5b8   :  { %5193 = vmatmul.mubr.bf16.vlgmr.msra.gmra.mxu1 %v27469_v10  ;;  %v23130_v10 = vld [vmem:[%s32833_s5 + $0xac] ss:$16 sps:$4 sm:$0xff]  }
 0x5b9   :  { %5876 = vmatmul.mubr.bf16.vlgmr.msra.gmra.mxu0 %v27357_v63  ;;  %5887 = vmatpush1.bf16.msra.mxu1 %v23113_v19  ;;  %v23185_v19 = vld [vmem:[%s32833_s5 + $0x360] ss:$16 sps:$4 sm:$0xff]  }
 0x5ba   :  { %5918 = vmatprep.mubr.bf16.mxu1 %v27678_v7  ;;  %5930 = vmatpush1.bf16.msra.mxu0 %v23116_v32  ;;  %v23188_v32 = vld [vmem:[%s32833_s5 + $0x168] ss:$16 sps:$4 sm:$0xff]  }
 0x5bb   :  { %5961 = vmatprep.mubr.bf16.mxu0 %v27482_v26  ;;  %5888 = vmatprep.subr.bf16.mxu1 %v23121_v50  ;;  %v23133_v26 = vld [vmem:[%s32833_s5 + $0x284] ss:$16 sps:$4 sm:$0xff]  }
 0x5bc   :  { %5931 = vmatprep.subr.bf16.mxu0 %v23124_v28  ;;  %v23193_v50 = vld [vmem:[%s32833_s5 + $0x344] ss:$16 sps:$4 sm:$0xff]   ;;  %v23196_v28 = vld [vmem:[%s32833_s5 + $0x14c] ss:$16 sps:$4 sm:$0xff]  }
 0x5bd   :  { %5889 = vmatpush1.bf16.msra.mxu1 %v23119_v62  ;;  %v23191_v62 = vld [vmem:[%s32833_s5 + $0x340] ss:$16 sps:$4 sm:$0xff]  }
 0x5be   :  { %5932 = vmatpush1.bf16.msra.mxu0 %v23122_v45  ;;  %5890 = vmatprep.subr.bf16.mxu1 %v23127_v56  ;;  %v23194_v45 = vld [vmem:[%s32833_s5 + $0x148] ss:$16 sps:$4 sm:$0xff]   ;;  %v23199_v56 = vld [vmem:[%s32833_s5 + $0x324] ss:$16 sps:$4 sm:$0xff]  }
 0x5bf   :  { %5933 = vmatprep.subr.bf16.mxu0 %v23130_v10  ;;  %v23202_v10 = vld [vmem:[%s32833_s5 + $0x12c] ss:$16 sps:$4 sm:$0xff]  }
 0x5c1   :  { %5891 = vmatpush1.bf16.msra.mxu1 %v23125_v57  ;;  %v23197_v57 = vld [vmem:[%s32833_s5 + $0x320] ss:$16 sps:$4 sm:$0xff]  }
 0x5c2   :  { %5934 = vmatpush1.bf16.msra.mxu0 %v23128_v8  ;;  %5892 = vmatprep.subr.bf16.mxu1 %v23133_v26  ;;  %v23200_v8 = vld [vmem:[%s32833_s5 + $0x128] ss:$16 sps:$4 sm:$0xff]   ;;  %v23205_v26 = vld [vmem:[%s32833_s5 + $0x304] ss:$16 sps:$4 sm:$0xff]  }
 0x5c3   :  { %5935 = vmatprep.subr.bf16.mxu0 %v23136_v1  ;;  %v23208_v1 = vld [vmem:[%s32833_s5 + $0x10c] ss:$16 sps:$4 sm:$0xff]  }
 0x5c5   :  { %5893 = vmatpush1.bf16.msra.mxu1 %v23131_v0  ;;  %v23203_v0 = vld [vmem:[%s32833_s5 + $0x300] ss:$16 sps:$4 sm:$0xff]  }
 0x5c6   :  { %5936 = vmatpush1.bf16.msra.mxu0 %v23134_v29  ;;  %5894 = vmatprep.subr.bf16.mxu1 %v23139_v49  ;;  %v23206_v29 = vld [vmem:[%s32833_s5 + $0x108] ss:$16 sps:$4 sm:$0xff]   ;;  %v23211_v49 = vld [vmem:[%s32833_s5 + $0x2ec] ss:$16 sps:$4 sm:$0xff]  }
 0x5c7   :  { %5937 = vmatprep.subr.bf16.mxu0 %v23142_v13  ;;  %v23209_v13 = vld [vmem:[%s32833_s5 + $0x2e8] ss:$16 sps:$4 sm:$0xff]  }
 0x5c9   :  { %5895 = vmatpush1.bf16.msra.mxu1 %v23137_v9  ;;  %v23214_v9 = vld [vmem:[%s32833_s5 + $0x2cc] ss:$16 sps:$4 sm:$0xff]  }
 0x5ca   :  { %5938 = vmatpush1.bf16.msra.mxu0 %v23140_v53  ;;  %5896 = vmatprep.subr.bf16.mxu1 %v23145_v54  ;;  %v23212_v53 = vld [vmem:[%s32833_s5 + $0x2c8] ss:$16 sps:$4 sm:$0xff]   ;;  %v23217_v54 = vld [vmem:[%s32833_s5 + $0x2ac] ss:$16 sps:$4 sm:$0xff]  }
 0x5cb   :  { %5939 = vmatprep.subr.bf16.mxu0 %v23148_v31  ;;  %v23221_v31 = vld [vmem:[%s32833_s5 + $0x28c] ss:$16 sps:$4 sm:$0xff]  }
 0x5cd   :  { %5897 = vmatpush1.bf16.msra.mxu1 %v23143_v46  ;;  %v23258_v46 = vld [vmem:[%s32833_s5 + $0x8e0] ss:$16 sps:$4 sm:$0xff]  }
 0x5ce   :  { %5940 = vmatpush1.bf16.msra.mxu0 %v23146_v43  ;;  %5898 = vmatprep.subr.bf16.mxu1 %v23151_v20  ;;  %v23260_v43 = vld [vmem:[%s32833_s5 + $0x8e4] ss:$16 sps:$4 sm:$0xff]   ;;  %v23219_v20 = vld [vmem:[%s32833_s5 + $0x288] ss:$16 sps:$4 sm:$0xff]  }
 0x5cf   :  { %5941 = vmatprep.subr.bf16.mxu0 %v23154_v4  ;;  %v23263_v4 = vld [vmem:[%s32833_s5 + $0x8c4] ss:$16 sps:$4 sm:$0xff]  }
 0x5d1   :  { %5899 = vmatpush1.bf16.msra.mxu1 %v23149_v41  ;;  %v23224_v41 = vld [vmem:[%s32833_s5 + $0x26c] ss:$16 sps:$4 sm:$0xff]  }
 0x5d2   :  { %5942 = vmatpush1.bf16.msra.mxu0 %v23152_v21  ;;  %5900 = vmatprep.subr.bf16.mxu1 %v23157_v18  ;;  %v23261_v21 = vld [vmem:[%s32833_s5 + $0x8c0] ss:$16 sps:$4 sm:$0xff]   ;;  %v23266_v18 = vld [vmem:[%s32833_s5 + $0x8a4] ss:$16 sps:$4 sm:$0xff]  }
 0x5d3   :  { %5943 = vmatprep.subr.bf16.mxu0 %v23160_v39  ;;  %v23222_v39 = vld [vmem:[%s32833_s5 + $0x268] ss:$16 sps:$4 sm:$0xff]  }
 0x5d5   :  { %5901 = vmatpush1.bf16.msra.mxu1 %v23155_v27  ;;  %v23227_v27 = vld [vmem:[%s32833_s5 + $0x24c] ss:$16 sps:$4 sm:$0xff]  }
 0x5d6   :  { %5944 = vmatpush1.bf16.msra.mxu0 %v23158_v35  ;;  %5902 = vmatprep.subr.bf16.mxu1 %v23163_v11  ;;  %v23264_v35 = vld [vmem:[%s32833_s5 + $0x8a0] ss:$16 sps:$4 sm:$0xff]   ;;  %v23269_v11 = vld [vmem:[%s32833_s5 + $0x884] ss:$16 sps:$4 sm:$0xff]  }
 0x5d7   :  { %5945 = vmatprep.subr.bf16.mxu0 %v23166_v59  ;;  %v23225_v59 = vld [vmem:[%s32833_s5 + $0x248] ss:$16 sps:$4 sm:$0xff]  }
 0x5d9   :  { %5903 = vmatpush2.bf16.msra.mxu1 %v23161_v42  ;;  %v23230_v42 = vld [vmem:[%s32833_s5 + $0x22c] ss:$16 sps:$4 sm:$0xff]  }
 0x5da   :  { %5946 = vmatpush2.bf16.msra.mxu0 %v23164_v51  ;;  %5904 = vmatprep.subr.bf16.mxu1 %v23169_v55  ;;  %v23267_v51 = vld [vmem:[%s32833_s5 + $0x880] ss:$16 sps:$4 sm:$0xff]   ;;  %v23272_v55 = vld [vmem:[%s32833_s5 + $0x864] ss:$16 sps:$4 sm:$0xff]  }
 0x5db   :  { %5947 = vmatprep.subr.bf16.mxu0 %v23172_v5  ;;  %v23228_v5 = vld [vmem:[%s32833_s5 + $0x228] ss:$16 sps:$4 sm:$0xff]  }
 0x5dd   :  { %5905 = vmatpush2.bf16.msra.mxu1 %v23167_v47  ;;  %v23233_v47 = vld [vmem:[%s32833_s5 + $0x20c] ss:$16 sps:$4 sm:$0xff]  }
 0x5de   :  { %5948 = vmatpush2.bf16.msra.mxu0 %v23170_v33  ;;  %5906 = vmatprep.subr.bf16.mxu1 %v23175_v58  ;;  %v23270_v33 = vld [vmem:[%s32833_s5 + $0x860] ss:$16 sps:$4 sm:$0xff]   ;;  %v23275_v58 = vld [vmem:[%s32833_s5 + $0x844] ss:$16 sps:$4 sm:$0xff]  }
 0x5df   :  { %5949 = vmatprep.subr.bf16.mxu0 %v23178_v24  ;;  %v23231_v24 = vld [vmem:[%s32833_s5 + $0x208] ss:$16 sps:$4 sm:$0xff]  }
 0x5e1   :  { %5907 = vmatpush2.bf16.msra.mxu1 %v23173_v44  ;;  %v23236_v44 = vld [vmem:[%s32833_s5 + $0x3ec] ss:$16 sps:$4 sm:$0xff]  }
 0x5e2   :  { %5950 = vmatpush2.bf16.msra.mxu0 %v23176_v14  ;;  %5908 = vmatprep.subr.bf16.mxu1 %v23181_v3  ;;  %v23273_v14 = vld [vmem:[%s32833_s5 + $0x840] ss:$16 sps:$4 sm:$0xff]   ;;  %v23278_v3 = vld [vmem:[%s32833_s5 + $0x824] ss:$16 sps:$4 sm:$0xff]  }
 0x5e3   :  { %5951 = vmatprep.subr.bf16.mxu0 %v23184_v38  ;;  %v23234_v38 = vld [vmem:[%s32833_s5 + $0x3e8] ss:$16 sps:$4 sm:$0xff]  }
 0x5e5   :  { %5909 = vmatpush2.bf16.msra.mxu1 %v23179_v15  ;;  %v23239_v15 = vld [vmem:[%s32833_s5 + $0x3cc] ss:$16 sps:$4 sm:$0xff]  }
 0x5e6   :  { %5952 = vmatpush2.bf16.msra.mxu0 %v23182_v16  ;;  %5910 = vmatprep.subr.bf16.mxu1 %v23187_v17  ;;  %v23276_v16 = vld [vmem:[%s32833_s5 + $0x820] ss:$16 sps:$4 sm:$0xff]   ;;  %v23281_v17 = vld [vmem:[%s32833_s5 + $0x804] ss:$16 sps:$4 sm:$0xff]  }
 0x5e7   :  { %5953 = vmatprep.subr.bf16.mxu0 %v23190_v48  ;;  %v23237_v48 = vld [vmem:[%s32833_s5 + $0x3c8] ss:$16 sps:$4 sm:$0xff]  }
 0x5e9   :  { %5911 = vmatpush2.bf16.msra.mxu1 %v23185_v19  ;;  %v23242_v19 = vld [vmem:[%s32833_s5 + $0x3ac] ss:$16 sps:$4 sm:$0xff]  }
 0x5ea   :  { %5954 = vmatpush2.bf16.msra.mxu0 %v23188_v32  ;;  %5912 = vmatprep.subr.bf16.mxu1 %v23193_v50  ;;  %v23279_v32 = vld [vmem:[%s32833_s5 + $0x800] ss:$16 sps:$4 sm:$0xff]   ;;  %v23284_v50 = vld [vmem:[%s32833_s5 + $0x9e4] ss:$16 sps:$4 sm:$0xff]  }
 0x5eb   :  { %5955 = vmatprep.subr.bf16.mxu0 %v23196_v28  ;;  %v23240_v28 = vld [vmem:[%s32833_s5 + $0x3a8] ss:$16 sps:$4 sm:$0xff]  }
 0x5ed   :  { %5913 = vmatpush2.bf16.msra.mxu1 %v23191_v62  ;;  %v23245_v62 = vld [vmem:[%s32833_s5 + $0x38c] ss:$16 sps:$4 sm:$0xff]  }
 0x5ee   :  { %5956 = vmatpush2.bf16.msra.mxu0 %v23194_v45  ;;  %5914 = vmatprep.subr.bf16.mxu1 %v23199_v56  ;;  %v23282_v45 = vld [vmem:[%s32833_s5 + $0x9e0] ss:$16 sps:$4 sm:$0xff]   ;;  %v23287_v56 = vld [vmem:[%s32833_s5 + $0x9c4] ss:$16 sps:$4 sm:$0xff]  }
 0x5ef   :  { %5957 = vmatprep.subr.bf16.mxu0 %v23202_v10  ;;  %v23243_v10 = vld [vmem:[%s32833_s5 + $0x388] ss:$16 sps:$4 sm:$0xff]  }
 0x5f1   :  { %5915 = vmatpush2.bf16.msra.mxu1 %v23197_v57  ;;  %v23248_v57 = vld [vmem:[%s32833_s5 + $0x36c] ss:$16 sps:$4 sm:$0xff]  }
 0x5f2   :  { %5958 = vmatpush2.bf16.msra.mxu0 %v23200_v8  ;;  %5916 = vmatprep.subr.bf16.mxu1 %v23205_v26  ;;  %v23285_v8 = vld [vmem:[%s32833_s5 + $0x9c0] ss:$16 sps:$4 sm:$0xff]   ;;  %v23290_v26 = vld [vmem:[%s32833_s5 + $0x9a4] ss:$16 sps:$4 sm:$0xff]  }
 0x5f3   :  { %5959 = vmatprep.subr.bf16.mxu0 %v23208_v1  ;;  %v23246_v1 = vld [vmem:[%s32833_s5 + $0x368] ss:$16 sps:$4 sm:$0xff]  }
 0x5f5   :  { %5917 = vmatpush2.bf16.msra.mxu1 %v23203_v0  ;;  %v23251_v0 = vld [vmem:[%s32833_s5 + $0x34c] ss:$16 sps:$4 sm:$0xff]  }
 0x5f6   :  { %5960 = vmatpush2.bf16.msra.mxu0 %v23206_v29  ;;  %5972 = vmatprep.subr.bf16.mxu1 %v23211_v49  ;;  %v23288_v29 = vld [vmem:[%s32833_s5 + $0x9a0] ss:$16 sps:$4 sm:$0xff]   ;;  %v23293_v49 = vld [vmem:[%s32833_s5 + $0x984] ss:$16 sps:$4 sm:$0xff]  }
 0x5f7   :  { %6038 = vmatprep.subr.bf16.mxu0 %v27074_v12 }
 0x5f8   :  { %5919 = vmatmul.mubr.bf16.vlgmr.msra.gmra.mxu1 %v27450_v37 }
 0x5f9   :  { %5962 = vmatmul.mubr.bf16.vlgmr.msra.gmra.mxu0 %v27357_v63  ;;  %5973 = vmatpush1.bf16.msra.mxu1 %v23209_v13  ;;  %v23215_v63 = vld [vmem:[%s32833_s5 + $0x2a8] ss:$16 sps:$4 sm:$0xff]  }
 0x5fa   :  { %6004 = vmatprep.mubr.bf16.mxu1 %v27678_v7  ;;  %6039 = vmatpush1.bf16.msra.mxu0 %v27072_v30  ;;  %v27889_v7 = vld [vmem:[%s32832_s4 + $0x10] sm:$0xff]   ;;  %v23249_v13 = vld [vmem:[%s32833_s5 + $0x348] ss:$16 sps:$4 sm:$0xff]  }
 0x5fb   :  { %6040 = vmatprep.subr.bf16.mxu0 %v27077_v52  ;;  %5974 = vmatprep.subr.bf16.mxu1 %v23214_v9  ;;  %v23254_v9 = vld [vmem:[%s32833_s5 + $0x32c] ss:$16 sps:$4 sm:$0xff]  }
 0x5fc   :  { %6058 = vmatprep.mubr.bf16.mxu0 %v25357_v2 }
 0x5fd   :  { %5975 = vmatpush1.bf16.msra.mxu1 %v23212_v53  ;;  %v23291_v53 = vld [vmem:[%s32833_s5 + $0x980] ss:$16 sps:$4 sm:$0xff]  }
 0x5fe   :  { %6041 = vmatpush1.bf16.msra.mxu0 %v27069_v36  ;;  %5976 = vmatprep.subr.bf16.mxu1 %v23217_v54  ;;  %v23252_v54 = vld [vmem:[%s32833_s5 + $0x328] ss:$16 sps:$4 sm:$0xff]  }
 0x5ff   :  { %6885 = vmatprep.subr.bf16.mxu0 %v23260_v43 }
 0x601   :  { %5977 = vmatpush1.bf16.msra.mxu1 %v23215_v63  ;;  %19341 = vmatmul.mubr.msk.bf16.vlgmr.msra.gmra.mxu0 %vm3939_vm9, %v27889_v7  ;;  %v23257_v63 = vld [vmem:[%s32833_s5 + $0x30c] ss:$16 sps:$4 sm:$0xff]  }
 0x602   :  { %5978 = vmatprep.subr.bf16.mxu1 %v23221_v31  ;;  %6886 = vmatpush1.bf16.msra.mxu0 %v23258_v46  ;;  %v23255_v31 = vld [vmem:[%s32833_s5 + $0x308] ss:$16 sps:$4 sm:$0xff]   ;;  %v5065_v46 = vpop.f32.mrf.mxu0 }
 0x603   :  { %6887 = vmatprep.subr.bf16.mxu0 %v23263_v4 }
 0x604   :  { %v5067_v43 = vpop.f32.mrf.mxu0 }
 0x605   :  { %5979 = vmatpush1.bf16.msra.mxu1 %v23219_v20 }
 0x606   :  { %5980 = vmatprep.subr.bf16.mxu1 %v23224_v41  ;;  %6888 = vmatpush1.bf16.msra.mxu0 %v23261_v21  ;;  %v23296_v41 = vld [vmem:[%s32833_s5 + $0x964] ss:$16 sps:$4 sm:$0xff]  }
 0x607   :  { %6889 = vmatprep.subr.bf16.mxu0 %v23266_v18  ;;  %v23294_v18 = vld [vmem:[%s32833_s5 + $0x960] ss:$16 sps:$4 sm:$0xff]  }
 0x609   :  { %5981 = vmatpush1.bf16.msra.mxu1 %v23222_v39 }
 0x60a   :  { %5982 = vmatprep.subr.bf16.mxu1 %v23227_v27  ;;  %6890 = vmatpush1.bf16.msra.mxu0 %v23264_v35 }
 0x60b   :  { %6891 = vmatprep.subr.bf16.mxu0 %v23269_v11  ;;  %v23299_v11 = vld [vmem:[%s32833_s5 + $0x944] ss:$16 sps:$4 sm:$0xff]  }
 0x60d   :  { %5983 = vmatpush1.bf16.msra.mxu1 %v23225_v59  ;;  %v23297_v59 = vld [vmem:[%s32833_s5 + $0x940] ss:$16 sps:$4 sm:$0xff]  }
 0x60e   :  { %5984 = vmatprep.subr.bf16.mxu1 %v23230_v42  ;;  %6892 = vmatpush1.bf16.msra.mxu0 %v23267_v51  ;;  %v23300_v42 = vld [vmem:[%s32833_s5 + $0x920] ss:$16 sps:$4 sm:$0xff]   ;;  %v23302_v51 = vld [vmem:[%s32833_s5 + $0x924] ss:$16 sps:$4 sm:$0xff]  }
 0x60f   :  { %6893 = vmatprep.subr.bf16.mxu0 %v23272_v55  ;;  %v23305_v55 = vld [vmem:[%s32833_s5 + $0x904] ss:$16 sps:$4 sm:$0xff]  }
 0x611   :  { %5985 = vmatpush1.bf16.msra.mxu1 %v23228_v5  ;;  %v23303_v5 = vld [vmem:[%s32833_s5 + $0x900] ss:$16 sps:$4 sm:$0xff]  }
 0x612   :  { %5986 = vmatprep.subr.bf16.mxu1 %v23233_v47  ;;  %6894 = vmatpush1.bf16.msra.mxu0 %v23270_v33  ;;  %v23308_v47 = vld [vmem:[%s32833_s5 + $0xae4] ss:$16 sps:$4 sm:$0xff]   ;;  %v23311_v33 = vld [vmem:[%s32833_s5 + $0x8ec] ss:$16 sps:$4 sm:$0xff]  }
 0x613   :  { %6895 = vmatprep.subr.bf16.mxu0 %v23275_v58  ;;  %v23312_v58 = vld [vmem:[%s32833_s5 + $0xac0] ss:$16 sps:$4 sm:$0xff]  }
 0x615   :  { %5987 = vmatpush1.bf16.msra.mxu1 %v23231_v24  ;;  %v23314_v24 = vld [vmem:[%s32833_s5 + $0xac4] ss:$16 sps:$4 sm:$0xff]  }
 0x616   :  { %5988 = vmatprep.subr.bf16.mxu1 %v23236_v44  ;;  %6896 = vmatpush1.bf16.msra.mxu0 %v23273_v14  ;;  %v23318_v44 = vld [vmem:[%s32833_s5 + $0xaa0] ss:$16 sps:$4 sm:$0xff]   ;;  %v23320_v14 = vld [vmem:[%s32833_s5 + $0xaa4] ss:$16 sps:$4 sm:$0xff]  }
 0x617   :  { %6897 = vmatprep.subr.bf16.mxu0 %v23278_v3  ;;  %v23324_v3 = vld [vmem:[%s32833_s5 + $0xa80] ss:$16 sps:$4 sm:$0xff]  }
 0x619   :  { %5989 = vmatpush2.bf16.msra.mxu1 %v23234_v38  ;;  %v23326_v38 = vld [vmem:[%s32833_s5 + $0xa84] ss:$16 sps:$4 sm:$0xff]  }
 0x61a   :  { %5990 = vmatprep.subr.bf16.mxu1 %v23239_v15  ;;  %6898 = vmatpush1.bf16.msra.mxu0 %v23276_v16  ;;  %v23330_v15 = vld [vmem:[%s32833_s5 + $0xa60] ss:$16 sps:$4 sm:$0xff]   ;;  %v23332_v16 = vld [vmem:[%s32833_s5 + $0xa64] ss:$16 sps:$4 sm:$0xff]  }
 0x61b   :  { %6899 = vmatprep.subr.bf16.mxu0 %v23281_v17  ;;  %v23336_v17 = vld [vmem:[%s32833_s5 + $0xa40] ss:$16 sps:$4 sm:$0xff]  }
 0x61d   :  { %5991 = vmatpush2.bf16.msra.mxu1 %v23237_v48  ;;  %v23338_v48 = vld [vmem:[%s32833_s5 + $0xa44] ss:$16 sps:$4 sm:$0xff]  }
 0x61e   :  { %5992 = vmatprep.subr.bf16.mxu1 %v23242_v19  ;;  %6900 = vmatpush1.bf16.msra.mxu0 %v23279_v32  ;;  %v23342_v19 = vld [vmem:[%s32833_s5 + $0xa20] ss:$16 sps:$4 sm:$0xff]   ;;  %v23344_v32 = vld [vmem:[%s32833_s5 + $0xa24] ss:$16 sps:$4 sm:$0xff]  }
 0x61f   :  { %6901 = vmatprep.subr.bf16.mxu0 %v23284_v50  ;;  %v23348_v50 = vld [vmem:[%s32833_s5 + $0xa00] ss:$16 sps:$4 sm:$0xff]  }
 0x621   :  { %5993 = vmatpush2.bf16.msra.mxu1 %v23240_v28  ;;  %v23350_v28 = vld [vmem:[%s32833_s5 + $0xa04] ss:$16 sps:$4 sm:$0xff]  }
 0x622   :  { %5994 = vmatprep.subr.bf16.mxu1 %v23245_v62  ;;  %6902 = vmatpush2.bf16.msra.mxu0 %v23282_v45  ;;  %v23354_v62 = vld [vmem:[%s32833_s5 + $0xbe0] ss:$16 sps:$4 sm:$0xff]   ;;  %v23356_v45 = vld [vmem:[%s32833_s5 + $0xbe4] ss:$16 sps:$4 sm:$0xff]  }
 0x623   :  { %6903 = vmatprep.subr.bf16.mxu0 %v23287_v56 }
 0x625   :  { %5995 = vmatpush2.bf16.msra.mxu1 %v23243_v10 }
 0x626   :  { %5996 = vmatprep.subr.bf16.mxu1 %v23248_v57  ;;  %6904 = vmatpush2.bf16.msra.mxu0 %v23285_v8  ;;  %v23360_v57 = vld [vmem:[%s32833_s5 + $0xbc0] ss:$16 sps:$4 sm:$0xff]   ;;  %v23362_v8 = vld [vmem:[%s32833_s5 + $0xbc4] ss:$16 sps:$4 sm:$0xff]  }
 0x627   :  { %6905 = vmatprep.subr.bf16.mxu0 %v23290_v26 }
 0x629   :  { %5997 = vmatpush2.bf16.msra.mxu1 %v23246_v1  ;;  %v23366_v1 = vld [vmem:[%s32833_s5 + $0xba0] ss:$16 sps:$4 sm:$0xff]  }
 0x62a   :  { %5998 = vmatprep.subr.bf16.mxu1 %v23251_v0  ;;  %6906 = vmatpush2.bf16.msra.mxu0 %v23288_v29  ;;  %v23368_v0 = vld [vmem:[%s32833_s5 + $0xba4] ss:$16 sps:$4 sm:$0xff]  }
 0x62b   :  { %6907 = vmatprep.subr.bf16.mxu0 %v23293_v49  ;;  %v23372_v49 = vld [vmem:[%s32833_s5 + $0xb80] ss:$16 sps:$4 sm:$0xff]  }
 0x62d   :  { %5999 = vmatpush2.bf16.msra.mxu1 %v23249_v13  ;;  %v23374_v13 = vld [vmem:[%s32833_s5 + $0xb84] ss:$16 sps:$4 sm:$0xff]  }
 0x62e   :  { %6000 = vmatprep.subr.bf16.mxu1 %v23254_v9  ;;  %6908 = vmatpush2.bf16.msra.mxu0 %v23291_v53 }
 0x62f   :  { %6909 = vmatprep.subr.bf16.mxu0 %v23296_v41 }
 0x631   :  { %6001 = vmatpush2.bf16.msra.mxu1 %v23252_v54 }
 0x632   :  { %6002 = vmatprep.subr.bf16.mxu1 %v23257_v63  ;;  %6910 = vmatpush2.bf16.msra.mxu0 %v23294_v18  ;;  %v23380_v63 = vld [vmem:[%s32833_s5 + $0xb64] ss:$16 sps:$4 sm:$0xff]  }
 0x633   :  { %6911 = vmatprep.subr.bf16.mxu0 %v23299_v11  ;;  %v23386_v11 = vld [vmem:[%s32833_s5 + $0xb44] ss:$16 sps:$4 sm:$0xff]  }
 0x635   :  { %6003 = vmatpush2.bf16.msra.mxu1 %v23255_v31 }
 0x636   :  { %6081 = vmatprep.subr.bf16.mxu1 %v27212_v6  ;;  %6912 = vmatpush2.bf16.msra.mxu0 %v23297_v59 }
 0x637   :  { %6913 = vmatprep.subr.bf16.mxu0 %v23302_v51  ;;  %v23384_v51 = vld [vmem:[%s32833_s5 + $0xb40] ss:$16 sps:$4 sm:$0xff]  }
 0x638   :  { %6005 = vmatmul.mubr.bf16.vlgmr.msra.gmra.mxu1 %v27450_v37  ;;  %v5108_v20 = vpop.f32.mrf.mxu1  ;;  %v5069_v37 = vpop.f32.mrf.mxu0 }
 0x639   :  { %v28046_v4 = vadd.f32 %v5108_v20, %v5065_v46  ;;  %6082 = vmatpush1.bf16.msra.mxu1 %v27210_v23  ;;  %6101 = vmatprep.mubr.bf16.mxu1 %v25357_v2 }
 0x63a   :  { %6083 = vmatprep.subr.bf16.mxu1 %v27215_v22  ;;  %v5110_v21 = vpop.f32.mrf.mxu1  ;;  %6914 = vmatpush2.bf16.msra.mxu0 %v23300_v42  ;;  %v28139_v56 = vpop.f32.mrf.mxu0 }
 0x63b   :  { %v28057_v39 = vadd.f32 %v5110_v21, %v5067_v43  ;;  %6915 = vmatprep.subr.bf16.mxu0 %v23305_v55  ;;  %v23378_v43 = vld [vmem:[%s32833_s5 + $0xb60] ss:$16 sps:$4 sm:$0xff]  }
 0x63c   :  { %v5112_v27 = vpop.f32.mrf.mxu1  ;;  %v5151_v10 = vpop.f32.mrf.mxu0  ;;  %v23390_v55 = vld [vmem:[%s32833_s5 + $0xb20] ss:$16 sps:$4 sm:$0xff]  }
 0x63d   :  { %v28059_v35 = vadd.f32 %v5112_v27, %v5069_v37  ;;  %6084 = vmatpush1.bf16.msra.mxu1 %v27197_v34 }
 0x63e   :  { %6916 = vmatpush2.bf16.msra.mxu0 %v23303_v5  ;;  %6928 = vmatprep.subr.bf16.mxu1 %v23308_v47  ;;  %v5153_v26 = vpop.f32.mrf.mxu0  ;;  %v28159_v9 = vpop.f32.mrf.mxu1  ;;  %v23398_v5 = vld [vmem:[%s32833_s5 + $0xb04] ss:$16 sps:$4 sm:$0xff]  }
 0x63f   :  { %6971 = vmatprep.subr.bf16.mxu0 %v23311_v33 }
 0x640   :  { %19342 = vmatmul.mubr.msk.bf16.vlgmr.msra.gmra.mxu1 %vm3939_vm9, %v27889_v7  ;;  %v23306_v7 = vld [vmem:[%s32833_s5 + $0xae0] ss:$16 sps:$4 sm:$0xff]   ;;  %v5155_v29 = vpop.f32.mrf.mxu0 }
 0x641   :  { %6929 = vmatpush1.bf16.msra.mxu1 %v23306_v7  ;;  %v23404_v7 = vld [vmem:[%s32833_s5 + $0xaec] ss:$16 sps:$4 sm:$0xff]  }
 0x642   :  { %6930 = vmatprep.subr.bf16.mxu1 %v23314_v24  ;;  %v28161_v53 = vpop.f32.mrf.mxu0 }
 0x645   :  { %6931 = vmatpush1.bf16.msra.mxu1 %v23312_v58 }
 0x646   :  { %6932 = vmatprep.subr.bf16.mxu1 %v23320_v14 }
 0x649   :  { %6933 = vmatpush1.bf16.msra.mxu1 %v23318_v44 }
 0x64a   :  { %6934 = vmatprep.subr.bf16.mxu1 %v23326_v38 }
 0x64d   :  { %6935 = vmatpush1.bf16.msra.mxu1 %v23324_v3 }
 0x64e   :  { %6936 = vmatprep.subr.bf16.mxu1 %v23332_v16 }
 0x651   :  { %6937 = vmatpush1.bf16.msra.mxu1 %v23330_v15 }
 0x652   :  { %6938 = vmatprep.subr.bf16.mxu1 %v23338_v48 }
 0x655   :  { %6939 = vmatpush1.bf16.msra.mxu1 %v23336_v17 }
 0x656   :  { %6940 = vmatprep.subr.bf16.mxu1 %v23344_v32 }
 0x659   :  { %6941 = vmatpush1.bf16.msra.mxu1 %v23342_v19 }
 0x65a   :  { %6942 = vmatprep.subr.bf16.mxu1 %v23350_v28 }
 0x65d   :  { %6943 = vmatpush1.bf16.msra.mxu1 %v23348_v50 }
 0x65e   :  { %6944 = vmatprep.subr.bf16.mxu1 %v23356_v45 }
 0x661   :  { %6945 = vmatpush2.bf16.msra.mxu1 %v23354_v62 }
 0x662   :  { %6946 = vmatprep.subr.bf16.mxu1 %v23362_v8 }
 0x665   :  { %6947 = vmatpush2.bf16.msra.mxu1 %v23360_v57 }
 0x666   :  { %6948 = vmatprep.subr.bf16.mxu1 %v23368_v0  ;;  %v23315_v0 = vld [vmem:[%s32833_s5 + $0x8c8] ss:$16 sps:$4 sm:$0xff]  }
 0x669   :  { %6949 = vmatpush2.bf16.msra.mxu1 %v23366_v1  ;;  %v23317_v1 = vld [vmem:[%s32833_s5 + $0x8cc] ss:$16 sps:$4 sm:$0xff]  }
 0x66a   :  { %6950 = vmatprep.subr.bf16.mxu1 %v23374_v13  ;;  %v23329_v13 = vld [vmem:[%s32833_s5 + $0x88c] ss:$16 sps:$4 sm:$0xff]  }
 0x66d   :  { %6951 = vmatpush2.bf16.msra.mxu1 %v23372_v49  ;;  %v23321_v49 = vld [vmem:[%s32833_s5 + $0x8a8] ss:$16 sps:$4 sm:$0xff]  }
 0x66e   :  { %6952 = vmatprep.subr.bf16.mxu1 %v23380_v63  ;;  %v23335_v63 = vld [vmem:[%s32833_s5 + $0x86c] ss:$16 sps:$4 sm:$0xff]  }
 0x671   :  { %6953 = vmatpush2.bf16.msra.mxu1 %v23378_v43  ;;  %v23339_v43 = vld [vmem:[%s32833_s5 + $0x848] ss:$16 sps:$4 sm:$0xff]  }
 0x672   :  { %6954 = vmatprep.subr.bf16.mxu1 %v23386_v11  ;;  %v23365_v11 = vld [vmem:[%s32833_s5 + $0x9cc] ss:$16 sps:$4 sm:$0xff]  }
 0x675   :  { %6955 = vmatpush2.bf16.msra.mxu1 %v23384_v51  ;;  %v23369_v51 = vld [vmem:[%s32833_s5 + $0x9a8] ss:$16 sps:$4 sm:$0xff]  }
 0x678   :  { %v5194_v54 = vpop.f32.mrf.mxu1 }
 0x679   :  { %v5195_v31 = vadd.f32 %v5194_v54, %v5151_v10  ;;  %v5877_v46 = vpop.f32.mrf.mxu0  ;;  %v23327_v54 = vld [vmem:[%s32833_s5 + $0x888] ss:$16 sps:$4 sm:$0xff]  }
 0x67a   :  { %v5878_v20 = vadd.f32 %v5877_v46, %v28046_v4  ;;  %v5196_v41 = vpop.f32.mrf.mxu1  ;;  %v23341_v46 = vld [vmem:[%s32833_s5 + $0x84c] ss:$16 sps:$4 sm:$0xff]  }
 0x67b   :  { %v5197_v21 = vadd.f32 %v5196_v41, %v5153_v26  ;;  %v5879_v18 = vpop.f32.mrf.mxu0  ;;  %v23309_v26 = vld [vmem:[%s32833_s5 + $0x8e8] ss:$16 sps:$4 sm:$0xff]  }
 0x67c   :  { %v5880_v37 = vadd.f32 %v5879_v18, %v28057_v39  ;;  %v5198_v27 = vpop.f32.mrf.mxu1  ;;  %v23392_v39 = vld [vmem:[%s32833_s5 + $0xb24] ss:$16 sps:$4 sm:$0xff]   ;;  %v23345_v41 = vld [vmem:[%s32833_s5 + $0x828] ss:$16 sps:$4 sm:$0xff]  }
 0x67d   :  { %v5199_v59 = vadd.f32 %v5198_v27, %v5155_v29  ;;  %v5881_v42 = vpop.f32.mrf.mxu0  ;;  %6956 = vmatprep.subr.bf16.mxu1 %v23392_v39  ;;  %v23323_v29 = vld [vmem:[%s32833_s5 + $0x8ac] ss:$16 sps:$4 sm:$0xff]   ;;  %v23351_v18 = vld [vmem:[%s32833_s5 + $0x808] ss:$16 sps:$4 sm:$0xff]  }
 0x67e   :  { %v5882_v4 = vadd.f32 %v5881_v42, %v28059_v35  ;;  %6957 = vmatpush2.bf16.msra.mxu1 %v23390_v55  ;;  %v23396_v35 = vld [vmem:[%s32833_s5 + $0xb00] ss:$16 sps:$4 sm:$0xff]   ;;  %v28193_v47 = vpop.f32.mrf.mxu1  ;;  %v23357_v27 = vld [vmem:[%s32833_s5 + $0x9e8] ss:$16 sps:$4 sm:$0xff]   ;;  %v23371_v42 = vld [vmem:[%s32833_s5 + $0x9ac] ss:$16 sps:$4 sm:$0xff]  }
 0x67f   :  { %6958 = vmatprep.subr.bf16.mxu1 %v23398_v5  ;;  %v28195_v33 = vpop.f32.mrf.mxu0  ;;  %v23375_v55 = vld [vmem:[%s32833_s5 + $0x988] ss:$16 sps:$4 sm:$0xff]   ;;  %v23383_v39 = vld [vmem:[%s32833_s5 + $0x96c] ss:$16 sps:$4 sm:$0xff]  }
 0x682   :  { %6959 = vmatpush2.bf16.msra.mxu1 %v23396_v35 }
 0x683   :  { %7014 = vmatprep.subr.bf16.mxu1 %v23404_v7  ;;  %v23381_v7 = vld [vmem:[%s32833_s5 + $0x968] ss:$16 sps:$4 sm:$0xff]  }
 0x6b8   :  { %v5920_v58 = vpop.f32.mrf.mxu1 }
 0x6b9   :  { %v28197_v24 = vadd.f32 %v5920_v58, %v5878_v20  ;;  %v5963_v44 = vpop.f32.mrf.mxu0  ;;  %v23347_v20 = vld [vmem:[%s32833_s5 + $0x82c] ss:$16 sps:$4 sm:$0xff]  }
 0x6ba   :  { %v28199_v14 = vadd.f32 %v5963_v44, %v5195_v31  ;;  %v5922_v3 = vpop.f32.mrf.mxu1  ;;  %v23333_v31 = vld [vmem:[%s32833_s5 + $0x868] ss:$16 sps:$4 sm:$0xff]   ;;  %v23389_v44 = vld [vmem:[%s32833_s5 + $0x94c] ss:$16 sps:$4 sm:$0xff]  }
 0x6bb   :  { %v28201_v38 = vadd.f32 %v5922_v3, %v5880_v37  ;;  %v5965_v15 = vpop.f32.mrf.mxu0  ;;  %v23359_v37 = vld [vmem:[%s32833_s5 + $0x9ec] ss:$16 sps:$4 sm:$0xff]  }
 0x6bc   :  { %v28203_v16 = vadd.f32 %v5965_v15, %v5197_v21  ;;  %v5924_v17 = vpop.f32.mrf.mxu1  ;;  %v23353_v21 = vld [vmem:[%s32833_s5 + $0x80c] ss:$16 sps:$4 sm:$0xff]  }
 0x6bd   :  { %v28205_v48 = vadd.f32 %v5924_v17, %v5882_v4  ;;  %v5967_v19 = vpop.f32.mrf.mxu0  ;;  %v23377_v4 = vld [vmem:[%s32833_s5 + $0x98c] ss:$16 sps:$4 sm:$0xff]  }
 0x6be   :  { %v28207_v32 = vadd.f32 %v5967_v19, %v5199_v59  ;;  %v23363_v59 = vld [vmem:[%s32833_s5 + $0x9c8] ss:$16 sps:$4 sm:$0xff]   ;;  %v28286_v5 = vpop.f32.mrf.mxu1 }
 0x6bf   :  { %v28209_v50 = vpop.f32.mrf.mxu0  ;;  %v23387_v19 = vld [vmem:[%s32833_s5 + $0x948] ss:$16 sps:$4 sm:$0xff]  }
 0x6c1   :  { %v6060_v28 = vpop.f32.mrf.mxu0 }
 0x6c3   :  { %v6062_v62 = vpop.f32.mrf.mxu0 }
 0x6c5   :  { %v6064_v45 = vpop.f32.mrf.mxu0 }
 0x6c6   :  { %v28211_v10 = vpack.c.bf16 %v6064_v45, %v6060_v28 }
 0x6c7   :  { %v6066_v57 = vpop.f32.mrf.mxu0 }
 0x6c8   :  { %v6113_v8 = vpack.c.bf16 %v6066_v57, %v6062_v62  ;;  %v23401_v57 = vld [vmem:[%s32833_s5 + $0x90c] ss:$16 sps:$4 sm:$0xff]  }
 0x6ca   :  { %6917 = vmatprep.mubr.bf16.mxu0 %v6113_v8 }
 0x6cb   :  { %6918 = vmatmul.mubr.bf16.vlgmr.msra.gmra.mxu0 %v28211_v10 }
 0x6cc   :  { %6972 = vmatpush1.bf16.msra.mxu0 %v23309_v26  ;;  %7003 = vmatprep.mubr.bf16.mxu0 %v6113_v8  ;;  %v23399_v26 = vld [vmem:[%s32833_s5 + $0x908] ss:$16 sps:$4 sm:$0xff]  }
 0x6cd   :  { %6973 = vmatprep.subr.bf16.mxu0 %v23317_v1 }
 0x6d0   :  { %6974 = vmatpush1.bf16.msra.mxu0 %v23315_v0 }
 0x6d1   :  { %6975 = vmatprep.subr.bf16.mxu0 %v23323_v29  ;;  %v23402_v29 = vld [vmem:[%s32833_s5 + $0xae8] ss:$16 sps:$4 sm:$0xff]  }
 0x6d4   :  { %6976 = vmatpush1.bf16.msra.mxu0 %v23321_v49 }
 0x6d5   :  { %6977 = vmatprep.subr.bf16.mxu0 %v23329_v13  ;;  %v23407_v13 = vld [vmem:[%s32833_s5 + $0xacc] ss:$16 sps:$4 sm:$0xff]  }
 0x6d8   :  { %6978 = vmatpush1.bf16.msra.mxu0 %v23327_v54  ;;  %v23405_v54 = vld [vmem:[%s32833_s5 + $0xac8] ss:$16 sps:$4 sm:$0xff]  }
 0x6d9   :  { %6979 = vmatprep.subr.bf16.mxu0 %v23335_v63  ;;  %v23453_v63 = vld [vmem:[%s32833_s5 + $0xce4] ss:$16 sps:$4 sm:$0xff]  }
 0x6dc   :  { %6980 = vmatpush1.bf16.msra.mxu0 %v23333_v31  ;;  %v23451_v31 = vld [vmem:[%s32833_s5 + $0xce0] ss:$16 sps:$4 sm:$0xff]  }
 0x6dd   :  { %6981 = vmatprep.subr.bf16.mxu0 %v23341_v46  ;;  %v23456_v46 = vld [vmem:[%s32833_s5 + $0xcc4] ss:$16 sps:$4 sm:$0xff]  }
 0x6e0   :  { %6982 = vmatpush1.bf16.msra.mxu0 %v23339_v43  ;;  %v23417_v43 = vld [vmem:[%s32833_s5 + $0xa6c] ss:$16 sps:$4 sm:$0xff]  }
 0x6e1   :  { %6983 = vmatprep.subr.bf16.mxu0 %v23347_v20  ;;  %v23454_v20 = vld [vmem:[%s32833_s5 + $0xcc0] ss:$16 sps:$4 sm:$0xff]  }
 0x6e4   :  { %6984 = vmatpush1.bf16.msra.mxu0 %v23345_v41  ;;  %v23459_v41 = vld [vmem:[%s32833_s5 + $0xca4] ss:$16 sps:$4 sm:$0xff]  }
 0x6e5   :  { %6985 = vmatprep.subr.bf16.mxu0 %v23353_v21  ;;  %v23415_v21 = vld [vmem:[%s32833_s5 + $0xa68] ss:$16 sps:$4 sm:$0xff]  }
 0x6e8   :  { %6986 = vmatpush1.bf16.msra.mxu0 %v23351_v18  ;;  %v23420_v18 = vld [vmem:[%s32833_s5 + $0xa4c] ss:$16 sps:$4 sm:$0xff]  }
 0x6e9   :  { %6987 = vmatprep.subr.bf16.mxu0 %v23359_v37  ;;  %v23457_v37 = vld [vmem:[%s32833_s5 + $0xca0] ss:$16 sps:$4 sm:$0xff]  }
 0x6ec   :  { %6988 = vmatpush2.bf16.msra.mxu0 %v23357_v27  ;;  %v23462_v27 = vld [vmem:[%s32833_s5 + $0xc84] ss:$16 sps:$4 sm:$0xff]  }
 0x6ed   :  { %6989 = vmatprep.subr.bf16.mxu0 %v23365_v11  ;;  %v23418_v11 = vld [vmem:[%s32833_s5 + $0xa48] ss:$16 sps:$4 sm:$0xff]  }
 0x6f0   :  { %6990 = vmatpush2.bf16.msra.mxu0 %v23363_v59  ;;  %v23423_v59 = vld [vmem:[%s32833_s5 + $0xa2c] ss:$16 sps:$4 sm:$0xff]  }
 0x6f1   :  { %6991 = vmatprep.subr.bf16.mxu0 %v23371_v42  ;;  %v23460_v42 = vld [vmem:[%s32833_s5 + $0xc80] ss:$16 sps:$4 sm:$0xff]  }
 0x6f4   :  { %6992 = vmatpush2.bf16.msra.mxu0 %v23369_v51  ;;  %v23465_v51 = vld [vmem:[%s32833_s5 + $0xc64] ss:$16 sps:$4 sm:$0xff]  }
 0x6f5   :  { %6993 = vmatprep.subr.bf16.mxu0 %v23377_v4  ;;  %v23421_v4 = vld [vmem:[%s32833_s5 + $0xa28] ss:$16 sps:$4 sm:$0xff]  }
 0x6f8   :  { %6994 = vmatpush2.bf16.msra.mxu0 %v23375_v55  ;;  %v6006_v35 = vpop.f32.mrf.mxu1  ;;  %v23426_v55 = vld [vmem:[%s32833_s5 + $0xa0c] ss:$16 sps:$4 sm:$0xff]  }
 0x6f9   :  { %v28292_v58 = vadd.f32 %v6006_v35, %v28199_v14  ;;  %6995 = vmatprep.subr.bf16.mxu0 %v23383_v39  ;;  %v23395_v14 = vld [vmem:[%s32833_s5 + $0x92c] ss:$16 sps:$4 sm:$0xff]   ;;  %v23463_v39 = vld [vmem:[%s32833_s5 + $0xc60] ss:$16 sps:$4 sm:$0xff]   ;;  %v23468_v35 = vld [vmem:[%s32833_s5 + $0xc44] ss:$16 sps:$4 sm:$0xff]  }
 0x6fa   :  { %v6008_v3 = vpop.f32.mrf.mxu1 }
 0x6fb   :  { %v28298_v15 = vadd.f32 %v6008_v3, %v28203_v16  ;;  %v23393_v16 = vld [vmem:[%s32833_s5 + $0x928] ss:$16 sps:$4 sm:$0xff]   ;;  %v23466_v3 = vld [vmem:[%s32833_s5 + $0xc40] ss:$16 sps:$4 sm:$0xff]  }
 0x6fc   :  { %6996 = vmatpush2.bf16.msra.mxu0 %v23381_v7  ;;  %v6010_v17 = vpop.f32.mrf.mxu1  ;;  %v23424_v7 = vld [vmem:[%s32833_s5 + $0xa08] ss:$16 sps:$4 sm:$0xff]  }
 0x6fd   :  { %v28304_v28 = vadd.f32 %v6010_v17, %v28207_v32  ;;  %6997 = vmatprep.subr.bf16.mxu0 %v23389_v44  ;;  %v23429_v44 = vld [vmem:[%s32833_s5 + $0xbec] ss:$16 sps:$4 sm:$0xff]   ;;  %v23471_v17 = vld [vmem:[%s32833_s5 + $0xc24] ss:$16 sps:$4 sm:$0xff]  }
 0x6fe   :  { %v28309_v62 = vpop.f32.mrf.mxu1 }
 0x700   :  { %6998 = vmatpush2.bf16.msra.mxu0 %v23387_v19  ;;  %v6103_v45 = vpop.f32.mrf.mxu1  ;;  %v23427_v19 = vld [vmem:[%s32833_s5 + $0xbe8] ss:$16 sps:$4 sm:$0xff]  }
 0x701   :  { %6999 = vmatprep.subr.bf16.mxu0 %v23395_v14  ;;  %v23432_v14 = vld [vmem:[%s32833_s5 + $0xbcc] ss:$16 sps:$4 sm:$0xff]  }
 0x702   :  { %v6105_v32 = vpop.f32.mrf.mxu1 }
 0x704   :  { %7000 = vmatpush2.bf16.msra.mxu0 %v23393_v16  ;;  %v6107_v8 = vpop.f32.mrf.mxu1  ;;  %v23474_v16 = vld [vmem:[%s32833_s5 + $0xc04] ss:$16 sps:$4 sm:$0xff]  }
 0x705   :  { %7001 = vmatprep.subr.bf16.mxu0 %v23401_v57  ;;  %v28323_v49 = vpack.c.bf16 %v6107_v8, %v6103_v45  ;;  %v23469_v45 = vld [vmem:[%s32833_s5 + $0xc20] ss:$16 sps:$4 sm:$0xff]   ;;  %v23430_v57 = vld [vmem:[%s32833_s5 + $0xbc8] ss:$16 sps:$4 sm:$0xff]  }
 0x706   :  { %v6109_v1 = vpop.f32.mrf.mxu1  ;;  %v23472_v8 = vld [vmem:[%s32833_s5 + $0xc00] ss:$16 sps:$4 sm:$0xff]  }
 0x707   :  { %v6115_v0 = vpack.c.bf16 %v6109_v1, %v6105_v32  ;;  %v23435_v32 = vld [vmem:[%s32833_s5 + $0xbac] ss:$16 sps:$4 sm:$0xff]   ;;  %v23433_v1 = vld [vmem:[%s32833_s5 + $0xba8] ss:$16 sps:$4 sm:$0xff]  }
 0x708   :  { %7002 = vmatpush2.bf16.msra.mxu0 %v23399_v26  ;;  %v23477_v26 = vld [vmem:[%s32833_s5 + $0xde4] ss:$16 sps:$4 sm:$0xff]  }
 0x709   :  { %7088 = vmatprep.subr.bf16.mxu0 %v27074_v12  ;;  %6960 = vmatprep.mubr.bf16.mxu1 %v6115_v0  ;;  %v23410_v12 = vld [vmem:[%s32833_s5 + $0xaac] ss:$16 sps:$4 sm:$0xff]  }
 0x70a   :  { %6961 = vmatmul.mubr.bf16.vlgmr.msra.gmra.mxu1 %v28323_v49 }
 0x70b   :  { %7004 = vmatmul.mubr.bf16.vlgmr.msra.gmra.mxu0 %v28211_v10  ;;  %7015 = vmatpush1.bf16.msra.mxu1 %v23402_v29  ;;  %v23408_v10 = vld [vmem:[%s32833_s5 + $0xaa8] ss:$16 sps:$4 sm:$0xff]   ;;  %v23475_v29 = vld [vmem:[%s32833_s5 + $0xde0] ss:$16 sps:$4 sm:$0xff]  }
 0x70c   :  { %7046 = vmatprep.mubr.bf16.mxu1 %v6115_v0  ;;  %7089 = vmatpush1.bf16.msra.mxu0 %v27072_v30  ;;  %v28349_v30 = vld [vmem:[%s32832_s4 + $0x18] sm:$0xff]  }
 0x70d   :  { %7090 = vmatprep.subr.bf16.mxu0 %v27077_v52  ;;  %7016 = vmatprep.subr.bf16.mxu1 %v23407_v13  ;;  %v23414_v52 = vld [vmem:[%s32833_s5 + $0xa8c] ss:$16 sps:$4 sm:$0xff]   ;;  %v23480_v13 = vld [vmem:[%s32833_s5 + $0xdc4] ss:$16 sps:$4 sm:$0xff]  }
 0x70e   :  { %7108 = vmatprep.mubr.bf16.mxu0 %v25357_v2  ;;  %v23438_v0 = vld [vmem:[%s32833_s5 + $0xb8c] ss:$16 sps:$4 sm:$0xff]  }
 0x70f   :  { %7017 = vmatpush1.bf16.msra.mxu1 %v23405_v54  ;;  %v23436_v54 = vld [vmem:[%s32833_s5 + $0xb88] ss:$16 sps:$4 sm:$0xff]  }
 0x710   :  { %7091 = vmatpush1.bf16.msra.mxu0 %v27069_v36  ;;  %7018 = vmatprep.subr.bf16.mxu1 %v23410_v12  ;;  %v23412_v36 = vld [vmem:[%s32833_s5 + $0xa88] ss:$16 sps:$4 sm:$0xff]   ;;  %v23441_v12 = vld [vmem:[%s32833_s5 + $0xb6c] ss:$16 sps:$4 sm:$0xff]  }
 0x711   :  { %7935 = vmatprep.subr.bf16.mxu0 %v23453_v63  ;;  %v23478_v63 = vld [vmem:[%s32833_s5 + $0xdc0] ss:$16 sps:$4 sm:$0xff]  }
 0x713   :  { %7019 = vmatpush1.bf16.msra.mxu1 %v23408_v10  ;;  %19602 = vmatmul.mubr.msk.bf16.vlgmr.msra.gmra.mxu0 %vm3939_vm9, %v28349_v30  ;;  %v23483_v10 = vld [vmem:[%s32833_s5 + $0xda4] ss:$16 sps:$4 sm:$0xff]  }
 0x714   :  { %7020 = vmatprep.subr.bf16.mxu1 %v23414_v52  ;;  %7936 = vmatpush1.bf16.msra.mxu0 %v23451_v31  ;;  %v23439_v52 = vld [vmem:[%s32833_s5 + $0xb68] ss:$16 sps:$4 sm:$0xff]   ;;  %v23444_v31 = vld [vmem:[%s32833_s5 + $0xb4c] ss:$16 sps:$4 sm:$0xff]  }
 0x715   :  { %7937 = vmatprep.subr.bf16.mxu0 %v23456_v46  ;;  %v23481_v46 = vld [vmem:[%s32833_s5 + $0xda0] ss:$16 sps:$4 sm:$0xff]  }
 0x717   :  { %7021 = vmatpush1.bf16.msra.mxu1 %v23412_v36  ;;  %v23486_v36 = vld [vmem:[%s32833_s5 + $0xd84] ss:$16 sps:$4 sm:$0xff]  }
 0x718   :  { %7022 = vmatprep.subr.bf16.mxu1 %v23417_v43  ;;  %7938 = vmatpush1.bf16.msra.mxu0 %v23454_v20  ;;  %v23442_v43 = vld [vmem:[%s32833_s5 + $0xb48] ss:$16 sps:$4 sm:$0xff]   ;;  %v23447_v20 = vld [vmem:[%s32833_s5 + $0xb2c] ss:$16 sps:$4 sm:$0xff]  }
 0x719   :  { %7939 = vmatprep.subr.bf16.mxu0 %v23459_v41  ;;  %v23484_v41 = vld [vmem:[%s32833_s5 + $0xd80] ss:$16 sps:$4 sm:$0xff]  }
 0x71b   :  { %7023 = vmatpush1.bf16.msra.mxu1 %v23415_v21  ;;  %v23445_v21 = vld [vmem:[%s32833_s5 + $0xb28] ss:$16 sps:$4 sm:$0xff]  }
 0x71c   :  { %7024 = vmatprep.subr.bf16.mxu1 %v23420_v18  ;;  %7940 = vmatpush1.bf16.msra.mxu0 %v23457_v37  ;;  %v23450_v18 = vld [vmem:[%s32833_s5 + $0xb0c] ss:$16 sps:$4 sm:$0xff]   ;;  %v23448_v37 = vld [vmem:[%s32833_s5 + $0xb08] ss:$16 sps:$4 sm:$0xff]  }
 0x71d   :  { %7941 = vmatprep.subr.bf16.mxu0 %v23462_v27  ;;  %v23489_v27 = vld [vmem:[%s32833_s5 + $0xd64] ss:$16 sps:$4 sm:$0xff]  }
 0x71f   :  { %7025 = vmatpush1.bf16.msra.mxu1 %v23418_v11  ;;  %v23487_v11 = vld [vmem:[%s32833_s5 + $0xd60] ss:$16 sps:$4 sm:$0xff]  }
 0x720   :  { %7026 = vmatprep.subr.bf16.mxu1 %v23423_v59  ;;  %7942 = vmatpush1.bf16.msra.mxu0 %v23460_v42  ;;  %v23496_v59 = vld [vmem:[%s32833_s5 + $0xd00] ss:$16 sps:$4 sm:$0xff]  }
 0x721   :  { %7943 = vmatprep.subr.bf16.mxu0 %v23465_v51  ;;  %v23499_v42 = vld [vmem:[%s32833_s5 + $0xee0] ss:$16 sps:$4 sm:$0xff]   ;;  %v23504_v51 = vld [vmem:[%s32833_s5 + $0xcec] ss:$16 sps:$4 sm:$0xff]  }
 0x723   :  { %7027 = vmatpush1.bf16.msra.mxu1 %v23421_v4  ;;  %v23505_v4 = vld [vmem:[%s32833_s5 + $0xec0] ss:$16 sps:$4 sm:$0xff]  }
 0x724   :  { %7028 = vmatprep.subr.bf16.mxu1 %v23426_v55  ;;  %7944 = vmatpush1.bf16.msra.mxu0 %v23463_v39  ;;  %v23507_v55 = vld [vmem:[%s32833_s5 + $0xec4] ss:$16 sps:$4 sm:$0xff]   ;;  %v23511_v39 = vld [vmem:[%s32833_s5 + $0xea0] ss:$16 sps:$4 sm:$0xff]  }
 0x725   :  { %7945 = vmatprep.subr.bf16.mxu0 %v23468_v35  ;;  %v23513_v35 = vld [vmem:[%s32833_s5 + $0xea4] ss:$16 sps:$4 sm:$0xff]  }
 0x727   :  { %7029 = vmatpush1.bf16.msra.mxu1 %v23424_v7  ;;  %v23517_v7 = vld [vmem:[%s32833_s5 + $0xe80] ss:$16 sps:$4 sm:$0xff]  }
 0x728   :  { %7030 = vmatprep.subr.bf16.mxu1 %v23429_v44  ;;  %7946 = vmatpush1.bf16.msra.mxu0 %v23466_v3  ;;  %v23519_v44 = vld [vmem:[%s32833_s5 + $0xe84] ss:$16 sps:$4 sm:$0xff]   ;;  %v23523_v3 = vld [vmem:[%s32833_s5 + $0xe60] ss:$16 sps:$4 sm:$0xff]  }
 0x729   :  { %7947 = vmatprep.subr.bf16.mxu0 %v23471_v17  ;;  %v23525_v17 = vld [vmem:[%s32833_s5 + $0xe64] ss:$16 sps:$4 sm:$0xff]  }
 0x72b   :  { %7031 = vmatpush2.bf16.msra.mxu1 %v23427_v19  ;;  %v23529_v19 = vld [vmem:[%s32833_s5 + $0xe40] ss:$16 sps:$4 sm:$0xff]  }
 0x72c   :  { %7032 = vmatprep.subr.bf16.mxu1 %v23432_v14  ;;  %7948 = vmatpush1.bf16.msra.mxu0 %v23469_v45  ;;  %v23531_v14 = vld [vmem:[%s32833_s5 + $0xe44] ss:$16 sps:$4 sm:$0xff]   ;;  %v23535_v45 = vld [vmem:[%s32833_s5 + $0xe20] ss:$16 sps:$4 sm:$0xff]  }
 0x72d   :  { %7949 = vmatprep.subr.bf16.mxu0 %v23474_v16  ;;  %v23537_v16 = vld [vmem:[%s32833_s5 + $0xe24] ss:$16 sps:$4 sm:$0xff]  }
 0x72f   :  { %7033 = vmatpush2.bf16.msra.mxu1 %v23430_v57  ;;  %v23541_v57 = vld [vmem:[%s32833_s5 + $0xe00] ss:$16 sps:$4 sm:$0xff]  }
 0x730   :  { %7034 = vmatprep.subr.bf16.mxu1 %v23435_v32  ;;  %7950 = vmatpush1.bf16.msra.mxu0 %v23472_v8  ;;  %v23543_v32 = vld [vmem:[%s32833_s5 + $0xe04] ss:$16 sps:$4 sm:$0xff]   ;;  %v23547_v8 = vld [vmem:[%s32833_s5 + $0xfe0] ss:$16 sps:$4 sm:$0xff]  }
 0x731   :  { %7951 = vmatprep.subr.bf16.mxu0 %v23477_v26  ;;  %v23549_v26 = vld [vmem:[%s32833_s5 + $0xfe4] ss:$16 sps:$4 sm:$0xff]  }
 0x733   :  { %7035 = vmatpush2.bf16.msra.mxu1 %v23433_v1  ;;  %v23553_v1 = vld [vmem:[%s32833_s5 + $0xfc0] ss:$16 sps:$4 sm:$0xff]  }
 0x734   :  { %7036 = vmatprep.subr.bf16.mxu1 %v23438_v0  ;;  %7952 = vmatpush2.bf16.msra.mxu0 %v23475_v29  ;;  %v23555_v0 = vld [vmem:[%s32833_s5 + $0xfc4] ss:$16 sps:$4 sm:$0xff]   ;;  %v23559_v29 = vld [vmem:[%s32833_s5 + $0xfa0] ss:$16 sps:$4 sm:$0xff]  }
 0x735   :  { %7953 = vmatprep.subr.bf16.mxu0 %v23480_v13  ;;  %v23561_v13 = vld [vmem:[%s32833_s5 + $0xfa4] ss:$16 sps:$4 sm:$0xff]  }
 0x737   :  { %7037 = vmatpush2.bf16.msra.mxu1 %v23436_v54  ;;  %v23565_v54 = vld [vmem:[%s32833_s5 + $0xf80] ss:$16 sps:$4 sm:$0xff]  }
 0x738   :  { %7038 = vmatprep.subr.bf16.mxu1 %v23441_v12  ;;  %7954 = vmatpush2.bf16.msra.mxu0 %v23478_v63  ;;  %v23567_v12 = vld [vmem:[%s32833_s5 + $0xf84] ss:$16 sps:$4 sm:$0xff]  }
 0x739   :  { %7955 = vmatprep.subr.bf16.mxu0 %v23483_v10  ;;  %v23573_v63 = vld [vmem:[%s32833_s5 + $0xf64] ss:$16 sps:$4 sm:$0xff]   ;;  %v23571_v10 = vld [vmem:[%s32833_s5 + $0xf60] ss:$16 sps:$4 sm:$0xff]  }
 0x73b   :  { %7039 = vmatpush2.bf16.msra.mxu1 %v23439_v52  ;;  %v23579_v52 = vld [vmem:[%s32833_s5 + $0xf44] ss:$16 sps:$4 sm:$0xff]  }
 0x73c   :  { %7040 = vmatprep.subr.bf16.mxu1 %v23444_v31  ;;  %7956 = vmatpush2.bf16.msra.mxu0 %v23481_v46  ;;  %v23577_v31 = vld [vmem:[%s32833_s5 + $0xf40] ss:$16 sps:$4 sm:$0xff]   ;;  %v23585_v46 = vld [vmem:[%s32833_s5 + $0xf24] ss:$16 sps:$4 sm:$0xff]  }
 0x73d   :  { %7957 = vmatprep.subr.bf16.mxu0 %v23486_v36  ;;  %v23583_v36 = vld [vmem:[%s32833_s5 + $0xf20] ss:$16 sps:$4 sm:$0xff]  }
 0x73f   :  { %7041 = vmatpush2.bf16.msra.mxu1 %v23442_v43  ;;  %v23591_v43 = vld [vmem:[%s32833_s5 + $0xf04] ss:$16 sps:$4 sm:$0xff]  }
 0x740   :  { %7042 = vmatprep.subr.bf16.mxu1 %v23447_v20  ;;  %7958 = vmatpush2.bf16.msra.mxu0 %v23484_v41  ;;  %v23589_v20 = vld [vmem:[%s32833_s5 + $0xf00] ss:$16 sps:$4 sm:$0xff]   ;;  %v23597_v41 = vld [vmem:[%s32833_s5 + $0xeec] ss:$16 sps:$4 sm:$0xff]  }
 0x741   :  { %7959 = vmatprep.subr.bf16.mxu0 %v23489_v27 }
 0x743   :  { %7043 = vmatpush2.bf16.msra.mxu1 %v23445_v21 }
 0x744   :  { %7044 = vmatprep.subr.bf16.mxu1 %v23450_v18  ;;  %7960 = vmatpush2.bf16.msra.mxu0 %v23487_v11 }
 0x747   :  { %7045 = vmatpush2.bf16.msra.mxu1 %v23448_v37 }
 0x748   :  { %7131 = vmatprep.subr.bf16.mxu1 %v27212_v6  ;;  %v23492_v6 = vld [vmem:[%s32833_s5 + $0xd44] ss:$16 sps:$4 sm:$0xff]  }
 0x749   :  { %7961 = vmatprep.subr.bf16.mxu0 %v23492_v6 }
 0x74a   :  { %7047 = vmatmul.mubr.bf16.vlgmr.msra.gmra.mxu1 %v28323_v49  ;;  %v23493_v49 = vld [vmem:[%s32833_s5 + $0xd20] ss:$16 sps:$4 sm:$0xff]  }
 0x74b   :  { %7132 = vmatpush1.bf16.msra.mxu1 %v27210_v23  ;;  %7151 = vmatprep.mubr.bf16.mxu1 %v25357_v2  ;;  %v23490_v23 = vld [vmem:[%s32833_s5 + $0xd40] ss:$16 sps:$4 sm:$0xff]  }
 0x74c   :  { %7133 = vmatprep.subr.bf16.mxu1 %v27215_v22  ;;  %7962 = vmatpush2.bf16.msra.mxu0 %v23490_v23  ;;  %v23495_v22 = vld [vmem:[%s32833_s5 + $0xd24] ss:$16 sps:$4 sm:$0xff]  }
 0x74d   :  { %7963 = vmatprep.subr.bf16.mxu0 %v23495_v22 }
 0x74f   :  { %7134 = vmatpush1.bf16.msra.mxu1 %v27197_v34  ;;  %v23498_v34 = vld [vmem:[%s32833_s5 + $0xd04] ss:$16 sps:$4 sm:$0xff]  }
 0x750   :  { %7964 = vmatpush2.bf16.msra.mxu0 %v23493_v49 }
 0x751   :  { %7965 = vmatprep.subr.bf16.mxu0 %v23498_v34 }
 0x752   :  { %19603 = vmatmul.mubr.msk.bf16.vlgmr.msra.gmra.mxu1 %vm3939_vm9, %v28349_v30  ;;  %v23501_v30 = vld [vmem:[%s32833_s5 + $0xee4] ss:$16 sps:$4 sm:$0xff]  }
 0x753   :  { %7978 = vmatprep.subr.bf16.mxu1 %v23501_v30 }
 0x754   :  { %7966 = vmatpush2.bf16.msra.mxu0 %v23496_v59  ;;  %7979 = vmatpush1.bf16.msra.mxu1 %v23499_v42 }
 0x755   :  { %8021 = vmatprep.subr.bf16.mxu0 %v23504_v51  ;;  %7980 = vmatprep.subr.bf16.mxu1 %v23507_v55 }
 0x758   :  { %7981 = vmatpush1.bf16.msra.mxu1 %v23505_v4 }
 0x759   :  { %7982 = vmatprep.subr.bf16.mxu1 %v23513_v35 }
 0x75c   :  { %7983 = vmatpush1.bf16.msra.mxu1 %v23511_v39 }
 0x75d   :  { %7984 = vmatprep.subr.bf16.mxu1 %v23519_v44 }
 0x760   :  { %7985 = vmatpush1.bf16.msra.mxu1 %v23517_v7 }
 0x761   :  { %7986 = vmatprep.subr.bf16.mxu1 %v23525_v17 }
 0x764   :  { %7987 = vmatpush1.bf16.msra.mxu1 %v23523_v3 }
 0x765   :  { %7988 = vmatprep.subr.bf16.mxu1 %v23531_v14  ;;  %v23516_v14 = vld [vmem:[%s32833_s5 + $0xcac] ss:$16 sps:$4 sm:$0xff]  }
 0x768   :  { %7989 = vmatpush1.bf16.msra.mxu1 %v23529_v19  ;;  %v23510_v19 = vld [vmem:[%s32833_s5 + $0xccc] ss:$16 sps:$4 sm:$0xff]  }
 0x769   :  { %7990 = vmatprep.subr.bf16.mxu1 %v23537_v16  ;;  %v23522_v16 = vld [vmem:[%s32833_s5 + $0xc8c] ss:$16 sps:$4 sm:$0xff]  }
 0x76c   :  { %7991 = vmatpush1.bf16.msra.mxu1 %v23535_v45  ;;  %v23514_v45 = vld [vmem:[%s32833_s5 + $0xca8] ss:$16 sps:$4 sm:$0xff]  }
 0x76d   :  { %7992 = vmatprep.subr.bf16.mxu1 %v23543_v32  ;;  %v23528_v32 = vld [vmem:[%s32833_s5 + $0xc6c] ss:$16 sps:$4 sm:$0xff]  }
 0x770   :  { %7993 = vmatpush1.bf16.msra.mxu1 %v23541_v57  ;;  %v23520_v57 = vld [vmem:[%s32833_s5 + $0xc88] ss:$16 sps:$4 sm:$0xff]  }
 0x771   :  { %7994 = vmatprep.subr.bf16.mxu1 %v23549_v26  ;;  %v23534_v26 = vld [vmem:[%s32833_s5 + $0xc4c] ss:$16 sps:$4 sm:$0xff]  }
 0x774   :  { %7995 = vmatpush2.bf16.msra.mxu1 %v23547_v8  ;;  %v23526_v8 = vld [vmem:[%s32833_s5 + $0xc68] ss:$16 sps:$4 sm:$0xff]  }
 0x775   :  { %7996 = vmatprep.subr.bf16.mxu1 %v23555_v0  ;;  %v23540_v0 = vld [vmem:[%s32833_s5 + $0xc2c] ss:$16 sps:$4 sm:$0xff]  }
 0x778   :  { %7997 = vmatpush2.bf16.msra.mxu1 %v23553_v1  ;;  %v23532_v1 = vld [vmem:[%s32833_s5 + $0xc48] ss:$16 sps:$4 sm:$0xff]  }
 0x779   :  { %7998 = vmatprep.subr.bf16.mxu1 %v23561_v13  ;;  %v23546_v13 = vld [vmem:[%s32833_s5 + $0xc0c] ss:$16 sps:$4 sm:$0xff]  }
 0x77c   :  { %7999 = vmatpush2.bf16.msra.mxu1 %v23559_v29  ;;  %v23538_v29 = vld [vmem:[%s32833_s5 + $0xc28] ss:$16 sps:$4 sm:$0xff]  }
 0x77d   :  { %8000 = vmatprep.subr.bf16.mxu1 %v23567_v12  ;;  %v23552_v12 = vld [vmem:[%s32833_s5 + $0xdec] ss:$16 sps:$4 sm:$0xff]  }
 0x780   :  { %8001 = vmatpush2.bf16.msra.mxu1 %v23565_v54  ;;  %v23544_v54 = vld [vmem:[%s32833_s5 + $0xc08] ss:$16 sps:$4 sm:$0xff]  }
 0x781   :  { %8002 = vmatprep.subr.bf16.mxu1 %v23573_v63  ;;  %v23550_v63 = vld [vmem:[%s32833_s5 + $0xde8] ss:$16 sps:$4 sm:$0xff]  }
 0x784   :  { %8003 = vmatpush2.bf16.msra.mxu1 %v23571_v10  ;;  %v23558_v10 = vld [vmem:[%s32833_s5 + $0xdcc] ss:$16 sps:$4 sm:$0xff]  }
 0x785   :  { %8004 = vmatprep.subr.bf16.mxu1 %v23579_v52  ;;  %v23556_v52 = vld [vmem:[%s32833_s5 + $0xdc8] ss:$16 sps:$4 sm:$0xff]  }
 0x788   :  { %8005 = vmatpush2.bf16.msra.mxu1 %v23577_v31  ;;  %v23564_v31 = vld [vmem:[%s32833_s5 + $0xdac] ss:$16 sps:$4 sm:$0xff]  }
 0x789   :  { %8006 = vmatprep.subr.bf16.mxu1 %v23585_v46  ;;  %v23562_v46 = vld [vmem:[%s32833_s5 + $0xda8] ss:$16 sps:$4 sm:$0xff]  }
 0x78b   :  { %v6919_v21 = vpop.f32.mrf.mxu0 }
 0x78c   :  { %8007 = vmatpush2.bf16.msra.mxu1 %v23583_v36  ;;  %v23570_v36 = vld [vmem:[%s32833_s5 + $0xd8c] ss:$16 sps:$4 sm:$0xff]  }
 0x78d   :  { %8008 = vmatprep.subr.bf16.mxu1 %v23591_v43  ;;  %v6921_v18 = vpop.f32.mrf.mxu0  ;;  %v23568_v43 = vld [vmem:[%s32833_s5 + $0xd88] ss:$16 sps:$4 sm:$0xff]  }
 0x78f   :  { %v6923_v37 = vpop.f32.mrf.mxu0 }
 0x790   :  { %8009 = vmatpush2.bf16.msra.mxu1 %v23589_v20  ;;  %v23576_v20 = vld [vmem:[%s32833_s5 + $0xd6c] ss:$16 sps:$4 sm:$0xff]  }
 0x791   :  { %8064 = vmatprep.subr.bf16.mxu1 %v23597_v41  ;;  %v28635_v27 = vpop.f32.mrf.mxu0 }
 0x7ca   :  { %v6962_v11 = vpop.f32.mrf.mxu1 }
 0x7cb   :  { %v6963_v6 = vadd.f32 %v6962_v11, %v6919_v21  ;;  %v28637_v23 = vpop.f32.mrf.mxu0  ;;  %v23582_v11 = vld [vmem:[%s32833_s5 + $0xd4c] ss:$16 sps:$4 sm:$0xff]  }
 0x7cc   :  { %v6964_v22 = vpop.f32.mrf.mxu1 }
 0x7cd   :  { %v28640_v49 = vadd.f32 %v6963_v6, %v28197_v24  ;;  %v6965_v34 = vadd.f32 %v6964_v22, %v6921_v18  ;;  %v28642_v59 = vpop.f32.mrf.mxu0  ;;  %v23574_v18 = vld [vmem:[%s32833_s5 + $0xd68] ss:$16 sps:$4 sm:$0xff]  }
 0x7ce   :  { %v6966_v30 = vpop.f32.mrf.mxu1 }
 0x7cf   :  { %v28645_v42 = vadd.f32 %v6965_v34, %v28201_v38  ;;  %v6967_v51 = vadd.f32 %v6966_v30, %v6923_v37  ;;  %v28647_v4 = vpop.f32.mrf.mxu0  ;;  %v23502_v38 = vld [vmem:[%s32833_s5 + $0xce8] ss:$16 sps:$4 sm:$0xff]  }
 0x7d0   :  { %v28729_v41 = vpop.f32.mrf.mxu1 }
 0x7d1   :  { %v28650_v55 = vadd.f32 %v6967_v51, %v28205_v48  ;;  %v28652_v39 = vpop.f32.mrf.mxu0  ;;  %v23508_v48 = vld [vmem:[%s32833_s5 + $0xcc8] ss:$16 sps:$4 sm:$0xff]  }
 0x7d2   :  { %v23580_v51 = vld [vmem:[%s32833_s5 + $0xd48] ss:$16 sps:$4 sm:$0xff]  }
 0x7d3   :  { %v7110_v35 = vpop.f32.mrf.mxu0 }
 0x7d5   :  { %v7112_v7 = vpop.f32.mrf.mxu0 }
 0x7d7   :  { %v7114_v44 = vpop.f32.mrf.mxu0 }
 0x7d8   :  { %v28654_v24 = vpack.c.bf16 %v7114_v44, %v7110_v35 }
 0x7d9   :  { %v7116_v3 = vpop.f32.mrf.mxu0 }
 0x7da   :  { %v7163_v17 = vpack.c.bf16 %v7116_v3, %v7112_v7  ;;  %v23588_v7 = vld [vmem:[%s32833_s5 + $0xd2c] ss:$16 sps:$4 sm:$0xff]   ;;  %v23586_v3 = vld [vmem:[%s32833_s5 + $0xd28] ss:$16 sps:$4 sm:$0xff]  }
 0x7dc   :  { %7967 = vmatprep.mubr.bf16.mxu0 %v7163_v17 }
 0x7dd   :  { %7968 = vmatmul.mubr.bf16.vlgmr.msra.gmra.mxu0 %v28654_v24 }
 0x7de   :  { %8022 = vmatpush1.bf16.msra.mxu0 %v23502_v38  ;;  %8053 = vmatprep.mubr.bf16.mxu0 %v7163_v17  ;;  %v23592_v38 = vld [vmem:[%s32833_s5 + $0xd08] ss:$16 sps:$4 sm:$0xff]  }
 0x7df   :  { %8023 = vmatprep.subr.bf16.mxu0 %v23510_v19 }
 0x7e2   :  { %8024 = vmatpush1.bf16.msra.mxu0 %v23508_v48  ;;  %v23595_v48 = vld [vmem:[%s32833_s5 + $0xee8] ss:$16 sps:$4 sm:$0xff]  }
 0x7e3   :  { %8025 = vmatprep.subr.bf16.mxu0 %v23516_v14 }
 0x7e6   :  { %8026 = vmatpush1.bf16.msra.mxu0 %v23514_v45  ;;  %v23600_v45 = vld [vmem:[%s32833_s5 + $0xecc] ss:$16 sps:$4 sm:$0xff]  }
 0x7e7   :  { %8027 = vmatprep.subr.bf16.mxu0 %v23522_v16  ;;  %v23598_v16 = vld [vmem:[%s32833_s5 + $0xec8] ss:$16 sps:$4 sm:$0xff]  }
 0x7ea   :  { %8028 = vmatpush1.bf16.msra.mxu0 %v23520_v57  ;;  %v23603_v57 = vld [vmem:[%s32833_s5 + $0xeac] ss:$16 sps:$4 sm:$0xff]  }
 0x7eb   :  { %8029 = vmatprep.subr.bf16.mxu0 %v23528_v32  ;;  %v23601_v32 = vld [vmem:[%s32833_s5 + $0xea8] ss:$16 sps:$4 sm:$0xff]  }
 0x7ee   :  { %8030 = vmatpush1.bf16.msra.mxu0 %v23526_v8  ;;  %v23604_v8 = vld [vmem:[%s32833_s5 + $0xe88] ss:$16 sps:$4 sm:$0xff]  }
 0x7ef   :  { %8031 = vmatprep.subr.bf16.mxu0 %v23534_v26  ;;  %v23609_v26 = vld [vmem:[%s32833_s5 + $0xe6c] ss:$16 sps:$4 sm:$0xff]  }
 0x7f2   :  { %8032 = vmatpush1.bf16.msra.mxu0 %v23532_v1  ;;  %v23607_v1 = vld [vmem:[%s32833_s5 + $0xe68] ss:$16 sps:$4 sm:$0xff]  }
 0x7f3   :  { %8033 = vmatprep.subr.bf16.mxu0 %v23540_v0  ;;  %v23612_v0 = vld [vmem:[%s32833_s5 + $0xe4c] ss:$16 sps:$4 sm:$0xff]  }
 0x7f6   :  { %8034 = vmatpush1.bf16.msra.mxu0 %v23538_v29  ;;  %v23610_v29 = vld [vmem:[%s32833_s5 + $0xe48] ss:$16 sps:$4 sm:$0xff]  }
 0x7f7   :  { %8035 = vmatprep.subr.bf16.mxu0 %v23546_v13  ;;  %v23615_v13 = vld [vmem:[%s32833_s5 + $0xe2c] ss:$16 sps:$4 sm:$0xff]  }
 0x7fa   :  { %8036 = vmatpush1.bf16.msra.mxu0 %v23544_v54  ;;  %v23613_v54 = vld [vmem:[%s32833_s5 + $0xe28] ss:$16 sps:$4 sm:$0xff]  }
 0x7fb   :  { %8037 = vmatprep.subr.bf16.mxu0 %v23552_v12  ;;  %v23618_v12 = vld [vmem:[%s32833_s5 + $0xe0c] ss:$16 sps:$4 sm:$0xff]  }
 0x7fe   :  { %8038 = vmatpush2.bf16.msra.mxu0 %v23550_v63  ;;  %v23616_v63 = vld [vmem:[%s32833_s5 + $0xe08] ss:$16 sps:$4 sm:$0xff]  }
 0x7ff   :  { %8039 = vmatprep.subr.bf16.mxu0 %v23558_v10  ;;  %v23621_v10 = vld [vmem:[%s32833_s5 + $0xfec] ss:$16 sps:$4 sm:$0xff]  }
 0x802   :  { %8040 = vmatpush2.bf16.msra.mxu0 %v23556_v52  ;;  %v23619_v52 = vld [vmem:[%s32833_s5 + $0xfe8] ss:$16 sps:$4 sm:$0xff]  }
 0x803   :  { %8041 = vmatprep.subr.bf16.mxu0 %v23564_v31  ;;  %v23624_v31 = vld [vmem:[%s32833_s5 + $0xfcc] ss:$16 sps:$4 sm:$0xff]  }
 0x806   :  { %8042 = vmatpush2.bf16.msra.mxu0 %v23562_v46  ;;  %v23622_v46 = vld [vmem:[%s32833_s5 + $0xfc8] ss:$16 sps:$4 sm:$0xff]  }
 0x807   :  { %8043 = vmatprep.subr.bf16.mxu0 %v23570_v36  ;;  %v23627_v36 = vld [vmem:[%s32833_s5 + $0xfac] ss:$16 sps:$4 sm:$0xff]  }
 0x80a   :  { %8044 = vmatpush2.bf16.msra.mxu0 %v23568_v43  ;;  %v7048_v21 = vpop.f32.mrf.mxu1  ;;  %v23625_v43 = vld [vmem:[%s32833_s5 + $0xfa8] ss:$16 sps:$4 sm:$0xff]  }
 0x80b   :  { %v7049_v37 = vadd.f32 %v7048_v21, %v28637_v23  ;;  %8045 = vmatprep.subr.bf16.mxu0 %v23576_v20  ;;  %v23630_v20 = vld [vmem:[%s32833_s5 + $0xf8c] ss:$16 sps:$4 sm:$0xff]   ;;  %v23628_v21 = vld [vmem:[%s32833_s5 + $0xf88] ss:$16 sps:$4 sm:$0xff]  }
 0x80c   :  { %v7050_v6 = vpop.f32.mrf.mxu1 }
 0x80d   :  { %v28739_v22 = vadd.f32 %v7049_v37, %v28292_v58  ;;  %v7051_v34 = vadd.f32 %v7050_v6, %v28642_v59  ;;  %v23631_v37 = vld [vmem:[%s32833_s5 + $0xf68] ss:$16 sps:$4 sm:$0xff]  }
 0x80e   :  { %8046 = vmatpush2.bf16.msra.mxu0 %v23574_v18  ;;  %v7052_v30 = vpop.f32.mrf.mxu1  ;;  %v23633_v18 = vld [vmem:[%s32833_s5 + $0xf6c] ss:$16 sps:$4 sm:$0xff]   ;;  %v23634_v6 = vld [vmem:[%s32833_s5 + $0xf48] ss:$16 sps:$4 sm:$0xff]  }
 0x80f   :  { %v28746_v35 = vadd.f32 %v7051_v34, %v28298_v15  ;;  %v7053_v23 = vadd.f32 %v7052_v30, %v28647_v4  ;;  %8047 = vmatprep.subr.bf16.mxu0 %v23582_v11  ;;  %v23594_v15 = vld [vmem:[%s32833_s5 + $0xd0c] ss:$16 sps:$4 sm:$0xff]   ;;  %v23637_v30 = vld [vmem:[%s32833_s5 + $0xf28] ss:$16 sps:$4 sm:$0xff]  }
 0x810   :  { %v28752_v58 = vpop.f32.mrf.mxu1  ;;  %v23636_v11 = vld [vmem:[%s32833_s5 + $0xf4c] ss:$16 sps:$4 sm:$0xff]  }
 0x811   :  { %v28755_v59 = vadd.f32 %v7053_v23, %v28304_v28  ;;  %v23639_v34 = vld [vmem:[%s32833_s5 + $0xf2c] ss:$16 sps:$4 sm:$0xff]   ;;  %v23640_v23 = vld [vmem:[%s32833_s5 + $0xf08] ss:$16 sps:$4 sm:$0xff]  }
 0x812   :  { %8048 = vmatpush2.bf16.msra.mxu0 %v23580_v51  ;;  %v7153_v44 = vpop.f32.mrf.mxu1  ;;  %v23642_v51 = vld [vmem:[%s32833_s5 + $0xf0c] ss:$16 sps:$4 sm:$0xff]  }
 0x813   :  { %8049 = vmatprep.subr.bf16.mxu0 %v23588_v7 }
 0x814   :  { %v7155_v4 = vpop.f32.mrf.mxu1 }
 0x816   :  { %8050 = vmatpush2.bf16.msra.mxu0 %v23586_v3  ;;  %v7157_v17 = vpop.f32.mrf.mxu1 }
 0x817   :  { %8051 = vmatprep.subr.bf16.mxu0 %v23594_v15  ;;  %v28769_v14 = vpack.c.bf16 %v7157_v17, %v7153_v44  ;;  %v28869_v44 = vld [vmem:[%s32834_s6] sm:$0xf] }
 0x818   :  { %v7159_v28 = vpop.f32.mrf.mxu1  ;;  %v8120_v17 = vrot.slane %v28869_v44, %v27037_v25 }
 0x819   :  { %v7165_v19 = vpack.c.bf16 %v7159_v28, %v7155_v4 }
 0x81a   :  { %8052 = vmatpush2.bf16.msra.mxu0 %v23592_v38  ;;  %v5115_v38 = vadd.f32 %v28159_v9, %v28139_v56 }
 0x81b   :  { %8010 = vmatprep.mubr.bf16.mxu1 %v7165_v19 }
 0x81c   :  { %8011 = vmatmul.mubr.bf16.vlgmr.msra.gmra.mxu1 %v28769_v14 }
 0x81d   :  { %8054 = vmatmul.mubr.bf16.vlgmr.msra.gmra.mxu0 %v28654_v24  ;;  %8065 = vmatpush1.bf16.msra.mxu1 %v23595_v48  ;;  %v23606_v24 = vld [vmem:[%s32833_s5 + $0xe8c] ss:$16 sps:$4 sm:$0xff]  }
 0x81e   :  { %8096 = vmatprep.mubr.bf16.mxu1 %v7165_v19  ;;  %8066 = vmatprep.subr.bf16.mxu1 %v23600_v45  ;;  %v5884_v45 = vadd.f32 %v28195_v33, %v5115_v38  ;;  %v23664_v38 = vld [vmem:[%s32836_s8 + $0x400] ss:$16 sps:$4 sm:$0xff]  }
 0x81f   :  { %8210 = vmatprep.mubr.bf16.mxu0 %v25357_v2 }
 0x820   :  { %v5927_v56 = vadd.f32 %v28286_v5, %v5884_v45 }
 0x821   :  { %8067 = vmatpush1.bf16.msra.mxu1 %v23598_v16  ;;  %v6969_v16 = vadd.f32 %v28729_v41, %v28635_v27 }
 0x822   :  { %8068 = vmatprep.subr.bf16.mxu1 %v23603_v57  ;;  %v8124_v57 = vrot.slane %v28869_v44, %v27058_v40 }
 0x825   :  { %8069 = vmatpush1.bf16.msra.mxu1 %v23601_v32 }
 0x826   :  { %8070 = vmatprep.subr.bf16.mxu1 %v23606_v24 }
 0x829   :  { %8071 = vmatpush1.bf16.msra.mxu1 %v23604_v8 }
 0x82a   :  { %8072 = vmatprep.subr.bf16.mxu1 %v23609_v26 }
 0x82d   :  { %8073 = vmatpush1.bf16.msra.mxu1 %v23607_v1 }
 0x82e   :  { %8074 = vmatprep.subr.bf16.mxu1 %v23612_v0  ;;  %v7062_v0 = vadd.f32 %v6969_v16, %v5927_v56 }
 0x831   :  { %8075 = vmatpush1.bf16.msra.mxu1 %v23610_v29 }
 0x832   :  { %8076 = vmatprep.subr.bf16.mxu1 %v23615_v13 }
 0x835   :  { %8077 = vmatpush1.bf16.msra.mxu1 %v23613_v54 }
 0x836   :  { %8078 = vmatprep.subr.bf16.mxu1 %v23618_v12 }
 0x839   :  { %8079 = vmatpush1.bf16.msra.mxu1 %v23616_v63 }
 0x83a   :  { %8080 = vmatprep.subr.bf16.mxu1 %v23621_v10 }
 0x83d   :  { %8081 = vmatpush2.bf16.msra.mxu1 %v23619_v52 }
 0x83e   :  { %8082 = vmatprep.subr.bf16.mxu1 %v23624_v31 }
 0x841   :  { %8083 = vmatpush2.bf16.msra.mxu1 %v23622_v46 }
 0x842   :  { %8084 = vmatprep.subr.bf16.mxu1 %v23627_v36  ;;  %v28893_v36 = vld [vmem:[%s32835_s7] sm:$0xf] }
 0x845   :  { %8085 = vmatpush2.bf16.msra.mxu1 %v23625_v43  ;;  %v23645_v43 = vld [vmem:[%s32836_s8 + $0x4e4] ss:$16 sps:$4 sm:$0xff]  }
 0x846   :  { %8086 = vmatprep.subr.bf16.mxu1 %v23630_v20  ;;  %v28906_v20 = vld [vmem:[%s32835_s7 + $0x4] sm:$0xf] }
 0x849   :  { %8087 = vmatpush2.bf16.msra.mxu1 %v23628_v21  ;;  %v23643_v21 = vld [vmem:[%s32836_s8 + $0x4e0] ss:$16 sps:$4 sm:$0xff]  }
 0x84a   :  { %8088 = vmatprep.subr.bf16.mxu1 %v23633_v18  ;;  %v23648_v18 = vld [vmem:[%s32836_s8 + $0x4c4] ss:$16 sps:$4 sm:$0xff]  }
 0x84d   :  { %8089 = vmatpush2.bf16.msra.mxu1 %v23631_v37  ;;  %v23646_v37 = vld [vmem:[%s32836_s8 + $0x4c0] ss:$16 sps:$4 sm:$0xff]  }
 0x84e   :  { %8090 = vmatprep.subr.bf16.mxu1 %v23636_v11  ;;  %v23651_v11 = vld [vmem:[%s32836_s8 + $0x4a4] ss:$16 sps:$4 sm:$0xff]  }
 0x851   :  { %8091 = vmatpush2.bf16.msra.mxu1 %v23634_v6  ;;  %v23649_v6 = vld [vmem:[%s32836_s8 + $0x4a0] ss:$16 sps:$4 sm:$0xff]  }
 0x852   :  { %8092 = vmatprep.subr.bf16.mxu1 %v23639_v34  ;;  %v23654_v34 = vld [vmem:[%s32836_s8 + $0x484] ss:$16 sps:$4 sm:$0xff]  }
 0x855   :  { %8093 = vmatpush2.bf16.msra.mxu1 %v23637_v30  ;;  %v23652_v30 = vld [vmem:[%s32836_s8 + $0x480] ss:$16 sps:$4 sm:$0xff]  }
 0x856   :  { %8094 = vmatprep.subr.bf16.mxu1 %v23642_v51  ;;  %v23657_v51 = vld [vmem:[%s32836_s8 + $0x464] ss:$16 sps:$4 sm:$0xff]  }
 0x859   :  { %8095 = vmatpush2.bf16.msra.mxu1 %v23640_v23  ;;  %v23655_v23 = vld [vmem:[%s32836_s8 + $0x460] ss:$16 sps:$4 sm:$0xff]  }
 0x85c   :  { %8097 = vmatmul.mubr.bf16.vlgmr.msra.gmra.mxu1 %v28769_v14 }
 0x85d   :  { %8251 = vmatprep.mubr.bf16.mxu1 %v25357_v2 }
 0x89d   :  { %v7969_v7 = vpop.f32.mrf.mxu0 }
 0x89f   :  { %v7971_v3 = vpop.f32.mrf.mxu0 }
 0x8a1   :  { %v7973_v19 = vpop.f32.mrf.mxu0 }
 0x8a3   :  { %v7975_v1 = vpop.f32.mrf.mxu0 }
 0x8dc   :  { %v8012_v15 = vpop.f32.mrf.mxu1 }
 0x8dd   :  { %v8013_v4 = vadd.f32 %v8012_v15, %v7969_v7  ;;  %v23660_v7 = vld [vmem:[%s32836_s8 + $0x444] ss:$16 sps:$4 sm:$0xff]  }
 0x8de   :  { %v8014_v28 = vpop.f32.mrf.mxu1  ;;  %v23663_v15 = vld [vmem:[%s32836_s8 + $0x424] ss:$16 sps:$4 sm:$0xff]  }
 0x8df   :  { %v8107_v48 = vadd.f32 %v8013_v4, %v28640_v49  ;;  %v8015_v14 = vadd.f32 %v8014_v28, %v7971_v3  ;;  %v23658_v3 = vld [vmem:[%s32836_s8 + $0x440] ss:$16 sps:$4 sm:$0xff]   ;;  %v23669_v28 = vld [vmem:[%s32836_s8 + $0x5e4] ss:$16 sps:$4 sm:$0xff]  }
 0x8e0   :  { %v8016_v32 = vpop.f32.mrf.mxu1  ;;  %v23661_v4 = vld [vmem:[%s32836_s8 + $0x420] ss:$16 sps:$4 sm:$0xff]  }
 0x8e1   :  { %v8137_v24 = vadd.f32 %v8120_v17, %v8107_v48  ;;  %v8108_v8 = vadd.f32 %v8015_v14, %v28645_v42  ;;  %v8017_v26 = vadd.f32 %v8016_v32, %v7973_v19  ;;  %v8055_v19 = vpop.f32.mrf.mxu0  ;;  %v23667_v48 = vld [vmem:[%s32836_s8 + $0x5e0] ss:$16 sps:$4 sm:$0xff]   ;;  %v23672_v14 = vld [vmem:[%s32836_s8 + $0x5c4] ss:$16 sps:$4 sm:$0xff]  }
 0x8e2   :  { %v8018_v9 = vpop.f32.mrf.mxu1 }
 0x8e3   :  { %v8111_v49 = vadd.f32 %v8017_v26, %v28650_v55  ;;  %v8138_v29 = vadd.f32 %v8124_v57, %v8108_v8  ;;  %v8019_v33 = vadd.f32 %v8018_v9, %v7975_v1  ;;  %v8153_v13 = vmul.f32 0.2, %v8137_v24  ;;  %v8057_v45 = vpop.f32.mrf.mxu0  ;;  %v23675_v8 = vld [vmem:[%s32836_s8 + $0x5a4] ss:$16 sps:$4 sm:$0xff]  }
 0x8e4   :  { %vm8145_vm2 = vcmp.ge.f32.partialorder %v8137_v24, 0.0  ;;  %v5201_v26 = vadd.f32 %v28193_v47, %v28161_v53 }
 0x8e5   :  { %v8141_v54 = vadd.f32 %v8120_v17, %v8111_v49  ;;  %v8112_v27 = vadd.f32 %v8019_v33, %v7062_v0  ;;  %v8154_v12 = vmul.f32 0.2, %v8138_v29  ;;  %vm8146_vm4 = vcmp.ge.f32.partialorder %v8138_v29, 0.0  ;;  %v23666_v17 = vld [vmem:[%s32836_s8 + $0x404] ss:$16 sps:$4 sm:$0xff]   ;;  %v8059_v9 = vpop.f32.mrf.mxu0 }
 0x8e6   :  { %v8161_v42 = vsel %vm8145_vm2, %v8137_v24, %v8153_v13  ;;  %v8128_v24 = vrot.slane %v28869_v44, %v27138_v60  ;;  %v5970_v0 = vadd.f32 %v28209_v50, %v5201_v26  ;;  %v8132_v33 = vrot.slane %v28869_v44, %v27179_v61  ;;  %v23678_v50 = vld [vmem:[%s32836_s8 + $0x584] ss:$16 sps:$4 sm:$0xff]  }
 0x8e7   :  { %vm8149_vm3 = vcmp.ge.f32.partialorder %v8141_v54, 0.0  ;;  %v8157_v41 = vmul.f32 0.2, %v8141_v54  ;;  %v8142_v63 = vadd.f32 %v8124_v57, %v8112_v27  ;;  %v8162_v31 = vsel %vm8146_vm4, %v8138_v29, %v8154_v12  ;;  %v23670_v57 = vld [vmem:[%s32836_s8 + $0x5c0] ss:$16 sps:$4 sm:$0xff]  }
 0x8e8   :  { %v7055_v29 = vadd.f32 %v28752_v58, %v28652_v39  ;;  %v6013_v39 = vadd.f32 %v28309_v62, %v5970_v0  ;;  %v8061_v58 = vpop.f32.mrf.mxu0  ;;  %v23729_v26 = vld [vmem:[%s32836_s8 + $0x624] ss:$16 sps:$4 sm:$0xff]   ;;  %v23745_v0 = vld [vmem:[%s32836_s8 + $0x7c0] ss:$16 sps:$4 sm:$0xff]   ;;  %vm16477_vm4 = vcmask 31744  }
 0x8e9   :  { %v8165_v10 = vsel %vm8149_vm3, %v8141_v54, %v8157_v41  ;;  %vm8150_vm5 = vcmp.ge.f32.partialorder %v8142_v63, 0.0  ;;  %v8158_v5 = vmul.f32 0.2, %v8142_v63  ;;  %v23673_v54 = vld [vmem:[%s32836_s8 + $0x5a0] ss:$16 sps:$4 sm:$0xff]   ;;  %vm16481_vm3 = vcmask 1041408  }
 0x8ea   :  { %v28884_v52 = vpack.c.bf16 %v8165_v10, %v8161_v42  ;;  %v7064_v41 = vadd.f32 %v7055_v29, %v6013_v39  ;;  %v23747_v29 = vld [vmem:[%s32836_s8 + $0x7c4] ss:$16 sps:$4 sm:$0xff]   ;;  %v23769_v39 = vld [vmem:[%s32836_s8 + $0x740] ss:$16 sps:$4 sm:$0xff]  }
 0x8eb   :  { %v8166_v55 = vsel %vm8150_vm5, %v8142_v63, %v8158_v5  ;;  %v23681_v5 = vld [vmem:[%s32836_s8 + $0x564] ss:$16 sps:$4 sm:$0xff]  }
 0x8ec   :  { %v28886_v46 = vpack.c.bf16 %v8166_v55, %v8162_v31 }
 0x8ee   :  { %8192 = vmatprep.subr.bf16.mxu0 %v28886_v46 }
 0x8ef   :  { %8193 = vmatpush1.bf16.msra.mxu0 %v28884_v52 }
 0x8f0   :  { %8411 = vmatprep.subr.bf16.mxu0 %v28886_v46 }
 0x8f2   :  { %19860 = vmatmul.mubr.msk.bf16.vlgmr.msra.gmra.mxu0 %vm8174_vm6, %v28893_v36 }
 0x8f3   :  { %8412 = vmatpush1.bf16.msra.mxu0 %v28884_v52  ;;  %8429 = vmatprep.mubr.bf16.mxu0 %v25357_v2 }
 0x8f4   :  { %9252 = vmatprep.subr.bf16.mxu0 %v23645_v43  ;;  %v23679_v43 = vld [vmem:[%s32836_s8 + $0x560] ss:$16 sps:$4 sm:$0xff]  }
 0x8fa   :  { %19863 = vmatmul.mubr.msk.bf16.vlgmr.msra.gmra.mxu0 %vm8174_vm6, %v28906_v20 }
 0x8fb   :  { %9253 = vmatpush1.bf16.msra.mxu0 %v23643_v21 }
 0x8fc   :  { %9254 = vmatprep.subr.bf16.mxu0 %v23648_v18 }
 0x8ff   :  { %9255 = vmatpush1.bf16.msra.mxu0 %v23646_v37 }
 0x900   :  { %9256 = vmatprep.subr.bf16.mxu0 %v23651_v11 }
 0x903   :  { %9257 = vmatpush1.bf16.msra.mxu0 %v23649_v6 }
 0x904   :  { %9258 = vmatprep.subr.bf16.mxu0 %v23654_v34 }
 0x907   :  { %9259 = vmatpush1.bf16.msra.mxu0 %v23652_v30 }
 0x908   :  { %9260 = vmatprep.subr.bf16.mxu0 %v23657_v51  ;;  %v23684_v51 = vld [vmem:[%s32836_s8 + $0x544] ss:$16 sps:$4 sm:$0xff]  }
 0x90b   :  { %9261 = vmatpush1.bf16.msra.mxu0 %v23655_v23  ;;  %v23682_v23 = vld [vmem:[%s32836_s8 + $0x540] ss:$16 sps:$4 sm:$0xff]  }
 0x90c   :  { %9262 = vmatprep.subr.bf16.mxu0 %v23660_v7  ;;  %v23685_v7 = vld [vmem:[%s32836_s8 + $0x520] ss:$16 sps:$4 sm:$0xff]  }
 0x90f   :  { %9263 = vmatpush1.bf16.msra.mxu0 %v23658_v3  ;;  %v23690_v3 = vld [vmem:[%s32836_s8 + $0x504] ss:$16 sps:$4 sm:$0xff]  }
 0x910   :  { %9264 = vmatprep.subr.bf16.mxu0 %v23663_v15  ;;  %v23688_v15 = vld [vmem:[%s32836_s8 + $0x500] ss:$16 sps:$4 sm:$0xff]  }
 0x913   :  { %9265 = vmatpush1.bf16.msra.mxu0 %v23661_v4  ;;  %v23691_v4 = vld [vmem:[%s32836_s8 + $0x6e0] ss:$16 sps:$4 sm:$0xff]  }
 0x914   :  { %9266 = vmatprep.subr.bf16.mxu0 %v23666_v17  ;;  %v23693_v17 = vld [vmem:[%s32836_s8 + $0x6e4] ss:$16 sps:$4 sm:$0xff]  }
 0x917   :  { %9267 = vmatpush1.bf16.msra.mxu0 %v23664_v38  ;;  %v23697_v38 = vld [vmem:[%s32836_s8 + $0x6c0] ss:$16 sps:$4 sm:$0xff]  }
 0x918   :  { %9268 = vmatprep.subr.bf16.mxu0 %v23669_v28  ;;  %v23699_v28 = vld [vmem:[%s32836_s8 + $0x6c4] ss:$16 sps:$4 sm:$0xff]  }
 0x91b   :  { %9269 = vmatpush2.bf16.msra.mxu0 %v23667_v48  ;;  %v23705_v48 = vld [vmem:[%s32836_s8 + $0x6a4] ss:$16 sps:$4 sm:$0xff]  }
 0x91c   :  { %v8098_v16 = vpop.f32.mrf.mxu1  ;;  %9270 = vmatprep.subr.bf16.mxu0 %v23672_v14  ;;  %v23709_v14 = vld [vmem:[%s32836_s8 + $0x680] ss:$16 sps:$4 sm:$0xff]  }
 0x91d   :  { %v8099_v32 = vadd.f32 %v8098_v16, %v8055_v19  ;;  %v23703_v19 = vld [vmem:[%s32836_s8 + $0x6a0] ss:$16 sps:$4 sm:$0xff]  }
 0x91e   :  { %v8100_v56 = vpop.f32.mrf.mxu1  ;;  %v23715_v16 = vld [vmem:[%s32836_s8 + $0x660] ss:$16 sps:$4 sm:$0xff]  }
 0x91f   :  { %v8109_v1 = vadd.f32 %v8099_v32, %v28739_v22  ;;  %v8101_v49 = vadd.f32 %v8100_v56, %v8057_v45  ;;  %9271 = vmatpush2.bf16.msra.mxu0 %v23670_v57  ;;  %v23711_v45 = vld [vmem:[%s32836_s8 + $0x684] ss:$16 sps:$4 sm:$0xff]   ;;  %v23721_v32 = vld [vmem:[%s32836_s8 + $0x640] ss:$16 sps:$4 sm:$0xff]  }
 0x920   :  { %v8102_v13 = vpop.f32.mrf.mxu1  ;;  %9272 = vmatprep.subr.bf16.mxu0 %v23675_v8  ;;  %v23717_v57 = vld [vmem:[%s32836_s8 + $0x664] ss:$16 sps:$4 sm:$0xff]   ;;  %v23727_v8 = vld [vmem:[%s32836_s8 + $0x620] ss:$16 sps:$4 sm:$0xff]  }
 0x921   :  { %v8139_v53 = vadd.f32 %v8128_v24, %v8109_v1  ;;  %v8110_v47 = vadd.f32 %v8101_v49, %v28746_v35  ;;  %v8103_v27 = vadd.f32 %v8102_v13, %v8059_v9  ;;  %v23676_v35 = vld [vmem:[%s32836_s8 + $0x580] ss:$16 sps:$4 sm:$0xff]   ;;  %v23735_v9 = vld [vmem:[%s32836_s8 + $0x604] ss:$16 sps:$4 sm:$0xff]  }
 0x922   :  { %v8104_v22 = vpop.f32.mrf.mxu1  ;;  %v23733_v56 = vld [vmem:[%s32836_s8 + $0x600] ss:$16 sps:$4 sm:$0xff]   ;;  %v23741_v49 = vld [vmem:[%s32836_s8 + $0x7e4] ss:$16 sps:$4 sm:$0xff]  }
 0x923   :  { %v8113_v44 = vadd.f32 %v8103_v27, %v28755_v59  ;;  %v8140_v12 = vadd.f32 %v8132_v33, %v8110_v47  ;;  %v8105_v63 = vadd.f32 %v8104_v22, %v8061_v58  ;;  %9273 = vmatpush2.bf16.msra.mxu0 %v23673_v54  ;;  %v8155_v42 = vmul.f32 0.2, %v8139_v53  ;;  %v23739_v1 = vld [vmem:[%s32836_s8 + $0x7e0] ss:$16 sps:$4 sm:$0xff]   ;;  %v23753_v13 = vld [vmem:[%s32836_s8 + $0x7a4] ss:$16 sps:$4 sm:$0xff]  }
 0x924   :  { %9274 = vmatprep.subr.bf16.mxu0 %v23678_v50  ;;  %vm8147_vm7 = vcmp.ge.f32.partialorder %v8139_v53, 0.0  ;;  %v23757_v54 = vld [vmem:[%s32836_s8 + $0x780] ss:$16 sps:$4 sm:$0xff]   ;;  %v23765_v27 = vld [vmem:[%s32836_s8 + $0x764] ss:$16 sps:$4 sm:$0xff]  }
 0x925   :  { %v8143_v10 = vadd.f32 %v8128_v24, %v8113_v44  ;;  %v8114_v62 = vadd.f32 %v8105_v63, %v7064_v41  ;;  %v8156_v59 = vmul.f32 0.2, %v8140_v12  ;;  %vm8148_vm9 = vcmp.ge.f32.partialorder %v8140_v12, 0.0  ;;  %v23723_v24 = vld [vmem:[%s32836_s8 + $0x644] ss:$16 sps:$4 sm:$0xff]  }
 0x926   :  { %v8163_v21 = vsel %vm8147_vm7, %v8139_v53, %v8155_v42  ;;  %v23759_v53 = vld [vmem:[%s32836_s8 + $0x784] ss:$16 sps:$4 sm:$0xff]   ;;  %v23763_v47 = vld [vmem:[%s32836_s8 + $0x760] ss:$16 sps:$4 sm:$0xff]   ;;  %vm18210_vm7 = vcmask 8192  }
 0x927   :  { %vm8151_vm8 = vcmp.ge.f32.partialorder %v8143_v10, 0.0  ;;  %v8159_v31 = vmul.f32 0.2, %v8143_v10  ;;  %v8144_v55 = vadd.f32 %v8132_v33, %v8114_v62  ;;  %9275 = vmatpush2.bf16.msra.mxu0 %v23676_v35  ;;  %v8164_v6 = vsel %vm8148_vm9, %v8140_v12, %v8156_v59  ;;  %v23751_v33 = vld [vmem:[%s32836_s8 + $0x7a0] ss:$16 sps:$4 sm:$0xff]  }
 0x928   :  { %9276 = vmatprep.subr.bf16.mxu0 %v23681_v5  ;;  %v23771_v50 = vld [vmem:[%s32836_s8 + $0x744] ss:$16 sps:$4 sm:$0xff]   ;;  %v23775_v58 = vld [vmem:[%s32836_s8 + $0x720] ss:$16 sps:$4 sm:$0xff]   ;;  %v23789_v12 = vld [vmem:[%s32836_s8 + $0x6ec] ss:$16 sps:$4 sm:$0xff]  }
 0x929   :  { %v8167_v18 = vsel %vm8151_vm8, %v8143_v10, %v8159_v31  ;;  %vm8152_vm10 = vcmp.ge.f32.partialorder %v8144_v55, 0.0  ;;  %v8160_v37 = vmul.f32 0.2, %v8144_v55  ;;  %v23777_v22 = vld [vmem:[%s32836_s8 + $0x724] ss:$16 sps:$4 sm:$0xff]  }
 0x92a   :  { %v28998_v11 = vpack.c.bf16 %v8167_v18, %v8163_v21  ;;  %v23783_v44 = vld [vmem:[%s32836_s8 + $0x704] ss:$16 sps:$4 sm:$0xff]   ;;  %v23781_v41 = vld [vmem:[%s32836_s8 + $0x700] ss:$16 sps:$4 sm:$0xff]  }
 0x92b   :  { %v8168_v34 = vsel %vm8152_vm10, %v8144_v55, %v8160_v37  ;;  %9277 = vmatpush2.bf16.msra.mxu0 %v23679_v43  ;;  %v23694_v55 = vld [vmem:[%s32836_s8 + $0x4e8] ss:$16 sps:$4 sm:$0xff]   ;;  %v23702_v43 = vld [vmem:[%s32836_s8 + $0x4cc] ss:$16 sps:$4 sm:$0xff]  }
 0x92c   :  { %v29000_v30 = vpack.c.bf16 %v8168_v34, %v8164_v6  ;;  %9278 = vmatprep.subr.bf16.mxu0 %v23684_v51  ;;  %v23700_v37 = vld [vmem:[%s32836_s8 + $0x4c8] ss:$16 sps:$4 sm:$0xff]   ;;  %v23708_v6 = vld [vmem:[%s32836_s8 + $0x4ac] ss:$16 sps:$4 sm:$0xff]  }
 0x92d   :  { %v23706_v34 = vld [vmem:[%s32836_s8 + $0x4a8] ss:$16 sps:$4 sm:$0xff]   ;;  %v23714_v51 = vld [vmem:[%s32836_s8 + $0x48c] ss:$16 sps:$4 sm:$0xff]  }
 0x92e   :  { %8233 = vmatprep.subr.bf16.mxu1 %v29000_v30 }
 0x92f   :  { %8234 = vmatpush1.bf16.msra.mxu1 %v28998_v11  ;;  %9279 = vmatpush2.bf16.msra.mxu0 %v23682_v23  ;;  %v23712_v23 = vld [vmem:[%s32836_s8 + $0x488] ss:$16 sps:$4 sm:$0xff]  }
 0x930   :  { %8452 = vmatprep.subr.bf16.mxu1 %v29000_v30 }
 0x932   :  { %19861 = vmatmul.mubr.msk.bf16.vlgmr.msra.gmra.mxu1 %vm8174_vm6, %v28893_v36  ;;  %v23687_v36 = vld [vmem:[%s32836_s8 + $0x524] ss:$16 sps:$4 sm:$0xff]  }
 0x933   :  { %8453 = vmatpush1.bf16.msra.mxu1 %v28998_v11  ;;  %8470 = vmatprep.mubr.bf16.mxu1 %v25357_v2 }
 0x934   :  { %9280 = vmatprep.subr.bf16.mxu0 %v23687_v36  ;;  %9293 = vmatprep.subr.bf16.mxu1 %v23693_v17  ;;  %v23718_v36 = vld [vmem:[%s32836_s8 + $0x468] ss:$16 sps:$4 sm:$0xff]  }
 0x935   :  { %9281 = vmatpush2.bf16.msra.mxu0 %v23685_v7  ;;  %v23720_v7 = vld [vmem:[%s32836_s8 + $0x46c] ss:$16 sps:$4 sm:$0xff]   ;;  %v23730_v17 = vld [vmem:[%s32836_s8 + $0x428] ss:$16 sps:$4 sm:$0xff]  }
 0x936   :  { %9282 = vmatprep.subr.bf16.mxu0 %v23690_v3  ;;  %v23726_v3 = vld [vmem:[%s32836_s8 + $0x44c] ss:$16 sps:$4 sm:$0xff]  }
 0x939   :  { %9283 = vmatpush2.bf16.msra.mxu0 %v23688_v15  ;;  %v23724_v15 = vld [vmem:[%s32836_s8 + $0x448] ss:$16 sps:$4 sm:$0xff]  }
 0x93a   :  { %19864 = vmatmul.mubr.msk.bf16.vlgmr.msra.gmra.mxu1 %vm8174_vm6, %v28906_v20  ;;  %v23696_v20 = vld [vmem:[%s32836_s8 + $0x4ec] ss:$16 sps:$4 sm:$0xff]  }
 0x93b   :  { %9294 = vmatpush1.bf16.msra.mxu1 %v23691_v4  ;;  %9334 = vmatprep.subr.bf16.mxu0 %v23696_v20  ;;  %v23732_v4 = vld [vmem:[%s32836_s8 + $0x42c] ss:$16 sps:$4 sm:$0xff]  }
 0x93c   :  { %9295 = vmatprep.subr.bf16.mxu1 %v23699_v28  ;;  %v23738_v20 = vld [vmem:[%s32836_s8 + $0x40c] ss:$16 sps:$4 sm:$0xff]  }
 0x93d   :  { %v23744_v28 = vld [vmem:[%s32836_s8 + $0x5ec] ss:$16 sps:$4 sm:$0xff]  }
 0x93f   :  { %9296 = vmatpush1.bf16.msra.mxu1 %v23697_v38  ;;  %v23736_v38 = vld [vmem:[%s32836_s8 + $0x408] ss:$16 sps:$4 sm:$0xff]  }
 0x940   :  { %9297 = vmatprep.subr.bf16.mxu1 %v23705_v48  ;;  %v23750_v48 = vld [vmem:[%s32836_s8 + $0x5cc] ss:$16 sps:$4 sm:$0xff]  }
 0x943   :  { %9298 = vmatpush1.bf16.msra.mxu1 %v23703_v19  ;;  %v23742_v19 = vld [vmem:[%s32836_s8 + $0x5e8] ss:$16 sps:$4 sm:$0xff]  }
 0x944   :  { %9299 = vmatprep.subr.bf16.mxu1 %v23711_v45  ;;  %v23756_v45 = vld [vmem:[%s32836_s8 + $0x5ac] ss:$16 sps:$4 sm:$0xff]  }
 0x947   :  { %9300 = vmatpush1.bf16.msra.mxu1 %v23709_v14  ;;  %v23748_v14 = vld [vmem:[%s32836_s8 + $0x5c8] ss:$16 sps:$4 sm:$0xff]  }
 0x948   :  { %9301 = vmatprep.subr.bf16.mxu1 %v23717_v57  ;;  %v23762_v57 = vld [vmem:[%s32836_s8 + $0x58c] ss:$16 sps:$4 sm:$0xff]  }
 0x94b   :  { %9302 = vmatpush1.bf16.msra.mxu1 %v23715_v16  ;;  %v23754_v16 = vld [vmem:[%s32836_s8 + $0x5a8] ss:$16 sps:$4 sm:$0xff]  }
 0x94c   :  { %9303 = vmatprep.subr.bf16.mxu1 %v23723_v24  ;;  %v23768_v24 = vld [vmem:[%s32836_s8 + $0x56c] ss:$16 sps:$4 sm:$0xff]  }
 0x94f   :  { %9304 = vmatpush1.bf16.msra.mxu1 %v23721_v32  ;;  %v23760_v32 = vld [vmem:[%s32836_s8 + $0x588] ss:$16 sps:$4 sm:$0xff]  }
 0x950   :  { %9305 = vmatprep.subr.bf16.mxu1 %v23729_v26  ;;  %v23774_v26 = vld [vmem:[%s32836_s8 + $0x54c] ss:$16 sps:$4 sm:$0xff]  }
 0x953   :  { %9306 = vmatpush1.bf16.msra.mxu1 %v23727_v8  ;;  %v23766_v8 = vld [vmem:[%s32836_s8 + $0x568] ss:$16 sps:$4 sm:$0xff]  }
 0x954   :  { %9307 = vmatprep.subr.bf16.mxu1 %v23735_v9 }
 0x957   :  { %9308 = vmatpush1.bf16.msra.mxu1 %v23733_v56  ;;  %v23772_v56 = vld [vmem:[%s32836_s8 + $0x548] ss:$16 sps:$4 sm:$0xff]  }
 0x958   :  { %9309 = vmatprep.subr.bf16.mxu1 %v23741_v49 }
 0x95b   :  { %9310 = vmatpush2.bf16.msra.mxu1 %v23739_v1  ;;  %v23780_v1 = vld [vmem:[%s32836_s8 + $0x52c] ss:$16 sps:$4 sm:$0xff]  }
 0x95c   :  { %9311 = vmatprep.subr.bf16.mxu1 %v23747_v29 }
 0x95f   :  { %9312 = vmatpush2.bf16.msra.mxu1 %v23745_v0  ;;  %v23778_v0 = vld [vmem:[%s32836_s8 + $0x528] ss:$16 sps:$4 sm:$0xff]  }
 0x960   :  { %9313 = vmatprep.subr.bf16.mxu1 %v23753_v13 }
 0x963   :  { %9314 = vmatpush2.bf16.msra.mxu1 %v23751_v33  ;;  %v23786_v33 = vld [vmem:[%s32836_s8 + $0x50c] ss:$16 sps:$4 sm:$0xff]  }
 0x964   :  { %9315 = vmatprep.subr.bf16.mxu1 %v23759_v53 }
 0x967   :  { %9316 = vmatpush2.bf16.msra.mxu1 %v23757_v54  ;;  %v23784_v54 = vld [vmem:[%s32836_s8 + $0x508] ss:$16 sps:$4 sm:$0xff]  }
 0x968   :  { %9317 = vmatprep.subr.bf16.mxu1 %v23765_v27 }
 0x96b   :  { %9318 = vmatpush2.bf16.msra.mxu1 %v23763_v47  ;;  %v23792_v47 = vld [vmem:[%s32836_s8 + $0xe4] ss:$16 sps:$4 sm:$0xff]  }
 0x96c   :  { %9319 = vmatprep.subr.bf16.mxu1 %v23771_v50 }
 0x96f   :  { %9320 = vmatpush2.bf16.msra.mxu1 %v23769_v39  ;;  %v23787_v39 = vld [vmem:[%s32836_s8 + $0x6e8] ss:$16 sps:$4 sm:$0xff]  }
 0x970   :  { %9321 = vmatprep.subr.bf16.mxu1 %v23777_v22 }
 0x973   :  { %9322 = vmatpush2.bf16.msra.mxu1 %v23775_v58 }
 0x974   :  { %9323 = vmatprep.subr.bf16.mxu1 %v23783_v44  ;;  %v23790_v44 = vld [vmem:[%s32836_s8 + $0xe0] ss:$16 sps:$4 sm:$0xff]  }
 0x977   :  { %9324 = vmatpush2.bf16.msra.mxu1 %v23781_v41  ;;  %v23795_v41 = vld [vmem:[%s32836_s8 + $0x6cc] ss:$16 sps:$4 sm:$0xff]  }
 0x978   :  { %9375 = vmatprep.subr.bf16.mxu1 %v23789_v12  ;;  %v23798_v12 = vld [vmem:[%s32836_s8 + $0xc4] ss:$16 sps:$4 sm:$0xff]  }
 0x9b2   :  { %v29131_v63 = vpop.f32.mrf.mxu0 }
 0x9b4   :  { %v29133_v35 = vpop.f32.mrf.mxu0 }
 0x9b6   :  { %v8216_v42 = vpop.f32.mrf.mxu0 }
 0x9b7   :  { %v29254_v42 = vpack.c.bf16 %v29133_v35, %v29133_v35  ;;  %v23801_v35 = vld [vmem:[%s32836_s8 + $0x6ac] ss:$16 sps:$4 sm:$0xff]  }
 0x9b8   :  { %v8217_v10 = vpop.f32.mrf.mxu0 }
 0x9ba   :  { %v8431_v5 = vpop.f32.mrf.mxu0 }
 0x9bb   :  { %v29135_v62 = vpack.c.bf16 %v8431_v5, %v8431_v5  ;;  %v23793_v5 = vld [vmem:[%s32836_s8 + $0x6c8] ss:$16 sps:$4 sm:$0xff]  }
 0x9bc   :  { %v8433_v31 = vpop.f32.mrf.mxu0 }
 0x9bd   :  { %v8480_v59 = vpack.c.bf16 %v8433_v31, %v8433_v31  ;;  %v23796_v31 = vld [vmem:[%s32836_s8 + $0xc0] ss:$16 sps:$4 sm:$0xff]  }
 0x9be   :  { %v8435_v21 = vpop.f32.mrf.mxu0 }
 0x9bf   :  { %9284 = vmatprep.mubr.bf16.mxu0 %v8480_v59  ;;  %v23810_v21 = vld [vmem:[%s32836_s8 + $0x84] ss:$16 sps:$4 sm:$0xff]  }
 0x9c0   :  { %9285 = vmatmul.mubr.bf16.vlgmr.msra.gmra.mxu0 %v29135_v62  ;;  %v8436_v18 = vpop.f32.mrf.mxu0 }
 0x9c1   :  { %9335 = vmatpush1.bf16.msra.mxu0 %v23694_v55  ;;  %9366 = vmatprep.mubr.bf16.mxu0 %v8480_v59  ;;  %v23799_v59 = vld [vmem:[%s32836_s8 + $0x6a8] ss:$16 sps:$4 sm:$0xff]   ;;  %v23802_v55 = vld [vmem:[%s32836_s8 + $0xa0] ss:$16 sps:$4 sm:$0xff]  }
 0x9c2   :  { %9336 = vmatprep.subr.bf16.mxu0 %v23702_v43  ;;  %v23807_v43 = vld [vmem:[%s32836_s8 + $0x68c] ss:$16 sps:$4 sm:$0xff]   ;;  %v23805_v18 = vld [vmem:[%s32836_s8 + $0x688] ss:$16 sps:$4 sm:$0xff]  }
 0x9c5   :  { %9337 = vmatpush1.bf16.msra.mxu0 %v23700_v37  ;;  %v23808_v37 = vld [vmem:[%s32836_s8 + $0x80] ss:$16 sps:$4 sm:$0xff]  }
 0x9c6   :  { %9338 = vmatprep.subr.bf16.mxu0 %v23708_v6  ;;  %v23813_v6 = vld [vmem:[%s32836_s8 + $0x66c] ss:$16 sps:$4 sm:$0xff]  }
 0x9c9   :  { %9339 = vmatpush1.bf16.msra.mxu0 %v23706_v34  ;;  %v23816_v34 = vld [vmem:[%s32836_s8 + $0x64] ss:$16 sps:$4 sm:$0xff]  }
 0x9ca   :  { %9340 = vmatprep.subr.bf16.mxu0 %v23714_v51  ;;  %v23811_v51 = vld [vmem:[%s32836_s8 + $0x668] ss:$16 sps:$4 sm:$0xff]  }
 0x9cd   :  { %9341 = vmatpush1.bf16.msra.mxu0 %v23712_v23  ;;  %v23814_v23 = vld [vmem:[%s32836_s8 + $0x60] ss:$16 sps:$4 sm:$0xff]  }
 0x9ce   :  { %9342 = vmatprep.subr.bf16.mxu0 %v23720_v7  ;;  %v23819_v7 = vld [vmem:[%s32836_s8 + $0x64c] ss:$16 sps:$4 sm:$0xff]  }
 0x9d1   :  { %9343 = vmatpush1.bf16.msra.mxu0 %v23718_v36  ;;  %v23822_v36 = vld [vmem:[%s32836_s8 + $0x44] ss:$16 sps:$4 sm:$0xff]  }
 0x9d2   :  { %9344 = vmatprep.subr.bf16.mxu0 %v23726_v3  ;;  %v23817_v3 = vld [vmem:[%s32836_s8 + $0x648] ss:$16 sps:$4 sm:$0xff]  }
 0x9d5   :  { %9345 = vmatpush1.bf16.msra.mxu0 %v23724_v15  ;;  %v23820_v15 = vld [vmem:[%s32836_s8 + $0x40] ss:$16 sps:$4 sm:$0xff]  }
 0x9d6   :  { %9346 = vmatprep.subr.bf16.mxu0 %v23732_v4  ;;  %v23825_v4 = vld [vmem:[%s32836_s8 + $0x62c] ss:$16 sps:$4 sm:$0xff]  }
 0x9d9   :  { %9347 = vmatpush1.bf16.msra.mxu0 %v23730_v17  ;;  %v23828_v17 = vld [vmem:[%s32836_s8 + $0x24] ss:$16 sps:$4 sm:$0xff]  }
 0x9da   :  { %9348 = vmatprep.subr.bf16.mxu0 %v23738_v20  ;;  %v23823_v20 = vld [vmem:[%s32836_s8 + $0x628] ss:$16 sps:$4 sm:$0xff]  }
 0x9dd   :  { %9349 = vmatpush1.bf16.msra.mxu0 %v23736_v38  ;;  %v23826_v38 = vld [vmem:[%s32836_s8 + $0x20] ss:$16 sps:$4 sm:$0xff]  }
 0x9de   :  { %9350 = vmatprep.subr.bf16.mxu0 %v23744_v28  ;;  %v23831_v28 = vld [vmem:[%s32836_s8 + $0x60c] ss:$16 sps:$4 sm:$0xff]  }
 0x9e1   :  { %9351 = vmatpush2.bf16.msra.mxu0 %v23742_v19  ;;  %v23834_v19 = vld [vmem:[%s32836_s8 + $0x4] ss:$16 sps:$4 sm:$0xff]  }
 0x9e2   :  { %9352 = vmatprep.subr.bf16.mxu0 %v23750_v48  ;;  %v23829_v48 = vld [vmem:[%s32836_s8 + $0x608] ss:$16 sps:$4 sm:$0xff]  }
 0x9e5   :  { %9353 = vmatpush2.bf16.msra.mxu0 %v23748_v14  ;;  %v23832_v14 = vld [vmem:[%s32836_s8] ss:$16 sps:$4 sm:$0xff]  }
 0x9e6   :  { %9354 = vmatprep.subr.bf16.mxu0 %v23756_v45  ;;  %v23837_v45 = vld [vmem:[%s32836_s8 + $0x7ec] ss:$16 sps:$4 sm:$0xff]  }
 0x9e9   :  { %9355 = vmatpush2.bf16.msra.mxu0 %v23754_v16  ;;  %v23840_v16 = vld [vmem:[%s32836_s8 + $0x1e4] ss:$16 sps:$4 sm:$0xff]  }
 0x9ea   :  { %9356 = vmatprep.subr.bf16.mxu0 %v23762_v57  ;;  %v23835_v57 = vld [vmem:[%s32836_s8 + $0x7e8] ss:$16 sps:$4 sm:$0xff]  }
 0x9ed   :  { %9357 = vmatpush2.bf16.msra.mxu0 %v23760_v32  ;;  %v23838_v32 = vld [vmem:[%s32836_s8 + $0x1e0] ss:$16 sps:$4 sm:$0xff]  }
 0x9ee   :  { %9358 = vmatprep.subr.bf16.mxu0 %v23768_v24  ;;  %v23843_v24 = vld [vmem:[%s32836_s8 + $0x7cc] ss:$16 sps:$4 sm:$0xff]  }
 0x9f1   :  { %9359 = vmatpush2.bf16.msra.mxu0 %v23766_v8  ;;  %v23846_v8 = vld [vmem:[%s32836_s8 + $0x1c4] ss:$16 sps:$4 sm:$0xff]  }
 0x9f2   :  { %v29219_v9 = vpop.f32.mrf.mxu1  ;;  %9360 = vmatprep.subr.bf16.mxu0 %v23774_v26  ;;  %v23841_v26 = vld [vmem:[%s32836_s8 + $0x7c8] ss:$16 sps:$4 sm:$0xff]  }
 0x9f4   :  { %v29224_v49 = vpop.f32.mrf.mxu1 }
 0x9f5   :  { %9361 = vmatpush2.bf16.msra.mxu0 %v23772_v56  ;;  %v23844_v56 = vld [vmem:[%s32836_s8 + $0x1c0] ss:$16 sps:$4 sm:$0xff]  }
 0x9f6   :  { %v8257_v29 = vpop.f32.mrf.mxu1  ;;  %9362 = vmatprep.subr.bf16.mxu0 %v23780_v1  ;;  %v23849_v1 = vld [vmem:[%s32836_s8 + $0x7ac] ss:$16 sps:$4 sm:$0xff]  }
 0x9f7   :  { %v23847_v29 = vld [vmem:[%s32836_s8 + $0x7a8] ss:$16 sps:$4 sm:$0xff]  }
 0x9f8   :  { %v8258_v13 = vpop.f32.mrf.mxu1 }
 0x9f9   :  { %9363 = vmatpush2.bf16.msra.mxu0 %v23778_v0  ;;  %v23852_v0 = vld [vmem:[%s32836_s8 + $0x1a4] ss:$16 sps:$4 sm:$0xff]   ;;  %v23855_v13 = vld [vmem:[%s32836_s8 + $0x78c] ss:$16 sps:$4 sm:$0xff]  }
 0x9fa   :  { %v8472_v53 = vpop.f32.mrf.mxu1  ;;  %9364 = vmatprep.subr.bf16.mxu0 %v23786_v33  ;;  %v23850_v33 = vld [vmem:[%s32836_s8 + $0x1a0] ss:$16 sps:$4 sm:$0xff]  }
 0x9fb   :  { %v29241_v22 = vpack.c.bf16 %v8472_v53, %v8472_v53  ;;  %v23853_v53 = vld [vmem:[%s32836_s8 + $0x788] ss:$16 sps:$4 sm:$0xff]  }
 0x9fc   :  { %v8474_v27 = vpop.f32.mrf.mxu1 }
 0x9fd   :  { %v8482_v50 = vpack.c.bf16 %v8474_v27, %v8474_v27  ;;  %9365 = vmatpush2.bf16.msra.mxu0 %v23784_v54  ;;  %v23858_v54 = vld [vmem:[%s32836_s8 + $0x184] ss:$16 sps:$4 sm:$0xff]   ;;  %v23861_v27 = vld [vmem:[%s32836_s8 + $0x76c] ss:$16 sps:$4 sm:$0xff]  }
 0x9fe   :  { %v8476_v58 = vpop.f32.mrf.mxu1  ;;  %10056 = vmatprep.subr.bf16.mxu0 %v23792_v47  ;;  %v23856_v47 = vld [vmem:[%s32836_s8 + $0x180] ss:$16 sps:$4 sm:$0xff]  }
 0x9ff   :  { %9325 = vmatprep.mubr.bf16.mxu1 %v8482_v50  ;;  %v23862_v58 = vld [vmem:[%s32836_s8 + $0x160] ss:$16 sps:$4 sm:$0xff]  }
 0xa00   :  { %v8477_v10 = vpop.f32.mrf.mxu1  ;;  %9326 = vmatmul.mubr.bf16.vlgmr.msra.gmra.mxu1 %v29241_v22  ;;  %9367 = vmatmul.mubr.bf16.vlgmr.msra.gmra.mxu0 %v29135_v62  ;;  %v23804_v62 = vld [vmem:[%s32836_s8 + $0xa4] ss:$16 sps:$4 sm:$0xff]  }
 0xa01   :  { %9376 = vmatpush1.bf16.msra.mxu1 %v23787_v39  ;;  %9407 = vmatprep.mubr.bf16.mxu1 %v8482_v50  ;;  %v23864_v50 = vld [vmem:[%s32836_s8 + $0x164] ss:$16 sps:$4 sm:$0xff]   ;;  %v23859_v39 = vld [vmem:[%s32836_s8 + $0x768] ss:$16 sps:$4 sm:$0xff]   ;;  %v23868_v10 = vld [vmem:[%s32836_s8 + $0x140] ss:$16 sps:$4 sm:$0xff]  }
 0xa02   :  { %10057 = vmatpush1.bf16.msra.mxu0 %v23790_v44  ;;  %10088 = vmatprep.mubr.bf16.mxu0 %v29254_v42  ;;  %v23867_v44 = vld [vmem:[%s32836_s8 + $0x74c] ss:$16 sps:$4 sm:$0xff]  }
 0xa03   :  { %9377 = vmatprep.subr.bf16.mxu1 %v23795_v41  ;;  %10058 = vmatprep.subr.bf16.mxu0 %v23798_v12  ;;  %v23870_v41 = vld [vmem:[%s32836_s8 + $0x144] ss:$16 sps:$4 sm:$0xff]   ;;  %v23865_v12 = vld [vmem:[%s32836_s8 + $0x748] ss:$16 sps:$4 sm:$0xff]  }
 0xa05   :  { %9378 = vmatpush1.bf16.msra.mxu1 %v23793_v5  ;;  %v23873_v5 = vld [vmem:[%s32836_s8 + $0x72c] ss:$16 sps:$4 sm:$0xff]  }
 0xa06   :  { %10059 = vmatpush1.bf16.msra.mxu0 %v23796_v31  ;;  %9379 = vmatprep.subr.bf16.mxu1 %v23801_v35  ;;  %v23876_v31 = vld [vmem:[%s32836_s8 + $0x124] ss:$16 sps:$4 sm:$0xff]   ;;  %v23871_v35 = vld [vmem:[%s32836_s8 + $0x728] ss:$16 sps:$4 sm:$0xff]  }
 0xa07   :  { %10060 = vmatprep.subr.bf16.mxu0 %v23804_v62  ;;  %v23874_v62 = vld [vmem:[%s32836_s8 + $0x120] ss:$16 sps:$4 sm:$0xff]  }
 0xa09   :  { %9380 = vmatpush1.bf16.msra.mxu1 %v23799_v59  ;;  %v23879_v59 = vld [vmem:[%s32836_s8 + $0x70c] ss:$16 sps:$4 sm:$0xff]  }
 0xa0a   :  { %10061 = vmatpush1.bf16.msra.mxu0 %v23802_v55  ;;  %9381 = vmatprep.subr.bf16.mxu1 %v23807_v43  ;;  %v23882_v55 = vld [vmem:[%s32836_s8 + $0x104] ss:$16 sps:$4 sm:$0xff]   ;;  %v23877_v43 = vld [vmem:[%s32836_s8 + $0x708] ss:$16 sps:$4 sm:$0xff]  }
 0xa0b   :  { %10062 = vmatprep.subr.bf16.mxu0 %v23810_v21  ;;  %v23880_v21 = vld [vmem:[%s32836_s8 + $0x100] ss:$16 sps:$4 sm:$0xff]  }
 0xa0d   :  { %9382 = vmatpush1.bf16.msra.mxu1 %v23805_v18  ;;  %v23885_v18 = vld [vmem:[%s32836_s8 + $0x2e4] ss:$16 sps:$4 sm:$0xff]  }
 0xa0e   :  { %10063 = vmatpush1.bf16.msra.mxu0 %v23808_v37  ;;  %9383 = vmatprep.subr.bf16.mxu1 %v23813_v6  ;;  %v23888_v37 = vld [vmem:[%s32836_s8 + $0xec] ss:$16 sps:$4 sm:$0xff]   ;;  %v23883_v6 = vld [vmem:[%s32836_s8 + $0x2e0] ss:$16 sps:$4 sm:$0xff]  }
 0xa0f   :  { %10064 = vmatprep.subr.bf16.mxu0 %v23816_v34  ;;  %v23886_v34 = vld [vmem:[%s32836_s8 + $0xe8] ss:$16 sps:$4 sm:$0xff]  }
 0xa11   :  { %9384 = vmatpush1.bf16.msra.mxu1 %v23811_v51  ;;  %v29447_v51 = vpack.c.bf16 %v29131_v63, %v29131_v63  ;;  %v23889_v63 = vld [vmem:[%s32836_s8 + $0x2c0] ss:$16 sps:$4 sm:$0xff]  }
 0xa12   :  { %10065 = vmatpush1.bf16.msra.mxu0 %v23814_v23  ;;  %9385 = vmatprep.subr.bf16.mxu1 %v23819_v7  ;;  %v23891_v23 = vld [vmem:[%s32836_s8 + $0x2c4] ss:$16 sps:$4 sm:$0xff]   ;;  %v29454_v7 = vpack.c.bf16 %v29224_v49, %v29224_v49  ;;  %v23892_v49 = vld [vmem:[%s32836_s8 + $0xc8] ss:$16 sps:$4 sm:$0xff]  }
 0xa13   :  { %10066 = vmatprep.subr.bf16.mxu0 %v23822_v36  ;;  %v23894_v36 = vld [vmem:[%s32836_s8 + $0xcc] ss:$16 sps:$4 sm:$0xff]  }
 0xa15   :  { %9386 = vmatpush1.bf16.msra.mxu1 %v23817_v3  ;;  %v23900_v3 = vld [vmem:[%s32836_s8 + $0xac] ss:$16 sps:$4 sm:$0xff]  }
 0xa16   :  { %10067 = vmatpush1.bf16.msra.mxu0 %v23820_v15  ;;  %9387 = vmatprep.subr.bf16.mxu1 %v23825_v4  ;;  %v23895_v15 = vld [vmem:[%s32836_s8 + $0x2a0] ss:$16 sps:$4 sm:$0xff]   ;;  %v23898_v4 = vld [vmem:[%s32836_s8 + $0xa8] ss:$16 sps:$4 sm:$0xff]  }
 0xa17   :  { %10068 = vmatprep.subr.bf16.mxu0 %v23828_v17  ;;  %v23906_v17 = vld [vmem:[%s32836_s8 + $0x8c] ss:$16 sps:$4 sm:$0xff]  }
 0xa19   :  { %9388 = vmatpush1.bf16.msra.mxu1 %v23823_v20  ;;  %v23901_v20 = vld [vmem:[%s32836_s8 + $0x280] ss:$16 sps:$4 sm:$0xff]  }
 0xa1a   :  { %10069 = vmatpush1.bf16.msra.mxu0 %v23826_v38  ;;  %9389 = vmatprep.subr.bf16.mxu1 %v23831_v28  ;;  %v23904_v38 = vld [vmem:[%s32836_s8 + $0x88] ss:$16 sps:$4 sm:$0xff]   ;;  %v23909_v28 = vld [vmem:[%s32836_s8 + $0x264] ss:$16 sps:$4 sm:$0xff]  }
 0xa1b   :  { %10070 = vmatprep.subr.bf16.mxu0 %v23834_v19  ;;  %v23912_v19 = vld [vmem:[%s32836_s8 + $0x6c] ss:$16 sps:$4 sm:$0xff]  }
 0xa1d   :  { %9390 = vmatpush1.bf16.msra.mxu1 %v23829_v48  ;;  %v23907_v48 = vld [vmem:[%s32836_s8 + $0x260] ss:$16 sps:$4 sm:$0xff]  }
 0xa1e   :  { %10071 = vmatpush1.bf16.msra.mxu0 %v23832_v14  ;;  %9391 = vmatprep.subr.bf16.mxu1 %v23837_v45  ;;  %v23910_v14 = vld [vmem:[%s32836_s8 + $0x68] ss:$16 sps:$4 sm:$0xff]   ;;  %v23915_v45 = vld [vmem:[%s32836_s8 + $0x244] ss:$16 sps:$4 sm:$0xff]  }
 0xa1f   :  { %10072 = vmatprep.subr.bf16.mxu0 %v23840_v16  ;;  %v23918_v16 = vld [vmem:[%s32836_s8 + $0x4c] ss:$16 sps:$4 sm:$0xff]  }
 0xa21   :  { %9392 = vmatpush2.bf16.msra.mxu1 %v23835_v57  ;;  %v23913_v57 = vld [vmem:[%s32836_s8 + $0x240] ss:$16 sps:$4 sm:$0xff]  }
 0xa22   :  { %10073 = vmatpush2.bf16.msra.mxu0 %v23838_v32  ;;  %9393 = vmatprep.subr.bf16.mxu1 %v23843_v24  ;;  %v23916_v32 = vld [vmem:[%s32836_s8 + $0x48] ss:$16 sps:$4 sm:$0xff]   ;;  %v23921_v24 = vld [vmem:[%s32836_s8 + $0x224] ss:$16 sps:$4 sm:$0xff]  }
 0xa23   :  { %10074 = vmatprep.subr.bf16.mxu0 %v23846_v8  ;;  %v23924_v8 = vld [vmem:[%s32836_s8 + $0x2c] ss:$16 sps:$4 sm:$0xff]  }
 0xa25   :  { %9394 = vmatpush2.bf16.msra.mxu1 %v23841_v26  ;;  %v23919_v26 = vld [vmem:[%s32836_s8 + $0x220] ss:$16 sps:$4 sm:$0xff]  }
 0xa26   :  { %10075 = vmatpush2.bf16.msra.mxu0 %v23844_v56  ;;  %9395 = vmatprep.subr.bf16.mxu1 %v23849_v1  ;;  %v23922_v56 = vld [vmem:[%s32836_s8 + $0x28] ss:$16 sps:$4 sm:$0xff]   ;;  %v23927_v1 = vld [vmem:[%s32836_s8 + $0x204] ss:$16 sps:$4 sm:$0xff]  }
 0xa27   :  { %10076 = vmatprep.subr.bf16.mxu0 %v23852_v0  ;;  %v23930_v0 = vld [vmem:[%s32836_s8 + $0xc] ss:$16 sps:$4 sm:$0xff]  }
 0xa29   :  { %9396 = vmatpush2.bf16.msra.mxu1 %v23847_v29  ;;  %v23925_v29 = vld [vmem:[%s32836_s8 + $0x200] ss:$16 sps:$4 sm:$0xff]  }
 0xa2a   :  { %10077 = vmatpush2.bf16.msra.mxu0 %v23850_v33  ;;  %9397 = vmatprep.subr.bf16.mxu1 %v23855_v13  ;;  %v23928_v33 = vld [vmem:[%s32836_s8 + $0x8] ss:$16 sps:$4 sm:$0xff]   ;;  %v23933_v13 = vld [vmem:[%s32836_s8 + $0x3e4] ss:$16 sps:$4 sm:$0xff]  }
 0xa2b   :  { %10078 = vmatprep.subr.bf16.mxu0 %v23858_v54  ;;  %v23936_v54 = vld [vmem:[%s32836_s8 + $0x1ec] ss:$16 sps:$4 sm:$0xff]  }
 0xa2d   :  { %9398 = vmatpush2.bf16.msra.mxu1 %v23853_v53  ;;  %v23931_v53 = vld [vmem:[%s32836_s8 + $0x3e0] ss:$16 sps:$4 sm:$0xff]  }
 0xa2e   :  { %10079 = vmatpush2.bf16.msra.mxu0 %v23856_v47  ;;  %9399 = vmatprep.subr.bf16.mxu1 %v23861_v27  ;;  %v23934_v47 = vld [vmem:[%s32836_s8 + $0x1e8] ss:$16 sps:$4 sm:$0xff]   ;;  %v23939_v27 = vld [vmem:[%s32836_s8 + $0x3c4] ss:$16 sps:$4 sm:$0xff]  }
 0xa2f   :  { %10080 = vmatprep.subr.bf16.mxu0 %v23864_v50  ;;  %v23942_v50 = vld [vmem:[%s32836_s8 + $0x1cc] ss:$16 sps:$4 sm:$0xff]  }
 0xa31   :  { %9400 = vmatpush2.bf16.msra.mxu1 %v23859_v39  ;;  %v23937_v39 = vld [vmem:[%s32836_s8 + $0x3c0] ss:$16 sps:$4 sm:$0xff]  }
 0xa32   :  { %10081 = vmatpush2.bf16.msra.mxu0 %v23862_v58  ;;  %9401 = vmatprep.subr.bf16.mxu1 %v23867_v44  ;;  %v23940_v58 = vld [vmem:[%s32836_s8 + $0x1c8] ss:$16 sps:$4 sm:$0xff]   ;;  %v23945_v44 = vld [vmem:[%s32836_s8 + $0x3a4] ss:$16 sps:$4 sm:$0xff]  }
 0xa33   :  { %10082 = vmatprep.subr.bf16.mxu0 %v23870_v41  ;;  %v23948_v41 = vld [vmem:[%s32836_s8 + $0x1ac] ss:$16 sps:$4 sm:$0xff]  }
 0xa35   :  { %9402 = vmatpush2.bf16.msra.mxu1 %v23865_v12  ;;  %v23943_v12 = vld [vmem:[%s32836_s8 + $0x3a0] ss:$16 sps:$4 sm:$0xff]  }
 0xa36   :  { %10083 = vmatpush2.bf16.msra.mxu0 %v23868_v10  ;;  %9403 = vmatprep.subr.bf16.mxu1 %v23873_v5  ;;  %v23946_v10 = vld [vmem:[%s32836_s8 + $0x1a8] ss:$16 sps:$4 sm:$0xff]   ;;  %v23951_v5 = vld [vmem:[%s32836_s8 + $0x384] ss:$16 sps:$4 sm:$0xff]  }
 0xa37   :  { %10084 = vmatprep.subr.bf16.mxu0 %v23876_v31  ;;  %v23954_v31 = vld [vmem:[%s32836_s8 + $0x18c] ss:$16 sps:$4 sm:$0xff]  }
 0xa39   :  { %9404 = vmatpush2.bf16.msra.mxu1 %v23871_v35  ;;  %v23949_v35 = vld [vmem:[%s32836_s8 + $0x380] ss:$16 sps:$4 sm:$0xff]  }
 0xa3a   :  { %10085 = vmatpush2.bf16.msra.mxu0 %v23874_v62  ;;  %9405 = vmatprep.subr.bf16.mxu1 %v23879_v59  ;;  %v23952_v62 = vld [vmem:[%s32836_s8 + $0x188] ss:$16 sps:$4 sm:$0xff]   ;;  %v23957_v59 = vld [vmem:[%s32836_s8 + $0x364] ss:$16 sps:$4 sm:$0xff]  }
 0xa3b   :  { %10086 = vmatprep.subr.bf16.mxu0 %v23882_v55  ;;  %v23960_v55 = vld [vmem:[%s32836_s8 + $0x16c] ss:$16 sps:$4 sm:$0xff]  }
 0xa3d   :  { %9406 = vmatpush2.bf16.msra.mxu1 %v23877_v43  ;;  %v23955_v43 = vld [vmem:[%s32836_s8 + $0x360] ss:$16 sps:$4 sm:$0xff]  }
 0xa3e   :  { %10087 = vmatpush2.bf16.msra.mxu0 %v23880_v21  ;;  %10097 = vmatprep.subr.bf16.mxu1 %v23885_v18  ;;  %v23958_v21 = vld [vmem:[%s32836_s8 + $0x168] ss:$16 sps:$4 sm:$0xff]   ;;  %v23963_v18 = vld [vmem:[%s32836_s8 + $0x344] ss:$16 sps:$4 sm:$0xff]  }
 0xa3f   :  { %10138 = vmatprep.subr.bf16.mxu0 %v23888_v37  ;;  %v23966_v37 = vld [vmem:[%s32836_s8 + $0x14c] ss:$16 sps:$4 sm:$0xff]  }
 0xa40   :  { %9408 = vmatmul.mubr.bf16.vlgmr.msra.gmra.mxu1 %v29241_v22  ;;  %v23897_v22 = vld [vmem:[%s32836_s8 + $0x2a4] ss:$16 sps:$4 sm:$0xff]  }
 0xa41   :  { %10089 = vmatmul.mubr.bf16.vlgmr.msra.gmra.mxu0 %v29447_v51  ;;  %10098 = vmatpush1.bf16.msra.mxu1 %v23883_v6  ;;  %v23961_v6 = vld [vmem:[%s32836_s8 + $0x340] ss:$16 sps:$4 sm:$0xff]  }
 0xa42   :  { %10129 = vmatprep.mubr.bf16.mxu1 %v29454_v7  ;;  %10139 = vmatpush1.bf16.msra.mxu0 %v23886_v34  ;;  %v23964_v34 = vld [vmem:[%s32836_s8 + $0x148] ss:$16 sps:$4 sm:$0xff]  }
 0xa43   :  { %10170 = vmatprep.mubr.bf16.mxu0 %v29254_v42  ;;  %10099 = vmatprep.subr.bf16.mxu1 %v23891_v23  ;;  %v23903_v42 = vld [vmem:[%s32836_s8 + $0x284] ss:$16 sps:$4 sm:$0xff]  }
 0xa44   :  { %10140 = vmatprep.subr.bf16.mxu0 %v23894_v36  ;;  %v23969_v23 = vld [vmem:[%s32836_s8 + $0x324] ss:$16 sps:$4 sm:$0xff]   ;;  %v23972_v36 = vld [vmem:[%s32836_s8 + $0x12c] ss:$16 sps:$4 sm:$0xff]  }
 0xa45   :  { %10100 = vmatpush1.bf16.msra.mxu1 %v23889_v63  ;;  %v23967_v63 = vld [vmem:[%s32836_s8 + $0x320] ss:$16 sps:$4 sm:$0xff]  }
 0xa46   :  { %10141 = vmatpush1.bf16.msra.mxu0 %v23892_v49  ;;  %10101 = vmatprep.subr.bf16.mxu1 %v23897_v22  ;;  %v23970_v49 = vld [vmem:[%s32836_s8 + $0x128] ss:$16 sps:$4 sm:$0xff]   ;;  %v23975_v22 = vld [vmem:[%s32836_s8 + $0x304] ss:$16 sps:$4 sm:$0xff]  }
 0xa47   :  { %10142 = vmatprep.subr.bf16.mxu0 %v23900_v3  ;;  %v23978_v3 = vld [vmem:[%s32836_s8 + $0x10c] ss:$16 sps:$4 sm:$0xff]  }
 0xa49   :  { %10102 = vmatpush1.bf16.msra.mxu1 %v23895_v15  ;;  %v23973_v15 = vld [vmem:[%s32836_s8 + $0x300] ss:$16 sps:$4 sm:$0xff]  }
 0xa4a   :  { %10143 = vmatpush1.bf16.msra.mxu0 %v23898_v4  ;;  %10103 = vmatprep.subr.bf16.mxu1 %v23903_v42  ;;  %v23976_v4 = vld [vmem:[%s32836_s8 + $0x108] ss:$16 sps:$4 sm:$0xff]   ;;  %v23981_v42 = vld [vmem:[%s32836_s8 + $0x2ec] ss:$16 sps:$4 sm:$0xff]  }
 0xa4b   :  { %10144 = vmatprep.subr.bf16.mxu0 %v23906_v17  ;;  %v23979_v17 = vld [vmem:[%s32836_s8 + $0x2e8] ss:$16 sps:$4 sm:$0xff]  }
 0xa4d   :  { %10104 = vmatpush1.bf16.msra.mxu1 %v23901_v20  ;;  %v29645_v20 = vpack.c.bf16 %v29219_v9, %v29219_v9  ;;  %v23982_v9 = vld [vmem:[%s32836_s8 + $0x2c8] ss:$16 sps:$4 sm:$0xff]  }
 0xa4e   :  { %10145 = vmatpush1.bf16.msra.mxu0 %v23904_v38  ;;  %10105 = vmatprep.subr.bf16.mxu1 %v23909_v28  ;;  %v23984_v38 = vld [vmem:[%s32836_s8 + $0x2cc] ss:$16 sps:$4 sm:$0xff]  }
 0xa4f   :  { %10146 = vmatprep.subr.bf16.mxu0 %v23912_v19  ;;  %v23987_v19 = vld [vmem:[%s32836_s8 + $0x2ac] ss:$16 sps:$4 sm:$0xff]  }
 0xa51   :  { %10106 = vmatpush1.bf16.msra.mxu1 %v23907_v48 }
 0xa52   :  { %10147 = vmatpush1.bf16.msra.mxu0 %v23910_v14  ;;  %10107 = vmatprep.subr.bf16.mxu1 %v23915_v45  ;;  %v23990_v45 = vld [vmem:[%s32836_s8 + $0x28c] ss:$16 sps:$4 sm:$0xff]  }
 0xa53   :  { %10148 = vmatprep.subr.bf16.mxu0 %v23918_v16 }
 0xa55   :  { %10108 = vmatpush1.bf16.msra.mxu1 %v23913_v57  ;;  %v24027_v57 = vld [vmem:[%s32836_s8 + $0x8e0] ss:$16 sps:$4 sm:$0xff]  }
 0xa56   :  { %10149 = vmatpush1.bf16.msra.mxu0 %v23916_v32  ;;  %10109 = vmatprep.subr.bf16.mxu1 %v23921_v24  ;;  %v24029_v32 = vld [vmem:[%s32836_s8 + $0x8e4] ss:$16 sps:$4 sm:$0xff]  }
 0xa57   :  { %10150 = vmatprep.subr.bf16.mxu0 %v23924_v8  ;;  %v24032_v24 = vld [vmem:[%s32836_s8 + $0x8c4] ss:$16 sps:$4 sm:$0xff]   ;;  %v23988_v8 = vld [vmem:[%s32836_s8 + $0x288] ss:$16 sps:$4 sm:$0xff]  }
 0xa59   :  { %10110 = vmatpush1.bf16.msra.mxu1 %v23919_v26  ;;  %v23993_v26 = vld [vmem:[%s32836_s8 + $0x26c] ss:$16 sps:$4 sm:$0xff]  }
 0xa5a   :  { %10151 = vmatpush1.bf16.msra.mxu0 %v23922_v56  ;;  %10111 = vmatprep.subr.bf16.mxu1 %v23927_v1  ;;  %v24030_v56 = vld [vmem:[%s32836_s8 + $0x8c0] ss:$16 sps:$4 sm:$0xff]   ;;  %v24035_v1 = vld [vmem:[%s32836_s8 + $0x8a4] ss:$16 sps:$4 sm:$0xff]  }
 0xa5b   :  { %10152 = vmatprep.subr.bf16.mxu0 %v23930_v0  ;;  %v23991_v0 = vld [vmem:[%s32836_s8 + $0x268] ss:$16 sps:$4 sm:$0xff]  }
 0xa5d   :  { %10112 = vmatpush1.bf16.msra.mxu1 %v23925_v29  ;;  %v23996_v29 = vld [vmem:[%s32836_s8 + $0x24c] ss:$16 sps:$4 sm:$0xff]  }
 0xa5e   :  { %10153 = vmatpush1.bf16.msra.mxu0 %v23928_v33  ;;  %10113 = vmatprep.subr.bf16.mxu1 %v23933_v13  ;;  %v24033_v33 = vld [vmem:[%s32836_s8 + $0x8a0] ss:$16 sps:$4 sm:$0xff]   ;;  %v24038_v13 = vld [vmem:[%s32836_s8 + $0x884] ss:$16 sps:$4 sm:$0xff]  }
 0xa5f   :  { %10154 = vmatprep.subr.bf16.mxu0 %v23936_v54  ;;  %v23994_v54 = vld [vmem:[%s32836_s8 + $0x248] ss:$16 sps:$4 sm:$0xff]  }
 0xa61   :  { %10114 = vmatpush2.bf16.msra.mxu1 %v23931_v53  ;;  %v23999_v53 = vld [vmem:[%s32836_s8 + $0x22c] ss:$16 sps:$4 sm:$0xff]  }
 0xa62   :  { %10155 = vmatpush2.bf16.msra.mxu0 %v23934_v47  ;;  %10115 = vmatprep.subr.bf16.mxu1 %v23939_v27  ;;  %v24036_v47 = vld [vmem:[%s32836_s8 + $0x880] ss:$16 sps:$4 sm:$0xff]   ;;  %v24041_v27 = vld [vmem:[%s32836_s8 + $0x864] ss:$16 sps:$4 sm:$0xff]  }
 0xa63   :  { %10156 = vmatprep.subr.bf16.mxu0 %v23942_v50  ;;  %v23997_v50 = vld [vmem:[%s32836_s8 + $0x228] ss:$16 sps:$4 sm:$0xff]  }
 0xa65   :  { %10116 = vmatpush2.bf16.msra.mxu1 %v23937_v39  ;;  %v24002_v39 = vld [vmem:[%s32836_s8 + $0x20c] ss:$16 sps:$4 sm:$0xff]  }
 0xa66   :  { %10157 = vmatpush2.bf16.msra.mxu0 %v23940_v58  ;;  %10117 = vmatprep.subr.bf16.mxu1 %v23945_v44  ;;  %v24039_v58 = vld [vmem:[%s32836_s8 + $0x860] ss:$16 sps:$4 sm:$0xff]   ;;  %v24044_v44 = vld [vmem:[%s32836_s8 + $0x844] ss:$16 sps:$4 sm:$0xff]  }
 0xa67   :  { %10158 = vmatprep.subr.bf16.mxu0 %v23948_v41  ;;  %v24000_v41 = vld [vmem:[%s32836_s8 + $0x208] ss:$16 sps:$4 sm:$0xff]  }
 0xa69   :  { %10118 = vmatpush2.bf16.msra.mxu1 %v23943_v12  ;;  %v24005_v12 = vld [vmem:[%s32836_s8 + $0x3ec] ss:$16 sps:$4 sm:$0xff]  }
 0xa6a   :  { %10159 = vmatpush2.bf16.msra.mxu0 %v23946_v10  ;;  %10119 = vmatprep.subr.bf16.mxu1 %v23951_v5  ;;  %v24042_v10 = vld [vmem:[%s32836_s8 + $0x840] ss:$16 sps:$4 sm:$0xff]   ;;  %v24047_v5 = vld [vmem:[%s32836_s8 + $0x824] ss:$16 sps:$4 sm:$0xff]  }
 0xa6b   :  { %10160 = vmatprep.subr.bf16.mxu0 %v23954_v31  ;;  %v24003_v31 = vld [vmem:[%s32836_s8 + $0x3e8] ss:$16 sps:$4 sm:$0xff]  }
 0xa6d   :  { %10120 = vmatpush2.bf16.msra.mxu1 %v23949_v35  ;;  %v24008_v35 = vld [vmem:[%s32836_s8 + $0x3cc] ss:$16 sps:$4 sm:$0xff]  }
 0xa6e   :  { %10161 = vmatpush2.bf16.msra.mxu0 %v23952_v62  ;;  %10121 = vmatprep.subr.bf16.mxu1 %v23957_v59  ;;  %v24045_v62 = vld [vmem:[%s32836_s8 + $0x820] ss:$16 sps:$4 sm:$0xff]   ;;  %v24050_v59 = vld [vmem:[%s32836_s8 + $0x804] ss:$16 sps:$4 sm:$0xff]  }
 0xa6f   :  { %10162 = vmatprep.subr.bf16.mxu0 %v23960_v55  ;;  %v24006_v55 = vld [vmem:[%s32836_s8 + $0x3c8] ss:$16 sps:$4 sm:$0xff]  }
 0xa71   :  { %10122 = vmatpush2.bf16.msra.mxu1 %v23955_v43  ;;  %v24011_v43 = vld [vmem:[%s32836_s8 + $0x3ac] ss:$16 sps:$4 sm:$0xff]  }
 0xa72   :  { %10163 = vmatpush2.bf16.msra.mxu0 %v23958_v21  ;;  %10123 = vmatprep.subr.bf16.mxu1 %v23963_v18  ;;  %v24048_v21 = vld [vmem:[%s32836_s8 + $0x800] ss:$16 sps:$4 sm:$0xff]   ;;  %v24053_v18 = vld [vmem:[%s32836_s8 + $0x9e4] ss:$16 sps:$4 sm:$0xff]  }
 0xa73   :  { %10164 = vmatprep.subr.bf16.mxu0 %v23966_v37  ;;  %v24009_v37 = vld [vmem:[%s32836_s8 + $0x3a8] ss:$16 sps:$4 sm:$0xff]  }
 0xa75   :  { %10124 = vmatpush2.bf16.msra.mxu1 %v23961_v6  ;;  %v24014_v6 = vld [vmem:[%s32836_s8 + $0x38c] ss:$16 sps:$4 sm:$0xff]  }
 0xa76   :  { %10165 = vmatpush2.bf16.msra.mxu0 %v23964_v34  ;;  %10125 = vmatprep.subr.bf16.mxu1 %v23969_v23  ;;  %v24051_v34 = vld [vmem:[%s32836_s8 + $0x9e0] ss:$16 sps:$4 sm:$0xff]   ;;  %v24056_v23 = vld [vmem:[%s32836_s8 + $0x9c4] ss:$16 sps:$4 sm:$0xff]  }
 0xa77   :  { %10166 = vmatprep.subr.bf16.mxu0 %v23972_v36  ;;  %v24012_v36 = vld [vmem:[%s32836_s8 + $0x388] ss:$16 sps:$4 sm:$0xff]  }
 0xa79   :  { %10126 = vmatpush2.bf16.msra.mxu1 %v23967_v63  ;;  %v24017_v63 = vld [vmem:[%s32836_s8 + $0x36c] ss:$16 sps:$4 sm:$0xff]  }
 0xa7a   :  { %10167 = vmatpush2.bf16.msra.mxu0 %v23970_v49  ;;  %10127 = vmatprep.subr.bf16.mxu1 %v23975_v22  ;;  %v24054_v49 = vld [vmem:[%s32836_s8 + $0x9c0] ss:$16 sps:$4 sm:$0xff]   ;;  %v24059_v22 = vld [vmem:[%s32836_s8 + $0x9a4] ss:$16 sps:$4 sm:$0xff]  }
 0xa7b   :  { %10168 = vmatprep.subr.bf16.mxu0 %v23978_v3  ;;  %v24015_v3 = vld [vmem:[%s32836_s8 + $0x368] ss:$16 sps:$4 sm:$0xff]  }
 0xa7d   :  { %10128 = vmatpush2.bf16.msra.mxu1 %v23973_v15  ;;  %v24020_v15 = vld [vmem:[%s32836_s8 + $0x34c] ss:$16 sps:$4 sm:$0xff]  }
 0xa7e   :  { %10169 = vmatpush2.bf16.msra.mxu0 %v23976_v4  ;;  %10179 = vmatprep.subr.bf16.mxu1 %v23981_v42  ;;  %v24057_v4 = vld [vmem:[%s32836_s8 + $0x9a0] ss:$16 sps:$4 sm:$0xff]   ;;  %v24062_v42 = vld [vmem:[%s32836_s8 + $0x984] ss:$16 sps:$4 sm:$0xff]  }
 0xa7f   :  { %10239 = vmatprep.subr.bf16.mxu0 %v28886_v46 }
 0xa80   :  { %10130 = vmatmul.mubr.bf16.vlgmr.msra.gmra.mxu1 %v29645_v20  ;;  %v29652_v28 = vpop.f32.mrf.mxu0 }
 0xa81   :  { %10171 = vmatmul.mubr.bf16.vlgmr.msra.gmra.mxu0 %v29447_v51  ;;  %10180 = vmatpush1.bf16.msra.mxu1 %v23979_v17  ;;  %v23985_v51 = vld [vmem:[%s32836_s8 + $0x2a8] ss:$16 sps:$4 sm:$0xff]  }
 0xa82   :  { %10211 = vmatprep.mubr.bf16.mxu1 %v29454_v7  ;;  %10240 = vmatpush1.bf16.msra.mxu0 %v28884_v52  ;;  %v29663_v48 = vpop.f32.mrf.mxu0  ;;  %v29672_v7 = vld [vmem:[%s32835_s7 + $0x8] sm:$0xf] }
 0xa83   :  { %10181 = vmatprep.subr.bf16.mxu1 %v23984_v38  ;;  %10257 = vmatprep.mubr.bf16.mxu0 %v25357_v2  ;;  %v24018_v17 = vld [vmem:[%s32836_s8 + $0x348] ss:$16 sps:$4 sm:$0xff]   ;;  %v24023_v38 = vld [vmem:[%s32836_s8 + $0x32c] ss:$16 sps:$4 sm:$0xff]  }
 0xa84   :  { %v9290_v14 = vpop.f32.mrf.mxu0  ;;  %11080 = vmatprep.subr.bf16.mxu0 %v24029_v32 }
 0xa85   :  { %10182 = vmatpush1.bf16.msra.mxu1 %v23982_v9  ;;  %v24060_v9 = vld [vmem:[%s32836_s8 + $0x980] ss:$16 sps:$4 sm:$0xff]   ;;  %v24021_v14 = vld [vmem:[%s32836_s8 + $0x328] ss:$16 sps:$4 sm:$0xff]  }
 0xa86   :  { %10183 = vmatprep.subr.bf16.mxu1 %v23987_v19  ;;  %v9291_v16 = vpop.f32.mrf.mxu0  ;;  %v24065_v19 = vld [vmem:[%s32836_s8 + $0x964] ss:$16 sps:$4 sm:$0xff]  }
 0xa87   :  { %v24024_v16 = vld [vmem:[%s32836_s8 + $0x308] ss:$16 sps:$4 sm:$0xff]  }
 0xa89   :  { %10184 = vmatpush1.bf16.msra.mxu1 %v23985_v51  ;;  %20250 = vmatmul.mubr.msk.bf16.vlgmr.msra.gmra.mxu0 %vm8174_vm6, %v29672_v7  ;;  %v24026_v51 = vld [vmem:[%s32836_s8 + $0x30c] ss:$16 sps:$4 sm:$0xff]  }
 0xa8a   :  { %10185 = vmatprep.subr.bf16.mxu1 %v23990_v45  ;;  %11081 = vmatpush1.bf16.msra.mxu0 %v24027_v57  ;;  %v24063_v45 = vld [vmem:[%s32836_s8 + $0x960] ss:$16 sps:$4 sm:$0xff]  }
 0xa8b   :  { %11082 = vmatprep.subr.bf16.mxu0 %v24032_v24 }
 0xa8d   :  { %10186 = vmatpush1.bf16.msra.mxu1 %v23988_v8  ;;  %v24068_v8 = vld [vmem:[%s32836_s8 + $0x944] ss:$16 sps:$4 sm:$0xff]  }
 0xa8e   :  { %10187 = vmatprep.subr.bf16.mxu1 %v23993_v26  ;;  %11083 = vmatpush1.bf16.msra.mxu0 %v24030_v56 }
 0xa8f   :  { %11084 = vmatprep.subr.bf16.mxu0 %v24035_v1 }
 0xa91   :  { %10188 = vmatpush1.bf16.msra.mxu1 %v23991_v0 }
 0xa92   :  { %10189 = vmatprep.subr.bf16.mxu1 %v23996_v29  ;;  %11085 = vmatpush1.bf16.msra.mxu0 %v24033_v33  ;;  %v24071_v29 = vld [vmem:[%s32836_s8 + $0x924] ss:$16 sps:$4 sm:$0xff]  }
 0xa93   :  { %11086 = vmatprep.subr.bf16.mxu0 %v24038_v13 }
 0xa95   :  { %10190 = vmatpush1.bf16.msra.mxu1 %v23994_v54  ;;  %v24069_v54 = vld [vmem:[%s32836_s8 + $0x920] ss:$16 sps:$4 sm:$0xff]  }
 0xa96   :  { %10191 = vmatprep.subr.bf16.mxu1 %v23999_v53  ;;  %11087 = vmatpush1.bf16.msra.mxu0 %v24036_v47  ;;  %v24072_v53 = vld [vmem:[%s32836_s8 + $0x900] ss:$16 sps:$4 sm:$0xff]  }
 0xa97   :  { %11088 = vmatprep.subr.bf16.mxu0 %v24041_v27  ;;  %v24075_v47 = vld [vmem:[%s32836_s8 + $0xae0] ss:$16 sps:$4 sm:$0xff]   ;;  %v24077_v27 = vld [vmem:[%s32836_s8 + $0xae4] ss:$16 sps:$4 sm:$0xff]  }
 0xa99   :  { %10192 = vmatpush1.bf16.msra.mxu1 %v23997_v50  ;;  %v24081_v50 = vld [vmem:[%s32836_s8 + $0xac0] ss:$16 sps:$4 sm:$0xff]  }
 0xa9a   :  { %10193 = vmatprep.subr.bf16.mxu1 %v24002_v39  ;;  %11089 = vmatpush1.bf16.msra.mxu0 %v24039_v58  ;;  %v24083_v39 = vld [vmem:[%s32836_s8 + $0xac4] ss:$16 sps:$4 sm:$0xff]   ;;  %v24087_v58 = vld [vmem:[%s32836_s8 + $0xaa0] ss:$16 sps:$4 sm:$0xff]  }
 0xa9b   :  { %11090 = vmatprep.subr.bf16.mxu0 %v24044_v44  ;;  %v24089_v44 = vld [vmem:[%s32836_s8 + $0xaa4] ss:$16 sps:$4 sm:$0xff]  }
 0xa9d   :  { %10194 = vmatpush1.bf16.msra.mxu1 %v24000_v41  ;;  %v24093_v41 = vld [vmem:[%s32836_s8 + $0xa80] ss:$16 sps:$4 sm:$0xff]  }
 0xa9e   :  { %10195 = vmatprep.subr.bf16.mxu1 %v24005_v12  ;;  %11091 = vmatpush1.bf16.msra.mxu0 %v24042_v10  ;;  %v24095_v12 = vld [vmem:[%s32836_s8 + $0xa84] ss:$16 sps:$4 sm:$0xff]   ;;  %v24099_v10 = vld [vmem:[%s32836_s8 + $0xa60] ss:$16 sps:$4 sm:$0xff]  }
 0xa9f   :  { %11092 = vmatprep.subr.bf16.mxu0 %v24047_v5  ;;  %v24101_v5 = vld [vmem:[%s32836_s8 + $0xa64] ss:$16 sps:$4 sm:$0xff]  }
 0xaa1   :  { %10196 = vmatpush2.bf16.msra.mxu1 %v24003_v31  ;;  %v24105_v31 = vld [vmem:[%s32836_s8 + $0xa40] ss:$16 sps:$4 sm:$0xff]  }
 0xaa2   :  { %10197 = vmatprep.subr.bf16.mxu1 %v24008_v35  ;;  %11093 = vmatpush1.bf16.msra.mxu0 %v24045_v62  ;;  %v24107_v35 = vld [vmem:[%s32836_s8 + $0xa44] ss:$16 sps:$4 sm:$0xff]   ;;  %v24111_v62 = vld [vmem:[%s32836_s8 + $0xa20] ss:$16 sps:$4 sm:$0xff]  }
 0xaa3   :  { %11094 = vmatprep.subr.bf16.mxu0 %v24050_v59  ;;  %v24113_v59 = vld [vmem:[%s32836_s8 + $0xa24] ss:$16 sps:$4 sm:$0xff]  }
 0xaa5   :  { %10198 = vmatpush2.bf16.msra.mxu1 %v24006_v55  ;;  %v24117_v55 = vld [vmem:[%s32836_s8 + $0xa00] ss:$16 sps:$4 sm:$0xff]  }
 0xaa6   :  { %10199 = vmatprep.subr.bf16.mxu1 %v24011_v43  ;;  %11095 = vmatpush1.bf16.msra.mxu0 %v24048_v21  ;;  %v24119_v43 = vld [vmem:[%s32836_s8 + $0xa04] ss:$16 sps:$4 sm:$0xff]   ;;  %v24123_v21 = vld [vmem:[%s32836_s8 + $0xbe0] ss:$16 sps:$4 sm:$0xff]  }
 0xaa7   :  { %11096 = vmatprep.subr.bf16.mxu0 %v24053_v18  ;;  %v24125_v18 = vld [vmem:[%s32836_s8 + $0xbe4] ss:$16 sps:$4 sm:$0xff]  }
 0xaa9   :  { %10200 = vmatpush2.bf16.msra.mxu1 %v24009_v37  ;;  %v24129_v37 = vld [vmem:[%s32836_s8 + $0xbc0] ss:$16 sps:$4 sm:$0xff]  }
 0xaaa   :  { %10201 = vmatprep.subr.bf16.mxu1 %v24014_v6  ;;  %11097 = vmatpush2.bf16.msra.mxu0 %v24051_v34  ;;  %v24131_v6 = vld [vmem:[%s32836_s8 + $0xbc4] ss:$16 sps:$4 sm:$0xff]   ;;  %v24135_v34 = vld [vmem:[%s32836_s8 + $0xba0] ss:$16 sps:$4 sm:$0xff]  }
 0xaab   :  { %11098 = vmatprep.subr.bf16.mxu0 %v24056_v23  ;;  %v24137_v23 = vld [vmem:[%s32836_s8 + $0xba4] ss:$16 sps:$4 sm:$0xff]  }
 0xaad   :  { %10202 = vmatpush2.bf16.msra.mxu1 %v24012_v36  ;;  %v24141_v36 = vld [vmem:[%s32836_s8 + $0xb80] ss:$16 sps:$4 sm:$0xff]  }
 0xaae   :  { %10203 = vmatprep.subr.bf16.mxu1 %v24017_v63  ;;  %11099 = vmatpush2.bf16.msra.mxu0 %v24054_v49  ;;  %v24143_v63 = vld [vmem:[%s32836_s8 + $0xb84] ss:$16 sps:$4 sm:$0xff]   ;;  %v24147_v49 = vld [vmem:[%s32836_s8 + $0xb60] ss:$16 sps:$4 sm:$0xff]  }
 0xaaf   :  { %11100 = vmatprep.subr.bf16.mxu0 %v24059_v22  ;;  %v24149_v22 = vld [vmem:[%s32836_s8 + $0xb64] ss:$16 sps:$4 sm:$0xff]  }
 0xab1   :  { %10204 = vmatpush2.bf16.msra.mxu1 %v24015_v3 }
 0xab2   :  { %10205 = vmatprep.subr.bf16.mxu1 %v24020_v15  ;;  %11101 = vmatpush2.bf16.msra.mxu0 %v24057_v4  ;;  %v24155_v15 = vld [vmem:[%s32836_s8 + $0xb44] ss:$16 sps:$4 sm:$0xff]  }
 0xab3   :  { %11102 = vmatprep.subr.bf16.mxu0 %v24062_v42 }
 0xab5   :  { %10206 = vmatpush2.bf16.msra.mxu1 %v24018_v17  ;;  %v24153_v17 = vld [vmem:[%s32836_s8 + $0xb40] ss:$16 sps:$4 sm:$0xff]  }
 0xab6   :  { %10207 = vmatprep.subr.bf16.mxu1 %v24023_v38  ;;  %11103 = vmatpush2.bf16.msra.mxu0 %v24060_v9 }
 0xab7   :  { %11104 = vmatprep.subr.bf16.mxu0 %v24065_v19 }
 0xab9   :  { %10208 = vmatpush2.bf16.msra.mxu1 %v24021_v14 }
 0xaba   :  { %10209 = vmatprep.subr.bf16.mxu1 %v24026_v51  ;;  %11105 = vmatpush2.bf16.msra.mxu0 %v24063_v45 }
 0xabb   :  { %11106 = vmatprep.subr.bf16.mxu0 %v24068_v8 }
 0xabd   :  { %10210 = vmatpush2.bf16.msra.mxu1 %v24024_v16  ;;  %v24159_v16 = vld [vmem:[%s32836_s8 + $0xb20] ss:$16 sps:$4 sm:$0xff]  }
 0xabe   :  { %10280 = vmatprep.subr.bf16.mxu1 %v29000_v30 }
 0xac0   :  { %10212 = vmatmul.mubr.bf16.vlgmr.msra.gmra.mxu1 %v29645_v20  ;;  %v9327_v57 = vpop.f32.mrf.mxu1  ;;  %v29834_v32 = vpop.f32.mrf.mxu0  ;;  %v24066_v20 = vld [vmem:[%s32836_s8 + $0x940] ss:$16 sps:$4 sm:$0xff]  }
 0xac1   :  { %v29837_v24 = vadd.f32 %v9327_v57, %v29652_v28  ;;  %10281 = vmatpush1.bf16.msra.mxu1 %v28998_v11  ;;  %10298 = vmatprep.mubr.bf16.mxu1 %v25357_v2  ;;  %v24161_v57 = vld [vmem:[%s32836_s8 + $0xb24] ss:$16 sps:$4 sm:$0xff]  }
 0xac2   :  { %v9329_v26 = vpop.f32.mrf.mxu1  ;;  %v29844_v56 = vpop.f32.mrf.mxu0  ;;  %11107 = vmatpush2.bf16.msra.mxu0 %v24066_v20  ;;  %11121 = vmatprep.subr.bf16.mxu1 %v24077_v27  ;;  %v24173_v20 = vld [vmem:[%s32836_s8 + $0xaec] ss:$16 sps:$4 sm:$0xff]  }
 0xac3   :  { %v29850_v1 = vadd.f32 %v9329_v26, %v29663_v48  ;;  %11108 = vmatprep.subr.bf16.mxu0 %v24071_v29  ;;  %v24074_v48 = vld [vmem:[%s32836_s8 + $0x904] ss:$16 sps:$4 sm:$0xff]  }
 0xac4   :  { %v9331_v28 = vpop.f32.mrf.mxu1  ;;  %v9372_v0 = vpop.f32.mrf.mxu0  ;;  %v24167_v26 = vld [vmem:[%s32836_s8 + $0xb04] ss:$16 sps:$4 sm:$0xff]  }
 0xac6   :  { %v9332_v33 = vpop.f32.mrf.mxu1  ;;  %v9373_v13 = vpop.f32.mrf.mxu0  ;;  %11109 = vmatpush2.bf16.msra.mxu0 %v24069_v54 }
 0xac7   :  { %11110 = vmatprep.subr.bf16.mxu0 %v24074_v48 }
 0xac8   :  { %20251 = vmatmul.mubr.msk.bf16.vlgmr.msra.gmra.mxu1 %vm8174_vm6, %v29672_v7  ;;  %v24080_v7 = vld [vmem:[%s32836_s8 + $0x8ec] ss:$16 sps:$4 sm:$0xff]  }
 0xac9   :  { %11122 = vmatpush1.bf16.msra.mxu1 %v24075_v47 }
 0xaca   :  { %11111 = vmatpush2.bf16.msra.mxu0 %v24072_v53  ;;  %11123 = vmatprep.subr.bf16.mxu1 %v24083_v39 }
 0xacb   :  { %11162 = vmatprep.subr.bf16.mxu0 %v24080_v7 }
 0xacd   :  { %11124 = vmatpush1.bf16.msra.mxu1 %v24081_v50 }
 0xace   :  { %11125 = vmatprep.subr.bf16.mxu1 %v24089_v44 }
 0xad1   :  { %11126 = vmatpush1.bf16.msra.mxu1 %v24087_v58 }
 0xad2   :  { %11127 = vmatprep.subr.bf16.mxu1 %v24095_v12  ;;  %v24086_v12 = vld [vmem:[%s32836_s8 + $0x8cc] ss:$16 sps:$4 sm:$0xff]  }
 0xad5   :  { %11128 = vmatpush1.bf16.msra.mxu1 %v24093_v41  ;;  %v24078_v41 = vld [vmem:[%s32836_s8 + $0x8e8] ss:$16 sps:$4 sm:$0xff]  }
 0xad6   :  { %11129 = vmatprep.subr.bf16.mxu1 %v24101_v5 }
 0xad9   :  { %11130 = vmatpush1.bf16.msra.mxu1 %v24099_v10 }
 0xada   :  { %11131 = vmatprep.subr.bf16.mxu1 %v24107_v35  ;;  %v24092_v35 = vld [vmem:[%s32836_s8 + $0x8ac] ss:$16 sps:$4 sm:$0xff]  }
 0xadd   :  { %11132 = vmatpush1.bf16.msra.mxu1 %v24105_v31  ;;  %v24084_v31 = vld [vmem:[%s32836_s8 + $0x8c8] ss:$16 sps:$4 sm:$0xff]  }
 0xade   :  { %11133 = vmatprep.subr.bf16.mxu1 %v24113_v59  ;;  %v24098_v59 = vld [vmem:[%s32836_s8 + $0x88c] ss:$16 sps:$4 sm:$0xff]  }
 0xae1   :  { %11134 = vmatpush1.bf16.msra.mxu1 %v24111_v62  ;;  %v24090_v62 = vld [vmem:[%s32836_s8 + $0x8a8] ss:$16 sps:$4 sm:$0xff]  }
 0xae2   :  { %11135 = vmatprep.subr.bf16.mxu1 %v24119_v43  ;;  %v24104_v43 = vld [vmem:[%s32836_s8 + $0x86c] ss:$16 sps:$4 sm:$0xff]  }
 0xae5   :  { %11136 = vmatpush1.bf16.msra.mxu1 %v24117_v55  ;;  %v24096_v55 = vld [vmem:[%s32836_s8 + $0x888] ss:$16 sps:$4 sm:$0xff]  }
 0xae6   :  { %11137 = vmatprep.subr.bf16.mxu1 %v24125_v18  ;;  %v24110_v18 = vld [vmem:[%s32836_s8 + $0x84c] ss:$16 sps:$4 sm:$0xff]  }
 0xae9   :  { %11138 = vmatpush2.bf16.msra.mxu1 %v24123_v21  ;;  %v24102_v21 = vld [vmem:[%s32836_s8 + $0x868] ss:$16 sps:$4 sm:$0xff]  }
 0xaea   :  { %11139 = vmatprep.subr.bf16.mxu1 %v24131_v6  ;;  %v24116_v6 = vld [vmem:[%s32836_s8 + $0x82c] ss:$16 sps:$4 sm:$0xff]  }
 0xaed   :  { %11140 = vmatpush2.bf16.msra.mxu1 %v24129_v37  ;;  %v24108_v37 = vld [vmem:[%s32836_s8 + $0x848] ss:$16 sps:$4 sm:$0xff]  }
 0xaee   :  { %11141 = vmatprep.subr.bf16.mxu1 %v24137_v23  ;;  %v24122_v23 = vld [vmem:[%s32836_s8 + $0x80c] ss:$16 sps:$4 sm:$0xff]  }
 0xaf1   :  { %11142 = vmatpush2.bf16.msra.mxu1 %v24135_v34  ;;  %v24114_v34 = vld [vmem:[%s32836_s8 + $0x828] ss:$16 sps:$4 sm:$0xff]  }
 0xaf2   :  { %11143 = vmatprep.subr.bf16.mxu1 %v24143_v63  ;;  %v24128_v63 = vld [vmem:[%s32836_s8 + $0x9ec] ss:$16 sps:$4 sm:$0xff]  }
 0xaf5   :  { %11144 = vmatpush2.bf16.msra.mxu1 %v24141_v36  ;;  %v24120_v36 = vld [vmem:[%s32836_s8 + $0x808] ss:$16 sps:$4 sm:$0xff]  }
 0xaf6   :  { %11145 = vmatprep.subr.bf16.mxu1 %v24149_v22  ;;  %v24134_v22 = vld [vmem:[%s32836_s8 + $0x9cc] ss:$16 sps:$4 sm:$0xff]  }
 0xaf9   :  { %11146 = vmatpush2.bf16.msra.mxu1 %v24147_v49  ;;  %v24126_v49 = vld [vmem:[%s32836_s8 + $0x9e8] ss:$16 sps:$4 sm:$0xff]  }
 0xafa   :  { %11147 = vmatprep.subr.bf16.mxu1 %v24155_v15  ;;  %v24140_v15 = vld [vmem:[%s32836_s8 + $0x9ac] ss:$16 sps:$4 sm:$0xff]  }
 0xafd   :  { %11148 = vmatpush2.bf16.msra.mxu1 %v24153_v17  ;;  %v24144_v17 = vld [vmem:[%s32836_s8 + $0x988] ss:$16 sps:$4 sm:$0xff]  }
 0xafe   :  { %11149 = vmatprep.subr.bf16.mxu1 %v24161_v57 }
 0xb00   :  { %v9409_v3 = vpop.f32.mrf.mxu1 }
 0xb01   :  { %v9410_v4 = vadd.f32 %v9409_v3, %v29834_v32  ;;  %v10090_v42 = vpop.f32.mrf.mxu0  ;;  %11150 = vmatpush2.bf16.msra.mxu1 %v24159_v16  ;;  %v24132_v3 = vld [vmem:[%s32836_s8 + $0x9c8] ss:$16 sps:$4 sm:$0xff]   ;;  %v24164_v16 = vld [vmem:[%s32836_s8 + $0x92c] ss:$16 sps:$4 sm:$0xff]  }
 0xb02   :  { %v10091_v38 = vadd.f32 %v10090_v42, %v29837_v24  ;;  %v9411_v9 = vpop.f32.mrf.mxu1  ;;  %11151 = vmatprep.subr.bf16.mxu1 %v24167_v26  ;;  %v24146_v42 = vld [vmem:[%s32836_s8 + $0x98c] ss:$16 sps:$4 sm:$0xff]  }
 0xb03   :  { %v9412_v19 = vadd.f32 %v9411_v9, %v29844_v56  ;;  %v10092_v14 = vpop.f32.mrf.mxu0  ;;  %v24165_v56 = vld [vmem:[%s32836_s8 + $0xb00] ss:$16 sps:$4 sm:$0xff]   ;;  %v24150_v9 = vld [vmem:[%s32836_s8 + $0x968] ss:$16 sps:$4 sm:$0xff]   ;;  %v24170_v26 = vld [vmem:[%s32836_s8 + $0x90c] ss:$16 sps:$4 sm:$0xff]  }
 0xb04   :  { %v10093_v51 = vadd.f32 %v10092_v14, %v29850_v1  ;;  %v9413_v45 = vpop.f32.mrf.mxu1 }
 0xb05   :  { %v10094_v32 = vpop.f32.mrf.mxu0  ;;  %11152 = vmatpush2.bf16.msra.mxu1 %v24165_v56 }
 0xb06   :  { %v9414_v8 = vpop.f32.mrf.mxu1  ;;  %11203 = vmatprep.subr.bf16.mxu1 %v24173_v20 }
 0xb07   :  { %v10095_v24 = vpop.f32.mrf.mxu0 }
 0xb08   :  { %v24162_v24 = vld [vmem:[%s32836_s8 + $0x928] ss:$16 sps:$4 sm:$0xff]  }
 0xb40   :  { %v10131_v1 = vpop.f32.mrf.mxu1 }
 0xb41   :  { %v29972_v28 = vadd.f32 %v10131_v1, %v10091_v38  ;;  %v10172_v0 = vpop.f32.mrf.mxu0  ;;  %v24152_v38 = vld [vmem:[%s32836_s8 + $0x96c] ss:$16 sps:$4 sm:$0xff]   ;;  %v24168_v1 = vld [vmem:[%s32836_s8 + $0x908] ss:$16 sps:$4 sm:$0xff]  }
 0xb42   :  { %v29974_v29 = vadd.f32 %v10172_v0, %v9410_v4  ;;  %v10133_v33 = vpop.f32.mrf.mxu1  ;;  %v24138_v4 = vld [vmem:[%s32836_s8 + $0x9a8] ss:$16 sps:$4 sm:$0xff]  }
 0xb43   :  { %v29976_v13 = vadd.f32 %v10133_v33, %v10093_v51  ;;  %v10174_v54 = vpop.f32.mrf.mxu0  ;;  %v24156_v51 = vld [vmem:[%s32836_s8 + $0x948] ss:$16 sps:$4 sm:$0xff]  }
 0xb44   :  { %v29978_v48 = vadd.f32 %v10174_v54, %v9412_v19  ;;  %v10135_v53 = vpop.f32.mrf.mxu1  ;;  %v24158_v19 = vld [vmem:[%s32836_s8 + $0x94c] ss:$16 sps:$4 sm:$0xff]   ;;  %v24171_v33 = vld [vmem:[%s32836_s8 + $0xae8] ss:$16 sps:$4 sm:$0xff]  }
 0xb45   :  { %v10176_v47 = vpop.f32.mrf.mxu0  ;;  %v24176_v53 = vld [vmem:[%s32836_s8 + $0xacc] ss:$16 sps:$4 sm:$0xff]  }
 0xb46   :  { %v10136_v27 = vpop.f32.mrf.mxu1 }
 0xb47   :  { %v10177_v7 = vpop.f32.mrf.mxu0  ;;  %v24221_v27 = vld [vmem:[%s32836_s8 + $0xce4] ss:$16 sps:$4 sm:$0xff]  }
 0xb48   :  { %v24174_v7 = vld [vmem:[%s32836_s8 + $0xac8] ss:$16 sps:$4 sm:$0xff]  }
 0xb49   :  { %v10259_v50 = vpop.f32.mrf.mxu0 }
 0xb4a   :  { %v29980_v39 = vpack.c.bf16 %v10259_v50, %v10259_v50  ;;  %v24177_v50 = vld [vmem:[%s32836_s8 + $0xaa8] ss:$16 sps:$4 sm:$0xff]  }
 0xb4b   :  { %v10261_v58 = vpop.f32.mrf.mxu0 }
 0xb4c   :  { %v10308_v44 = vpack.c.bf16 %v10261_v58, %v10261_v58  ;;  %v24219_v58 = vld [vmem:[%s32836_s8 + $0xce0] ss:$16 sps:$4 sm:$0xff]  }
 0xb4d   :  { %v10263_v10 = vpop.f32.mrf.mxu0 }
 0xb4e   :  { %11112 = vmatprep.mubr.bf16.mxu0 %v10308_v44  ;;  %v24222_v10 = vld [vmem:[%s32836_s8 + $0xcc0] ss:$16 sps:$4 sm:$0xff]  }
 0xb4f   :  { %11113 = vmatmul.mubr.bf16.vlgmr.msra.gmra.mxu0 %v29980_v39  ;;  %v10264_v5 = vpop.f32.mrf.mxu0 }
 0xb50   :  { %11163 = vmatpush1.bf16.msra.mxu0 %v24078_v41  ;;  %11194 = vmatprep.mubr.bf16.mxu0 %v10308_v44  ;;  %v24224_v44 = vld [vmem:[%s32836_s8 + $0xcc4] ss:$16 sps:$4 sm:$0xff]   ;;  %v24180_v41 = vld [vmem:[%s32836_s8 + $0xa88] ss:$16 sps:$4 sm:$0xff]  }
 0xb51   :  { %11164 = vmatprep.subr.bf16.mxu0 %v24086_v12  ;;  %v24185_v12 = vld [vmem:[%s32836_s8 + $0xa6c] ss:$16 sps:$4 sm:$0xff]   ;;  %v24227_v5 = vld [vmem:[%s32836_s8 + $0xca4] ss:$16 sps:$4 sm:$0xff]  }
 0xb54   :  { %11165 = vmatpush1.bf16.msra.mxu0 %v24084_v31  ;;  %v24183_v31 = vld [vmem:[%s32836_s8 + $0xa68] ss:$16 sps:$4 sm:$0xff]  }
 0xb55   :  { %11166 = vmatprep.subr.bf16.mxu0 %v24092_v35  ;;  %v24188_v35 = vld [vmem:[%s32836_s8 + $0xa4c] ss:$16 sps:$4 sm:$0xff]  }
 0xb58   :  { %11167 = vmatpush1.bf16.msra.mxu0 %v24090_v62  ;;  %v24225_v62 = vld [vmem:[%s32836_s8 + $0xca0] ss:$16 sps:$4 sm:$0xff]  }
 0xb59   :  { %11168 = vmatprep.subr.bf16.mxu0 %v24098_v59  ;;  %v24230_v59 = vld [vmem:[%s32836_s8 + $0xc84] ss:$16 sps:$4 sm:$0xff]  }
 0xb5c   :  { %11169 = vmatpush1.bf16.msra.mxu0 %v24096_v55  ;;  %v24186_v55 = vld [vmem:[%s32836_s8 + $0xa48] ss:$16 sps:$4 sm:$0xff]  }
 0xb5d   :  { %11170 = vmatprep.subr.bf16.mxu0 %v24104_v43  ;;  %v24191_v43 = vld [vmem:[%s32836_s8 + $0xa2c] ss:$16 sps:$4 sm:$0xff]  }
 0xb60   :  { %11171 = vmatpush1.bf16.msra.mxu0 %v24102_v21  ;;  %v24228_v21 = vld [vmem:[%s32836_s8 + $0xc80] ss:$16 sps:$4 sm:$0xff]  }
 0xb61   :  { %11172 = vmatprep.subr.bf16.mxu0 %v24110_v18  ;;  %v24233_v18 = vld [vmem:[%s32836_s8 + $0xc64] ss:$16 sps:$4 sm:$0xff]  }
 0xb64   :  { %11173 = vmatpush1.bf16.msra.mxu0 %v24108_v37  ;;  %v24189_v37 = vld [vmem:[%s32836_s8 + $0xa28] ss:$16 sps:$4 sm:$0xff]  }
 0xb65   :  { %11174 = vmatprep.subr.bf16.mxu0 %v24116_v6  ;;  %v24194_v6 = vld [vmem:[%s32836_s8 + $0xa0c] ss:$16 sps:$4 sm:$0xff]  }
 0xb68   :  { %11175 = vmatpush1.bf16.msra.mxu0 %v24114_v34  ;;  %v24231_v34 = vld [vmem:[%s32836_s8 + $0xc60] ss:$16 sps:$4 sm:$0xff]  }
 0xb69   :  { %11176 = vmatprep.subr.bf16.mxu0 %v24122_v23  ;;  %v24236_v23 = vld [vmem:[%s32836_s8 + $0xc44] ss:$16 sps:$4 sm:$0xff]  }
 0xb6c   :  { %11177 = vmatpush1.bf16.msra.mxu0 %v24120_v36  ;;  %v24192_v36 = vld [vmem:[%s32836_s8 + $0xa08] ss:$16 sps:$4 sm:$0xff]  }
 0xb6d   :  { %11178 = vmatprep.subr.bf16.mxu0 %v24128_v63  ;;  %v24197_v63 = vld [vmem:[%s32836_s8 + $0xbec] ss:$16 sps:$4 sm:$0xff]  }
 0xb70   :  { %11179 = vmatpush2.bf16.msra.mxu0 %v24126_v49  ;;  %v24234_v49 = vld [vmem:[%s32836_s8 + $0xc40] ss:$16 sps:$4 sm:$0xff]  }
 0xb71   :  { %11180 = vmatprep.subr.bf16.mxu0 %v24134_v22  ;;  %v24239_v22 = vld [vmem:[%s32836_s8 + $0xc24] ss:$16 sps:$4 sm:$0xff]  }
 0xb74   :  { %11181 = vmatpush2.bf16.msra.mxu0 %v24132_v3  ;;  %v24195_v3 = vld [vmem:[%s32836_s8 + $0xbe8] ss:$16 sps:$4 sm:$0xff]  }
 0xb75   :  { %11182 = vmatprep.subr.bf16.mxu0 %v24140_v15  ;;  %v24200_v15 = vld [vmem:[%s32836_s8 + $0xbcc] ss:$16 sps:$4 sm:$0xff]  }
 0xb78   :  { %11183 = vmatpush2.bf16.msra.mxu0 %v24138_v4  ;;  %v24237_v4 = vld [vmem:[%s32836_s8 + $0xc20] ss:$16 sps:$4 sm:$0xff]  }
 0xb79   :  { %11184 = vmatprep.subr.bf16.mxu0 %v24146_v42  ;;  %v24242_v42 = vld [vmem:[%s32836_s8 + $0xc04] ss:$16 sps:$4 sm:$0xff]  }
 0xb7c   :  { %11185 = vmatpush2.bf16.msra.mxu0 %v24144_v17  ;;  %v24198_v17 = vld [vmem:[%s32836_s8 + $0xbc8] ss:$16 sps:$4 sm:$0xff]  }
 0xb7d   :  { %11186 = vmatprep.subr.bf16.mxu0 %v24152_v38  ;;  %v24203_v38 = vld [vmem:[%s32836_s8 + $0xbac] ss:$16 sps:$4 sm:$0xff]  }
 0xb80   :  { %11187 = vmatpush2.bf16.msra.mxu0 %v24150_v9  ;;  %v10213_v14 = vpop.f32.mrf.mxu1  ;;  %v24240_v9 = vld [vmem:[%s32836_s8 + $0xc00] ss:$16 sps:$4 sm:$0xff]  }
 0xb81   :  { %v30065_v45 = vadd.f32 %v10213_v14, %v29974_v29  ;;  %11188 = vmatprep.subr.bf16.mxu0 %v24158_v19  ;;  %v24245_v19 = vld [vmem:[%s32836_s8 + $0xde4] ss:$16 sps:$4 sm:$0xff]   ;;  %v24201_v14 = vld [vmem:[%s32836_s8 + $0xba8] ss:$16 sps:$4 sm:$0xff]  }
 0xb82   :  { %v10215_v57 = vpop.f32.mrf.mxu1 }
 0xb83   :  { %v30071_v32 = vadd.f32 %v10215_v57, %v29978_v48  ;;  %v24248_v57 = vld [vmem:[%s32836_s8 + $0xdc4] ss:$16 sps:$4 sm:$0xff]  }
 0xb84   :  { %11189 = vmatpush2.bf16.msra.mxu0 %v24156_v51  ;;  %v10217_v8 = vpop.f32.mrf.mxu1  ;;  %v24206_v51 = vld [vmem:[%s32836_s8 + $0xb8c] ss:$16 sps:$4 sm:$0xff]  }
 0xb85   :  { %11190 = vmatprep.subr.bf16.mxu0 %v24164_v16  ;;  %v24243_v16 = vld [vmem:[%s32836_s8 + $0xde0] ss:$16 sps:$4 sm:$0xff]   ;;  %v24204_v8 = vld [vmem:[%s32836_s8 + $0xb88] ss:$16 sps:$4 sm:$0xff]  }
 0xb86   :  { %v10218_v56 = vpop.f32.mrf.mxu1 }
 0xb87   :  { %v24251_v56 = vld [vmem:[%s32836_s8 + $0xda4] ss:$16 sps:$4 sm:$0xff]  }
 0xb88   :  { %11191 = vmatpush2.bf16.msra.mxu0 %v24162_v24  ;;  %v10300_v20 = vpop.f32.mrf.mxu1  ;;  %v24209_v24 = vld [vmem:[%s32836_s8 + $0xb6c] ss:$16 sps:$4 sm:$0xff]  }
 0xb89   :  { %11192 = vmatprep.subr.bf16.mxu0 %v24170_v26  ;;  %v30085_v54 = vpack.c.bf16 %v10300_v20, %v10300_v20  ;;  %v24246_v26 = vld [vmem:[%s32836_s8 + $0xdc0] ss:$16 sps:$4 sm:$0xff]   ;;  %v24207_v20 = vld [vmem:[%s32836_s8 + $0xb68] ss:$16 sps:$4 sm:$0xff]  }
 0xb8a   :  { %v10302_v0 = vpop.f32.mrf.mxu1 }
 0xb8b   :  { %v10310_v29 = vpack.c.bf16 %v10302_v0, %v10302_v0  ;;  %v24249_v0 = vld [vmem:[%s32836_s8 + $0xda0] ss:$16 sps:$4 sm:$0xff]  }
 0xb8c   :  { %11193 = vmatpush2.bf16.msra.mxu0 %v24168_v1  ;;  %v10304_v48 = vpop.f32.mrf.mxu1  ;;  %v24212_v1 = vld [vmem:[%s32836_s8 + $0xb4c] ss:$16 sps:$4 sm:$0xff]  }
 0xb8d   :  { %11267 = vmatprep.subr.bf16.mxu0 %v28886_v46  ;;  %11153 = vmatprep.mubr.bf16.mxu1 %v10310_v29  ;;  %v24179_v46 = vld [vmem:[%s32836_s8 + $0xaac] ss:$16 sps:$4 sm:$0xff]  }
 0xb8e   :  { %v10305_v47 = vpop.f32.mrf.mxu1  ;;  %11154 = vmatmul.mubr.bf16.vlgmr.msra.gmra.mxu1 %v30085_v54  ;;  %v24215_v48 = vld [vmem:[%s32836_s8 + $0xb2c] ss:$16 sps:$4 sm:$0xff]  }
 0xb8f   :  { %11195 = vmatmul.mubr.bf16.vlgmr.msra.gmra.mxu0 %v29980_v39  ;;  %11204 = vmatpush1.bf16.msra.mxu1 %v24171_v33  ;;  %v30110_v39 = vld [vmem:[%s32835_s7 + $0xc] sm:$0xf]  ;;  %v24210_v33 = vld [vmem:[%s32836_s8 + $0xb48] ss:$16 sps:$4 sm:$0xff]   ;;  %v24257_v47 = vld [vmem:[%s32836_s8 + $0xd64] ss:$16 sps:$4 sm:$0xff]  }
 0xb90   :  { %11235 = vmatprep.mubr.bf16.mxu1 %v10310_v29  ;;  %11268 = vmatpush1.bf16.msra.mxu0 %v28884_v52  ;;  %v24182_v52 = vld [vmem:[%s32836_s8 + $0xa8c] ss:$16 sps:$4 sm:$0xff]   ;;  %v24254_v29 = vld [vmem:[%s32836_s8 + $0xd84] ss:$16 sps:$4 sm:$0xff]  }
 0xb91   :  { %11205 = vmatprep.subr.bf16.mxu1 %v24176_v53  ;;  %11285 = vmatprep.mubr.bf16.mxu0 %v25357_v2  ;;  %v24252_v53 = vld [vmem:[%s32836_s8 + $0xd80] ss:$16 sps:$4 sm:$0xff]  }
 0xb92   :  { %12108 = vmatprep.subr.bf16.mxu0 %v24221_v27  ;;  %v24213_v27 = vld [vmem:[%s32836_s8 + $0xb28] ss:$16 sps:$4 sm:$0xff]  }
 0xb93   :  { %11206 = vmatpush1.bf16.msra.mxu1 %v24174_v7  ;;  %v24218_v7 = vld [vmem:[%s32836_s8 + $0xb0c] ss:$16 sps:$4 sm:$0xff]  }
 0xb94   :  { %11207 = vmatprep.subr.bf16.mxu1 %v24179_v46  ;;  %v24255_v46 = vld [vmem:[%s32836_s8 + $0xd60] ss:$16 sps:$4 sm:$0xff]  }
 0xb97   :  { %11208 = vmatpush1.bf16.msra.mxu1 %v24177_v50  ;;  %20509 = vmatmul.mubr.msk.bf16.vlgmr.msra.gmra.mxu0 %vm8174_vm6, %v30110_v39  ;;  %v24216_v50 = vld [vmem:[%s32836_s8 + $0xb08] ss:$16 sps:$4 sm:$0xff]  }
 0xb98   :  { %11209 = vmatprep.subr.bf16.mxu1 %v24182_v52  ;;  %12109 = vmatpush1.bf16.msra.mxu0 %v24219_v58  ;;  %v24260_v52 = vld [vmem:[%s32836_s8 + $0xd44] ss:$16 sps:$4 sm:$0xff]   ;;  %v24258_v58 = vld [vmem:[%s32836_s8 + $0xd40] ss:$16 sps:$4 sm:$0xff]  }
 0xb99   :  { %12110 = vmatprep.subr.bf16.mxu0 %v24224_v44  ;;  %v24264_v44 = vld [vmem:[%s32836_s8 + $0xd00] ss:$16 sps:$4 sm:$0xff]  }
 0xb9b   :  { %11210 = vmatpush1.bf16.msra.mxu1 %v24180_v41  ;;  %v24269_v41 = vld [vmem:[%s32836_s8 + $0xee4] ss:$16 sps:$4 sm:$0xff]  }
 0xb9c   :  { %11211 = vmatprep.subr.bf16.mxu1 %v24185_v12  ;;  %12111 = vmatpush1.bf16.msra.mxu0 %v24222_v10  ;;  %v24267_v12 = vld [vmem:[%s32836_s8 + $0xee0] ss:$16 sps:$4 sm:$0xff]  }
 0xb9d   :  { %12112 = vmatprep.subr.bf16.mxu0 %v24227_v5  ;;  %v24273_v10 = vld [vmem:[%s32836_s8 + $0xec0] ss:$16 sps:$4 sm:$0xff]   ;;  %v24275_v5 = vld [vmem:[%s32836_s8 + $0xec4] ss:$16 sps:$4 sm:$0xff]  }
 0xb9f   :  { %11212 = vmatpush1.bf16.msra.mxu1 %v24183_v31  ;;  %v24279_v31 = vld [vmem:[%s32836_s8 + $0xea0] ss:$16 sps:$4 sm:$0xff]  }
 0xba0   :  { %11213 = vmatprep.subr.bf16.mxu1 %v24188_v35  ;;  %12113 = vmatpush1.bf16.msra.mxu0 %v24225_v62  ;;  %v24281_v35 = vld [vmem:[%s32836_s8 + $0xea4] ss:$16 sps:$4 sm:$0xff]   ;;  %v24285_v62 = vld [vmem:[%s32836_s8 + $0xe80] ss:$16 sps:$4 sm:$0xff]  }
 0xba1   :  { %12114 = vmatprep.subr.bf16.mxu0 %v24230_v59  ;;  %v24287_v59 = vld [vmem:[%s32836_s8 + $0xe84] ss:$16 sps:$4 sm:$0xff]  }
 0xba3   :  { %11214 = vmatpush1.bf16.msra.mxu1 %v24186_v55  ;;  %v24291_v55 = vld [vmem:[%s32836_s8 + $0xe60] ss:$16 sps:$4 sm:$0xff]  }
 0xba4   :  { %11215 = vmatprep.subr.bf16.mxu1 %v24191_v43  ;;  %12115 = vmatpush1.bf16.msra.mxu0 %v24228_v21  ;;  %v24293_v43 = vld [vmem:[%s32836_s8 + $0xe64] ss:$16 sps:$4 sm:$0xff]   ;;  %v24297_v21 = vld [vmem:[%s32836_s8 + $0xe40] ss:$16 sps:$4 sm:$0xff]  }
 0xba5   :  { %12116 = vmatprep.subr.bf16.mxu0 %v24233_v18  ;;  %v24299_v18 = vld [vmem:[%s32836_s8 + $0xe44] ss:$16 sps:$4 sm:$0xff]  }
 0xba7   :  { %11216 = vmatpush1.bf16.msra.mxu1 %v24189_v37  ;;  %v24303_v37 = vld [vmem:[%s32836_s8 + $0xe20] ss:$16 sps:$4 sm:$0xff]  }
 0xba8   :  { %11217 = vmatprep.subr.bf16.mxu1 %v24194_v6  ;;  %12117 = vmatpush1.bf16.msra.mxu0 %v24231_v34  ;;  %v24305_v6 = vld [vmem:[%s32836_s8 + $0xe24] ss:$16 sps:$4 sm:$0xff]   ;;  %v24309_v34 = vld [vmem:[%s32836_s8 + $0xe00] ss:$16 sps:$4 sm:$0xff]  }
 0xba9   :  { %12118 = vmatprep.subr.bf16.mxu0 %v24236_v23  ;;  %v24311_v23 = vld [vmem:[%s32836_s8 + $0xe04] ss:$16 sps:$4 sm:$0xff]  }
 0xbab   :  { %11218 = vmatpush1.bf16.msra.mxu1 %v24192_v36  ;;  %v24315_v36 = vld [vmem:[%s32836_s8 + $0xfe0] ss:$16 sps:$4 sm:$0xff]  }
 0xbac   :  { %11219 = vmatprep.subr.bf16.mxu1 %v24197_v63  ;;  %12119 = vmatpush1.bf16.msra.mxu0 %v24234_v49  ;;  %v24317_v63 = vld [vmem:[%s32836_s8 + $0xfe4] ss:$16 sps:$4 sm:$0xff]   ;;  %v24321_v49 = vld [vmem:[%s32836_s8 + $0xfc0] ss:$16 sps:$4 sm:$0xff]  }
 0xbad   :  { %12120 = vmatprep.subr.bf16.mxu0 %v24239_v22  ;;  %v24323_v22 = vld [vmem:[%s32836_s8 + $0xfc4] ss:$16 sps:$4 sm:$0xff]  }
 0xbaf   :  { %11220 = vmatpush2.bf16.msra.mxu1 %v24195_v3  ;;  %v24327_v3 = vld [vmem:[%s32836_s8 + $0xfa0] ss:$16 sps:$4 sm:$0xff]  }
 0xbb0   :  { %11221 = vmatprep.subr.bf16.mxu1 %v24200_v15  ;;  %12121 = vmatpush1.bf16.msra.mxu0 %v24237_v4  ;;  %v24329_v15 = vld [vmem:[%s32836_s8 + $0xfa4] ss:$16 sps:$4 sm:$0xff]   ;;  %v24333_v4 = vld [vmem:[%s32836_s8 + $0xf80] ss:$16 sps:$4 sm:$0xff]  }
 0xbb1   :  { %12122 = vmatprep.subr.bf16.mxu0 %v24242_v42  ;;  %v24335_v42 = vld [vmem:[%s32836_s8 + $0xf84] ss:$16 sps:$4 sm:$0xff]  }
 0xbb3   :  { %11222 = vmatpush2.bf16.msra.mxu1 %v24198_v17  ;;  %v24339_v17 = vld [vmem:[%s32836_s8 + $0xf60] ss:$16 sps:$4 sm:$0xff]  }
 0xbb4   :  { %11223 = vmatprep.subr.bf16.mxu1 %v24203_v38  ;;  %12123 = vmatpush1.bf16.msra.mxu0 %v24240_v9  ;;  %v24341_v38 = vld [vmem:[%s32836_s8 + $0xf64] ss:$16 sps:$4 sm:$0xff]  }
 0xbb5   :  { %12124 = vmatprep.subr.bf16.mxu0 %v24245_v19  ;;  %v24347_v9 = vld [vmem:[%s32836_s8 + $0xf44] ss:$16 sps:$4 sm:$0xff]  }
 0xbb7   :  { %11224 = vmatpush2.bf16.msra.mxu1 %v24201_v14  ;;  %v24345_v14 = vld [vmem:[%s32836_s8 + $0xf40] ss:$16 sps:$4 sm:$0xff]  }
 0xbb8   :  { %11225 = vmatprep.subr.bf16.mxu1 %v24206_v51  ;;  %12125 = vmatpush2.bf16.msra.mxu0 %v24243_v16  ;;  %v24353_v16 = vld [vmem:[%s32836_s8 + $0xf24] ss:$16 sps:$4 sm:$0xff]  }
 0xbb9   :  { %12126 = vmatprep.subr.bf16.mxu0 %v24248_v57 }
 0xbbb   :  { %11226 = vmatpush2.bf16.msra.mxu1 %v24204_v8  ;;  %v24351_v8 = vld [vmem:[%s32836_s8 + $0xf20] ss:$16 sps:$4 sm:$0xff]  }
 0xbbc   :  { %11227 = vmatprep.subr.bf16.mxu1 %v24209_v24  ;;  %12127 = vmatpush2.bf16.msra.mxu0 %v24246_v26  ;;  %v24359_v26 = vld [vmem:[%s32836_s8 + $0xf04] ss:$16 sps:$4 sm:$0xff]  }
 0xbbd   :  { %12128 = vmatprep.subr.bf16.mxu0 %v24251_v56  ;;  %v24357_v56 = vld [vmem:[%s32836_s8 + $0xf00] ss:$16 sps:$4 sm:$0xff]  }
 0xbbf   :  { %11228 = vmatpush2.bf16.msra.mxu1 %v24207_v20  ;;  %v24365_v20 = vld [vmem:[%s32836_s8 + $0xeec] ss:$16 sps:$4 sm:$0xff]  }
 0xbc0   :  { %11229 = vmatprep.subr.bf16.mxu1 %v24212_v1  ;;  %12129 = vmatpush2.bf16.msra.mxu0 %v24249_v0 }
 0xbc1   :  { %12130 = vmatprep.subr.bf16.mxu0 %v24254_v29 }
 0xbc3   :  { %11230 = vmatpush2.bf16.msra.mxu1 %v24210_v33 }
 0xbc4   :  { %11231 = vmatprep.subr.bf16.mxu1 %v24215_v48  ;;  %12131 = vmatpush2.bf16.msra.mxu0 %v24252_v53 }
 0xbc5   :  { %12132 = vmatprep.subr.bf16.mxu0 %v24257_v47 }
 0xbc7   :  { %11232 = vmatpush2.bf16.msra.mxu1 %v24213_v27 }
 0xbc8   :  { %11233 = vmatprep.subr.bf16.mxu1 %v24218_v7  ;;  %12133 = vmatpush2.bf16.msra.mxu0 %v24255_v46 }
 0xbc9   :  { %12134 = vmatprep.subr.bf16.mxu0 %v24260_v52 }
 0xbcb   :  { %11234 = vmatpush2.bf16.msra.mxu1 %v24216_v50 }
 0xbcc   :  { %11308 = vmatprep.subr.bf16.mxu1 %v29000_v30  ;;  %12135 = vmatpush2.bf16.msra.mxu0 %v24258_v58  ;;  %v24263_v30 = vld [vmem:[%s32836_s8 + $0xd24] ss:$16 sps:$4 sm:$0xff]  }
 0xbcd   :  { %12136 = vmatprep.subr.bf16.mxu0 %v24263_v30 }
 0xbce   :  { %11236 = vmatmul.mubr.bf16.vlgmr.msra.gmra.mxu1 %v30085_v54  ;;  %v24261_v54 = vld [vmem:[%s32836_s8 + $0xd20] ss:$16 sps:$4 sm:$0xff]  }
 0xbcf   :  { %11309 = vmatpush1.bf16.msra.mxu1 %v28998_v11  ;;  %11326 = vmatprep.mubr.bf16.mxu1 %v25357_v2  ;;  %v24266_v11 = vld [vmem:[%s32836_s8 + $0xd04] ss:$16 sps:$4 sm:$0xff]  }
 0xbd0   :  { %12137 = vmatpush2.bf16.msra.mxu0 %v24261_v54  ;;  %12149 = vmatprep.subr.bf16.mxu1 %v24269_v41 }
 0xbd1   :  { %12138 = vmatprep.subr.bf16.mxu0 %v24266_v11 }
 0xbd4   :  { %12139 = vmatpush2.bf16.msra.mxu0 %v24264_v44  ;;  %v24278_v44 = vld [vmem:[%s32836_s8 + $0xccc] ss:$16 sps:$4 sm:$0xff]  }
 0xbd6   :  { %20510 = vmatmul.mubr.msk.bf16.vlgmr.msra.gmra.mxu1 %vm8174_vm6, %v30110_v39  ;;  %v24272_v39 = vld [vmem:[%s32836_s8 + $0xcec] ss:$16 sps:$4 sm:$0xff]  }
 0xbd7   :  { %12150 = vmatpush1.bf16.msra.mxu1 %v24267_v12  ;;  %12190 = vmatprep.subr.bf16.mxu0 %v24272_v39  ;;  %v24276_v12 = vld [vmem:[%s32836_s8 + $0xcc8] ss:$16 sps:$4 sm:$0xff]   ;;  %v24284_v39 = vld [vmem:[%s32836_s8 + $0xcac] ss:$16 sps:$4 sm:$0xff]  }
 0xbd8   :  { %12151 = vmatprep.subr.bf16.mxu1 %v24275_v5  ;;  %v24290_v5 = vld [vmem:[%s32836_s8 + $0xc8c] ss:$16 sps:$4 sm:$0xff]  }
 0xbdb   :  { %12152 = vmatpush1.bf16.msra.mxu1 %v24273_v10  ;;  %v24282_v10 = vld [vmem:[%s32836_s8 + $0xca8] ss:$16 sps:$4 sm:$0xff]  }
 0xbdc   :  { %12153 = vmatprep.subr.bf16.mxu1 %v24281_v35  ;;  %v24296_v35 = vld [vmem:[%s32836_s8 + $0xc6c] ss:$16 sps:$4 sm:$0xff]  }
 0xbdf   :  { %12154 = vmatpush1.bf16.msra.mxu1 %v24279_v31  ;;  %v24288_v31 = vld [vmem:[%s32836_s8 + $0xc88] ss:$16 sps:$4 sm:$0xff]  }
 0xbe0   :  { %12155 = vmatprep.subr.bf16.mxu1 %v24287_v59  ;;  %v24302_v59 = vld [vmem:[%s32836_s8 + $0xc4c] ss:$16 sps:$4 sm:$0xff]  }
 0xbe3   :  { %12156 = vmatpush1.bf16.msra.mxu1 %v24285_v62  ;;  %v24294_v62 = vld [vmem:[%s32836_s8 + $0xc68] ss:$16 sps:$4 sm:$0xff]  }
 0xbe4   :  { %12157 = vmatprep.subr.bf16.mxu1 %v24293_v43  ;;  %v24308_v43 = vld [vmem:[%s32836_s8 + $0xc2c] ss:$16 sps:$4 sm:$0xff]  }
 0xbe7   :  { %12158 = vmatpush1.bf16.msra.mxu1 %v24291_v55  ;;  %v24300_v55 = vld [vmem:[%s32836_s8 + $0xc48] ss:$16 sps:$4 sm:$0xff]  }
 0xbe8   :  { %12159 = vmatprep.subr.bf16.mxu1 %v24299_v18  ;;  %v24314_v18 = vld [vmem:[%s32836_s8 + $0xc0c] ss:$16 sps:$4 sm:$0xff]  }
 0xbeb   :  { %12160 = vmatpush1.bf16.msra.mxu1 %v24297_v21  ;;  %v24306_v21 = vld [vmem:[%s32836_s8 + $0xc28] ss:$16 sps:$4 sm:$0xff]  }
 0xbec   :  { %12161 = vmatprep.subr.bf16.mxu1 %v24305_v6  ;;  %v24320_v6 = vld [vmem:[%s32836_s8 + $0xdec] ss:$16 sps:$4 sm:$0xff]  }
 0xbef   :  { %12162 = vmatpush1.bf16.msra.mxu1 %v24303_v37  ;;  %v24312_v37 = vld [vmem:[%s32836_s8 + $0xc08] ss:$16 sps:$4 sm:$0xff]  }
 0xbf0   :  { %12163 = vmatprep.subr.bf16.mxu1 %v24311_v23  ;;  %v24326_v23 = vld [vmem:[%s32836_s8 + $0xdcc] ss:$16 sps:$4 sm:$0xff]  }
 0xbf3   :  { %12164 = vmatpush1.bf16.msra.mxu1 %v24309_v34  ;;  %v24318_v34 = vld [vmem:[%s32836_s8 + $0xde8] ss:$16 sps:$4 sm:$0xff]  }
 0xbf4   :  { %12165 = vmatprep.subr.bf16.mxu1 %v24317_v63  ;;  %v24332_v63 = vld [vmem:[%s32836_s8 + $0xdac] ss:$16 sps:$4 sm:$0xff]  }
 0xbf7   :  { %12166 = vmatpush2.bf16.msra.mxu1 %v24315_v36  ;;  %v24324_v36 = vld [vmem:[%s32836_s8 + $0xdc8] ss:$16 sps:$4 sm:$0xff]  }
 0xbf8   :  { %12167 = vmatprep.subr.bf16.mxu1 %v24323_v22  ;;  %v24338_v22 = vld [vmem:[%s32836_s8 + $0xd8c] ss:$16 sps:$4 sm:$0xff]  }
 0xbfb   :  { %12168 = vmatpush2.bf16.msra.mxu1 %v24321_v49  ;;  %v24330_v49 = vld [vmem:[%s32836_s8 + $0xda8] ss:$16 sps:$4 sm:$0xff]  }
 0xbfc   :  { %12169 = vmatprep.subr.bf16.mxu1 %v24329_v15  ;;  %v24344_v15 = vld [vmem:[%s32836_s8 + $0xd6c] ss:$16 sps:$4 sm:$0xff]  }
 0xbff   :  { %12170 = vmatpush2.bf16.msra.mxu1 %v24327_v3  ;;  %v24336_v3 = vld [vmem:[%s32836_s8 + $0xd88] ss:$16 sps:$4 sm:$0xff]  }
 0xc00   :  { %12171 = vmatprep.subr.bf16.mxu1 %v24335_v42  ;;  %v24350_v42 = vld [vmem:[%s32836_s8 + $0xd4c] ss:$16 sps:$4 sm:$0xff]  }
 0xc03   :  { %12172 = vmatpush2.bf16.msra.mxu1 %v24333_v4  ;;  %v24342_v4 = vld [vmem:[%s32836_s8 + $0xd68] ss:$16 sps:$4 sm:$0xff]  }
 0xc04   :  { %12173 = vmatprep.subr.bf16.mxu1 %v24341_v38  ;;  %v24348_v38 = vld [vmem:[%s32836_s8 + $0xd48] ss:$16 sps:$4 sm:$0xff]  }
 0xc07   :  { %12174 = vmatpush2.bf16.msra.mxu1 %v24339_v17 }
 0xc08   :  { %12175 = vmatprep.subr.bf16.mxu1 %v24347_v9 }
 0xc0b   :  { %12176 = vmatpush2.bf16.msra.mxu1 %v24345_v14 }
 0xc0c   :  { %12177 = vmatprep.subr.bf16.mxu1 %v24353_v16 }
 0xc0f   :  { %v11114_v19 = vpop.f32.mrf.mxu0  ;;  %12178 = vmatpush2.bf16.msra.mxu1 %v24351_v8  ;;  %v24354_v8 = vld [vmem:[%s32836_s8 + $0xd28] ss:$16 sps:$4 sm:$0xff]  }
 0xc10   :  { %12179 = vmatprep.subr.bf16.mxu1 %v24359_v26  ;;  %v24362_v26 = vld [vmem:[%s32836_s8 + $0xd0c] ss:$16 sps:$4 sm:$0xff]  }
 0xc11   :  { %v11116_v51 = vpop.f32.mrf.mxu0 }
 0xc13   :  { %v11118_v57 = vpop.f32.mrf.mxu0  ;;  %12180 = vmatpush2.bf16.msra.mxu1 %v24357_v56 }
 0xc14   :  { %12231 = vmatprep.subr.bf16.mxu1 %v24365_v20  ;;  %v24360_v20 = vld [vmem:[%s32836_s8 + $0xd08] ss:$16 sps:$4 sm:$0xff]  }
 0xc15   :  { %v11119_v24 = vpop.f32.mrf.mxu0 }
 0xc4e   :  { %v11155_v1 = vpop.f32.mrf.mxu1 }
 0xc4f   :  { %v11156_v0 = vadd.f32 %v11155_v1, %v11114_v19  ;;  %v30393_v29 = vpop.f32.mrf.mxu0  ;;  %v24356_v19 = vld [vmem:[%s32836_s8 + $0xd2c] ss:$16 sps:$4 sm:$0xff]  }
 0xc50   :  { %v11157_v33 = vpop.f32.mrf.mxu1 }
 0xc51   :  { %v30396_v48 = vadd.f32 %v11156_v0, %v29972_v28  ;;  %v11158_v53 = vadd.f32 %v11157_v33, %v11116_v51  ;;  %v30398_v47 = vpop.f32.mrf.mxu0  ;;  %v24270_v28 = vld [vmem:[%s32836_s8 + $0xce8] ss:$16 sps:$4 sm:$0xff]  }
 0xc52   :  { %v11159_v27 = vpop.f32.mrf.mxu1 }
 0xc53   :  { %v30401_v7 = vadd.f32 %v11158_v53, %v29976_v13  ;;  %v11200_v46 = vpop.f32.mrf.mxu0  ;;  %v24368_v53 = vld [vmem:[%s32836_s8 + $0xecc] ss:$16 sps:$4 sm:$0xff]   ;;  %v24366_v27 = vld [vmem:[%s32836_s8 + $0xec8] ss:$16 sps:$4 sm:$0xff]  }
 0xc54   :  { %v11160_v50 = vpop.f32.mrf.mxu1  ;;  %v24371_v46 = vld [vmem:[%s32836_s8 + $0xeac] ss:$16 sps:$4 sm:$0xff]  }
 0xc55   :  { %v11201_v52 = vpop.f32.mrf.mxu0  ;;  %v24369_v50 = vld [vmem:[%s32836_s8 + $0xea8] ss:$16 sps:$4 sm:$0xff]  }
 0xc56   :  { %v24374_v52 = vld [vmem:[%s32836_s8 + $0xe8c] ss:$16 sps:$4 sm:$0xff]  }
 0xc57   :  { %v11287_v58 = vpop.f32.mrf.mxu0 }
 0xc58   :  { %v30403_v30 = vpack.c.bf16 %v11287_v58, %v11287_v58  ;;  %v24372_v58 = vld [vmem:[%s32836_s8 + $0xe88] ss:$16 sps:$4 sm:$0xff]  }
 0xc59   :  { %v11289_v54 = vpop.f32.mrf.mxu0 }
 0xc5a   :  { %v11336_v11 = vpack.c.bf16 %v11289_v54, %v11289_v54  ;;  %v24375_v54 = vld [vmem:[%s32836_s8 + $0xe68] ss:$16 sps:$4 sm:$0xff]  }
 0xc5b   :  { %v11291_v41 = vpop.f32.mrf.mxu0 }
 0xc5c   :  { %12140 = vmatprep.mubr.bf16.mxu0 %v11336_v11  ;;  %v24381_v41 = vld [vmem:[%s32836_s8 + $0xe28] ss:$16 sps:$4 sm:$0xff]  }
 0xc5d   :  { %12141 = vmatmul.mubr.bf16.vlgmr.msra.gmra.mxu0 %v30403_v30  ;;  %v11292_v13 = vpop.f32.mrf.mxu0 }
 0xc5e   :  { %12191 = vmatpush1.bf16.msra.mxu0 %v24270_v28  ;;  %12222 = vmatprep.mubr.bf16.mxu0 %v11336_v11  ;;  %v24380_v11 = vld [vmem:[%s32836_s8 + $0xe4c] ss:$16 sps:$4 sm:$0xff]   ;;  %v24378_v28 = vld [vmem:[%s32836_s8 + $0xe48] ss:$16 sps:$4 sm:$0xff]  }
 0xc5f   :  { %12192 = vmatprep.subr.bf16.mxu0 %v24278_v44  ;;  %v24383_v44 = vld [vmem:[%s32836_s8 + $0xe2c] ss:$16 sps:$4 sm:$0xff]  }
 0xc60   :  { %v24386_v13 = vld [vmem:[%s32836_s8 + $0xe0c] ss:$16 sps:$4 sm:$0xff]  }
 0xc62   :  { %12193 = vmatpush1.bf16.msra.mxu0 %v24276_v12  ;;  %v24384_v12 = vld [vmem:[%s32836_s8 + $0xe08] ss:$16 sps:$4 sm:$0xff]  }
 0xc63   :  { %12194 = vmatprep.subr.bf16.mxu0 %v24284_v39  ;;  %v24389_v39 = vld [vmem:[%s32836_s8 + $0xfec] ss:$16 sps:$4 sm:$0xff]  }
 0xc66   :  { %12195 = vmatpush1.bf16.msra.mxu0 %v24282_v10  ;;  %v24387_v10 = vld [vmem:[%s32836_s8 + $0xfe8] ss:$16 sps:$4 sm:$0xff]  }
 0xc67   :  { %12196 = vmatprep.subr.bf16.mxu0 %v24290_v5  ;;  %v24392_v5 = vld [vmem:[%s32836_s8 + $0xfcc] ss:$16 sps:$4 sm:$0xff]  }
 0xc6a   :  { %12197 = vmatpush1.bf16.msra.mxu0 %v24288_v31  ;;  %v24390_v31 = vld [vmem:[%s32836_s8 + $0xfc8] ss:$16 sps:$4 sm:$0xff]  }
 0xc6b   :  { %12198 = vmatprep.subr.bf16.mxu0 %v24296_v35  ;;  %v24395_v35 = vld [vmem:[%s32836_s8 + $0xfac] ss:$16 sps:$4 sm:$0xff]  }
 0xc6e   :  { %12199 = vmatpush1.bf16.msra.mxu0 %v24294_v62  ;;  %v24393_v62 = vld [vmem:[%s32836_s8 + $0xfa8] ss:$16 sps:$4 sm:$0xff]  }
 0xc6f   :  { %12200 = vmatprep.subr.bf16.mxu0 %v24302_v59  ;;  %v24398_v59 = vld [vmem:[%s32836_s8 + $0xf8c] ss:$16 sps:$4 sm:$0xff]  }
 0xc72   :  { %12201 = vmatpush1.bf16.msra.mxu0 %v24300_v55  ;;  %v24396_v55 = vld [vmem:[%s32836_s8 + $0xf88] ss:$16 sps:$4 sm:$0xff]  }
 0xc73   :  { %12202 = vmatprep.subr.bf16.mxu0 %v24308_v43  ;;  %v24401_v43 = vld [vmem:[%s32836_s8 + $0xf6c] ss:$16 sps:$4 sm:$0xff]  }
 0xc76   :  { %12203 = vmatpush1.bf16.msra.mxu0 %v24306_v21  ;;  %v24399_v21 = vld [vmem:[%s32836_s8 + $0xf68] ss:$16 sps:$4 sm:$0xff]  }
 0xc77   :  { %12204 = vmatprep.subr.bf16.mxu0 %v24314_v18  ;;  %v24404_v18 = vld [vmem:[%s32836_s8 + $0xf4c] ss:$16 sps:$4 sm:$0xff]  }
 0xc7a   :  { %12205 = vmatpush1.bf16.msra.mxu0 %v24312_v37  ;;  %v24402_v37 = vld [vmem:[%s32836_s8 + $0xf48] ss:$16 sps:$4 sm:$0xff]  }
 0xc7b   :  { %12206 = vmatprep.subr.bf16.mxu0 %v24320_v6  ;;  %v24407_v6 = vld [vmem:[%s32836_s8 + $0xf2c] ss:$16 sps:$4 sm:$0xff]  }
 0xc7e   :  { %12207 = vmatpush2.bf16.msra.mxu0 %v24318_v34  ;;  %v24405_v34 = vld [vmem:[%s32836_s8 + $0xf28] ss:$16 sps:$4 sm:$0xff]  }
 0xc7f   :  { %12208 = vmatprep.subr.bf16.mxu0 %v24326_v23  ;;  %v24410_v23 = vld [vmem:[%s32836_s8 + $0xf0c] ss:$16 sps:$4 sm:$0xff]  }
 0xc82   :  { %12209 = vmatpush2.bf16.msra.mxu0 %v24324_v36  ;;  %v24408_v36 = vld [vmem:[%s32836_s8 + $0xf08] ss:$16 sps:$4 sm:$0xff]  }
 0xc83   :  { %12210 = vmatprep.subr.bf16.mxu0 %v24332_v63 }
 0xc86   :  { %12211 = vmatpush2.bf16.msra.mxu0 %v24330_v49 }
 0xc87   :  { %12212 = vmatprep.subr.bf16.mxu0 %v24338_v22 }
 0xc8a   :  { %12213 = vmatpush2.bf16.msra.mxu0 %v24336_v3 }
 0xc8b   :  { %12214 = vmatprep.subr.bf16.mxu0 %v24344_v15  ;;  %v30610_v15 = vld [vmem:[%s32837_s9] sm:$0xf] }
 0xc8e   :  { %12215 = vmatpush2.bf16.msra.mxu0 %v24342_v4  ;;  %v11237_v17 = vpop.f32.mrf.mxu1 }
 0xc8f   :  { %v11238_v9 = vadd.f32 %v11237_v17, %v30393_v29  ;;  %12216 = vmatprep.subr.bf16.mxu0 %v24350_v42  ;;  %v12281_v17 = vrot.slane %v30610_v15, %v27037_v25 }
 0xc90   :  { %v11239_v14 = vpop.f32.mrf.mxu1 }
 0xc91   :  { %v30492_v51 = vadd.f32 %v11238_v9, %v30065_v45  ;;  %v11240_v16 = vadd.f32 %v11239_v14, %v30398_v47 }
 0xc92   :  { %12217 = vmatpush2.bf16.msra.mxu0 %v24348_v38  ;;  %v11241_v57 = vpop.f32.mrf.mxu1 }
 0xc93   :  { %v30499_v24 = vadd.f32 %v11240_v16, %v30071_v32  ;;  %12218 = vmatprep.subr.bf16.mxu0 %v24356_v19  ;;  %v24363_v32 = vld [vmem:[%s32836_s8 + $0xee8] ss:$16 sps:$4 sm:$0xff]   ;;  %v12285_v16 = vrot.slane %v30610_v15, %v27058_v40 }
 0xc94   :  { %v11242_v56 = vpop.f32.mrf.mxu1 }
 0xc96   :  { %12219 = vmatpush2.bf16.msra.mxu0 %v24354_v8  ;;  %v11328_v45 = vpop.f32.mrf.mxu1 }
 0xc97   :  { %12220 = vmatprep.subr.bf16.mxu0 %v24362_v26  ;;  %v30510_v29 = vpack.c.bf16 %v11328_v45, %v11328_v45 }
 0xc98   :  { %v11330_v1 = vpop.f32.mrf.mxu1 }
 0xc99   :  { %v11338_v0 = vpack.c.bf16 %v11330_v1, %v11330_v1 }
 0xc9a   :  { %12221 = vmatpush2.bf16.msra.mxu0 %v24360_v20  ;;  %v11332_v33 = vpop.f32.mrf.mxu1 }
 0xc9b   :  { %12181 = vmatprep.mubr.bf16.mxu1 %v11338_v0 }
 0xc9c   :  { %v11333_v47 = vpop.f32.mrf.mxu1  ;;  %12182 = vmatmul.mubr.bf16.vlgmr.msra.gmra.mxu1 %v30510_v29 }
 0xc9d   :  { %12223 = vmatmul.mubr.bf16.vlgmr.msra.gmra.mxu0 %v30403_v30  ;;  %12232 = vmatpush1.bf16.msra.mxu1 %v24363_v32  ;;  %v24377_v30 = vld [vmem:[%s32836_s8 + $0xe6c] ss:$16 sps:$4 sm:$0xff]  }
 0xc9e   :  { %12263 = vmatprep.mubr.bf16.mxu1 %v11338_v0  ;;  %12233 = vmatprep.subr.bf16.mxu1 %v24368_v53 }
 0xc9f   :  { %12368 = vmatprep.mubr.bf16.mxu0 %v25357_v2 }
 0xca1   :  { %12234 = vmatpush1.bf16.msra.mxu1 %v24366_v27 }
 0xca2   :  { %12235 = vmatprep.subr.bf16.mxu1 %v24371_v46  ;;  %v24413_v46 = vld [vmem:[%s32839_s11 + $0x4e4] ss:$16 sps:$4 sm:$0xff]  }
 0xca5   :  { %12236 = vmatpush1.bf16.msra.mxu1 %v24369_v50  ;;  %v30647_v50 = vld [vmem:[%s32838_s10 + $0x2] sm:$0x3] }
 0xca6   :  { %12237 = vmatprep.subr.bf16.mxu1 %v24374_v52  ;;  %v24411_v52 = vld [vmem:[%s32839_s11 + $0x4e0] ss:$16 sps:$4 sm:$0xff]  }
 0xca9   :  { %12238 = vmatpush1.bf16.msra.mxu1 %v24372_v58  ;;  %v24416_v58 = vld [vmem:[%s32839_s11 + $0x4c4] ss:$16 sps:$4 sm:$0xff]  }
 0xcaa   :  { %12239 = vmatprep.subr.bf16.mxu1 %v24377_v30  ;;  %v24414_v30 = vld [vmem:[%s32839_s11 + $0x4c0] ss:$16 sps:$4 sm:$0xff]  }
 0xcad   :  { %12240 = vmatpush1.bf16.msra.mxu1 %v24375_v54  ;;  %v24419_v54 = vld [vmem:[%s32839_s11 + $0x4a4] ss:$16 sps:$4 sm:$0xff]  }
 0xcae   :  { %12241 = vmatprep.subr.bf16.mxu1 %v24380_v11  ;;  %v24417_v11 = vld [vmem:[%s32839_s11 + $0x4a0] ss:$16 sps:$4 sm:$0xff]  }
 0xcb1   :  { %12242 = vmatpush1.bf16.msra.mxu1 %v24378_v28  ;;  %v24422_v28 = vld [vmem:[%s32839_s11 + $0x484] ss:$16 sps:$4 sm:$0xff]  }
 0xcb2   :  { %12243 = vmatprep.subr.bf16.mxu1 %v24383_v44  ;;  %v24420_v44 = vld [vmem:[%s32839_s11 + $0x480] ss:$16 sps:$4 sm:$0xff]  }
 0xcb5   :  { %12244 = vmatpush1.bf16.msra.mxu1 %v24381_v41  ;;  %v24425_v41 = vld [vmem:[%s32839_s11 + $0x464] ss:$16 sps:$4 sm:$0xff]  }
 0xcb6   :  { %12245 = vmatprep.subr.bf16.mxu1 %v24386_v13  ;;  %v24423_v13 = vld [vmem:[%s32839_s11 + $0x460] ss:$16 sps:$4 sm:$0xff]  }
 0xcb9   :  { %12246 = vmatpush1.bf16.msra.mxu1 %v24384_v12  ;;  %v24428_v12 = vld [vmem:[%s32839_s11 + $0x444] ss:$16 sps:$4 sm:$0xff]  }
 0xcba   :  { %12247 = vmatprep.subr.bf16.mxu1 %v24389_v39  ;;  %v24426_v39 = vld [vmem:[%s32839_s11 + $0x440] ss:$16 sps:$4 sm:$0xff]  }
 0xcbd   :  { %12248 = vmatpush2.bf16.msra.mxu1 %v24387_v10  ;;  %v24431_v10 = vld [vmem:[%s32839_s11 + $0x424] ss:$16 sps:$4 sm:$0xff]  }
 0xcbe   :  { %12249 = vmatprep.subr.bf16.mxu1 %v24392_v5  ;;  %v24429_v5 = vld [vmem:[%s32839_s11 + $0x420] ss:$16 sps:$4 sm:$0xff]  }
 0xcc1   :  { %12250 = vmatpush2.bf16.msra.mxu1 %v24390_v31  ;;  %v24434_v31 = vld [vmem:[%s32839_s11 + $0x404] ss:$16 sps:$4 sm:$0xff]  }
 0xcc2   :  { %12251 = vmatprep.subr.bf16.mxu1 %v24395_v35  ;;  %v24432_v35 = vld [vmem:[%s32839_s11 + $0x400] ss:$16 sps:$4 sm:$0xff]  }
 0xcc5   :  { %12252 = vmatpush2.bf16.msra.mxu1 %v24393_v62  ;;  %v24437_v62 = vld [vmem:[%s32839_s11 + $0x5e4] ss:$16 sps:$4 sm:$0xff]  }
 0xcc6   :  { %12253 = vmatprep.subr.bf16.mxu1 %v24398_v59  ;;  %v24435_v59 = vld [vmem:[%s32839_s11 + $0x5e0] ss:$16 sps:$4 sm:$0xff]  }
 0xcc9   :  { %12254 = vmatpush2.bf16.msra.mxu1 %v24396_v55  ;;  %v24440_v55 = vld [vmem:[%s32839_s11 + $0x5c4] ss:$16 sps:$4 sm:$0xff]  }
 0xcca   :  { %12255 = vmatprep.subr.bf16.mxu1 %v24401_v43  ;;  %v24438_v43 = vld [vmem:[%s32839_s11 + $0x5c0] ss:$16 sps:$4 sm:$0xff]  }
 0xccd   :  { %12256 = vmatpush2.bf16.msra.mxu1 %v24399_v21  ;;  %v24443_v21 = vld [vmem:[%s32839_s11 + $0x5a4] ss:$16 sps:$4 sm:$0xff]  }
 0xcce   :  { %12257 = vmatprep.subr.bf16.mxu1 %v24404_v18  ;;  %v24441_v18 = vld [vmem:[%s32839_s11 + $0x5a0] ss:$16 sps:$4 sm:$0xff]  }
 0xcd1   :  { %12258 = vmatpush2.bf16.msra.mxu1 %v24402_v37 }
 0xcd2   :  { %12259 = vmatprep.subr.bf16.mxu1 %v24407_v6  ;;  %v24446_v6 = vld [vmem:[%s32839_s11 + $0x584] ss:$16 sps:$4 sm:$0xff]  }
 0xcd5   :  { %12260 = vmatpush2.bf16.msra.mxu1 %v24405_v34 }
 0xcd6   :  { %12261 = vmatprep.subr.bf16.mxu1 %v24410_v23  ;;  %v12289_v23 = vrot.slane %v30610_v15, %v27138_v60 }
 0xcd9   :  { %12262 = vmatpush2.bf16.msra.mxu1 %v24408_v36 }
 0xcdc   :  { %12264 = vmatmul.mubr.bf16.vlgmr.msra.gmra.mxu1 %v30510_v29 }
 0xcdd   :  { %12409 = vmatprep.mubr.bf16.mxu1 %v25357_v2 }
 0xd1d   :  { %v12142_v63 = vpop.f32.mrf.mxu0 }
 0xd1f   :  { %v12144_v49 = vpop.f32.mrf.mxu0 }
 0xd21   :  { %v12146_v22 = vpop.f32.mrf.mxu0 }
 0xd22   :  { %v12293_v22 = vrot.slane %v30610_v15, %v27179_v61  ;;  %v24447_v15 = vld [vmem:[%s32839_s11 + $0x560] ss:$16 sps:$4 sm:$0xff]  }
 0xd23   :  { %v12147_v3 = vpop.f32.mrf.mxu0 }
 0xd24   :  { %v24444_v3 = vld [vmem:[%s32839_s11 + $0x580] ss:$16 sps:$4 sm:$0xff]  }
 0xd5c   :  { %v12183_v4 = vpop.f32.mrf.mxu1 }
 0xd5d   :  { %v12184_v42 = vadd.f32 %v12183_v4, %v12142_v63  ;;  %v30614_v38 = vpop.f32.mrf.mxu0 }
 0xd5e   :  { %v12185_v9 = vpop.f32.mrf.mxu1 }
 0xd5f   :  { %v12272_v19 = vadd.f32 %v12184_v42, %v30396_v48  ;;  %v12186_v14 = vadd.f32 %v12185_v9, %v12144_v49  ;;  %v30619_v57 = vpop.f32.mrf.mxu0  ;;  %v24449_v42 = vld [vmem:[%s32839_s11 + $0x564] ss:$16 sps:$4 sm:$0xff]  }
 0xd60   :  { %v12187_v8 = vpop.f32.mrf.mxu1 }
 0xd61   :  { %v12298_v26 = vadd.f32 %v12281_v17, %v12272_v19  ;;  %v12273_v56 = vadd.f32 %v12186_v14, %v30401_v7  ;;  %v12228_v45 = vpop.f32.mrf.mxu0  ;;  %v30633_v7 = vld [vmem:[%s32838_s10] sm:$0x3] }
 0xd62   :  { %v12188_v20 = vpop.f32.mrf.mxu1  ;;  %v24450_v45 = vld [vmem:[%s32839_s11 + $0x540] ss:$16 sps:$4 sm:$0xff]  }
 0xd63   :  { %v12306_v1 = vmul.f32 0.2, %v12298_v26  ;;  %v12299_v0 = vadd.f32 %v12285_v16, %v12273_v56  ;;  %v12229_v32 = vpop.f32.mrf.mxu0  ;;  %vm12302_vm11 = vcmp.ge.f32.partialorder %v12298_v26, 0.0  ;;  %v24452_v56 = vld [vmem:[%s32839_s11 + $0x544] ss:$16 sps:$4 sm:$0xff]  }
 0xd64   :  { %v24453_v20 = vld [vmem:[%s32839_s11 + $0x520] ss:$16 sps:$4 sm:$0xff]  }
 0xd65   :  { %vm12303_vm12 = vcmp.ge.f32.partialorder %v12299_v0, 0.0  ;;  %v12307_v29 = vmul.f32 0.2, %v12299_v0  ;;  %v12310_v33 = vsel %vm12302_vm11, %v12298_v26, %v12306_v1  ;;  %v24455_v1 = vld [vmem:[%s32839_s11 + $0x524] ss:$16 sps:$4 sm:$0xff]  }
 0xd66   :  { %v12314_v48 = vpack.c.bf16 %v12310_v33, %v12310_v33  ;;  %v24456_v32 = vld [vmem:[%s32839_s11 + $0x500] ss:$16 sps:$4 sm:$0xff]   ;;  %v24461_v33 = vld [vmem:[%s32839_s11 + $0x6e4] ss:$16 sps:$4 sm:$0xff]  }
 0xd67   :  { %v12311_v53 = vsel %vm12303_vm12, %v12299_v0, %v12307_v29  ;;  %v24458_v0 = vld [vmem:[%s32839_s11 + $0x504] ss:$16 sps:$4 sm:$0xff]   ;;  %v24459_v29 = vld [vmem:[%s32839_s11 + $0x6e0] ss:$16 sps:$4 sm:$0xff]  }
 0xd68   :  { %v30622_v47 = vpack.c.bf16 %v12311_v53, %v12311_v53  ;;  %v30627_v27 = vsel %vm12323_vm13, %v12314_v48, 0  ;;  %v24464_v48 = vld [vmem:[%s32839_s11 + $0x4ec] ss:$16 sps:$4 sm:$0xff]   ;;  %v24465_v53 = vld [vmem:[%s32839_s11 + $0x6c0] ss:$16 sps:$4 sm:$0xff]  }
 0xd6a   :  { %20767 = vmatprep.subr.msk.bf16.mxu0 %vm12323_vm13, %v30622_v47 }
 0xd6b   :  { %12351 = vmatpush1.bf16.msra.mxu0 %v30627_v27 }
 0xd6c   :  { %20772 = vmatprep.subr.msk.bf16.mxu0 %vm12323_vm13, %v30622_v47 }
 0xd6e   :  { %20768 = vmatmul.mubr.msk.bf16.vlgmr.msra.gmra.mxu0 %vm12319_vm14, %v30633_v7 }
 0xd6f   :  { %12570 = vmatpush1.bf16.msra.mxu0 %v30627_v27  ;;  %12587 = vmatprep.mubr.bf16.mxu0 %v25357_v2 }
 0xd70   :  { %13410 = vmatprep.subr.bf16.mxu0 %v24413_v46  ;;  %v24471_v46 = vld [vmem:[%s32839_s11 + $0x6a0] ss:$16 sps:$4 sm:$0xff]  }
 0xd76   :  { %20773 = vmatmul.mubr.msk.bf16.vlgmr.msra.gmra.mxu0 %vm12319_vm14, %v30647_v50 }
 0xd77   :  { %13411 = vmatpush1.bf16.msra.mxu0 %v24411_v52  ;;  %v24477_v52 = vld [vmem:[%s32839_s11 + $0x680] ss:$16 sps:$4 sm:$0xff]  }
 0xd78   :  { %13412 = vmatprep.subr.bf16.mxu0 %v24416_v58  ;;  %v24479_v58 = vld [vmem:[%s32839_s11 + $0x684] ss:$16 sps:$4 sm:$0xff]  }
 0xd7b   :  { %13413 = vmatpush1.bf16.msra.mxu0 %v24414_v30  ;;  %v24483_v30 = vld [vmem:[%s32839_s11 + $0x660] ss:$16 sps:$4 sm:$0xff]  }
 0xd7c   :  { %13414 = vmatprep.subr.bf16.mxu0 %v24419_v54  ;;  %v24485_v54 = vld [vmem:[%s32839_s11 + $0x664] ss:$16 sps:$4 sm:$0xff]  }
 0xd7f   :  { %13415 = vmatpush1.bf16.msra.mxu0 %v24417_v11  ;;  %v24489_v11 = vld [vmem:[%s32839_s11 + $0x640] ss:$16 sps:$4 sm:$0xff]  }
 0xd80   :  { %13416 = vmatprep.subr.bf16.mxu0 %v24422_v28  ;;  %v24491_v28 = vld [vmem:[%s32839_s11 + $0x644] ss:$16 sps:$4 sm:$0xff]  }
 0xd83   :  { %13417 = vmatpush1.bf16.msra.mxu0 %v24420_v44  ;;  %v24495_v44 = vld [vmem:[%s32839_s11 + $0x620] ss:$16 sps:$4 sm:$0xff]  }
 0xd84   :  { %13418 = vmatprep.subr.bf16.mxu0 %v24425_v41  ;;  %v24497_v41 = vld [vmem:[%s32839_s11 + $0x624] ss:$16 sps:$4 sm:$0xff]  }
 0xd87   :  { %13419 = vmatpush1.bf16.msra.mxu0 %v24423_v13  ;;  %v24501_v13 = vld [vmem:[%s32839_s11 + $0x600] ss:$16 sps:$4 sm:$0xff]  }
 0xd88   :  { %13420 = vmatprep.subr.bf16.mxu0 %v24428_v12  ;;  %v24503_v12 = vld [vmem:[%s32839_s11 + $0x604] ss:$16 sps:$4 sm:$0xff]  }
 0xd8b   :  { %13421 = vmatpush1.bf16.msra.mxu0 %v24426_v39  ;;  %v24507_v39 = vld [vmem:[%s32839_s11 + $0x7e0] ss:$16 sps:$4 sm:$0xff]  }
 0xd8c   :  { %13422 = vmatprep.subr.bf16.mxu0 %v24431_v10  ;;  %v24509_v10 = vld [vmem:[%s32839_s11 + $0x7e4] ss:$16 sps:$4 sm:$0xff]  }
 0xd8f   :  { %13423 = vmatpush1.bf16.msra.mxu0 %v24429_v5  ;;  %v24513_v5 = vld [vmem:[%s32839_s11 + $0x7c0] ss:$16 sps:$4 sm:$0xff]  }
 0xd90   :  { %13424 = vmatprep.subr.bf16.mxu0 %v24434_v31  ;;  %v24515_v31 = vld [vmem:[%s32839_s11 + $0x7c4] ss:$16 sps:$4 sm:$0xff]  }
 0xd93   :  { %13425 = vmatpush1.bf16.msra.mxu0 %v24432_v35  ;;  %v24519_v35 = vld [vmem:[%s32839_s11 + $0x7a0] ss:$16 sps:$4 sm:$0xff]  }
 0xd94   :  { %13426 = vmatprep.subr.bf16.mxu0 %v24437_v62  ;;  %v24521_v62 = vld [vmem:[%s32839_s11 + $0x7a4] ss:$16 sps:$4 sm:$0xff]  }
 0xd97   :  { %13427 = vmatpush2.bf16.msra.mxu0 %v24435_v59  ;;  %v24525_v59 = vld [vmem:[%s32839_s11 + $0x780] ss:$16 sps:$4 sm:$0xff]  }
 0xd98   :  { %13428 = vmatprep.subr.bf16.mxu0 %v24440_v55  ;;  %v24527_v55 = vld [vmem:[%s32839_s11 + $0x784] ss:$16 sps:$4 sm:$0xff]  }
 0xd9b   :  { %13429 = vmatpush2.bf16.msra.mxu0 %v24438_v43  ;;  %v24531_v43 = vld [vmem:[%s32839_s11 + $0x760] ss:$16 sps:$4 sm:$0xff]  }
 0xd9c   :  { %v12265_v37 = vpop.f32.mrf.mxu1  ;;  %13430 = vmatprep.subr.bf16.mxu0 %v24443_v21  ;;  %v24533_v21 = vld [vmem:[%s32839_s11 + $0x764] ss:$16 sps:$4 sm:$0xff]  }
 0xd9d   :  { %v12266_v34 = vadd.f32 %v12265_v37, %v30614_v38  ;;  %v24537_v37 = vld [vmem:[%s32839_s11 + $0x740] ss:$16 sps:$4 sm:$0xff]  }
 0xd9e   :  { %v12267_v36 = vpop.f32.mrf.mxu1 }
 0xd9f   :  { %v12274_v63 = vadd.f32 %v12266_v34, %v30492_v51  ;;  %v12268_v49 = vadd.f32 %v12267_v36, %v30619_v57  ;;  %13431 = vmatpush2.bf16.msra.mxu0 %v24441_v18  ;;  %v24539_v18 = vld [vmem:[%s32839_s11 + $0x744] ss:$16 sps:$4 sm:$0xff]   ;;  %v24543_v34 = vld [vmem:[%s32839_s11 + $0x720] ss:$16 sps:$4 sm:$0xff]  }
 0xda0   :  { %v12269_v4 = vpop.f32.mrf.mxu1  ;;  %13432 = vmatprep.subr.bf16.mxu0 %v24446_v6  ;;  %v24545_v6 = vld [vmem:[%s32839_s11 + $0x724] ss:$16 sps:$4 sm:$0xff]   ;;  %v24549_v36 = vld [vmem:[%s32839_s11 + $0x700] ss:$16 sps:$4 sm:$0xff]  }
 0xda1   :  { %v12300_v17 = vadd.f32 %v12289_v23, %v12274_v63  ;;  %v12275_v38 = vadd.f32 %v12268_v49, %v30499_v24  ;;  %v24551_v23 = vld [vmem:[%s32839_s11 + $0x704] ss:$16 sps:$4 sm:$0xff]   ;;  %v24557_v63 = vld [vmem:[%s32839_s11 + $0x6ec] ss:$16 sps:$4 sm:$0xff]  }
 0xda2   :  { %v12270_v51 = vpop.f32.mrf.mxu1 }
 0xda3   :  { %v12308_v9 = vmul.f32 0.2, %v12300_v17  ;;  %v12301_v19 = vadd.f32 %v12293_v22, %v12275_v38  ;;  %vm12304_vm15 = vcmp.ge.f32.partialorder %v12300_v17, 0.0  ;;  %13433 = vmatpush2.bf16.msra.mxu0 %v24444_v3 }
 0xda4   :  { %13434 = vmatprep.subr.bf16.mxu0 %v24449_v42 }
 0xda5   :  { %vm12305_vm0 = vcmp.ge.f32.partialorder %v12301_v19, 0.0  ;;  %v12309_v14 = vmul.f32 0.2, %v12301_v19  ;;  %v12312_v16 = vsel %vm12304_vm15, %v12300_v17, %v12308_v9  ;;  %v24462_v9 = vld [vmem:[%s32839_s11 + $0x4e8] ss:$16 sps:$4 sm:$0xff]  }
 0xda6   :  { %v12316_v57 = vpack.c.bf16 %v12312_v16, %v12312_v16  ;;  %v24468_v16 = vld [vmem:[%s32839_s11 + $0x4c8] ss:$16 sps:$4 sm:$0xff]  }
 0xda7   :  { %v12313_v8 = vsel %vm12305_vm0, %v12301_v19, %v12309_v14  ;;  %13435 = vmatpush2.bf16.msra.mxu0 %v24447_v15  ;;  %v24470_v19 = vld [vmem:[%s32839_s11 + $0x4cc] ss:$16 sps:$4 sm:$0xff]  }
 0xda8   :  { %v30734_v26 = vpack.c.bf16 %v12313_v8, %v12313_v8  ;;  %v30739_v24 = vsel %vm12323_vm13, %v12316_v57, 0  ;;  %13436 = vmatprep.subr.bf16.mxu0 %v24452_v56  ;;  %v24476_v57 = vld [vmem:[%s32839_s11 + $0x4ac] ss:$16 sps:$4 sm:$0xff]   ;;  %v24474_v8 = vld [vmem:[%s32839_s11 + $0x4a8] ss:$16 sps:$4 sm:$0xff]  }
 0xda9   :  { %v24482_v56 = vld [vmem:[%s32839_s11 + $0x48c] ss:$16 sps:$4 sm:$0xff]  }
 0xdaa   :  { %20769 = vmatprep.subr.msk.bf16.mxu1 %vm12323_vm13, %v30734_v26 }
 0xdab   :  { %12392 = vmatpush1.bf16.msra.mxu1 %v30739_v24  ;;  %13437 = vmatpush2.bf16.msra.mxu0 %v24450_v45  ;;  %v24480_v45 = vld [vmem:[%s32839_s11 + $0x488] ss:$16 sps:$4 sm:$0xff]  }
 0xdac   :  { %20774 = vmatprep.subr.msk.bf16.mxu1 %vm12323_vm13, %v30734_v26  ;;  %13438 = vmatprep.subr.bf16.mxu0 %v24455_v1  ;;  %v24486_v1 = vld [vmem:[%s32839_s11 + $0x468] ss:$16 sps:$4 sm:$0xff]  }
 0xdae   :  { %20770 = vmatmul.mubr.msk.bf16.vlgmr.msra.gmra.mxu1 %vm12319_vm14, %v30633_v7  ;;  %v24467_v7 = vld [vmem:[%s32839_s11 + $0x6c4] ss:$16 sps:$4 sm:$0xff]  }
 0xdaf   :  { %12611 = vmatpush1.bf16.msra.mxu1 %v30739_v24  ;;  %12628 = vmatprep.mubr.bf16.mxu1 %v25357_v2 }
 0xdb0   :  { %13439 = vmatpush2.bf16.msra.mxu0 %v24453_v20  ;;  %13451 = vmatprep.subr.bf16.mxu1 %v24461_v33  ;;  %v24488_v20 = vld [vmem:[%s32839_s11 + $0x46c] ss:$16 sps:$4 sm:$0xff]   ;;  %v24498_v33 = vld [vmem:[%s32839_s11 + $0x428] ss:$16 sps:$4 sm:$0xff]  }
 0xdb1   :  { %13440 = vmatprep.subr.bf16.mxu0 %v24458_v0  ;;  %v24494_v0 = vld [vmem:[%s32839_s11 + $0x44c] ss:$16 sps:$4 sm:$0xff]  }
 0xdb4   :  { %13441 = vmatpush2.bf16.msra.mxu0 %v24456_v32  ;;  %v24492_v32 = vld [vmem:[%s32839_s11 + $0x448] ss:$16 sps:$4 sm:$0xff]  }
 0xdb5   :  { %13492 = vmatprep.subr.bf16.mxu0 %v24464_v48  ;;  %v24506_v48 = vld [vmem:[%s32839_s11 + $0x40c] ss:$16 sps:$4 sm:$0xff]  }
 0xdb6   :  { %20775 = vmatmul.mubr.msk.bf16.vlgmr.msra.gmra.mxu1 %vm12319_vm14, %v30647_v50  ;;  %v24473_v50 = vld [vmem:[%s32839_s11 + $0x6a4] ss:$16 sps:$4 sm:$0xff]  }
 0xdb7   :  { %13452 = vmatpush1.bf16.msra.mxu1 %v24459_v29  ;;  %v24500_v29 = vld [vmem:[%s32839_s11 + $0x42c] ss:$16 sps:$4 sm:$0xff]  }
 0xdb8   :  { %13453 = vmatprep.subr.bf16.mxu1 %v24467_v7  ;;  %v24512_v7 = vld [vmem:[%s32839_s11 + $0x5ec] ss:$16 sps:$4 sm:$0xff]  }
 0xdbb   :  { %13454 = vmatpush1.bf16.msra.mxu1 %v24465_v53  ;;  %v24504_v53 = vld [vmem:[%s32839_s11 + $0x408] ss:$16 sps:$4 sm:$0xff]  }
 0xdbc   :  { %13455 = vmatprep.subr.bf16.mxu1 %v24473_v50  ;;  %v24518_v50 = vld [vmem:[%s32839_s11 + $0x5cc] ss:$16 sps:$4 sm:$0xff]  }
 0xdbf   :  { %13456 = vmatpush1.bf16.msra.mxu1 %v24471_v46  ;;  %v24510_v46 = vld [vmem:[%s32839_s11 + $0x5e8] ss:$16 sps:$4 sm:$0xff]  }
 0xdc0   :  { %13457 = vmatprep.subr.bf16.mxu1 %v24479_v58  ;;  %v24524_v58 = vld [vmem:[%s32839_s11 + $0x5ac] ss:$16 sps:$4 sm:$0xff]  }
 0xdc3   :  { %13458 = vmatpush1.bf16.msra.mxu1 %v24477_v52  ;;  %v24516_v52 = vld [vmem:[%s32839_s11 + $0x5c8] ss:$16 sps:$4 sm:$0xff]  }
 0xdc4   :  { %13459 = vmatprep.subr.bf16.mxu1 %v24485_v54  ;;  %v24530_v54 = vld [vmem:[%s32839_s11 + $0x58c] ss:$16 sps:$4 sm:$0xff]  }
 0xdc7   :  { %13460 = vmatpush1.bf16.msra.mxu1 %v24483_v30  ;;  %v24522_v30 = vld [vmem:[%s32839_s11 + $0x5a8] ss:$16 sps:$4 sm:$0xff]  }
 0xdc8   :  { %13461 = vmatprep.subr.bf16.mxu1 %v24491_v28  ;;  %v24536_v28 = vld [vmem:[%s32839_s11 + $0x56c] ss:$16 sps:$4 sm:$0xff]  }
 0xdcb   :  { %13462 = vmatpush1.bf16.msra.mxu1 %v24489_v11  ;;  %v24528_v11 = vld [vmem:[%s32839_s11 + $0x588] ss:$16 sps:$4 sm:$0xff]  }
 0xdcc   :  { %13463 = vmatprep.subr.bf16.mxu1 %v24497_v41  ;;  %v24542_v41 = vld [vmem:[%s32839_s11 + $0x54c] ss:$16 sps:$4 sm:$0xff]  }
 0xdcf   :  { %13464 = vmatpush1.bf16.msra.mxu1 %v24495_v44  ;;  %v24534_v44 = vld [vmem:[%s32839_s11 + $0x568] ss:$16 sps:$4 sm:$0xff]  }
 0xdd0   :  { %13465 = vmatprep.subr.bf16.mxu1 %v24503_v12 }
 0xdd3   :  { %13466 = vmatpush1.bf16.msra.mxu1 %v24501_v13  ;;  %v24540_v13 = vld [vmem:[%s32839_s11 + $0x548] ss:$16 sps:$4 sm:$0xff]  }
 0xdd4   :  { %13467 = vmatprep.subr.bf16.mxu1 %v24509_v10 }
 0xdd7   :  { %13468 = vmatpush2.bf16.msra.mxu1 %v24507_v39  ;;  %v24548_v39 = vld [vmem:[%s32839_s11 + $0x52c] ss:$16 sps:$4 sm:$0xff]  }
 0xdd8   :  { %13469 = vmatprep.subr.bf16.mxu1 %v24515_v31 }
 0xddb   :  { %13470 = vmatpush2.bf16.msra.mxu1 %v24513_v5  ;;  %v24546_v5 = vld [vmem:[%s32839_s11 + $0x528] ss:$16 sps:$4 sm:$0xff]  }
 0xddc   :  { %13471 = vmatprep.subr.bf16.mxu1 %v24521_v62 }
 0xddf   :  { %13472 = vmatpush2.bf16.msra.mxu1 %v24519_v35  ;;  %v24554_v35 = vld [vmem:[%s32839_s11 + $0x50c] ss:$16 sps:$4 sm:$0xff]  }
 0xde0   :  { %13473 = vmatprep.subr.bf16.mxu1 %v24527_v55 }
 0xde3   :  { %13474 = vmatpush2.bf16.msra.mxu1 %v24525_v59  ;;  %v24552_v59 = vld [vmem:[%s32839_s11 + $0x508] ss:$16 sps:$4 sm:$0xff]  }
 0xde4   :  { %13475 = vmatprep.subr.bf16.mxu1 %v24533_v21 }
 0xde7   :  { %13476 = vmatpush2.bf16.msra.mxu1 %v24531_v43  ;;  %v24560_v43 = vld [vmem:[%s32839_s11 + $0xe4] ss:$16 sps:$4 sm:$0xff]  }
 0xde8   :  { %13477 = vmatprep.subr.bf16.mxu1 %v24539_v18 }
 0xdeb   :  { %13478 = vmatpush2.bf16.msra.mxu1 %v24537_v37  ;;  %v24555_v37 = vld [vmem:[%s32839_s11 + $0x6e8] ss:$16 sps:$4 sm:$0xff]  }
 0xdec   :  { %13479 = vmatprep.subr.bf16.mxu1 %v24545_v6 }
 0xdef   :  { %13480 = vmatpush2.bf16.msra.mxu1 %v24543_v34 }
 0xdf0   :  { %13481 = vmatprep.subr.bf16.mxu1 %v24551_v23  ;;  %v24558_v23 = vld [vmem:[%s32839_s11 + $0xe0] ss:$16 sps:$4 sm:$0xff]  }
 0xdf3   :  { %13482 = vmatpush2.bf16.msra.mxu1 %v24549_v36  ;;  %v24563_v36 = vld [vmem:[%s32839_s11 + $0x6cc] ss:$16 sps:$4 sm:$0xff]  }
 0xdf4   :  { %13533 = vmatprep.subr.bf16.mxu1 %v24557_v63  ;;  %v24566_v63 = vld [vmem:[%s32839_s11 + $0xc4] ss:$16 sps:$4 sm:$0xff]  }
 0xe2e   :  { %v30870_v49 = vpop.f32.mrf.mxu0 }
 0xe30   :  { %v30872_v22 = vpop.f32.mrf.mxu0 }
 0xe32   :  { %v12374_v3 = vpop.f32.mrf.mxu0 }
 0xe33   :  { %v30993_v3 = vpack.c.bf16 %v30872_v22, %v30872_v22  ;;  %v24569_v22 = vld [vmem:[%s32839_s11 + $0x6ac] ss:$16 sps:$4 sm:$0xff]  }
 0xe34   :  { %v12375_v4 = vpop.f32.mrf.mxu0 }
 0xe36   :  { %v12589_v42 = vpop.f32.mrf.mxu0 }
 0xe37   :  { %v30874_v17 = vpack.c.bf16 %v12589_v42, %v12589_v42  ;;  %v24561_v42 = vld [vmem:[%s32839_s11 + $0x6c8] ss:$16 sps:$4 sm:$0xff]  }
 0xe38   :  { %v12591_v38 = vpop.f32.mrf.mxu0 }
 0xe39   :  { %v12638_v51 = vpack.c.bf16 %v12591_v38, %v12591_v38  ;;  %v24564_v38 = vld [vmem:[%s32839_s11 + $0xc0] ss:$16 sps:$4 sm:$0xff]  }
 0xe3a   :  { %v12593_v15 = vpop.f32.mrf.mxu0 }
 0xe3b   :  { %13442 = vmatprep.mubr.bf16.mxu0 %v12638_v51  ;;  %v24578_v15 = vld [vmem:[%s32839_s11 + $0x84] ss:$16 sps:$4 sm:$0xff]  }
 0xe3c   :  { %13443 = vmatmul.mubr.bf16.vlgmr.msra.gmra.mxu0 %v30874_v17  ;;  %v12594_v14 = vpop.f32.mrf.mxu0 }
 0xe3d   :  { %13493 = vmatpush1.bf16.msra.mxu0 %v24462_v9  ;;  %13524 = vmatprep.mubr.bf16.mxu0 %v12638_v51  ;;  %v24567_v51 = vld [vmem:[%s32839_s11 + $0x6a8] ss:$16 sps:$4 sm:$0xff]   ;;  %v24570_v9 = vld [vmem:[%s32839_s11 + $0xa0] ss:$16 sps:$4 sm:$0xff]  }
 0xe3e   :  { %13494 = vmatprep.subr.bf16.mxu0 %v24470_v19  ;;  %v24575_v19 = vld [vmem:[%s32839_s11 + $0x68c] ss:$16 sps:$4 sm:$0xff]   ;;  %v24573_v14 = vld [vmem:[%s32839_s11 + $0x688] ss:$16 sps:$4 sm:$0xff]  }
 0xe41   :  { %13495 = vmatpush1.bf16.msra.mxu0 %v24468_v16  ;;  %v24576_v16 = vld [vmem:[%s32839_s11 + $0x80] ss:$16 sps:$4 sm:$0xff]  }
 0xe42   :  { %13496 = vmatprep.subr.bf16.mxu0 %v24476_v57  ;;  %v24581_v57 = vld [vmem:[%s32839_s11 + $0x66c] ss:$16 sps:$4 sm:$0xff]  }
 0xe45   :  { %13497 = vmatpush1.bf16.msra.mxu0 %v24474_v8  ;;  %v24584_v8 = vld [vmem:[%s32839_s11 + $0x64] ss:$16 sps:$4 sm:$0xff]  }
 0xe46   :  { %13498 = vmatprep.subr.bf16.mxu0 %v24482_v56  ;;  %v24579_v56 = vld [vmem:[%s32839_s11 + $0x668] ss:$16 sps:$4 sm:$0xff]  }
 0xe49   :  { %13499 = vmatpush1.bf16.msra.mxu0 %v24480_v45  ;;  %v24582_v45 = vld [vmem:[%s32839_s11 + $0x60] ss:$16 sps:$4 sm:$0xff]  }
 0xe4a   :  { %13500 = vmatprep.subr.bf16.mxu0 %v24488_v20  ;;  %v24587_v20 = vld [vmem:[%s32839_s11 + $0x64c] ss:$16 sps:$4 sm:$0xff]  }
 0xe4d   :  { %13501 = vmatpush1.bf16.msra.mxu0 %v24486_v1  ;;  %v24590_v1 = vld [vmem:[%s32839_s11 + $0x44] ss:$16 sps:$4 sm:$0xff]  }
 0xe4e   :  { %13502 = vmatprep.subr.bf16.mxu0 %v24494_v0  ;;  %v24585_v0 = vld [vmem:[%s32839_s11 + $0x648] ss:$16 sps:$4 sm:$0xff]  }
 0xe51   :  { %13503 = vmatpush1.bf16.msra.mxu0 %v24492_v32  ;;  %v24588_v32 = vld [vmem:[%s32839_s11 + $0x40] ss:$16 sps:$4 sm:$0xff]  }
 0xe52   :  { %13504 = vmatprep.subr.bf16.mxu0 %v24500_v29  ;;  %v24593_v29 = vld [vmem:[%s32839_s11 + $0x62c] ss:$16 sps:$4 sm:$0xff]  }
 0xe55   :  { %13505 = vmatpush1.bf16.msra.mxu0 %v24498_v33  ;;  %v24596_v33 = vld [vmem:[%s32839_s11 + $0x24] ss:$16 sps:$4 sm:$0xff]  }
 0xe56   :  { %13506 = vmatprep.subr.bf16.mxu0 %v24506_v48  ;;  %v24591_v48 = vld [vmem:[%s32839_s11 + $0x628] ss:$16 sps:$4 sm:$0xff]  }
 0xe59   :  { %13507 = vmatpush1.bf16.msra.mxu0 %v24504_v53  ;;  %v24594_v53 = vld [vmem:[%s32839_s11 + $0x20] ss:$16 sps:$4 sm:$0xff]  }
 0xe5a   :  { %13508 = vmatprep.subr.bf16.mxu0 %v24512_v7  ;;  %v24599_v7 = vld [vmem:[%s32839_s11 + $0x60c] ss:$16 sps:$4 sm:$0xff]  }
 0xe5d   :  { %13509 = vmatpush2.bf16.msra.mxu0 %v24510_v46  ;;  %v24602_v46 = vld [vmem:[%s32839_s11 + $0x4] ss:$16 sps:$4 sm:$0xff]  }
 0xe5e   :  { %13510 = vmatprep.subr.bf16.mxu0 %v24518_v50  ;;  %v24597_v50 = vld [vmem:[%s32839_s11 + $0x608] ss:$16 sps:$4 sm:$0xff]  }
 0xe61   :  { %13511 = vmatpush2.bf16.msra.mxu0 %v24516_v52  ;;  %v24600_v52 = vld [vmem:[%s32839_s11] ss:$16 sps:$4 sm:$0xff]  }
 0xe62   :  { %13512 = vmatprep.subr.bf16.mxu0 %v24524_v58  ;;  %v24605_v58 = vld [vmem:[%s32839_s11 + $0x7ec] ss:$16 sps:$4 sm:$0xff]  }
 0xe65   :  { %13513 = vmatpush2.bf16.msra.mxu0 %v24522_v30  ;;  %v24608_v30 = vld [vmem:[%s32839_s11 + $0x1e4] ss:$16 sps:$4 sm:$0xff]  }
 0xe66   :  { %13514 = vmatprep.subr.bf16.mxu0 %v24530_v54  ;;  %v24603_v54 = vld [vmem:[%s32839_s11 + $0x7e8] ss:$16 sps:$4 sm:$0xff]  }
 0xe69   :  { %13515 = vmatpush2.bf16.msra.mxu0 %v24528_v11  ;;  %v24606_v11 = vld [vmem:[%s32839_s11 + $0x1e0] ss:$16 sps:$4 sm:$0xff]  }
 0xe6a   :  { %13516 = vmatprep.subr.bf16.mxu0 %v24536_v28  ;;  %v24611_v28 = vld [vmem:[%s32839_s11 + $0x7cc] ss:$16 sps:$4 sm:$0xff]  }
 0xe6d   :  { %13517 = vmatpush2.bf16.msra.mxu0 %v24534_v44  ;;  %v24614_v44 = vld [vmem:[%s32839_s11 + $0x1c4] ss:$16 sps:$4 sm:$0xff]  }
 0xe6e   :  { %v30958_v12 = vpop.f32.mrf.mxu1  ;;  %13518 = vmatprep.subr.bf16.mxu0 %v24542_v41  ;;  %v24609_v41 = vld [vmem:[%s32839_s11 + $0x7c8] ss:$16 sps:$4 sm:$0xff]  }
 0xe70   :  { %v30963_v10 = vpop.f32.mrf.mxu1 }
 0xe71   :  { %13519 = vmatpush2.bf16.msra.mxu0 %v24540_v13  ;;  %v24612_v13 = vld [vmem:[%s32839_s11 + $0x1c0] ss:$16 sps:$4 sm:$0xff]  }
 0xe72   :  { %v12415_v31 = vpop.f32.mrf.mxu1  ;;  %13520 = vmatprep.subr.bf16.mxu0 %v24548_v39  ;;  %v24617_v39 = vld [vmem:[%s32839_s11 + $0x7ac] ss:$16 sps:$4 sm:$0xff]  }
 0xe73   :  { %v24615_v31 = vld [vmem:[%s32839_s11 + $0x7a8] ss:$16 sps:$4 sm:$0xff]  }
 0xe74   :  { %v12416_v62 = vpop.f32.mrf.mxu1 }
 0xe75   :  { %13521 = vmatpush2.bf16.msra.mxu0 %v24546_v5  ;;  %v24620_v5 = vld [vmem:[%s32839_s11 + $0x1a4] ss:$16 sps:$4 sm:$0xff]   ;;  %v24623_v62 = vld [vmem:[%s32839_s11 + $0x78c] ss:$16 sps:$4 sm:$0xff]  }
 0xe76   :  { %v12630_v55 = vpop.f32.mrf.mxu1  ;;  %13522 = vmatprep.subr.bf16.mxu0 %v24554_v35  ;;  %v24618_v35 = vld [vmem:[%s32839_s11 + $0x1a0] ss:$16 sps:$4 sm:$0xff]  }
 0xe77   :  { %v30980_v6 = vpack.c.bf16 %v12630_v55, %v12630_v55  ;;  %v24621_v55 = vld [vmem:[%s32839_s11 + $0x788] ss:$16 sps:$4 sm:$0xff]  }
 0xe78   :  { %v12632_v21 = vpop.f32.mrf.mxu1 }
 0xe79   :  { %v12640_v18 = vpack.c.bf16 %v12632_v21, %v12632_v21  ;;  %13523 = vmatpush2.bf16.msra.mxu0 %v24552_v59  ;;  %v24626_v59 = vld [vmem:[%s32839_s11 + $0x184] ss:$16 sps:$4 sm:$0xff]   ;;  %v24629_v21 = vld [vmem:[%s32839_s11 + $0x76c] ss:$16 sps:$4 sm:$0xff]  }
 0xe7a   :  { %v12634_v34 = vpop.f32.mrf.mxu1  ;;  %14214 = vmatprep.subr.bf16.mxu0 %v24560_v43  ;;  %v24624_v43 = vld [vmem:[%s32839_s11 + $0x180] ss:$16 sps:$4 sm:$0xff]  }
 0xe7b   :  { %13483 = vmatprep.mubr.bf16.mxu1 %v12640_v18  ;;  %v24630_v34 = vld [vmem:[%s32839_s11 + $0x160] ss:$16 sps:$4 sm:$0xff]  }
 0xe7c   :  { %v12635_v4 = vpop.f32.mrf.mxu1  ;;  %13484 = vmatmul.mubr.bf16.vlgmr.msra.gmra.mxu1 %v30980_v6  ;;  %13525 = vmatmul.mubr.bf16.vlgmr.msra.gmra.mxu0 %v30874_v17  ;;  %v24572_v17 = vld [vmem:[%s32839_s11 + $0xa4] ss:$16 sps:$4 sm:$0xff]  }
 0xe7d   :  { %13534 = vmatpush1.bf16.msra.mxu1 %v24555_v37  ;;  %13565 = vmatprep.mubr.bf16.mxu1 %v12640_v18  ;;  %v24632_v18 = vld [vmem:[%s32839_s11 + $0x164] ss:$16 sps:$4 sm:$0xff]   ;;  %v24627_v37 = vld [vmem:[%s32839_s11 + $0x768] ss:$16 sps:$4 sm:$0xff]   ;;  %v24636_v4 = vld [vmem:[%s32839_s11 + $0x140] ss:$16 sps:$4 sm:$0xff]  }
 0xe7e   :  { %14215 = vmatpush1.bf16.msra.mxu0 %v24558_v23  ;;  %14246 = vmatprep.mubr.bf16.mxu0 %v30993_v3  ;;  %v24635_v23 = vld [vmem:[%s32839_s11 + $0x74c] ss:$16 sps:$4 sm:$0xff]  }
 0xe7f   :  { %13535 = vmatprep.subr.bf16.mxu1 %v24563_v36  ;;  %14216 = vmatprep.subr.bf16.mxu0 %v24566_v63  ;;  %v24638_v36 = vld [vmem:[%s32839_s11 + $0x144] ss:$16 sps:$4 sm:$0xff]   ;;  %v24633_v63 = vld [vmem:[%s32839_s11 + $0x748] ss:$16 sps:$4 sm:$0xff]  }
 0xe81   :  { %13536 = vmatpush1.bf16.msra.mxu1 %v24561_v42  ;;  %v24641_v42 = vld [vmem:[%s32839_s11 + $0x72c] ss:$16 sps:$4 sm:$0xff]  }
 0xe82   :  { %14217 = vmatpush1.bf16.msra.mxu0 %v24564_v38  ;;  %13537 = vmatprep.subr.bf16.mxu1 %v24569_v22  ;;  %v24644_v38 = vld [vmem:[%s32839_s11 + $0x124] ss:$16 sps:$4 sm:$0xff]   ;;  %v24639_v22 = vld [vmem:[%s32839_s11 + $0x728] ss:$16 sps:$4 sm:$0xff]  }
 0xe83   :  { %14218 = vmatprep.subr.bf16.mxu0 %v24572_v17  ;;  %v24642_v17 = vld [vmem:[%s32839_s11 + $0x120] ss:$16 sps:$4 sm:$0xff]  }
 0xe85   :  { %13538 = vmatpush1.bf16.msra.mxu1 %v24567_v51  ;;  %v24647_v51 = vld [vmem:[%s32839_s11 + $0x70c] ss:$16 sps:$4 sm:$0xff]  }
 0xe86   :  { %14219 = vmatpush1.bf16.msra.mxu0 %v24570_v9  ;;  %13539 = vmatprep.subr.bf16.mxu1 %v24575_v19  ;;  %v24650_v9 = vld [vmem:[%s32839_s11 + $0x104] ss:$16 sps:$4 sm:$0xff]   ;;  %v24645_v19 = vld [vmem:[%s32839_s11 + $0x708] ss:$16 sps:$4 sm:$0xff]  }
 0xe87   :  { %14220 = vmatprep.subr.bf16.mxu0 %v24578_v15  ;;  %v24648_v15 = vld [vmem:[%s32839_s11 + $0x100] ss:$16 sps:$4 sm:$0xff]  }
 0xe89   :  { %13540 = vmatpush1.bf16.msra.mxu1 %v24573_v14  ;;  %v24653_v14 = vld [vmem:[%s32839_s11 + $0x2e4] ss:$16 sps:$4 sm:$0xff]  }
 0xe8a   :  { %14221 = vmatpush1.bf16.msra.mxu0 %v24576_v16  ;;  %13541 = vmatprep.subr.bf16.mxu1 %v24581_v57  ;;  %v24656_v16 = vld [vmem:[%s32839_s11 + $0xec] ss:$16 sps:$4 sm:$0xff]   ;;  %v24651_v57 = vld [vmem:[%s32839_s11 + $0x2e0] ss:$16 sps:$4 sm:$0xff]  }
 0xe8b   :  { %14222 = vmatprep.subr.bf16.mxu0 %v24584_v8  ;;  %v24654_v8 = vld [vmem:[%s32839_s11 + $0xe8] ss:$16 sps:$4 sm:$0xff]  }
 0xe8d   :  { %13542 = vmatpush1.bf16.msra.mxu1 %v24579_v56  ;;  %v31186_v56 = vpack.c.bf16 %v30870_v49, %v30870_v49  ;;  %v24657_v49 = vld [vmem:[%s32839_s11 + $0x2c0] ss:$16 sps:$4 sm:$0xff]  }
 0xe8e   :  { %14223 = vmatpush1.bf16.msra.mxu0 %v24582_v45  ;;  %13543 = vmatprep.subr.bf16.mxu1 %v24587_v20  ;;  %v24659_v45 = vld [vmem:[%s32839_s11 + $0x2c4] ss:$16 sps:$4 sm:$0xff]   ;;  %v31193_v20 = vpack.c.bf16 %v30963_v10, %v30963_v10  ;;  %v24660_v10 = vld [vmem:[%s32839_s11 + $0xc8] ss:$16 sps:$4 sm:$0xff]  }
 0xe8f   :  { %14224 = vmatprep.subr.bf16.mxu0 %v24590_v1  ;;  %v24662_v1 = vld [vmem:[%s32839_s11 + $0xcc] ss:$16 sps:$4 sm:$0xff]  }
 0xe91   :  { %13544 = vmatpush1.bf16.msra.mxu1 %v24585_v0  ;;  %v24668_v0 = vld [vmem:[%s32839_s11 + $0xac] ss:$16 sps:$4 sm:$0xff]  }
 0xe92   :  { %14225 = vmatpush1.bf16.msra.mxu0 %v24588_v32  ;;  %13545 = vmatprep.subr.bf16.mxu1 %v24593_v29  ;;  %v24663_v32 = vld [vmem:[%s32839_s11 + $0x2a0] ss:$16 sps:$4 sm:$0xff]   ;;  %v24666_v29 = vld [vmem:[%s32839_s11 + $0xa8] ss:$16 sps:$4 sm:$0xff]  }
 0xe93   :  { %14226 = vmatprep.subr.bf16.mxu0 %v24596_v33  ;;  %v24674_v33 = vld [vmem:[%s32839_s11 + $0x8c] ss:$16 sps:$4 sm:$0xff]  }
 0xe95   :  { %13546 = vmatpush1.bf16.msra.mxu1 %v24591_v48  ;;  %v24669_v48 = vld [vmem:[%s32839_s11 + $0x280] ss:$16 sps:$4 sm:$0xff]  }
 0xe96   :  { %14227 = vmatpush1.bf16.msra.mxu0 %v24594_v53  ;;  %13547 = vmatprep.subr.bf16.mxu1 %v24599_v7  ;;  %v24672_v53 = vld [vmem:[%s32839_s11 + $0x88] ss:$16 sps:$4 sm:$0xff]   ;;  %v24677_v7 = vld [vmem:[%s32839_s11 + $0x264] ss:$16 sps:$4 sm:$0xff]  }
 0xe97   :  { %14228 = vmatprep.subr.bf16.mxu0 %v24602_v46  ;;  %v24680_v46 = vld [vmem:[%s32839_s11 + $0x6c] ss:$16 sps:$4 sm:$0xff]  }
 0xe99   :  { %13548 = vmatpush1.bf16.msra.mxu1 %v24597_v50  ;;  %v24675_v50 = vld [vmem:[%s32839_s11 + $0x260] ss:$16 sps:$4 sm:$0xff]  }
 0xe9a   :  { %14229 = vmatpush1.bf16.msra.mxu0 %v24600_v52  ;;  %13549 = vmatprep.subr.bf16.mxu1 %v24605_v58  ;;  %v24678_v52 = vld [vmem:[%s32839_s11 + $0x68] ss:$16 sps:$4 sm:$0xff]   ;;  %v24683_v58 = vld [vmem:[%s32839_s11 + $0x244] ss:$16 sps:$4 sm:$0xff]  }
 0xe9b   :  { %14230 = vmatprep.subr.bf16.mxu0 %v24608_v30  ;;  %v24686_v30 = vld [vmem:[%s32839_s11 + $0x4c] ss:$16 sps:$4 sm:$0xff]  }
 0xe9d   :  { %13550 = vmatpush2.bf16.msra.mxu1 %v24603_v54  ;;  %v24681_v54 = vld [vmem:[%s32839_s11 + $0x240] ss:$16 sps:$4 sm:$0xff]  }
 0xe9e   :  { %14231 = vmatpush2.bf16.msra.mxu0 %v24606_v11  ;;  %13551 = vmatprep.subr.bf16.mxu1 %v24611_v28  ;;  %v24684_v11 = vld [vmem:[%s32839_s11 + $0x48] ss:$16 sps:$4 sm:$0xff]   ;;  %v24689_v28 = vld [vmem:[%s32839_s11 + $0x224] ss:$16 sps:$4 sm:$0xff]  }
 0xe9f   :  { %14232 = vmatprep.subr.bf16.mxu0 %v24614_v44  ;;  %v24692_v44 = vld [vmem:[%s32839_s11 + $0x2c] ss:$16 sps:$4 sm:$0xff]  }
 0xea1   :  { %13552 = vmatpush2.bf16.msra.mxu1 %v24609_v41  ;;  %v24687_v41 = vld [vmem:[%s32839_s11 + $0x220] ss:$16 sps:$4 sm:$0xff]  }
 0xea2   :  { %14233 = vmatpush2.bf16.msra.mxu0 %v24612_v13  ;;  %13553 = vmatprep.subr.bf16.mxu1 %v24617_v39  ;;  %v24690_v13 = vld [vmem:[%s32839_s11 + $0x28] ss:$16 sps:$4 sm:$0xff]   ;;  %v24695_v39 = vld [vmem:[%s32839_s11 + $0x204] ss:$16 sps:$4 sm:$0xff]  }
 0xea3   :  { %14234 = vmatprep.subr.bf16.mxu0 %v24620_v5  ;;  %v24698_v5 = vld [vmem:[%s32839_s11 + $0xc] ss:$16 sps:$4 sm:$0xff]  }
 0xea5   :  { %13554 = vmatpush2.bf16.msra.mxu1 %v24615_v31  ;;  %v24693_v31 = vld [vmem:[%s32839_s11 + $0x200] ss:$16 sps:$4 sm:$0xff]  }
 0xea6   :  { %14235 = vmatpush2.bf16.msra.mxu0 %v24618_v35  ;;  %13555 = vmatprep.subr.bf16.mxu1 %v24623_v62  ;;  %v24696_v35 = vld [vmem:[%s32839_s11 + $0x8] ss:$16 sps:$4 sm:$0xff]   ;;  %v24701_v62 = vld [vmem:[%s32839_s11 + $0x3e4] ss:$16 sps:$4 sm:$0xff]  }
 0xea7   :  { %14236 = vmatprep.subr.bf16.mxu0 %v24626_v59  ;;  %v24704_v59 = vld [vmem:[%s32839_s11 + $0x1ec] ss:$16 sps:$4 sm:$0xff]  }
 0xea9   :  { %13556 = vmatpush2.bf16.msra.mxu1 %v24621_v55  ;;  %v24699_v55 = vld [vmem:[%s32839_s11 + $0x3e0] ss:$16 sps:$4 sm:$0xff]  }
 0xeaa   :  { %14237 = vmatpush2.bf16.msra.mxu0 %v24624_v43  ;;  %13557 = vmatprep.subr.bf16.mxu1 %v24629_v21  ;;  %v24702_v43 = vld [vmem:[%s32839_s11 + $0x1e8] ss:$16 sps:$4 sm:$0xff]   ;;  %v24707_v21 = vld [vmem:[%s32839_s11 + $0x3c4] ss:$16 sps:$4 sm:$0xff]  }
 0xeab   :  { %14238 = vmatprep.subr.bf16.mxu0 %v24632_v18  ;;  %v24710_v18 = vld [vmem:[%s32839_s11 + $0x1cc] ss:$16 sps:$4 sm:$0xff]  }
 0xead   :  { %13558 = vmatpush2.bf16.msra.mxu1 %v24627_v37  ;;  %v24705_v37 = vld [vmem:[%s32839_s11 + $0x3c0] ss:$16 sps:$4 sm:$0xff]  }
 0xeae   :  { %14239 = vmatpush2.bf16.msra.mxu0 %v24630_v34  ;;  %13559 = vmatprep.subr.bf16.mxu1 %v24635_v23  ;;  %v24708_v34 = vld [vmem:[%s32839_s11 + $0x1c8] ss:$16 sps:$4 sm:$0xff]   ;;  %v24713_v23 = vld [vmem:[%s32839_s11 + $0x3a4] ss:$16 sps:$4 sm:$0xff]  }
 0xeaf   :  { %14240 = vmatprep.subr.bf16.mxu0 %v24638_v36  ;;  %v24716_v36 = vld [vmem:[%s32839_s11 + $0x1ac] ss:$16 sps:$4 sm:$0xff]  }
 0xeb1   :  { %13560 = vmatpush2.bf16.msra.mxu1 %v24633_v63  ;;  %v24711_v63 = vld [vmem:[%s32839_s11 + $0x3a0] ss:$16 sps:$4 sm:$0xff]  }
 0xeb2   :  { %14241 = vmatpush2.bf16.msra.mxu0 %v24636_v4  ;;  %13561 = vmatprep.subr.bf16.mxu1 %v24641_v42  ;;  %v24714_v4 = vld [vmem:[%s32839_s11 + $0x1a8] ss:$16 sps:$4 sm:$0xff]   ;;  %v24719_v42 = vld [vmem:[%s32839_s11 + $0x384] ss:$16 sps:$4 sm:$0xff]  }
 0xeb3   :  { %14242 = vmatprep.subr.bf16.mxu0 %v24644_v38  ;;  %v24722_v38 = vld [vmem:[%s32839_s11 + $0x18c] ss:$16 sps:$4 sm:$0xff]  }
 0xeb5   :  { %13562 = vmatpush2.bf16.msra.mxu1 %v24639_v22  ;;  %v24717_v22 = vld [vmem:[%s32839_s11 + $0x380] ss:$16 sps:$4 sm:$0xff]  }
 0xeb6   :  { %14243 = vmatpush2.bf16.msra.mxu0 %v24642_v17  ;;  %13563 = vmatprep.subr.bf16.mxu1 %v24647_v51  ;;  %v24720_v17 = vld [vmem:[%s32839_s11 + $0x188] ss:$16 sps:$4 sm:$0xff]   ;;  %v24725_v51 = vld [vmem:[%s32839_s11 + $0x364] ss:$16 sps:$4 sm:$0xff]  }
 0xeb7   :  { %14244 = vmatprep.subr.bf16.mxu0 %v24650_v9  ;;  %v24728_v9 = vld [vmem:[%s32839_s11 + $0x16c] ss:$16 sps:$4 sm:$0xff]  }
 0xeb9   :  { %13564 = vmatpush2.bf16.msra.mxu1 %v24645_v19  ;;  %v24723_v19 = vld [vmem:[%s32839_s11 + $0x360] ss:$16 sps:$4 sm:$0xff]  }
 0xeba   :  { %14245 = vmatpush2.bf16.msra.mxu0 %v24648_v15  ;;  %14255 = vmatprep.subr.bf16.mxu1 %v24653_v14  ;;  %v24726_v15 = vld [vmem:[%s32839_s11 + $0x168] ss:$16 sps:$4 sm:$0xff]   ;;  %v24731_v14 = vld [vmem:[%s32839_s11 + $0x344] ss:$16 sps:$4 sm:$0xff]  }
 0xebb   :  { %14296 = vmatprep.subr.bf16.mxu0 %v24656_v16  ;;  %v24734_v16 = vld [vmem:[%s32839_s11 + $0x14c] ss:$16 sps:$4 sm:$0xff]  }
 0xebc   :  { %13566 = vmatmul.mubr.bf16.vlgmr.msra.gmra.mxu1 %v30980_v6  ;;  %v24665_v6 = vld [vmem:[%s32839_s11 + $0x2a4] ss:$16 sps:$4 sm:$0xff]  }
 0xebd   :  { %14247 = vmatmul.mubr.bf16.vlgmr.msra.gmra.mxu0 %v31186_v56  ;;  %14256 = vmatpush1.bf16.msra.mxu1 %v24651_v57  ;;  %v24729_v57 = vld [vmem:[%s32839_s11 + $0x340] ss:$16 sps:$4 sm:$0xff]  }
 0xebe   :  { %14287 = vmatprep.mubr.bf16.mxu1 %v31193_v20  ;;  %14297 = vmatpush1.bf16.msra.mxu0 %v24654_v8  ;;  %v24732_v8 = vld [vmem:[%s32839_s11 + $0x148] ss:$16 sps:$4 sm:$0xff]  }
 0xebf   :  { %14328 = vmatprep.mubr.bf16.mxu0 %v30993_v3  ;;  %14257 = vmatprep.subr.bf16.mxu1 %v24659_v45  ;;  %v24671_v3 = vld [vmem:[%s32839_s11 + $0x284] ss:$16 sps:$4 sm:$0xff]  }
 0xec0   :  { %14298 = vmatprep.subr.bf16.mxu0 %v24662_v1  ;;  %v24737_v45 = vld [vmem:[%s32839_s11 + $0x324] ss:$16 sps:$4 sm:$0xff]   ;;  %v24740_v1 = vld [vmem:[%s32839_s11 + $0x12c] ss:$16 sps:$4 sm:$0xff]  }
 0xec1   :  { %14258 = vmatpush1.bf16.msra.mxu1 %v24657_v49  ;;  %v24735_v49 = vld [vmem:[%s32839_s11 + $0x320] ss:$16 sps:$4 sm:$0xff]  }
 0xec2   :  { %14299 = vmatpush1.bf16.msra.mxu0 %v24660_v10  ;;  %14259 = vmatprep.subr.bf16.mxu1 %v24665_v6  ;;  %v24738_v10 = vld [vmem:[%s32839_s11 + $0x128] ss:$16 sps:$4 sm:$0xff]   ;;  %v24743_v6 = vld [vmem:[%s32839_s11 + $0x304] ss:$16 sps:$4 sm:$0xff]  }
 0xec3   :  { %14300 = vmatprep.subr.bf16.mxu0 %v24668_v0  ;;  %v24746_v0 = vld [vmem:[%s32839_s11 + $0x10c] ss:$16 sps:$4 sm:$0xff]  }
 0xec5   :  { %14260 = vmatpush1.bf16.msra.mxu1 %v24663_v32  ;;  %v24741_v32 = vld [vmem:[%s32839_s11 + $0x300] ss:$16 sps:$4 sm:$0xff]  }
 0xec6   :  { %14301 = vmatpush1.bf16.msra.mxu0 %v24666_v29  ;;  %14261 = vmatprep.subr.bf16.mxu1 %v24671_v3  ;;  %v24744_v29 = vld [vmem:[%s32839_s11 + $0x108] ss:$16 sps:$4 sm:$0xff]   ;;  %v24749_v3 = vld [vmem:[%s32839_s11 + $0x2ec] ss:$16 sps:$4 sm:$0xff]  }
 0xec7   :  { %14302 = vmatprep.subr.bf16.mxu0 %v24674_v33  ;;  %v24747_v33 = vld [vmem:[%s32839_s11 + $0x2e8] ss:$16 sps:$4 sm:$0xff]  }
 0xec9   :  { %14262 = vmatpush1.bf16.msra.mxu1 %v24669_v48  ;;  %v31384_v48 = vpack.c.bf16 %v30958_v12, %v30958_v12  ;;  %v24750_v12 = vld [vmem:[%s32839_s11 + $0x2c8] ss:$16 sps:$4 sm:$0xff]  }
 0xeca   :  { %14303 = vmatpush1.bf16.msra.mxu0 %v24672_v53  ;;  %14263 = vmatprep.subr.bf16.mxu1 %v24677_v7  ;;  %v24752_v53 = vld [vmem:[%s32839_s11 + $0x2cc] ss:$16 sps:$4 sm:$0xff]  }
 0xecb   :  { %14304 = vmatprep.subr.bf16.mxu0 %v24680_v46  ;;  %v24755_v46 = vld [vmem:[%s32839_s11 + $0x2ac] ss:$16 sps:$4 sm:$0xff]  }
 0xecd   :  { %14264 = vmatpush1.bf16.msra.mxu1 %v24675_v50 }
 0xece   :  { %14305 = vmatpush1.bf16.msra.mxu0 %v24678_v52  ;;  %14265 = vmatprep.subr.bf16.mxu1 %v24683_v58  ;;  %v24758_v58 = vld [vmem:[%s32839_s11 + $0x28c] ss:$16 sps:$4 sm:$0xff]  }
 0xecf   :  { %14306 = vmatprep.subr.bf16.mxu0 %v24686_v30 }
 0xed1   :  { %14266 = vmatpush1.bf16.msra.mxu1 %v24681_v54  ;;  %v24795_v54 = vld [vmem:[%s32839_s11 + $0x8e0] ss:$16 sps:$4 sm:$0xff]  }
 0xed2   :  { %14307 = vmatpush1.bf16.msra.mxu0 %v24684_v11  ;;  %14267 = vmatprep.subr.bf16.mxu1 %v24689_v28  ;;  %v24797_v11 = vld [vmem:[%s32839_s11 + $0x8e4] ss:$16 sps:$4 sm:$0xff]  }
 0xed3   :  { %14308 = vmatprep.subr.bf16.mxu0 %v24692_v44  ;;  %v24800_v28 = vld [vmem:[%s32839_s11 + $0x8c4] ss:$16 sps:$4 sm:$0xff]   ;;  %v24756_v44 = vld [vmem:[%s32839_s11 + $0x288] ss:$16 sps:$4 sm:$0xff]  }
 0xed5   :  { %14268 = vmatpush1.bf16.msra.mxu1 %v24687_v41  ;;  %v24761_v41 = vld [vmem:[%s32839_s11 + $0x26c] ss:$16 sps:$4 sm:$0xff]  }
 0xed6   :  { %14309 = vmatpush1.bf16.msra.mxu0 %v24690_v13  ;;  %14269 = vmatprep.subr.bf16.mxu1 %v24695_v39  ;;  %v24798_v13 = vld [vmem:[%s32839_s11 + $0x8c0] ss:$16 sps:$4 sm:$0xff]   ;;  %v24803_v39 = vld [vmem:[%s32839_s11 + $0x8a4] ss:$16 sps:$4 sm:$0xff]  }
 0xed7   :  { %14310 = vmatprep.subr.bf16.mxu0 %v24698_v5  ;;  %v24759_v5 = vld [vmem:[%s32839_s11 + $0x268] ss:$16 sps:$4 sm:$0xff]  }
 0xed9   :  { %14270 = vmatpush1.bf16.msra.mxu1 %v24693_v31  ;;  %v24764_v31 = vld [vmem:[%s32839_s11 + $0x24c] ss:$16 sps:$4 sm:$0xff]  }
 0xeda   :  { %14311 = vmatpush1.bf16.msra.mxu0 %v24696_v35  ;;  %14271 = vmatprep.subr.bf16.mxu1 %v24701_v62  ;;  %v24801_v35 = vld [vmem:[%s32839_s11 + $0x8a0] ss:$16 sps:$4 sm:$0xff]   ;;  %v24806_v62 = vld [vmem:[%s32839_s11 + $0x884] ss:$16 sps:$4 sm:$0xff]  }
 0xedb   :  { %14312 = vmatprep.subr.bf16.mxu0 %v24704_v59  ;;  %v24762_v59 = vld [vmem:[%s32839_s11 + $0x248] ss:$16 sps:$4 sm:$0xff]  }
 0xedd   :  { %14272 = vmatpush2.bf16.msra.mxu1 %v24699_v55  ;;  %v24767_v55 = vld [vmem:[%s32839_s11 + $0x22c] ss:$16 sps:$4 sm:$0xff]  }
 0xede   :  { %14313 = vmatpush2.bf16.msra.mxu0 %v24702_v43  ;;  %14273 = vmatprep.subr.bf16.mxu1 %v24707_v21  ;;  %v24804_v43 = vld [vmem:[%s32839_s11 + $0x880] ss:$16 sps:$4 sm:$0xff]   ;;  %v24809_v21 = vld [vmem:[%s32839_s11 + $0x864] ss:$16 sps:$4 sm:$0xff]  }
 0xedf   :  { %14314 = vmatprep.subr.bf16.mxu0 %v24710_v18  ;;  %v24765_v18 = vld [vmem:[%s32839_s11 + $0x228] ss:$16 sps:$4 sm:$0xff]  }
 0xee1   :  { %14274 = vmatpush2.bf16.msra.mxu1 %v24705_v37  ;;  %v24770_v37 = vld [vmem:[%s32839_s11 + $0x20c] ss:$16 sps:$4 sm:$0xff]  }
 0xee2   :  { %14315 = vmatpush2.bf16.msra.mxu0 %v24708_v34  ;;  %14275 = vmatprep.subr.bf16.mxu1 %v24713_v23  ;;  %v24807_v34 = vld [vmem:[%s32839_s11 + $0x860] ss:$16 sps:$4 sm:$0xff]   ;;  %v24812_v23 = vld [vmem:[%s32839_s11 + $0x844] ss:$16 sps:$4 sm:$0xff]  }
 0xee3   :  { %14316 = vmatprep.subr.bf16.mxu0 %v24716_v36  ;;  %v24768_v36 = vld [vmem:[%s32839_s11 + $0x208] ss:$16 sps:$4 sm:$0xff]  }
 0xee5   :  { %14276 = vmatpush2.bf16.msra.mxu1 %v24711_v63  ;;  %v24773_v63 = vld [vmem:[%s32839_s11 + $0x3ec] ss:$16 sps:$4 sm:$0xff]  }
 0xee6   :  { %14317 = vmatpush2.bf16.msra.mxu0 %v24714_v4  ;;  %14277 = vmatprep.subr.bf16.mxu1 %v24719_v42  ;;  %v24810_v4 = vld [vmem:[%s32839_s11 + $0x840] ss:$16 sps:$4 sm:$0xff]   ;;  %v24815_v42 = vld [vmem:[%s32839_s11 + $0x824] ss:$16 sps:$4 sm:$0xff]  }
 0xee7   :  { %14318 = vmatprep.subr.bf16.mxu0 %v24722_v38  ;;  %v24771_v38 = vld [vmem:[%s32839_s11 + $0x3e8] ss:$16 sps:$4 sm:$0xff]  }
 0xee9   :  { %14278 = vmatpush2.bf16.msra.mxu1 %v24717_v22  ;;  %v24776_v22 = vld [vmem:[%s32839_s11 + $0x3cc] ss:$16 sps:$4 sm:$0xff]  }
 0xeea   :  { %14319 = vmatpush2.bf16.msra.mxu0 %v24720_v17  ;;  %14279 = vmatprep.subr.bf16.mxu1 %v24725_v51  ;;  %v24813_v17 = vld [vmem:[%s32839_s11 + $0x820] ss:$16 sps:$4 sm:$0xff]   ;;  %v24818_v51 = vld [vmem:[%s32839_s11 + $0x804] ss:$16 sps:$4 sm:$0xff]  }
 0xeeb   :  { %14320 = vmatprep.subr.bf16.mxu0 %v24728_v9  ;;  %v24774_v9 = vld [vmem:[%s32839_s11 + $0x3c8] ss:$16 sps:$4 sm:$0xff]  }
 0xeed   :  { %14280 = vmatpush2.bf16.msra.mxu1 %v24723_v19  ;;  %v24779_v19 = vld [vmem:[%s32839_s11 + $0x3ac] ss:$16 sps:$4 sm:$0xff]  }
 0xeee   :  { %14321 = vmatpush2.bf16.msra.mxu0 %v24726_v15  ;;  %14281 = vmatprep.subr.bf16.mxu1 %v24731_v14  ;;  %v24816_v15 = vld [vmem:[%s32839_s11 + $0x800] ss:$16 sps:$4 sm:$0xff]   ;;  %v24821_v14 = vld [vmem:[%s32839_s11 + $0x9e4] ss:$16 sps:$4 sm:$0xff]  }
 0xeef   :  { %14322 = vmatprep.subr.bf16.mxu0 %v24734_v16  ;;  %v24777_v16 = vld [vmem:[%s32839_s11 + $0x3a8] ss:$16 sps:$4 sm:$0xff]  }
 0xef1   :  { %14282 = vmatpush2.bf16.msra.mxu1 %v24729_v57  ;;  %v24782_v57 = vld [vmem:[%s32839_s11 + $0x38c] ss:$16 sps:$4 sm:$0xff]  }
 0xef2   :  { %14323 = vmatpush2.bf16.msra.mxu0 %v24732_v8  ;;  %14283 = vmatprep.subr.bf16.mxu1 %v24737_v45  ;;  %v24819_v8 = vld [vmem:[%s32839_s11 + $0x9e0] ss:$16 sps:$4 sm:$0xff]   ;;  %v24824_v45 = vld [vmem:[%s32839_s11 + $0x9c4] ss:$16 sps:$4 sm:$0xff]  }
 0xef3   :  { %14324 = vmatprep.subr.bf16.mxu0 %v24740_v1  ;;  %v24780_v1 = vld [vmem:[%s32839_s11 + $0x388] ss:$16 sps:$4 sm:$0xff]  }
 0xef5   :  { %14284 = vmatpush2.bf16.msra.mxu1 %v24735_v49  ;;  %v24785_v49 = vld [vmem:[%s32839_s11 + $0x36c] ss:$16 sps:$4 sm:$0xff]  }
 0xef6   :  { %14325 = vmatpush2.bf16.msra.mxu0 %v24738_v10  ;;  %14285 = vmatprep.subr.bf16.mxu1 %v24743_v6  ;;  %v24822_v10 = vld [vmem:[%s32839_s11 + $0x9c0] ss:$16 sps:$4 sm:$0xff]   ;;  %v24827_v6 = vld [vmem:[%s32839_s11 + $0x9a4] ss:$16 sps:$4 sm:$0xff]  }
 0xef7   :  { %14326 = vmatprep.subr.bf16.mxu0 %v24746_v0  ;;  %v24783_v0 = vld [vmem:[%s32839_s11 + $0x368] ss:$16 sps:$4 sm:$0xff]  }
 0xef9   :  { %14286 = vmatpush2.bf16.msra.mxu1 %v24741_v32  ;;  %v24788_v32 = vld [vmem:[%s32839_s11 + $0x34c] ss:$16 sps:$4 sm:$0xff]  }
 0xefa   :  { %14327 = vmatpush2.bf16.msra.mxu0 %v24744_v29  ;;  %14337 = vmatprep.subr.bf16.mxu1 %v24749_v3  ;;  %v24825_v29 = vld [vmem:[%s32839_s11 + $0x9a0] ss:$16 sps:$4 sm:$0xff]   ;;  %v24830_v3 = vld [vmem:[%s32839_s11 + $0x984] ss:$16 sps:$4 sm:$0xff]  }
 0xefb   :  { %21161 = vmatprep.subr.msk.bf16.mxu0 %vm12323_vm13, %v30622_v47 }
 0xefc   :  { %14288 = vmatmul.mubr.bf16.vlgmr.msra.gmra.mxu1 %v31384_v48  ;;  %v31392_v7 = vpop.f32.mrf.mxu0 }
 0xefd   :  { %14329 = vmatmul.mubr.bf16.vlgmr.msra.gmra.mxu0 %v31186_v56  ;;  %14338 = vmatpush1.bf16.msra.mxu1 %v24747_v33  ;;  %v24753_v56 = vld [vmem:[%s32839_s11 + $0x2a8] ss:$16 sps:$4 sm:$0xff]  }
 0xefe   :  { %14369 = vmatprep.mubr.bf16.mxu1 %v31193_v20  ;;  %14398 = vmatpush1.bf16.msra.mxu0 %v30627_v27  ;;  %v31403_v50 = vpop.f32.mrf.mxu0  ;;  %v31412_v20 = vld [vmem:[%s32838_s10 + $0x4] sm:$0x3]  ;;  %v24786_v33 = vld [vmem:[%s32839_s11 + $0x348] ss:$16 sps:$4 sm:$0xff]  }
 0xeff   :  { %14339 = vmatprep.subr.bf16.mxu1 %v24752_v53  ;;  %14415 = vmatprep.mubr.bf16.mxu0 %v25357_v2  ;;  %v24791_v53 = vld [vmem:[%s32839_s11 + $0x32c] ss:$16 sps:$4 sm:$0xff]  }
 0xf00   :  { %v13448_v52 = vpop.f32.mrf.mxu0  ;;  %15238 = vmatprep.subr.bf16.mxu0 %v24797_v11 }
 0xf01   :  { %14340 = vmatpush1.bf16.msra.mxu1 %v24750_v12  ;;  %v24828_v12 = vld [vmem:[%s32839_s11 + $0x980] ss:$16 sps:$4 sm:$0xff]   ;;  %v24789_v52 = vld [vmem:[%s32839_s11 + $0x328] ss:$16 sps:$4 sm:$0xff]  }
 0xf02   :  { %14341 = vmatprep.subr.bf16.mxu1 %v24755_v46  ;;  %v13449_v30 = vpop.f32.mrf.mxu0  ;;  %v24833_v46 = vld [vmem:[%s32839_s11 + $0x964] ss:$16 sps:$4 sm:$0xff]  }
 0xf03   :  { %v24792_v30 = vld [vmem:[%s32839_s11 + $0x308] ss:$16 sps:$4 sm:$0xff]  }
 0xf05   :  { %14342 = vmatpush1.bf16.msra.mxu1 %v24753_v56  ;;  %21162 = vmatmul.mubr.msk.bf16.vlgmr.msra.gmra.mxu0 %vm12319_vm14, %v31412_v20  ;;  %v24794_v56 = vld [vmem:[%s32839_s11 + $0x30c] ss:$16 sps:$4 sm:$0xff]  }
 0xf06   :  { %14343 = vmatprep.subr.bf16.mxu1 %v24758_v58  ;;  %15239 = vmatpush1.bf16.msra.mxu0 %v24795_v54  ;;  %v24831_v58 = vld [vmem:[%s32839_s11 + $0x960] ss:$16 sps:$4 sm:$0xff]  }
 0xf07   :  { %15240 = vmatprep.subr.bf16.mxu0 %v24800_v28 }
 0xf09   :  { %14344 = vmatpush1.bf16.msra.mxu1 %v24756_v44  ;;  %v24836_v44 = vld [vmem:[%s32839_s11 + $0x944] ss:$16 sps:$4 sm:$0xff]  }
 0xf0a   :  { %14345 = vmatprep.subr.bf16.mxu1 %v24761_v41  ;;  %15241 = vmatpush1.bf16.msra.mxu0 %v24798_v13 }
 0xf0b   :  { %15242 = vmatprep.subr.bf16.mxu0 %v24803_v39 }
 0xf0d   :  { %14346 = vmatpush1.bf16.msra.mxu1 %v24759_v5 }
 0xf0e   :  { %14347 = vmatprep.subr.bf16.mxu1 %v24764_v31  ;;  %15243 = vmatpush1.bf16.msra.mxu0 %v24801_v35  ;;  %v24839_v31 = vld [vmem:[%s32839_s11 + $0x924] ss:$16 sps:$4 sm:$0xff]  }
 0xf0f   :  { %15244 = vmatprep.subr.bf16.mxu0 %v24806_v62 }
 0xf11   :  { %14348 = vmatpush1.bf16.msra.mxu1 %v24762_v59  ;;  %v24837_v59 = vld [vmem:[%s32839_s11 + $0x920] ss:$16 sps:$4 sm:$0xff]  }
 0xf12   :  { %14349 = vmatprep.subr.bf16.mxu1 %v24767_v55  ;;  %15245 = vmatpush1.bf16.msra.mxu0 %v24804_v43  ;;  %v24840_v55 = vld [vmem:[%s32839_s11 + $0x900] ss:$16 sps:$4 sm:$0xff]  }
 0xf13   :  { %15246 = vmatprep.subr.bf16.mxu0 %v24809_v21  ;;  %v24843_v43 = vld [vmem:[%s32839_s11 + $0xae0] ss:$16 sps:$4 sm:$0xff]   ;;  %v24845_v21 = vld [vmem:[%s32839_s11 + $0xae4] ss:$16 sps:$4 sm:$0xff]  }
 0xf15   :  { %14350 = vmatpush1.bf16.msra.mxu1 %v24765_v18  ;;  %v24849_v18 = vld [vmem:[%s32839_s11 + $0xac0] ss:$16 sps:$4 sm:$0xff]  }
 0xf16   :  { %14351 = vmatprep.subr.bf16.mxu1 %v24770_v37  ;;  %15247 = vmatpush1.bf16.msra.mxu0 %v24807_v34  ;;  %v24851_v37 = vld [vmem:[%s32839_s11 + $0xac4] ss:$16 sps:$4 sm:$0xff]   ;;  %v24855_v34 = vld [vmem:[%s32839_s11 + $0xaa0] ss:$16 sps:$4 sm:$0xff]  }
 0xf17   :  { %15248 = vmatprep.subr.bf16.mxu0 %v24812_v23  ;;  %v24857_v23 = vld [vmem:[%s32839_s11 + $0xaa4] ss:$16 sps:$4 sm:$0xff]  }
 0xf19   :  { %14352 = vmatpush1.bf16.msra.mxu1 %v24768_v36  ;;  %v24861_v36 = vld [vmem:[%s32839_s11 + $0xa80] ss:$16 sps:$4 sm:$0xff]  }
 0xf1a   :  { %14353 = vmatprep.subr.bf16.mxu1 %v24773_v63  ;;  %15249 = vmatpush1.bf16.msra.mxu0 %v24810_v4  ;;  %v24863_v63 = vld [vmem:[%s32839_s11 + $0xa84] ss:$16 sps:$4 sm:$0xff]   ;;  %v24867_v4 = vld [vmem:[%s32839_s11 + $0xa60] ss:$16 sps:$4 sm:$0xff]  }
 0xf1b   :  { %15250 = vmatprep.subr.bf16.mxu0 %v24815_v42  ;;  %v24869_v42 = vld [vmem:[%s32839_s11 + $0xa64] ss:$16 sps:$4 sm:$0xff]  }
 0xf1d   :  { %14354 = vmatpush2.bf16.msra.mxu1 %v24771_v38  ;;  %v24873_v38 = vld [vmem:[%s32839_s11 + $0xa40] ss:$16 sps:$4 sm:$0xff]  }
 0xf1e   :  { %14355 = vmatprep.subr.bf16.mxu1 %v24776_v22  ;;  %15251 = vmatpush1.bf16.msra.mxu0 %v24813_v17  ;;  %v24875_v22 = vld [vmem:[%s32839_s11 + $0xa44] ss:$16 sps:$4 sm:$0xff]   ;;  %v24879_v17 = vld [vmem:[%s32839_s11 + $0xa20] ss:$16 sps:$4 sm:$0xff]  }
 0xf1f   :  { %15252 = vmatprep.subr.bf16.mxu0 %v24818_v51  ;;  %v24881_v51 = vld [vmem:[%s32839_s11 + $0xa24] ss:$16 sps:$4 sm:$0xff]  }
 0xf21   :  { %14356 = vmatpush2.bf16.msra.mxu1 %v24774_v9  ;;  %v24885_v9 = vld [vmem:[%s32839_s11 + $0xa00] ss:$16 sps:$4 sm:$0xff]  }
 0xf22   :  { %14357 = vmatprep.subr.bf16.mxu1 %v24779_v19  ;;  %15253 = vmatpush1.bf16.msra.mxu0 %v24816_v15  ;;  %v24887_v19 = vld [vmem:[%s32839_s11 + $0xa04] ss:$16 sps:$4 sm:$0xff]   ;;  %v24891_v15 = vld [vmem:[%s32839_s11 + $0xbe0] ss:$16 sps:$4 sm:$0xff]  }
 0xf23   :  { %15254 = vmatprep.subr.bf16.mxu0 %v24821_v14  ;;  %v24893_v14 = vld [vmem:[%s32839_s11 + $0xbe4] ss:$16 sps:$4 sm:$0xff]  }
 0xf25   :  { %14358 = vmatpush2.bf16.msra.mxu1 %v24777_v16  ;;  %v24897_v16 = vld [vmem:[%s32839_s11 + $0xbc0] ss:$16 sps:$4 sm:$0xff]  }
 0xf26   :  { %14359 = vmatprep.subr.bf16.mxu1 %v24782_v57  ;;  %15255 = vmatpush2.bf16.msra.mxu0 %v24819_v8  ;;  %v24899_v57 = vld [vmem:[%s32839_s11 + $0xbc4] ss:$16 sps:$4 sm:$0xff]   ;;  %v24903_v8 = vld [vmem:[%s32839_s11 + $0xba0] ss:$16 sps:$4 sm:$0xff]  }
 0xf27   :  { %15256 = vmatprep.subr.bf16.mxu0 %v24824_v45  ;;  %v24905_v45 = vld [vmem:[%s32839_s11 + $0xba4] ss:$16 sps:$4 sm:$0xff]  }
 0xf29   :  { %14360 = vmatpush2.bf16.msra.mxu1 %v24780_v1  ;;  %v24909_v1 = vld [vmem:[%s32839_s11 + $0xb80] ss:$16 sps:$4 sm:$0xff]  }
 0xf2a   :  { %14361 = vmatprep.subr.bf16.mxu1 %v24785_v49  ;;  %15257 = vmatpush2.bf16.msra.mxu0 %v24822_v10  ;;  %v24911_v49 = vld [vmem:[%s32839_s11 + $0xb84] ss:$16 sps:$4 sm:$0xff]   ;;  %v24915_v10 = vld [vmem:[%s32839_s11 + $0xb60] ss:$16 sps:$4 sm:$0xff]  }
 0xf2b   :  { %15258 = vmatprep.subr.bf16.mxu0 %v24827_v6  ;;  %v24917_v6 = vld [vmem:[%s32839_s11 + $0xb64] ss:$16 sps:$4 sm:$0xff]  }
 0xf2d   :  { %14362 = vmatpush2.bf16.msra.mxu1 %v24783_v0 }
 0xf2e   :  { %14363 = vmatprep.subr.bf16.mxu1 %v24788_v32  ;;  %15259 = vmatpush2.bf16.msra.mxu0 %v24825_v29  ;;  %v24923_v32 = vld [vmem:[%s32839_s11 + $0xb44] ss:$16 sps:$4 sm:$0xff]  }
 0xf2f   :  { %15260 = vmatprep.subr.bf16.mxu0 %v24830_v3 }
 0xf31   :  { %14364 = vmatpush2.bf16.msra.mxu1 %v24786_v33  ;;  %v24921_v33 = vld [vmem:[%s32839_s11 + $0xb40] ss:$16 sps:$4 sm:$0xff]  }
 0xf32   :  { %14365 = vmatprep.subr.bf16.mxu1 %v24791_v53  ;;  %15261 = vmatpush2.bf16.msra.mxu0 %v24828_v12 }
 0xf33   :  { %15262 = vmatprep.subr.bf16.mxu0 %v24833_v46 }
 0xf35   :  { %14366 = vmatpush2.bf16.msra.mxu1 %v24789_v52 }
 0xf36   :  { %14367 = vmatprep.subr.bf16.mxu1 %v24794_v56  ;;  %15263 = vmatpush2.bf16.msra.mxu0 %v24831_v58 }
 0xf37   :  { %15264 = vmatprep.subr.bf16.mxu0 %v24836_v44 }
 0xf39   :  { %14368 = vmatpush2.bf16.msra.mxu1 %v24792_v30  ;;  %v24927_v30 = vld [vmem:[%s32839_s11 + $0xb20] ss:$16 sps:$4 sm:$0xff]  }
 0xf3a   :  { %21163 = vmatprep.subr.msk.bf16.mxu1 %vm12323_vm13, %v30734_v26 }
 0xf3c   :  { %14370 = vmatmul.mubr.bf16.vlgmr.msra.gmra.mxu1 %v31384_v48  ;;  %v13485_v54 = vpop.f32.mrf.mxu1  ;;  %v31575_v11 = vpop.f32.mrf.mxu0  ;;  %v24834_v48 = vld [vmem:[%s32839_s11 + $0x940] ss:$16 sps:$4 sm:$0xff]  }
 0xf3d   :  { %v31578_v28 = vadd.f32 %v13485_v54, %v31392_v7  ;;  %14439 = vmatpush1.bf16.msra.mxu1 %v30739_v24  ;;  %14456 = vmatprep.mubr.bf16.mxu1 %v25357_v2  ;;  %v24929_v54 = vld [vmem:[%s32839_s11 + $0xb24] ss:$16 sps:$4 sm:$0xff]  }
 0xf3e   :  { %v13487_v41 = vpop.f32.mrf.mxu1  ;;  %v31585_v13 = vpop.f32.mrf.mxu0  ;;  %15265 = vmatpush2.bf16.msra.mxu0 %v24834_v48  ;;  %15279 = vmatprep.subr.bf16.mxu1 %v24845_v21  ;;  %v24941_v48 = vld [vmem:[%s32839_s11 + $0xaec] ss:$16 sps:$4 sm:$0xff]  }
 0xf3f   :  { %v31591_v39 = vadd.f32 %v13487_v41, %v31403_v50  ;;  %15266 = vmatprep.subr.bf16.mxu0 %v24839_v31  ;;  %v24842_v50 = vld [vmem:[%s32839_s11 + $0x904] ss:$16 sps:$4 sm:$0xff]  }
 0xf40   :  { %v13489_v7 = vpop.f32.mrf.mxu1  ;;  %v13530_v5 = vpop.f32.mrf.mxu0  ;;  %v24935_v41 = vld [vmem:[%s32839_s11 + $0xb04] ss:$16 sps:$4 sm:$0xff]  }
 0xf42   :  { %v13490_v35 = vpop.f32.mrf.mxu1  ;;  %v13531_v62 = vpop.f32.mrf.mxu0  ;;  %15267 = vmatpush2.bf16.msra.mxu0 %v24837_v59 }
 0xf43   :  { %15268 = vmatprep.subr.bf16.mxu0 %v24842_v50 }
 0xf44   :  { %21164 = vmatmul.mubr.msk.bf16.vlgmr.msra.gmra.mxu1 %vm12319_vm14, %v31412_v20  ;;  %v24848_v20 = vld [vmem:[%s32839_s11 + $0x8ec] ss:$16 sps:$4 sm:$0xff]  }
 0xf45   :  { %15280 = vmatpush1.bf16.msra.mxu1 %v24843_v43 }
 0xf46   :  { %15269 = vmatpush2.bf16.msra.mxu0 %v24840_v55  ;;  %15281 = vmatprep.subr.bf16.mxu1 %v24851_v37 }
 0xf47   :  { %15320 = vmatprep.subr.bf16.mxu0 %v24848_v20 }
 0xf49   :  { %15282 = vmatpush1.bf16.msra.mxu1 %v24849_v18 }
 0xf4a   :  { %15283 = vmatprep.subr.bf16.mxu1 %v24857_v23 }
 0xf4d   :  { %15284 = vmatpush1.bf16.msra.mxu1 %v24855_v34 }
 0xf4e   :  { %15285 = vmatprep.subr.bf16.mxu1 %v24863_v63  ;;  %v24854_v63 = vld [vmem:[%s32839_s11 + $0x8cc] ss:$16 sps:$4 sm:$0xff]  }
 0xf51   :  { %15286 = vmatpush1.bf16.msra.mxu1 %v24861_v36  ;;  %v24846_v36 = vld [vmem:[%s32839_s11 + $0x8e8] ss:$16 sps:$4 sm:$0xff]  }
 0xf52   :  { %15287 = vmatprep.subr.bf16.mxu1 %v24869_v42 }
 0xf55   :  { %15288 = vmatpush1.bf16.msra.mxu1 %v24867_v4 }
 0xf56   :  { %15289 = vmatprep.subr.bf16.mxu1 %v24875_v22  ;;  %v24860_v22 = vld [vmem:[%s32839_s11 + $0x8ac] ss:$16 sps:$4 sm:$0xff]  }
 0xf59   :  { %15290 = vmatpush1.bf16.msra.mxu1 %v24873_v38  ;;  %v24852_v38 = vld [vmem:[%s32839_s11 + $0x8c8] ss:$16 sps:$4 sm:$0xff]  }
 0xf5a   :  { %15291 = vmatprep.subr.bf16.mxu1 %v24881_v51  ;;  %v24866_v51 = vld [vmem:[%s32839_s11 + $0x88c] ss:$16 sps:$4 sm:$0xff]  }
 0xf5d   :  { %15292 = vmatpush1.bf16.msra.mxu1 %v24879_v17  ;;  %v24858_v17 = vld [vmem:[%s32839_s11 + $0x8a8] ss:$16 sps:$4 sm:$0xff]  }
 0xf5e   :  { %15293 = vmatprep.subr.bf16.mxu1 %v24887_v19  ;;  %v24872_v19 = vld [vmem:[%s32839_s11 + $0x86c] ss:$16 sps:$4 sm:$0xff]  }
 0xf61   :  { %15294 = vmatpush1.bf16.msra.mxu1 %v24885_v9  ;;  %v24864_v9 = vld [vmem:[%s32839_s11 + $0x888] ss:$16 sps:$4 sm:$0xff]  }
 0xf62   :  { %15295 = vmatprep.subr.bf16.mxu1 %v24893_v14  ;;  %v24878_v14 = vld [vmem:[%s32839_s11 + $0x84c] ss:$16 sps:$4 sm:$0xff]  }
 0xf65   :  { %15296 = vmatpush2.bf16.msra.mxu1 %v24891_v15  ;;  %v24870_v15 = vld [vmem:[%s32839_s11 + $0x868] ss:$16 sps:$4 sm:$0xff]  }
 0xf66   :  { %15297 = vmatprep.subr.bf16.mxu1 %v24899_v57  ;;  %v24884_v57 = vld [vmem:[%s32839_s11 + $0x82c] ss:$16 sps:$4 sm:$0xff]  }
 0xf69   :  { %15298 = vmatpush2.bf16.msra.mxu1 %v24897_v16  ;;  %v24876_v16 = vld [vmem:[%s32839_s11 + $0x848] ss:$16 sps:$4 sm:$0xff]  }
 0xf6a   :  { %15299 = vmatprep.subr.bf16.mxu1 %v24905_v45  ;;  %v24890_v45 = vld [vmem:[%s32839_s11 + $0x80c] ss:$16 sps:$4 sm:$0xff]  }
 0xf6d   :  { %15300 = vmatpush2.bf16.msra.mxu1 %v24903_v8  ;;  %v24882_v8 = vld [vmem:[%s32839_s11 + $0x828] ss:$16 sps:$4 sm:$0xff]  }
 0xf6e   :  { %15301 = vmatprep.subr.bf16.mxu1 %v24911_v49  ;;  %v24896_v49 = vld [vmem:[%s32839_s11 + $0x9ec] ss:$16 sps:$4 sm:$0xff]  }
 0xf71   :  { %15302 = vmatpush2.bf16.msra.mxu1 %v24909_v1  ;;  %v24888_v1 = vld [vmem:[%s32839_s11 + $0x808] ss:$16 sps:$4 sm:$0xff]  }
 0xf72   :  { %15303 = vmatprep.subr.bf16.mxu1 %v24917_v6  ;;  %v24902_v6 = vld [vmem:[%s32839_s11 + $0x9cc] ss:$16 sps:$4 sm:$0xff]  }
 0xf75   :  { %15304 = vmatpush2.bf16.msra.mxu1 %v24915_v10  ;;  %v24894_v10 = vld [vmem:[%s32839_s11 + $0x9e8] ss:$16 sps:$4 sm:$0xff]  }
 0xf76   :  { %15305 = vmatprep.subr.bf16.mxu1 %v24923_v32  ;;  %v24908_v32 = vld [vmem:[%s32839_s11 + $0x9ac] ss:$16 sps:$4 sm:$0xff]  }
 0xf79   :  { %15306 = vmatpush2.bf16.msra.mxu1 %v24921_v33  ;;  %v24912_v33 = vld [vmem:[%s32839_s11 + $0x988] ss:$16 sps:$4 sm:$0xff]  }
 0xf7a   :  { %15307 = vmatprep.subr.bf16.mxu1 %v24929_v54 }
 0xf7c   :  { %v13567_v0 = vpop.f32.mrf.mxu1 }
 0xf7d   :  { %v13568_v29 = vadd.f32 %v13567_v0, %v31575_v11  ;;  %v14248_v3 = vpop.f32.mrf.mxu0  ;;  %15308 = vmatpush2.bf16.msra.mxu1 %v24927_v30  ;;  %v24900_v0 = vld [vmem:[%s32839_s11 + $0x9c8] ss:$16 sps:$4 sm:$0xff]   ;;  %v24932_v30 = vld [vmem:[%s32839_s11 + $0x92c] ss:$16 sps:$4 sm:$0xff]  }
 0xf7e   :  { %v14249_v53 = vadd.f32 %v14248_v3, %v31578_v28  ;;  %v13569_v12 = vpop.f32.mrf.mxu1  ;;  %15309 = vmatprep.subr.bf16.mxu1 %v24935_v41  ;;  %v24914_v3 = vld [vmem:[%s32839_s11 + $0x98c] ss:$16 sps:$4 sm:$0xff]  }
 0xf7f   :  { %v13570_v46 = vadd.f32 %v13569_v12, %v31585_v13  ;;  %v14250_v52 = vpop.f32.mrf.mxu0  ;;  %v24933_v13 = vld [vmem:[%s32839_s11 + $0xb00] ss:$16 sps:$4 sm:$0xff]   ;;  %v24918_v12 = vld [vmem:[%s32839_s11 + $0x968] ss:$16 sps:$4 sm:$0xff]   ;;  %v24938_v41 = vld [vmem:[%s32839_s11 + $0x90c] ss:$16 sps:$4 sm:$0xff]  }
 0xf80   :  { %v14251_v56 = vadd.f32 %v14250_v52, %v31591_v39  ;;  %v13571_v58 = vpop.f32.mrf.mxu1 }
 0xf81   :  { %v14252_v11 = vpop.f32.mrf.mxu0  ;;  %15310 = vmatpush2.bf16.msra.mxu1 %v24933_v13 }
 0xf82   :  { %v13572_v44 = vpop.f32.mrf.mxu1  ;;  %15361 = vmatprep.subr.bf16.mxu1 %v24941_v48 }
 0xf83   :  { %v14253_v28 = vpop.f32.mrf.mxu0 }
 0xf84   :  { %v24930_v28 = vld [vmem:[%s32839_s11 + $0x928] ss:$16 sps:$4 sm:$0xff]  }
 0xfbc   :  { %v14289_v39 = vpop.f32.mrf.mxu1 }
 0xfbd   :  { %v31713_v7 = vadd.f32 %v14289_v39, %v14249_v53  ;;  %v14330_v5 = vpop.f32.mrf.mxu0  ;;  %v24920_v53 = vld [vmem:[%s32839_s11 + $0x96c] ss:$16 sps:$4 sm:$0xff]   ;;  %v24936_v39 = vld [vmem:[%s32839_s11 + $0x908] ss:$16 sps:$4 sm:$0xff]  }
 0xfbe   :  { %v31715_v31 = vadd.f32 %v14330_v5, %v13568_v29  ;;  %v14291_v35 = vpop.f32.mrf.mxu1  ;;  %v24906_v29 = vld [vmem:[%s32839_s11 + $0x9a8] ss:$16 sps:$4 sm:$0xff]  }
 0xfbf   :  { %v31717_v62 = vadd.f32 %v14291_v35, %v14251_v56  ;;  %v14332_v59 = vpop.f32.mrf.mxu0  ;;  %v24924_v56 = vld [vmem:[%s32839_s11 + $0x948] ss:$16 sps:$4 sm:$0xff]  }
 0xfc0   :  { %v31719_v50 = vadd.f32 %v14332_v59, %v13570_v46  ;;  %v14293_v55 = vpop.f32.mrf.mxu1  ;;  %v24926_v46 = vld [vmem:[%s32839_s11 + $0x94c] ss:$16 sps:$4 sm:$0xff]   ;;  %v24939_v35 = vld [vmem:[%s32839_s11 + $0xae8] ss:$16 sps:$4 sm:$0xff]  }
 0xfc1   :  { %v14334_v43 = vpop.f32.mrf.mxu0  ;;  %v24944_v55 = vld [vmem:[%s32839_s11 + $0xacc] ss:$16 sps:$4 sm:$0xff]  }
 0xfc2   :  { %v14294_v21 = vpop.f32.mrf.mxu1 }
 0xfc3   :  { %v14335_v20 = vpop.f32.mrf.mxu0  ;;  %v24989_v21 = vld [vmem:[%s32839_s11 + $0xce4] ss:$16 sps:$4 sm:$0xff]  }
 0xfc4   :  { %v24942_v20 = vld [vmem:[%s32839_s11 + $0xac8] ss:$16 sps:$4 sm:$0xff]  }
 0xfc5   :  { %v14417_v18 = vpop.f32.mrf.mxu0 }
 0xfc6   :  { %v31721_v37 = vpack.c.bf16 %v14417_v18, %v14417_v18  ;;  %v24945_v18 = vld [vmem:[%s32839_s11 + $0xaa8] ss:$16 sps:$4 sm:$0xff]  }
 0xfc7   :  { %v14419_v34 = vpop.f32.mrf.mxu0 }
 0xfc8   :  { %v14466_v23 = vpack.c.bf16 %v14419_v34, %v14419_v34  ;;  %v24987_v34 = vld [vmem:[%s32839_s11 + $0xce0] ss:$16 sps:$4 sm:$0xff]  }
 0xfc9   :  { %v14421_v4 = vpop.f32.mrf.mxu0 }
 0xfca   :  { %15270 = vmatprep.mubr.bf16.mxu0 %v14466_v23  ;;  %v24990_v4 = vld [vmem:[%s32839_s11 + $0xcc0] ss:$16 sps:$4 sm:$0xff]  }
 0xfcb   :  { %15271 = vmatmul.mubr.bf16.vlgmr.msra.gmra.mxu0 %v31721_v37  ;;  %v14422_v42 = vpop.f32.mrf.mxu0 }
 0xfcc   :  { %15321 = vmatpush1.bf16.msra.mxu0 %v24846_v36  ;;  %15352 = vmatprep.mubr.bf16.mxu0 %v14466_v23  ;;  %v24992_v23 = vld [vmem:[%s32839_s11 + $0xcc4] ss:$16 sps:$4 sm:$0xff]   ;;  %v24948_v36 = vld [vmem:[%s32839_s11 + $0xa88] ss:$16 sps:$4 sm:$0xff]  }
 0xfcd   :  { %15322 = vmatprep.subr.bf16.mxu0 %v24854_v63  ;;  %v24953_v63 = vld [vmem:[%s32839_s11 + $0xa6c] ss:$16 sps:$4 sm:$0xff]   ;;  %v24995_v42 = vld [vmem:[%s32839_s11 + $0xca4] ss:$16 sps:$4 sm:$0xff]  }
 0xfd0   :  { %15323 = vmatpush1.bf16.msra.mxu0 %v24852_v38  ;;  %v24951_v38 = vld [vmem:[%s32839_s11 + $0xa68] ss:$16 sps:$4 sm:$0xff]  }
 0xfd1   :  { %15324 = vmatprep.subr.bf16.mxu0 %v24860_v22  ;;  %v24956_v22 = vld [vmem:[%s32839_s11 + $0xa4c] ss:$16 sps:$4 sm:$0xff]  }
 0xfd4   :  { %15325 = vmatpush1.bf16.msra.mxu0 %v24858_v17  ;;  %v24993_v17 = vld [vmem:[%s32839_s11 + $0xca0] ss:$16 sps:$4 sm:$0xff]  }
 0xfd5   :  { %15326 = vmatprep.subr.bf16.mxu0 %v24866_v51  ;;  %v24998_v51 = vld [vmem:[%s32839_s11 + $0xc84] ss:$16 sps:$4 sm:$0xff]  }
 0xfd8   :  { %15327 = vmatpush1.bf16.msra.mxu0 %v24864_v9  ;;  %v24954_v9 = vld [vmem:[%s32839_s11 + $0xa48] ss:$16 sps:$4 sm:$0xff]  }
 0xfd9   :  { %15328 = vmatprep.subr.bf16.mxu0 %v24872_v19  ;;  %v24959_v19 = vld [vmem:[%s32839_s11 + $0xa2c] ss:$16 sps:$4 sm:$0xff]  }
 0xfdc   :  { %15329 = vmatpush1.bf16.msra.mxu0 %v24870_v15  ;;  %v24996_v15 = vld [vmem:[%s32839_s11 + $0xc80] ss:$16 sps:$4 sm:$0xff]  }
 0xfdd   :  { %15330 = vmatprep.subr.bf16.mxu0 %v24878_v14  ;;  %v25001_v14 = vld [vmem:[%s32839_s11 + $0xc64] ss:$16 sps:$4 sm:$0xff]  }
 0xfe0   :  { %15331 = vmatpush1.bf16.msra.mxu0 %v24876_v16  ;;  %v24957_v16 = vld [vmem:[%s32839_s11 + $0xa28] ss:$16 sps:$4 sm:$0xff]  }
 0xfe1   :  { %15332 = vmatprep.subr.bf16.mxu0 %v24884_v57  ;;  %v24962_v57 = vld [vmem:[%s32839_s11 + $0xa0c] ss:$16 sps:$4 sm:$0xff]  }
 0xfe4   :  { %15333 = vmatpush1.bf16.msra.mxu0 %v24882_v8  ;;  %v24999_v8 = vld [vmem:[%s32839_s11 + $0xc60] ss:$16 sps:$4 sm:$0xff]  }
 0xfe5   :  { %15334 = vmatprep.subr.bf16.mxu0 %v24890_v45  ;;  %v25004_v45 = vld [vmem:[%s32839_s11 + $0xc44] ss:$16 sps:$4 sm:$0xff]  }
 0xfe8   :  { %15335 = vmatpush1.bf16.msra.mxu0 %v24888_v1  ;;  %v24960_v1 = vld [vmem:[%s32839_s11 + $0xa08] ss:$16 sps:$4 sm:$0xff]  }
 0xfe9   :  { %15336 = vmatprep.subr.bf16.mxu0 %v24896_v49  ;;  %v24965_v49 = vld [vmem:[%s32839_s11 + $0xbec] ss:$16 sps:$4 sm:$0xff]  }
 0xfec   :  { %15337 = vmatpush2.bf16.msra.mxu0 %v24894_v10  ;;  %v25002_v10 = vld [vmem:[%s32839_s11 + $0xc40] ss:$16 sps:$4 sm:$0xff]  }
 0xfed   :  { %15338 = vmatprep.subr.bf16.mxu0 %v24902_v6  ;;  %v25007_v6 = vld [vmem:[%s32839_s11 + $0xc24] ss:$16 sps:$4 sm:$0xff]  }
 0xff0   :  { %15339 = vmatpush2.bf16.msra.mxu0 %v24900_v0  ;;  %v24963_v0 = vld [vmem:[%s32839_s11 + $0xbe8] ss:$16 sps:$4 sm:$0xff]  }
 0xff1   :  { %15340 = vmatprep.subr.bf16.mxu0 %v24908_v32  ;;  %v24968_v32 = vld [vmem:[%s32839_s11 + $0xbcc] ss:$16 sps:$4 sm:$0xff]  }
 0xff4   :  { %15341 = vmatpush2.bf16.msra.mxu0 %v24906_v29  ;;  %v25005_v29 = vld [vmem:[%s32839_s11 + $0xc20] ss:$16 sps:$4 sm:$0xff]  }
 0xff5   :  { %15342 = vmatprep.subr.bf16.mxu0 %v24914_v3  ;;  %v25010_v3 = vld [vmem:[%s32839_s11 + $0xc04] ss:$16 sps:$4 sm:$0xff]  }
 0xff8   :  { %15343 = vmatpush2.bf16.msra.mxu0 %v24912_v33  ;;  %v24966_v33 = vld [vmem:[%s32839_s11 + $0xbc8] ss:$16 sps:$4 sm:$0xff]  }
 0xff9   :  { %15344 = vmatprep.subr.bf16.mxu0 %v24920_v53  ;;  %v24971_v53 = vld [vmem:[%s32839_s11 + $0xbac] ss:$16 sps:$4 sm:$0xff]  }
 0xffc   :  { %15345 = vmatpush2.bf16.msra.mxu0 %v24918_v12  ;;  %v14371_v52 = vpop.f32.mrf.mxu1  ;;  %v25008_v12 = vld [vmem:[%s32839_s11 + $0xc00] ss:$16 sps:$4 sm:$0xff]  }
 0xffd   :  { %v31806_v58 = vadd.f32 %v14371_v52, %v31715_v31  ;;  %15346 = vmatprep.subr.bf16.mxu0 %v24926_v46  ;;  %v25013_v46 = vld [vmem:[%s32839_s11 + $0xde4] ss:$16 sps:$4 sm:$0xff]   ;;  %v24969_v52 = vld [vmem:[%s32839_s11 + $0xba8] ss:$16 sps:$4 sm:$0xff]  }
 0xffe   :  { %v14373_v54 = vpop.f32.mrf.mxu1 }
 0xfff   :  { %v31812_v11 = vadd.f32 %v14373_v54, %v31719_v50  ;;  %v25016_v54 = vld [vmem:[%s32839_s11 + $0xdc4] ss:$16 sps:$4 sm:$0xff]  }
0x1000   :  { %15347 = vmatpush2.bf16.msra.mxu0 %v24924_v56  ;;  %v14375_v44 = vpop.f32.mrf.mxu1  ;;  %v24974_v56 = vld [vmem:[%s32839_s11 + $0xb8c] ss:$16 sps:$4 sm:$0xff]  }
0x1001   :  { %15348 = vmatprep.subr.bf16.mxu0 %v24932_v30  ;;  %v25011_v30 = vld [vmem:[%s32839_s11 + $0xde0] ss:$16 sps:$4 sm:$0xff]   ;;  %v24972_v44 = vld [vmem:[%s32839_s11 + $0xb88] ss:$16 sps:$4 sm:$0xff]  }
0x1002   :  { %v14376_v13 = vpop.f32.mrf.mxu1 }
0x1003   :  { %v25019_v13 = vld [vmem:[%s32839_s11 + $0xda4] ss:$16 sps:$4 sm:$0xff]  }
0x1004   :  { %15349 = vmatpush2.bf16.msra.mxu0 %v24930_v28  ;;  %v14458_v48 = vpop.f32.mrf.mxu1  ;;  %v24977_v28 = vld [vmem:[%s32839_s11 + $0xb6c] ss:$16 sps:$4 sm:$0xff]  }
0x1005   :  { %15350 = vmatprep.subr.bf16.mxu0 %v24938_v41  ;;  %v31826_v59 = vpack.c.bf16 %v14458_v48, %v14458_v48  ;;  %v25014_v41 = vld [vmem:[%s32839_s11 + $0xdc0] ss:$16 sps:$4 sm:$0xff]   ;;  %v24975_v48 = vld [vmem:[%s32839_s11 + $0xb68] ss:$16 sps:$4 sm:$0xff]  }
0x1006   :  { %v14460_v5 = vpop.f32.mrf.mxu1 }
0x1007   :  { %v14468_v31 = vpack.c.bf16 %v14460_v5, %v14460_v5  ;;  %v25017_v5 = vld [vmem:[%s32839_s11 + $0xda0] ss:$16 sps:$4 sm:$0xff]  }
0x1008   :  { %15351 = vmatpush2.bf16.msra.mxu0 %v24936_v39  ;;  %v14462_v50 = vpop.f32.mrf.mxu1  ;;  %v24980_v39 = vld [vmem:[%s32839_s11 + $0xb4c] ss:$16 sps:$4 sm:$0xff]  }
0x1009   :  { %21422 = vmatprep.subr.msk.bf16.mxu0 %vm12323_vm13, %v30622_v47  ;;  %15311 = vmatprep.mubr.bf16.mxu1 %v14468_v31  ;;  %v24947_v47 = vld [vmem:[%s32839_s11 + $0xaac] ss:$16 sps:$4 sm:$0xff]  }
0x100a   :  { %v14463_v43 = vpop.f32.mrf.mxu1  ;;  %15312 = vmatmul.mubr.bf16.vlgmr.msra.gmra.mxu1 %v31826_v59  ;;  %v24983_v50 = vld [vmem:[%s32839_s11 + $0xb2c] ss:$16 sps:$4 sm:$0xff]  }
0x100b   :  { %15353 = vmatmul.mubr.bf16.vlgmr.msra.gmra.mxu0 %v31721_v37  ;;  %15362 = vmatpush1.bf16.msra.mxu1 %v24939_v35  ;;  %v31852_v37 = vld [vmem:[%s32838_s10 + $0x6] sm:$0x3]  ;;  %v24978_v35 = vld [vmem:[%s32839_s11 + $0xb48] ss:$16 sps:$4 sm:$0xff]  }
0x100c   :  { %15393 = vmatprep.mubr.bf16.mxu1 %v14468_v31  ;;  %15426 = vmatpush1.bf16.msra.mxu0 %v30627_v27  ;;  %v24950_v27 = vld [vmem:[%s32839_s11 + $0xa8c] ss:$16 sps:$4 sm:$0xff]   ;;  %v25022_v31 = vld [vmem:[%s32839_s11 + $0xd84] ss:$16 sps:$4 sm:$0xff]  }
0x100d   :  { %15363 = vmatprep.subr.bf16.mxu1 %v24944_v55  ;;  %15443 = vmatprep.mubr.bf16.mxu0 %v25357_v2  ;;  %v25020_v55 = vld [vmem:[%s32839_s11 + $0xd80] ss:$16 sps:$4 sm:$0xff]   ;;  %v25025_v43 = vld [vmem:[%s32839_s11 + $0xd64] ss:$16 sps:$4 sm:$0xff]  }
0x100e   :  { %16266 = vmatprep.subr.bf16.mxu0 %v24989_v21  ;;  %v24981_v21 = vld [vmem:[%s32839_s11 + $0xb28] ss:$16 sps:$4 sm:$0xff]  }
0x100f   :  { %15364 = vmatpush1.bf16.msra.mxu1 %v24942_v20  ;;  %v24986_v20 = vld [vmem:[%s32839_s11 + $0xb0c] ss:$16 sps:$4 sm:$0xff]  }
0x1010   :  { %15365 = vmatprep.subr.bf16.mxu1 %v24947_v47  ;;  %v25023_v47 = vld [vmem:[%s32839_s11 + $0xd60] ss:$16 sps:$4 sm:$0xff]  }
0x1013   :  { %15366 = vmatpush1.bf16.msra.mxu1 %v24945_v18  ;;  %21423 = vmatmul.mubr.msk.bf16.vlgmr.msra.gmra.mxu0 %vm12319_vm14, %v31852_v37  ;;  %v24984_v18 = vld [vmem:[%s32839_s11 + $0xb08] ss:$16 sps:$4 sm:$0xff]  }
0x1014   :  { %15367 = vmatprep.subr.bf16.mxu1 %v24950_v27  ;;  %16267 = vmatpush1.bf16.msra.mxu0 %v24987_v34  ;;  %v25028_v27 = vld [vmem:[%s32839_s11 + $0xd44] ss:$16 sps:$4 sm:$0xff]   ;;  %v25026_v34 = vld [vmem:[%s32839_s11 + $0xd40] ss:$16 sps:$4 sm:$0xff]  }
0x1015   :  { %16268 = vmatprep.subr.bf16.mxu0 %v24992_v23  ;;  %v25032_v23 = vld [vmem:[%s32839_s11 + $0xd00] ss:$16 sps:$4 sm:$0xff]  }
0x1017   :  { %15368 = vmatpush1.bf16.msra.mxu1 %v24948_v36  ;;  %v25037_v36 = vld [vmem:[%s32839_s11 + $0xee4] ss:$16 sps:$4 sm:$0xff]  }
0x1018   :  { %15369 = vmatprep.subr.bf16.mxu1 %v24953_v63  ;;  %16269 = vmatpush1.bf16.msra.mxu0 %v24990_v4  ;;  %v25035_v63 = vld [vmem:[%s32839_s11 + $0xee0] ss:$16 sps:$4 sm:$0xff]  }
0x1019   :  { %16270 = vmatprep.subr.bf16.mxu0 %v24995_v42  ;;  %v25041_v4 = vld [vmem:[%s32839_s11 + $0xec0] ss:$16 sps:$4 sm:$0xff]   ;;  %v25043_v42 = vld [vmem:[%s32839_s11 + $0xec4] ss:$16 sps:$4 sm:$0xff]  }
0x101b   :  { %15370 = vmatpush1.bf16.msra.mxu1 %v24951_v38  ;;  %v25047_v38 = vld [vmem:[%s32839_s11 + $0xea0] ss:$16 sps:$4 sm:$0xff]  }
0x101c   :  { %15371 = vmatprep.subr.bf16.mxu1 %v24956_v22  ;;  %16271 = vmatpush1.bf16.msra.mxu0 %v24993_v17  ;;  %v25049_v22 = vld [vmem:[%s32839_s11 + $0xea4] ss:$16 sps:$4 sm:$0xff]   ;;  %v25053_v17 = vld [vmem:[%s32839_s11 + $0xe80] ss:$16 sps:$4 sm:$0xff]  }
0x101d   :  { %16272 = vmatprep.subr.bf16.mxu0 %v24998_v51  ;;  %v25055_v51 = vld [vmem:[%s32839_s11 + $0xe84] ss:$16 sps:$4 sm:$0xff]  }
0x101f   :  { %15372 = vmatpush1.bf16.msra.mxu1 %v24954_v9  ;;  %v25059_v9 = vld [vmem:[%s32839_s11 + $0xe60] ss:$16 sps:$4 sm:$0xff]  }
0x1020   :  { %15373 = vmatprep.subr.bf16.mxu1 %v24959_v19  ;;  %16273 = vmatpush1.bf16.msra.mxu0 %v24996_v15  ;;  %v25061_v19 = vld [vmem:[%s32839_s11 + $0xe64] ss:$16 sps:$4 sm:$0xff]   ;;  %v25065_v15 = vld [vmem:[%s32839_s11 + $0xe40] ss:$16 sps:$4 sm:$0xff]  }
0x1021   :  { %16274 = vmatprep.subr.bf16.mxu0 %v25001_v14  ;;  %v25067_v14 = vld [vmem:[%s32839_s11 + $0xe44] ss:$16 sps:$4 sm:$0xff]  }
0x1023   :  { %15374 = vmatpush1.bf16.msra.mxu1 %v24957_v16  ;;  %v25071_v16 = vld [vmem:[%s32839_s11 + $0xe20] ss:$16 sps:$4 sm:$0xff]  }
0x1024   :  { %15375 = vmatprep.subr.bf16.mxu1 %v24962_v57  ;;  %16275 = vmatpush1.bf16.msra.mxu0 %v24999_v8  ;;  %v25073_v57 = vld [vmem:[%s32839_s11 + $0xe24] ss:$16 sps:$4 sm:$0xff]   ;;  %v25077_v8 = vld [vmem:[%s32839_s11 + $0xe00] ss:$16 sps:$4 sm:$0xff]  }
0x1025   :  { %16276 = vmatprep.subr.bf16.mxu0 %v25004_v45  ;;  %v25079_v45 = vld [vmem:[%s32839_s11 + $0xe04] ss:$16 sps:$4 sm:$0xff]  }
0x1027   :  { %15376 = vmatpush1.bf16.msra.mxu1 %v24960_v1  ;;  %v25083_v1 = vld [vmem:[%s32839_s11 + $0xfe0] ss:$16 sps:$4 sm:$0xff]  }
0x1028   :  { %15377 = vmatprep.subr.bf16.mxu1 %v24965_v49  ;;  %16277 = vmatpush1.bf16.msra.mxu0 %v25002_v10  ;;  %v25085_v49 = vld [vmem:[%s32839_s11 + $0xfe4] ss:$16 sps:$4 sm:$0xff]   ;;  %v25089_v10 = vld [vmem:[%s32839_s11 + $0xfc0] ss:$16 sps:$4 sm:$0xff]  }
0x1029   :  { %16278 = vmatprep.subr.bf16.mxu0 %v25007_v6  ;;  %v25091_v6 = vld [vmem:[%s32839_s11 + $0xfc4] ss:$16 sps:$4 sm:$0xff]  }
0x102b   :  { %15378 = vmatpush2.bf16.msra.mxu1 %v24963_v0  ;;  %v25095_v0 = vld [vmem:[%s32839_s11 + $0xfa0] ss:$16 sps:$4 sm:$0xff]  }
0x102c   :  { %15379 = vmatprep.subr.bf16.mxu1 %v24968_v32  ;;  %16279 = vmatpush1.bf16.msra.mxu0 %v25005_v29  ;;  %v25097_v32 = vld [vmem:[%s32839_s11 + $0xfa4] ss:$16 sps:$4 sm:$0xff]   ;;  %v25101_v29 = vld [vmem:[%s32839_s11 + $0xf80] ss:$16 sps:$4 sm:$0xff]  }
0x102d   :  { %16280 = vmatprep.subr.bf16.mxu0 %v25010_v3  ;;  %v25103_v3 = vld [vmem:[%s32839_s11 + $0xf84] ss:$16 sps:$4 sm:$0xff]  }
0x102f   :  { %15380 = vmatpush2.bf16.msra.mxu1 %v24966_v33  ;;  %v25107_v33 = vld [vmem:[%s32839_s11 + $0xf60] ss:$16 sps:$4 sm:$0xff]  }
0x1030   :  { %15381 = vmatprep.subr.bf16.mxu1 %v24971_v53  ;;  %16281 = vmatpush1.bf16.msra.mxu0 %v25008_v12  ;;  %v25109_v53 = vld [vmem:[%s32839_s11 + $0xf64] ss:$16 sps:$4 sm:$0xff]  }
0x1031   :  { %16282 = vmatprep.subr.bf16.mxu0 %v25013_v46  ;;  %v25115_v12 = vld [vmem:[%s32839_s11 + $0xf44] ss:$16 sps:$4 sm:$0xff]  }
0x1033   :  { %15382 = vmatpush2.bf16.msra.mxu1 %v24969_v52  ;;  %v25113_v52 = vld [vmem:[%s32839_s11 + $0xf40] ss:$16 sps:$4 sm:$0xff]  }
0x1034   :  { %15383 = vmatprep.subr.bf16.mxu1 %v24974_v56  ;;  %16283 = vmatpush2.bf16.msra.mxu0 %v25011_v30  ;;  %v25121_v30 = vld [vmem:[%s32839_s11 + $0xf24] ss:$16 sps:$4 sm:$0xff]  }
0x1035   :  { %16284 = vmatprep.subr.bf16.mxu0 %v25016_v54 }
0x1037   :  { %15384 = vmatpush2.bf16.msra.mxu1 %v24972_v44  ;;  %v25119_v44 = vld [vmem:[%s32839_s11 + $0xf20] ss:$16 sps:$4 sm:$0xff]  }
0x1038   :  { %15385 = vmatprep.subr.bf16.mxu1 %v24977_v28  ;;  %16285 = vmatpush2.bf16.msra.mxu0 %v25014_v41  ;;  %v25127_v41 = vld [vmem:[%s32839_s11 + $0xf04] ss:$16 sps:$4 sm:$0xff]  }
0x1039   :  { %16286 = vmatprep.subr.bf16.mxu0 %v25019_v13  ;;  %v25125_v13 = vld [vmem:[%s32839_s11 + $0xf00] ss:$16 sps:$4 sm:$0xff]  }
0x103b   :  { %15386 = vmatpush2.bf16.msra.mxu1 %v24975_v48  ;;  %v25133_v48 = vld [vmem:[%s32839_s11 + $0xeec] ss:$16 sps:$4 sm:$0xff]  }
0x103c   :  { %15387 = vmatprep.subr.bf16.mxu1 %v24980_v39  ;;  %16287 = vmatpush2.bf16.msra.mxu0 %v25017_v5 }
0x103d   :  { %16288 = vmatprep.subr.bf16.mxu0 %v25022_v31 }
0x103f   :  { %15388 = vmatpush2.bf16.msra.mxu1 %v24978_v35 }
0x1040   :  { %15389 = vmatprep.subr.bf16.mxu1 %v24983_v50  ;;  %16289 = vmatpush2.bf16.msra.mxu0 %v25020_v55 }
0x1041   :  { %16290 = vmatprep.subr.bf16.mxu0 %v25025_v43 }
0x1043   :  { %15390 = vmatpush2.bf16.msra.mxu1 %v24981_v21 }
0x1044   :  { %15391 = vmatprep.subr.bf16.mxu1 %v24986_v20  ;;  %16291 = vmatpush2.bf16.msra.mxu0 %v25023_v47 }
0x1045   :  { %16292 = vmatprep.subr.bf16.mxu0 %v25028_v27 }
0x1047   :  { %15392 = vmatpush2.bf16.msra.mxu1 %v24984_v18 }
0x1048   :  { %21424 = vmatprep.subr.msk.bf16.mxu1 %vm12323_vm13, %v30734_v26  ;;  %16293 = vmatpush2.bf16.msra.mxu0 %v25026_v34  ;;  %v25031_v26 = vld [vmem:[%s32839_s11 + $0xd24] ss:$16 sps:$4 sm:$0xff]  }
0x1049   :  { %16294 = vmatprep.subr.bf16.mxu0 %v25031_v26 }
0x104a   :  { %15394 = vmatmul.mubr.bf16.vlgmr.msra.gmra.mxu1 %v31826_v59  ;;  %v25029_v59 = vld [vmem:[%s32839_s11 + $0xd20] ss:$16 sps:$4 sm:$0xff]  }
0x104b   :  { %15467 = vmatpush1.bf16.msra.mxu1 %v30739_v24  ;;  %15484 = vmatprep.mubr.bf16.mxu1 %v25357_v2  ;;  %v25034_v24 = vld [vmem:[%s32839_s11 + $0xd04] ss:$16 sps:$4 sm:$0xff]  }
0x104c   :  { %16295 = vmatpush2.bf16.msra.mxu0 %v25029_v59  ;;  %16307 = vmatprep.subr.bf16.mxu1 %v25037_v36 }
0x104d   :  { %16296 = vmatprep.subr.bf16.mxu0 %v25034_v24 }
0x1050   :  { %16297 = vmatpush2.bf16.msra.mxu0 %v25032_v23  ;;  %v25046_v23 = vld [vmem:[%s32839_s11 + $0xccc] ss:$16 sps:$4 sm:$0xff]  }
0x1052   :  { %21425 = vmatmul.mubr.msk.bf16.vlgmr.msra.gmra.mxu1 %vm12319_vm14, %v31852_v37  ;;  %v25040_v37 = vld [vmem:[%s32839_s11 + $0xcec] ss:$16 sps:$4 sm:$0xff]  }
0x1053   :  { %16308 = vmatpush1.bf16.msra.mxu1 %v25035_v63  ;;  %16348 = vmatprep.subr.bf16.mxu0 %v25040_v37  ;;  %v25044_v63 = vld [vmem:[%s32839_s11 + $0xcc8] ss:$16 sps:$4 sm:$0xff]   ;;  %v25052_v37 = vld [vmem:[%s32839_s11 + $0xcac] ss:$16 sps:$4 sm:$0xff]  }
0x1054   :  { %16309 = vmatprep.subr.bf16.mxu1 %v25043_v42  ;;  %v25058_v42 = vld [vmem:[%s32839_s11 + $0xc8c] ss:$16 sps:$4 sm:$0xff]  }
0x1057   :  { %16310 = vmatpush1.bf16.msra.mxu1 %v25041_v4  ;;  %v25050_v4 = vld [vmem:[%s32839_s11 + $0xca8] ss:$16 sps:$4 sm:$0xff]  }
0x1058   :  { %16311 = vmatprep.subr.bf16.mxu1 %v25049_v22  ;;  %v25064_v22 = vld [vmem:[%s32839_s11 + $0xc6c] ss:$16 sps:$4 sm:$0xff]  }
0x105b   :  { %16312 = vmatpush1.bf16.msra.mxu1 %v25047_v38  ;;  %v25056_v38 = vld [vmem:[%s32839_s11 + $0xc88] ss:$16 sps:$4 sm:$0xff]  }
0x105c   :  { %16313 = vmatprep.subr.bf16.mxu1 %v25055_v51  ;;  %v25070_v51 = vld [vmem:[%s32839_s11 + $0xc4c] ss:$16 sps:$4 sm:$0xff]  }
0x105f   :  { %16314 = vmatpush1.bf16.msra.mxu1 %v25053_v17  ;;  %v25062_v17 = vld [vmem:[%s32839_s11 + $0xc68] ss:$16 sps:$4 sm:$0xff]  }
0x1060   :  { %16315 = vmatprep.subr.bf16.mxu1 %v25061_v19  ;;  %v25076_v19 = vld [vmem:[%s32839_s11 + $0xc2c] ss:$16 sps:$4 sm:$0xff]  }
0x1063   :  { %16316 = vmatpush1.bf16.msra.mxu1 %v25059_v9  ;;  %v25068_v9 = vld [vmem:[%s32839_s11 + $0xc48] ss:$16 sps:$4 sm:$0xff]  }
0x1064   :  { %16317 = vmatprep.subr.bf16.mxu1 %v25067_v14  ;;  %v25082_v14 = vld [vmem:[%s32839_s11 + $0xc0c] ss:$16 sps:$4 sm:$0xff]  }
0x1067   :  { %16318 = vmatpush1.bf16.msra.mxu1 %v25065_v15  ;;  %v25074_v15 = vld [vmem:[%s32839_s11 + $0xc28] ss:$16 sps:$4 sm:$0xff]  }
0x1068   :  { %16319 = vmatprep.subr.bf16.mxu1 %v25073_v57  ;;  %v25088_v57 = vld [vmem:[%s32839_s11 + $0xdec] ss:$16 sps:$4 sm:$0xff]  }
0x106b   :  { %16320 = vmatpush1.bf16.msra.mxu1 %v25071_v16  ;;  %v25080_v16 = vld [vmem:[%s32839_s11 + $0xc08] ss:$16 sps:$4 sm:$0xff]  }
0x106c   :  { %16321 = vmatprep.subr.bf16.mxu1 %v25079_v45  ;;  %v25094_v45 = vld [vmem:[%s32839_s11 + $0xdcc] ss:$16 sps:$4 sm:$0xff]  }
0x106f   :  { %16322 = vmatpush1.bf16.msra.mxu1 %v25077_v8  ;;  %v25086_v8 = vld [vmem:[%s32839_s11 + $0xde8] ss:$16 sps:$4 sm:$0xff]  }
0x1070   :  { %16323 = vmatprep.subr.bf16.mxu1 %v25085_v49  ;;  %v25100_v49 = vld [vmem:[%s32839_s11 + $0xdac] ss:$16 sps:$4 sm:$0xff]  }
0x1073   :  { %16324 = vmatpush2.bf16.msra.mxu1 %v25083_v1  ;;  %v25092_v1 = vld [vmem:[%s32839_s11 + $0xdc8] ss:$16 sps:$4 sm:$0xff]  }
0x1074   :  { %16325 = vmatprep.subr.bf16.mxu1 %v25091_v6  ;;  %v25106_v6 = vld [vmem:[%s32839_s11 + $0xd8c] ss:$16 sps:$4 sm:$0xff]  }
0x1077   :  { %16326 = vmatpush2.bf16.msra.mxu1 %v25089_v10  ;;  %v25098_v10 = vld [vmem:[%s32839_s11 + $0xda8] ss:$16 sps:$4 sm:$0xff]  }
0x1078   :  { %16327 = vmatprep.subr.bf16.mxu1 %v25097_v32  ;;  %v25112_v32 = vld [vmem:[%s32839_s11 + $0xd6c] ss:$16 sps:$4 sm:$0xff]  }
0x107b   :  { %16328 = vmatpush2.bf16.msra.mxu1 %v25095_v0  ;;  %v25104_v0 = vld [vmem:[%s32839_s11 + $0xd88] ss:$16 sps:$4 sm:$0xff]  }
0x107c   :  { %16329 = vmatprep.subr.bf16.mxu1 %v25103_v3  ;;  %v25118_v3 = vld [vmem:[%s32839_s11 + $0xd4c] ss:$16 sps:$4 sm:$0xff]  }
0x107f   :  { %16330 = vmatpush2.bf16.msra.mxu1 %v25101_v29  ;;  %v25110_v29 = vld [vmem:[%s32839_s11 + $0xd68] ss:$16 sps:$4 sm:$0xff]  }
0x1080   :  { %16331 = vmatprep.subr.bf16.mxu1 %v25109_v53  ;;  %v25116_v53 = vld [vmem:[%s32839_s11 + $0xd48] ss:$16 sps:$4 sm:$0xff]  }
0x1083   :  { %16332 = vmatpush2.bf16.msra.mxu1 %v25107_v33 }
0x1084   :  { %16333 = vmatprep.subr.bf16.mxu1 %v25115_v12 }
0x1087   :  { %16334 = vmatpush2.bf16.msra.mxu1 %v25113_v52 }
0x1088   :  { %16335 = vmatprep.subr.bf16.mxu1 %v25121_v30 }
0x108b   :  { %v15272_v46 = vpop.f32.mrf.mxu0  ;;  %16336 = vmatpush2.bf16.msra.mxu1 %v25119_v44  ;;  %v25122_v44 = vld [vmem:[%s32839_s11 + $0xd28] ss:$16 sps:$4 sm:$0xff]  }
0x108c   :  { %16337 = vmatprep.subr.bf16.mxu1 %v25127_v41  ;;  %v25130_v41 = vld [vmem:[%s32839_s11 + $0xd0c] ss:$16 sps:$4 sm:$0xff]  }
0x108d   :  { %v15274_v56 = vpop.f32.mrf.mxu0 }
0x108f   :  { %v15276_v54 = vpop.f32.mrf.mxu0  ;;  %16338 = vmatpush2.bf16.msra.mxu1 %v25125_v13 }
0x1090   :  { %16389 = vmatprep.subr.bf16.mxu1 %v25133_v48  ;;  %v25128_v48 = vld [vmem:[%s32839_s11 + $0xd08] ss:$16 sps:$4 sm:$0xff]  }
0x1091   :  { %v15277_v28 = vpop.f32.mrf.mxu0 }
0x10ca   :  { %v15313_v39 = vpop.f32.mrf.mxu1 }
0x10cb   :  { %v15314_v5 = vadd.f32 %v15313_v39, %v15272_v46  ;;  %v32136_v31 = vpop.f32.mrf.mxu0  ;;  %v25124_v46 = vld [vmem:[%s32839_s11 + $0xd2c] ss:$16 sps:$4 sm:$0xff]  }
0x10cc   :  { %v15315_v35 = vpop.f32.mrf.mxu1 }
0x10cd   :  { %v32139_v50 = vadd.f32 %v15314_v5, %v31713_v7  ;;  %v15316_v55 = vadd.f32 %v15315_v35, %v15274_v56  ;;  %v32141_v43 = vpop.f32.mrf.mxu0  ;;  %v25038_v7 = vld [vmem:[%s32839_s11 + $0xce8] ss:$16 sps:$4 sm:$0xff]  }
0x10ce   :  { %v15317_v21 = vpop.f32.mrf.mxu1 }
0x10cf   :  { %v32144_v20 = vadd.f32 %v15316_v55, %v31717_v62  ;;  %v15358_v47 = vpop.f32.mrf.mxu0  ;;  %v25136_v55 = vld [vmem:[%s32839_s11 + $0xecc] ss:$16 sps:$4 sm:$0xff]   ;;  %v25134_v21 = vld [vmem:[%s32839_s11 + $0xec8] ss:$16 sps:$4 sm:$0xff]  }
0x10d0   :  { %v15318_v18 = vpop.f32.mrf.mxu1  ;;  %v25139_v47 = vld [vmem:[%s32839_s11 + $0xeac] ss:$16 sps:$4 sm:$0xff]  }
0x10d1   :  { %v15359_v27 = vpop.f32.mrf.mxu0  ;;  %v25137_v18 = vld [vmem:[%s32839_s11 + $0xea8] ss:$16 sps:$4 sm:$0xff]  }
0x10d2   :  { %v25142_v27 = vld [vmem:[%s32839_s11 + $0xe8c] ss:$16 sps:$4 sm:$0xff]  }
0x10d3   :  { %v15445_v34 = vpop.f32.mrf.mxu0 }
0x10d4   :  { %v32146_v26 = vpack.c.bf16 %v15445_v34, %v15445_v34  ;;  %v25140_v34 = vld [vmem:[%s32839_s11 + $0xe88] ss:$16 sps:$4 sm:$0xff]  }
0x10d5   :  { %v15447_v59 = vpop.f32.mrf.mxu0 }
0x10d6   :  { %v15494_v24 = vpack.c.bf16 %v15447_v59, %v15447_v59  ;;  %v25143_v59 = vld [vmem:[%s32839_s11 + $0xe68] ss:$16 sps:$4 sm:$0xff]  }
0x10d7   :  { %v15449_v36 = vpop.f32.mrf.mxu0 }
0x10d8   :  { %16298 = vmatprep.mubr.bf16.mxu0 %v15494_v24  ;;  %v25149_v36 = vld [vmem:[%s32839_s11 + $0xe28] ss:$16 sps:$4 sm:$0xff]  }
0x10d9   :  { %16299 = vmatmul.mubr.bf16.vlgmr.msra.gmra.mxu0 %v32146_v26  ;;  %v15450_v62 = vpop.f32.mrf.mxu0 }
0x10da   :  { %16349 = vmatpush1.bf16.msra.mxu0 %v25038_v7  ;;  %16380 = vmatprep.mubr.bf16.mxu0 %v15494_v24  ;;  %v25148_v24 = vld [vmem:[%s32839_s11 + $0xe4c] ss:$16 sps:$4 sm:$0xff]   ;;  %v25146_v7 = vld [vmem:[%s32839_s11 + $0xe48] ss:$16 sps:$4 sm:$0xff]  }
0x10db   :  { %16350 = vmatprep.subr.bf16.mxu0 %v25046_v23  ;;  %v25151_v23 = vld [vmem:[%s32839_s11 + $0xe2c] ss:$16 sps:$4 sm:$0xff]  }
0x10dc   :  { %v25154_v62 = vld [vmem:[%s32839_s11 + $0xe0c] ss:$16 sps:$4 sm:$0xff]  }
0x10de   :  { %16351 = vmatpush1.bf16.msra.mxu0 %v25044_v63  ;;  %v25152_v63 = vld [vmem:[%s32839_s11 + $0xe08] ss:$16 sps:$4 sm:$0xff]  }
0x10df   :  { %16352 = vmatprep.subr.bf16.mxu0 %v25052_v37  ;;  %v25157_v37 = vld [vmem:[%s32839_s11 + $0xfec] ss:$16 sps:$4 sm:$0xff]  }
0x10e2   :  { %16353 = vmatpush1.bf16.msra.mxu0 %v25050_v4  ;;  %v25155_v4 = vld [vmem:[%s32839_s11 + $0xfe8] ss:$16 sps:$4 sm:$0xff]  }
0x10e3   :  { %16354 = vmatprep.subr.bf16.mxu0 %v25058_v42  ;;  %v25160_v42 = vld [vmem:[%s32839_s11 + $0xfcc] ss:$16 sps:$4 sm:$0xff]  }
0x10e6   :  { %16355 = vmatpush1.bf16.msra.mxu0 %v25056_v38  ;;  %v25158_v38 = vld [vmem:[%s32839_s11 + $0xfc8] ss:$16 sps:$4 sm:$0xff]  }
0x10e7   :  { %16356 = vmatprep.subr.bf16.mxu0 %v25064_v22  ;;  %v25163_v22 = vld [vmem:[%s32839_s11 + $0xfac] ss:$16 sps:$4 sm:$0xff]  }
0x10ea   :  { %16357 = vmatpush1.bf16.msra.mxu0 %v25062_v17  ;;  %v25161_v17 = vld [vmem:[%s32839_s11 + $0xfa8] ss:$16 sps:$4 sm:$0xff]  }
0x10eb   :  { %16358 = vmatprep.subr.bf16.mxu0 %v25070_v51  ;;  %v25166_v51 = vld [vmem:[%s32839_s11 + $0xf8c] ss:$16 sps:$4 sm:$0xff]  }
0x10ee   :  { %16359 = vmatpush1.bf16.msra.mxu0 %v25068_v9  ;;  %v25164_v9 = vld [vmem:[%s32839_s11 + $0xf88] ss:$16 sps:$4 sm:$0xff]  }
0x10ef   :  { %16360 = vmatprep.subr.bf16.mxu0 %v25076_v19  ;;  %v25169_v19 = vld [vmem:[%s32839_s11 + $0xf6c] ss:$16 sps:$4 sm:$0xff]  }
0x10f2   :  { %16361 = vmatpush1.bf16.msra.mxu0 %v25074_v15  ;;  %v25167_v15 = vld [vmem:[%s32839_s11 + $0xf68] ss:$16 sps:$4 sm:$0xff]  }
0x10f3   :  { %16362 = vmatprep.subr.bf16.mxu0 %v25082_v14  ;;  %v25172_v14 = vld [vmem:[%s32839_s11 + $0xf4c] ss:$16 sps:$4 sm:$0xff]  }
0x10f6   :  { %16363 = vmatpush1.bf16.msra.mxu0 %v25080_v16  ;;  %v25170_v16 = vld [vmem:[%s32839_s11 + $0xf48] ss:$16 sps:$4 sm:$0xff]  }
0x10f7   :  { %16364 = vmatprep.subr.bf16.mxu0 %v25088_v57  ;;  %v25175_v57 = vld [vmem:[%s32839_s11 + $0xf2c] ss:$16 sps:$4 sm:$0xff]  }
0x10fa   :  { %16365 = vmatpush2.bf16.msra.mxu0 %v25086_v8  ;;  %v25173_v8 = vld [vmem:[%s32839_s11 + $0xf28] ss:$16 sps:$4 sm:$0xff]  }
0x10fb   :  { %16366 = vmatprep.subr.bf16.mxu0 %v25094_v45  ;;  %v25178_v45 = vld [vmem:[%s32839_s11 + $0xf0c] ss:$16 sps:$4 sm:$0xff]  }
0x10fe   :  { %16367 = vmatpush2.bf16.msra.mxu0 %v25092_v1  ;;  %v25176_v1 = vld [vmem:[%s32839_s11 + $0xf08] ss:$16 sps:$4 sm:$0xff]  }
0x10ff   :  { %16368 = vmatprep.subr.bf16.mxu0 %v25100_v49 }
0x1102   :  { %16369 = vmatpush2.bf16.msra.mxu0 %v25098_v10 }
0x1103   :  { %16370 = vmatprep.subr.bf16.mxu0 %v25106_v6 }
0x1106   :  { %16371 = vmatpush2.bf16.msra.mxu0 %v25104_v0 }
0x1107   :  { %16372 = vmatprep.subr.bf16.mxu0 %v25112_v32  ;;  %v32353_v32 = vld [vmem:[%s32840_s12] sm:$0xf] }
0x110a   :  { %16373 = vmatpush2.bf16.msra.mxu0 %v25110_v29  ;;  %v15395_v33 = vpop.f32.mrf.mxu1 }
0x110b   :  { %v15396_v12 = vadd.f32 %v15395_v33, %v32136_v31  ;;  %16374 = vmatprep.subr.bf16.mxu0 %v25118_v3  ;;  %v16439_v33 = vrot.slane %v32353_v32, %v27037_v25 }
0x110c   :  { %v15397_v52 = vpop.f32.mrf.mxu1 }
0x110d   :  { %v32235_v56 = vadd.f32 %v15396_v12, %v31806_v58  ;;  %v15398_v30 = vadd.f32 %v15397_v52, %v32141_v43 }
0x110e   :  { %16375 = vmatpush2.bf16.msra.mxu0 %v25116_v53  ;;  %v15399_v54 = vpop.f32.mrf.mxu1 }
0x110f   :  { %v32242_v28 = vadd.f32 %v15398_v30, %v31812_v11  ;;  %16376 = vmatprep.subr.bf16.mxu0 %v25124_v46  ;;  %v25131_v11 = vld [vmem:[%s32839_s11 + $0xee8] ss:$16 sps:$4 sm:$0xff]   ;;  %v16443_v30 = vrot.slane %v32353_v32, %v27058_v40 }
0x1110   :  { %v15400_v13 = vpop.f32.mrf.mxu1 }
0x1112   :  { %16377 = vmatpush2.bf16.msra.mxu0 %v25122_v44  ;;  %v15486_v58 = vpop.f32.mrf.mxu1 }
0x1113   :  { %16378 = vmatprep.subr.bf16.mxu0 %v25130_v41  ;;  %v32253_v31 = vpack.c.bf16 %v15486_v58, %v15486_v58 }
0x1114   :  { %v15488_v39 = vpop.f32.mrf.mxu1 }
0x1115   :  { %v15496_v5 = vpack.c.bf16 %v15488_v39, %v15488_v39 }
0x1116   :  { %16379 = vmatpush2.bf16.msra.mxu0 %v25128_v48  ;;  %v15490_v35 = vpop.f32.mrf.mxu1 }
0x1117   :  { %16339 = vmatprep.mubr.bf16.mxu1 %v15496_v5 }
0x1118   :  { %v15491_v43 = vpop.f32.mrf.mxu1  ;;  %16340 = vmatmul.mubr.bf16.vlgmr.msra.gmra.mxu1 %v32253_v31 }
0x1119   :  { %16381 = vmatmul.mubr.bf16.vlgmr.msra.gmra.mxu0 %v32146_v26  ;;  %16390 = vmatpush1.bf16.msra.mxu1 %v25131_v11  ;;  %v25145_v26 = vld [vmem:[%s32839_s11 + $0xe6c] ss:$16 sps:$4 sm:$0xff]  }
0x111a   :  { %16421 = vmatprep.mubr.bf16.mxu1 %v15496_v5  ;;  %16391 = vmatprep.subr.bf16.mxu1 %v25136_v55  ;;  %v25179_v43 = vld [vmem:[%s32842_s14 + $0x178] sm:$0xff]  }
0x111b   :  { %16526 = vmatprep.mubr.bf16.mxu0 %v25357_v2 }
0x111d   :  { %16392 = vmatpush1.bf16.msra.mxu1 %v25134_v21  ;;  %v21686_v21 = vld [vmem:[%s32841_s13 + $0x1] sm:$0x1] }
0x111e   :  { %16393 = vmatprep.subr.bf16.mxu1 %v25139_v47  ;;  %v25180_v47 = vld [vmem:[%s32842_s14 + $0x138] sm:$0xff]  }
0x1121   :  { %16394 = vmatpush1.bf16.msra.mxu1 %v25137_v18  ;;  %v25181_v18 = vld [vmem:[%s32842_s14 + $0x170] sm:$0xff]  }
0x1122   :  { %16395 = vmatprep.subr.bf16.mxu1 %v25142_v27  ;;  %v25182_v27 = vld [vmem:[%s32842_s14 + $0x130] sm:$0xff]  }
0x1125   :  { %16396 = vmatpush1.bf16.msra.mxu1 %v25140_v34  ;;  %v25183_v34 = vld [vmem:[%s32842_s14 + $0x168] sm:$0xff]  }
0x1126   :  { %16397 = vmatprep.subr.bf16.mxu1 %v25145_v26  ;;  %v25184_v26 = vld [vmem:[%s32842_s14 + $0x128] sm:$0xff]  }
0x1129   :  { %16398 = vmatpush1.bf16.msra.mxu1 %v25143_v59  ;;  %v25185_v59 = vld [vmem:[%s32842_s14 + $0x160] sm:$0xff]  }
0x112a   :  { %16399 = vmatprep.subr.bf16.mxu1 %v25148_v24  ;;  %v25186_v24 = vld [vmem:[%s32842_s14 + $0x120] sm:$0xff]  }
0x112d   :  { %16400 = vmatpush1.bf16.msra.mxu1 %v25146_v7  ;;  %v25187_v7 = vld [vmem:[%s32842_s14 + $0x158] sm:$0xff]  }
0x112e   :  { %16401 = vmatprep.subr.bf16.mxu1 %v25151_v23  ;;  %v25188_v23 = vld [vmem:[%s32842_s14 + $0x118] sm:$0xff]  }
0x1131   :  { %16402 = vmatpush1.bf16.msra.mxu1 %v25149_v36 }
0x1132   :  { %16403 = vmatprep.subr.bf16.mxu1 %v25154_v62 }
0x1135   :  { %16404 = vmatpush1.bf16.msra.mxu1 %v25152_v63  ;;  %v16447_v63 = vrot.slane %v32353_v32, %v27138_v60 }
0x1136   :  { %16405 = vmatprep.subr.bf16.mxu1 %v25157_v37 }
0x1139   :  { %16406 = vmatpush2.bf16.msra.mxu1 %v25155_v4 }
0x113a   :  { %16407 = vmatprep.subr.bf16.mxu1 %v25160_v42 }
0x113d   :  { %16408 = vmatpush2.bf16.msra.mxu1 %v25158_v38  ;;  %v16451_v38 = vrot.slane %v32353_v32, %v27179_v61  ;;  %v25212_v32 = vld [vmem:[%s32842_s14 + $0x1b8] sm:$0xff]  }
0x113e   :  { %16409 = vmatprep.subr.bf16.mxu1 %v25163_v22 }
0x1141   :  { %16410 = vmatpush2.bf16.msra.mxu1 %v25161_v17 }
0x1142   :  { %16411 = vmatprep.subr.bf16.mxu1 %v25166_v51 }
0x1145   :  { %16412 = vmatpush2.bf16.msra.mxu1 %v25164_v9 }
0x1146   :  { %16413 = vmatprep.subr.bf16.mxu1 %v25169_v19 }
0x1149   :  { %16414 = vmatpush2.bf16.msra.mxu1 %v25167_v15 }
0x114a   :  { %16415 = vmatprep.subr.bf16.mxu1 %v25172_v14 }
0x114d   :  { %16416 = vmatpush2.bf16.msra.mxu1 %v25170_v16 }
0x114e   :  { %16417 = vmatprep.subr.bf16.mxu1 %v25175_v57 }
0x1151   :  { %16418 = vmatpush2.bf16.msra.mxu1 %v25173_v8 }
0x1152   :  { %16419 = vmatprep.subr.bf16.mxu1 %v25178_v45  ;;  %v25191_v45 = vld [vmem:[%s32842_s14 + $0x148] sm:$0xff]  }
0x1155   :  { %16420 = vmatpush2.bf16.msra.mxu1 %v25176_v1  ;;  %v25192_v1 = vld [vmem:[%s32842_s14 + $0x108] sm:$0xff]  }
0x1158   :  { %16422 = vmatmul.mubr.bf16.vlgmr.msra.gmra.mxu1 %v32253_v31 }
0x1159   :  { %16567 = vmatprep.mubr.bf16.mxu1 %v25357_v2 }
0x1199   :  { %v16300_v49 = vpop.f32.mrf.mxu0 }
0x119b   :  { %v16302_v10 = vpop.f32.mrf.mxu0 }
0x119d   :  { %v16304_v6 = vpop.f32.mrf.mxu0 }
0x119e   :  { %v25195_v6 = vld [vmem:[%s32842_s14 + $0x78] sm:$0xff]  }
0x119f   :  { %v16305_v0 = vpop.f32.mrf.mxu0 }
0x11a0   :  { %v25211_v0 = vld [vmem:[%s32842_s14 + $0x1f8] sm:$0xff]  }
0x11d8   :  { %v16341_v29 = vpop.f32.mrf.mxu1 }
0x11d9   :  { %v16342_v3 = vadd.f32 %v16341_v29, %v16300_v49  ;;  %v16382_v53 = vpop.f32.mrf.mxu0  ;;  %v25193_v49 = vld [vmem:[%s32842_s14 + $0x140] sm:$0xff]   ;;  %v25213_v29 = vld [vmem:[%s32842_s14 + $0x1f0] sm:$0xff]  }
0x11da   :  { %v16343_v12 = vpop.f32.mrf.mxu1 }
0x11db   :  { %v16430_v46 = vadd.f32 %v16342_v3, %v32139_v50  ;;  %v16344_v52 = vadd.f32 %v16343_v12, %v16302_v10  ;;  %v16384_v54 = vpop.f32.mrf.mxu0  ;;  %v25194_v10 = vld [vmem:[%s32842_s14 + $0x100] sm:$0xff]   ;;  %v25214_v3 = vld [vmem:[%s32842_s14 + $0x1b0] sm:$0xff]  }
0x11dc   :  { %v16345_v44 = vpop.f32.mrf.mxu1  ;;  %v25219_v12 = vld [vmem:[%s32842_s14 + $0x1e0] sm:$0xff]  }
0x11dd   :  { %v16456_v41 = vadd.f32 %v16439_v33, %v16430_v46  ;;  %v16431_v13 = vadd.f32 %v16344_v52, %v32144_v20  ;;  %v16386_v58 = vpop.f32.mrf.mxu0  ;;  %v16476_v20 = vld [vmem:[%s32841_s13] sm:$0x1]  ;;  %v25215_v33 = vld [vmem:[%s32842_s14 + $0x1e8] sm:$0xff]   ;;  %v25223_v52 = vld [vmem:[%s32842_s14 + $0x1d8] sm:$0xff]  }
0x11de   :  { %v16346_v48 = vpop.f32.mrf.mxu1  ;;  %v25221_v46 = vld [vmem:[%s32842_s14 + $0x1a0] sm:$0xff]   ;;  %v25229_v44 = vld [vmem:[%s32842_s14 + $0x190] sm:$0xff]  }
0x11df   :  { %v16464_v39 = vmul.f32 0.2, %v16456_v41  ;;  %v16457_v5 = vadd.f32 %v16443_v30, %v16431_v13  ;;  %v16387_v11 = vpop.f32.mrf.mxu0  ;;  %vm16460_vm1 = vcmp.ge.f32.partialorder %v16456_v41, 0.0  ;;  %v25225_v30 = vld [vmem:[%s32842_s14 + $0x198] sm:$0xff]   ;;  %v25233_v13 = vld [vmem:[%s32842_s14 + $0x188] sm:$0xff]   ;;  %v25235_v58 = vld [vmem:[%s32842_s14 + $0x1c0] sm:$0xff]  }
0x11e0   :  { %v25237_v48 = vld [vmem:[%s32842_s14 + $0x180] sm:$0xff]  }
0x11e1   :  { %vm16461_vm2 = vcmp.ge.f32.partialorder %v16457_v5, 0.0  ;;  %v16465_v25 = vmul.f32 0.2, %v16457_v5  ;;  %v16468_v31 = vsel %vm16460_vm1, %v16456_v41, %v16464_v39  ;;  %v25231_v41 = vld [vmem:[%s32842_s14 + $0x1c8] sm:$0xff]   ;;  %v25239_v39 = vld [vmem:[%s32842_s14 + $0xf8] sm:$0xff]  }
0x11e2   :  { %v16472_v35 = vpack.c.bf16 %v16468_v31, %v16468_v31 }
0x11e3   :  { %v16469_v50 = vsel %vm16461_vm2, %v16457_v5, %v16465_v25 }
0x11e4   :  { %v32361_v55 = vpack.c.bf16 %v16469_v50, %v16469_v50  ;;  %v32366_v40 = vsel %vm16481_vm3, %v16472_v35, 0 }
0x11e6   :  { %21682 = vmatprep.subr.msk.bf16.mxu0 %vm16481_vm3, %v32361_v55 }
0x11e7   :  { %16509 = vmatpush1.bf16.msra.mxu0 %v32366_v40 }
0x11e8   :  { %21687 = vmatprep.subr.msk.bf16.mxu0 %vm16481_vm3, %v32361_v55 }
0x11ea   :  { %21683 = vmatmul.mubr.msk.bf16.vlgmr.msra.gmra.mxu0 %vm16477_vm4, %v16476_v20 }
0x11eb   :  { %16664 = vmatpush1.bf16.msra.mxu0 %v32366_v40  ;;  %16681 = vmatprep.mubr.bf16.mxu0 %v25357_v2 }
0x11ec   :  { %22045 = vmatprep.subr.bf16.mxu0 %v25179_v43 }
0x11f2   :  { %21688 = vmatmul.mubr.msk.bf16.vlgmr.msra.gmra.mxu0 %vm16477_vm4, %v21686_v21 }
0x11f3   :  { %22046 = vmatpush3.bf16.msra.mxu0 %v25180_v47  ;;  %v25196_v47 = vld [vmem:[%s32842_s14 + $0x38] sm:$0xff]  }
0x11f4   :  { %22047 = vmatprep.subr.bf16.mxu0 %v25181_v18  ;;  %v25197_v18 = vld [vmem:[%s32842_s14 + $0x70] sm:$0xff]  }
0x11f7   :  { %22048 = vmatpush3.bf16.msra.mxu0 %v25182_v27 }
0x11f8   :  { %22049 = vmatprep.subr.bf16.mxu0 %v25183_v34 }
0x11fb   :  { %22050 = vmatpush3.bf16.msra.mxu0 %v25184_v26  ;;  %v25198_v26 = vld [vmem:[%s32842_s14 + $0x30] sm:$0xff]  }
0x11fc   :  { %22051 = vmatprep.subr.bf16.mxu0 %v25185_v59  ;;  %v25199_v59 = vld [vmem:[%s32842_s14 + $0x68] sm:$0xff]  }
0x11ff   :  { %22052 = vmatpush3.bf16.msra.mxu0 %v25186_v24  ;;  %v25200_v24 = vld [vmem:[%s32842_s14 + $0x28] sm:$0xff]  }
0x1200   :  { %22053 = vmatprep.subr.bf16.mxu0 %v25187_v7  ;;  %v25201_v7 = vld [vmem:[%s32842_s14 + $0x60] sm:$0xff]  }
0x1203   :  { %22054 = vmatpush3.bf16.msra.mxu0 %v25188_v23  ;;  %v25202_v23 = vld [vmem:[%s32842_s14 + $0x20] sm:$0xff]  }
0x1218   :  { %v16423_v36 = vpop.f32.mrf.mxu1 }
0x1219   :  { %v16424_v62 = vadd.f32 %v16423_v36, %v16382_v53  ;;  %v25217_v53 = vld [vmem:[%s32842_s14 + $0x1a8] sm:$0xff]   ;;  %v25203_v36 = vld [vmem:[%s32842_s14 + $0x58] sm:$0xff]  }
0x121a   :  { %v16425_v37 = vpop.f32.mrf.mxu1 }
0x121b   :  { %v16432_v4 = vadd.f32 %v16424_v62, %v32235_v56  ;;  %v16426_v42 = vadd.f32 %v16425_v37, %v16384_v54  ;;  %v25189_v56 = vld [vmem:[%s32842_s14 + $0x150] sm:$0xff]   ;;  %v25204_v62 = vld [vmem:[%s32842_s14 + $0x18] sm:$0xff]  }
0x121c   :  { %v16427_v22 = vpop.f32.mrf.mxu1  ;;  %22055 = vmatprep.subr.bf16.mxu0 %v25189_v56  ;;  %v25227_v54 = vld [vmem:[%s32842_s14 + $0x1d0] sm:$0xff]   ;;  %v25230_v56 = vld [vmem:[%s32842_s14 + $0x220] sm:$0xff]  }
0x121d   :  { %v16458_v17 = vadd.f32 %v16447_v63, %v16432_v4  ;;  %v16433_v51 = vadd.f32 %v16426_v42, %v32242_v28  ;;  %v25190_v28 = vld [vmem:[%s32842_s14 + $0x110] sm:$0xff]   ;;  %v25207_v4 = vld [vmem:[%s32842_s14 + $0x48] sm:$0xff]   ;;  %v25210_v22 = vld [vmem:[%s32842_s14] sm:$0xff]  }
0x121e   :  { %v16428_v9 = vpop.f32.mrf.mxu1  ;;  %22056 = vmatpush3.bf16.msra.mxu0 %v25190_v28  ;;  %v25205_v63 = vld [vmem:[%s32842_s14 + $0x50] sm:$0xff]   ;;  %v25208_v42 = vld [vmem:[%s32842_s14 + $0x8] sm:$0xff]  }
0x121f   :  { %v16466_v19 = vmul.f32 0.2, %v16458_v17  ;;  %v16459_v15 = vadd.f32 %v16451_v38, %v16433_v51  ;;  %vm16462_vm5 = vcmp.ge.f32.partialorder %v16458_v17, 0.0  ;;  %22057 = vmatprep.subr.bf16.mxu0 %v25191_v45  ;;  %v25206_v37 = vld [vmem:[%s32842_s14 + $0x10] sm:$0xff]   ;;  %v25209_v38 = vld [vmem:[%s32842_s14 + $0x40] sm:$0xff]   ;;  %v25216_v51 = vld [vmem:[%s32842_s14 + $0x278] sm:$0xff]  }
0x1220   :  { %v32558_v9 = vld [vmem:[%s32841_s13 + $0x2] sm:$0x1]  ;;  %v25232_v45 = vld [vmem:[%s32842_s14 + $0x258] sm:$0xff]  }
0x1221   :  { %vm16463_vm6 = vcmp.ge.f32.partialorder %v16459_v15, 0.0  ;;  %v16467_v14 = vmul.f32 0.2, %v16459_v15  ;;  %v16470_v16 = vsel %vm16462_vm5, %v16458_v17, %v16466_v19  ;;  %v25218_v19 = vld [vmem:[%s32842_s14 + $0x238] sm:$0xff]  }
0x1222   :  { %v16474_v57 = vpack.c.bf16 %v16470_v16, %v16470_v16  ;;  %22058 = vmatpush3.bf16.msra.mxu0 %v25192_v1  ;;  %v25224_v16 = vld [vmem:[%s32842_s14 + $0x268] sm:$0xff]  }
0x1223   :  { %v16471_v60 = vsel %vm16463_vm6, %v16459_v15, %v16467_v14  ;;  %22059 = vmatprep.subr.bf16.mxu0 %v25193_v49  ;;  %v25220_v15 = vld [vmem:[%s32842_s14 + $0x270] sm:$0xff]   ;;  %v25234_v49 = vld [vmem:[%s32842_s14 + $0x218] sm:$0xff]  }
0x1224   :  { %v32417_v8 = vpack.c.bf16 %v16471_v60, %v16471_v60  ;;  %v32422_v61 = vsel %vm16481_vm3, %v16474_v57, 0  ;;  %v25222_v14 = vld [vmem:[%s32842_s14 + $0x230] sm:$0xff]   ;;  %v25226_v57 = vld [vmem:[%s32842_s14 + $0x228] sm:$0xff]   ;;  %v25228_v60 = vld [vmem:[%s32842_s14 + $0x260] sm:$0xff]  }
0x1226   :  { %21684 = vmatprep.subr.msk.bf16.mxu1 %vm16481_vm3, %v32417_v8  ;;  %22060 = vmatpush3.bf16.msra.mxu0 %v25194_v10 }
0x1227   :  { %16550 = vmatpush1.bf16.msra.mxu1 %v32422_v61  ;;  %22089 = vmatprep.subr.bf16.mxu0 %v25195_v6  ;;  %v25236_v6 = vld [vmem:[%s32842_s14 + $0x250] sm:$0xff]  }
0x1228   :  { %21689 = vmatprep.subr.msk.bf16.mxu1 %vm16481_vm3, %v32417_v8 }
0x122a   :  { %21685 = vmatmul.mubr.msk.bf16.vlgmr.msra.gmra.mxu1 %vm16477_vm4, %v16476_v20 }
0x122b   :  { %16705 = vmatpush1.bf16.msra.mxu1 %v32422_v61  ;;  %16722 = vmatprep.mubr.bf16.mxu1 %v25357_v2 }
0x122c   :  { %22067 = vmatprep.subr.bf16.mxu1 %v25211_v0 }
0x1232   :  { %21690 = vmatmul.mubr.msk.bf16.vlgmr.msra.gmra.mxu1 %vm16477_vm4, %v21686_v21 }
0x1233   :  { %22068 = vmatpush3.bf16.msra.mxu1 %v25212_v32  ;;  %v25238_v32 = vld [vmem:[%s32842_s14 + $0x210] sm:$0xff]  }
0x1234   :  { %22069 = vmatprep.subr.bf16.mxu1 %v25213_v29 }
0x1237   :  { %22070 = vmatpush3.bf16.msra.mxu1 %v25214_v3  ;;  %v25240_v3 = vld [vmem:[%s32842_s14 + $0x248] sm:$0xff]  }
0x1238   :  { %22071 = vmatprep.subr.bf16.mxu1 %v25215_v33 }
0x123b   :  { %22072 = vmatpush3.bf16.msra.mxu1 %v25217_v53 }
0x123c   :  { %22073 = vmatprep.subr.bf16.mxu1 %v25219_v12  ;;  %v25241_v12 = vld [vmem:[%s32842_s14 + $0xb8] sm:$0xff]  }
0x123f   :  { %22074 = vmatpush3.bf16.msra.mxu1 %v25221_v46  ;;  %v25242_v46 = vld [vmem:[%s32842_s14 + $0x208] sm:$0xff]  }
0x1240   :  { %22075 = vmatprep.subr.bf16.mxu1 %v25223_v52 }
0x1243   :  { %22076 = vmatpush3.bf16.msra.mxu1 %v25225_v30 }
0x1244   :  { %22077 = vmatprep.subr.bf16.mxu1 %v25227_v54  ;;  %v25243_v54 = vld [vmem:[%s32842_s14 + $0xf0] sm:$0xff]  }
0x1247   :  { %22078 = vmatpush3.bf16.msra.mxu1 %v25229_v44  ;;  %v25244_v44 = vld [vmem:[%s32842_s14 + $0x240] sm:$0xff]  }
0x1248   :  { %22079 = vmatprep.subr.bf16.mxu1 %v25231_v41 }
0x124b   :  { %22080 = vmatpush3.bf16.msra.mxu1 %v25233_v13 }
0x124c   :  { %22081 = vmatprep.subr.bf16.mxu1 %v25235_v58  ;;  %v25245_v58 = vld [vmem:[%s32842_s14 + $0xb0] sm:$0xff]  }
0x124f   :  { %22082 = vmatpush3.bf16.msra.mxu1 %v25237_v48  ;;  %v25246_v48 = vld [vmem:[%s32842_s14 + $0x200] sm:$0xff]  }
0x1250   :  { %22111 = vmatprep.subr.bf16.mxu1 %v25239_v39  ;;  %v25247_v39 = vld [vmem:[%s32842_s14 + $0xe8] sm:$0xff]  }
0x12aa   :  { %v16528_v5 = vpop.f32.mrf.mxu0 }
0x12ab   :  { %v16576_v17 = vpack.c.bf16 %v16528_v5, %v16528_v5  ;;  %v25248_v5 = vld [vmem:[%s32842_s14 + $0xa8] sm:$0xff]  }
0x12ac   :  { %v16530_v11 = vpop.f32.mrf.mxu0 }
0x12ad   :  { %v16577_v43 = vpack.c.bf16 %v16530_v11, %v16530_v11  ;;  %v25249_v11 = vld [vmem:[%s32842_s14 + $0xe0] sm:$0xff]  }
0x12ae   :  { %v16532_v25 = vpop.f32.mrf.mxu0 }
0x12af   :  { %v25250_v25 = vld [vmem:[%s32842_s14 + $0xa0] sm:$0xff]  }
0x12b0   :  { %v16533_v31 = vpop.f32.mrf.mxu0 }
0x12b1   :  { %v25251_v31 = vld [vmem:[%s32842_s14 + $0xd8] sm:$0xff]  }
0x12b2   :  { %v16683_v35 = vpop.f32.mrf.mxu0 }
0x12b3   :  { %v16731_v50 = vpack.c.bf16 %v16683_v35, %v16683_v35  ;;  %v25253_v35 = vld [vmem:[%s32842_s14 + $0xd0] sm:$0xff]  }
0x12b4   :  { %v16685_v20 = vpop.f32.mrf.mxu0 }
0x12b5   :  { %v16732_v21 = vpack.c.bf16 %v16685_v20, %v16685_v20  ;;  %v25255_v20 = vld [vmem:[%s32842_s14 + $0xc8] sm:$0xff]  }
0x12b6   :  { %v16687_v27 = vpop.f32.mrf.mxu0 }
0x12b7   :  { %17024 = vmatprep.mubr.bf16.mxu0 %v16732_v21  ;;  %v25257_v21 = vld [vmem:[%s32842_s14 + $0xc0] sm:$0xff]   ;;  %v25259_v27 = vld [vmem:[%s32842_s14 + $0x2f8] sm:$0xff]  }
0x12b8   :  { %17025 = vmatmul.mubr.bf16.vlgmr.msra.gmra.mxu0 %v16731_v50  ;;  %v16688_v34 = vpop.f32.mrf.mxu0  ;;  %v25254_v50 = vld [vmem:[%s32842_s14 + $0x90] sm:$0xff]  }
0x12b9   :  { %22090 = vmatpush3.bf16.msra.mxu0 %v25196_v47  ;;  %17296 = vmatprep.mubr.bf16.mxu0 %v16577_v43  ;;  %v25256_v43 = vld [vmem:[%s32842_s14 + $0x88] sm:$0xff]   ;;  %v25258_v47 = vld [vmem:[%s32842_s14 + $0x80] sm:$0xff]   ;;  %v25260_v34 = vld [vmem:[%s32842_s14 + $0x2b8] sm:$0xff]  }
0x12ba   :  { %22091 = vmatprep.subr.bf16.mxu0 %v25197_v18 }
0x12bd   :  { %22092 = vmatpush3.bf16.msra.mxu0 %v25198_v26  ;;  %v25261_v26 = vld [vmem:[%s32842_s14 + $0x2f0] sm:$0xff]  }
0x12be   :  { %22093 = vmatprep.subr.bf16.mxu0 %v25199_v59  ;;  %v25262_v59 = vld [vmem:[%s32842_s14 + $0x2b0] sm:$0xff]  }
0x12c1   :  { %22094 = vmatpush3.bf16.msra.mxu0 %v25200_v24  ;;  %v25263_v24 = vld [vmem:[%s32842_s14 + $0x2e8] sm:$0xff]  }
0x12c2   :  { %22095 = vmatprep.subr.bf16.mxu0 %v25201_v7  ;;  %v25264_v7 = vld [vmem:[%s32842_s14 + $0x2a8] sm:$0xff]  }
0x12c5   :  { %22096 = vmatpush3.bf16.msra.mxu0 %v25202_v23  ;;  %v25265_v23 = vld [vmem:[%s32842_s14 + $0x2e0] sm:$0xff]  }
0x12c6   :  { %22097 = vmatprep.subr.bf16.mxu0 %v25203_v36  ;;  %v25266_v36 = vld [vmem:[%s32842_s14 + $0x2a0] sm:$0xff]  }
0x12c9   :  { %22098 = vmatpush3.bf16.msra.mxu0 %v25204_v62  ;;  %v25267_v62 = vld [vmem:[%s32842_s14 + $0x2d8] sm:$0xff]  }
0x12ca   :  { %22099 = vmatprep.subr.bf16.mxu0 %v25205_v63  ;;  %v25268_v63 = vld [vmem:[%s32842_s14 + $0x298] sm:$0xff]  }
0x12cd   :  { %22100 = vmatpush3.bf16.msra.mxu0 %v25206_v37  ;;  %v25269_v37 = vld [vmem:[%s32842_s14 + $0x2d0] sm:$0xff]  }
0x12ce   :  { %22101 = vmatprep.subr.bf16.mxu0 %v25207_v4  ;;  %v25270_v4 = vld [vmem:[%s32842_s14 + $0x290] sm:$0xff]  }
0x12d1   :  { %22102 = vmatpush3.bf16.msra.mxu0 %v25208_v42  ;;  %v25271_v42 = vld [vmem:[%s32842_s14 + $0x2c8] sm:$0xff]  }
0x12d2   :  { %22103 = vmatprep.subr.bf16.mxu0 %v25209_v38  ;;  %v25272_v38 = vld [vmem:[%s32842_s14 + $0x288] sm:$0xff]  }
0x12d5   :  { %22104 = vmatpush3.bf16.msra.mxu0 %v25210_v22  ;;  %v25273_v22 = vld [vmem:[%s32842_s14 + $0x2c0] sm:$0xff]  }
0x12d6   :  { %21820 = vmatprep.subr.msk.bf16.mxu0 %vm16481_vm3, %v32361_v55 }
0x12d8   :  { %17297 = vmatmul.mubr.bf16.vlgmr.msra.gmra.mxu0 %v16576_v17  ;;  %v25274_v17 = vld [vmem:[%s32842_s14 + $0x280] sm:$0xff]  }
0x12d9   :  { %17364 = vmatpush1.bf16.msra.mxu0 %v32366_v40  ;;  %17381 = vmatprep.mubr.bf16.mxu0 %v25357_v2 }
0x12da   :  { %22133 = vmatprep.subr.bf16.mxu0 %v25216_v51 }
0x12e0   :  { %21821 = vmatmul.mubr.msk.bf16.vlgmr.msra.gmra.mxu0 %vm16477_vm4, %v32558_v9 }
0x12e1   :  { %22134 = vmatpush3.bf16.msra.mxu0 %v25218_v19 }
0x12e2   :  { %22135 = vmatprep.subr.bf16.mxu0 %v25220_v15 }
0x12e5   :  { %22136 = vmatpush3.bf16.msra.mxu0 %v25222_v14 }
0x12e6   :  { %22137 = vmatprep.subr.bf16.mxu0 %v25224_v16 }
0x12e9   :  { %22138 = vmatpush3.bf16.msra.mxu0 %v25226_v57 }
0x12ea   :  { %v32583_v28 = vpop.f32.mrf.mxu1  ;;  %22139 = vmatprep.subr.bf16.mxu0 %v25228_v60 }
0x12eb   :  { %v16578_v18 = vpack.c.bf16 %v32583_v28, %v32583_v28 }
0x12ec   :  { %v16571_v1 = vpop.f32.mrf.mxu1 }
0x12ed   :  { %22140 = vmatpush3.bf16.msra.mxu0 %v25230_v56  ;;  %v16579_v41 = vpack.c.bf16 %v16571_v1, %v16571_v1 }
0x12ee   :  { %v16573_v10 = vpop.f32.mrf.mxu1  ;;  %22141 = vmatprep.subr.bf16.mxu0 %v25232_v45 }
0x12f0   :  { %v16574_v0 = vpop.f32.mrf.mxu1 }
0x12f1   :  { %22142 = vmatpush3.bf16.msra.mxu0 %v25234_v49  ;;  %v25275_v0 = vld [vmem:[%s32842_s14 + $0x378] sm:$0xff]  }
0x12f2   :  { %v16724_v29 = vpop.f32.mrf.mxu1  ;;  %22143 = vmatprep.subr.bf16.mxu0 %v25236_v6 }
0x12f3   :  { %v16733_v52 = vpack.c.bf16 %v16724_v29, %v16724_v29  ;;  %v25277_v29 = vld [vmem:[%s32842_s14 + $0x338] sm:$0xff]  }
0x12f4   :  { %v16726_v33 = vpop.f32.mrf.mxu1 }
0x12f5   :  { %v16734_v53 = vpack.c.bf16 %v16726_v33, %v16726_v33  ;;  %22144 = vmatpush3.bf16.msra.mxu0 %v25238_v32  ;;  %v21920_v32 = vld [vmem:[%s32841_s13 + $0x3] sm:$0x1]  ;;  %v25283_v33 = vld [vmem:[%s32842_s14 + $0x368] sm:$0xff]   ;;  %s18218_s13 = sshll.u32 %s25358_s17, 4  ;;  %s18219_s13 = int_to_ptr.vmem [resolvable:$true] %s18218_s13 }
0x12f6   :  { %22145 = vmatprep.subr.bf16.mxu0 %v25240_v3  ;;  %v16728_v30 = vpop.f32.mrf.mxu1  ;;  %v25279_v3 = vld [vmem:[%s32842_s14 + $0x370] sm:$0xff]   ;;  %s25335_s18 = scalar_lea.vmem %s18219_s13, 16  ;;  %s25339_s1 = scalar_lea.vmem %s18219_s13, 32 }
0x12f7   :  { %17064 = vmatprep.mubr.bf16.mxu1 %v16734_v53  ;;  %v25285_v53 = vld [vmem:[%s32842_s14 + $0x328] sm:$0xff]   ;;  %v25291_v30 = vld [vmem:[%s32842_s14 + $0x358] sm:$0xff]   ;;  %p25336_p0 = scmp.ne.s32.totalorder %s18219_s13, %s25335_s18  ;;  %p25340_p1 = scmp.lt.s32.totalorder %s18219_s13, %s18219_s13 }
0x12f8   :  { %17065 = vmatmul.mubr.bf16.vlgmr.msra.gmra.mxu1 %v16733_v52  ;;  %v16729_v13 = vpop.f32.mrf.mxu1  ;;  %p25341_p2 = scmp.lt.s32.totalorder %s25339_s1, %s25335_s18 }
0x12f9   :  { %22112 = vmatpush3.bf16.msra.mxu1 %v25241_v12  ;;  %22146 = vmatpush3.bf16.msra.mxu0 %v25242_v46  ;;  %v25287_v12 = vld [vmem:[%s32842_s14 + $0x360] sm:$0xff]  }
0x12fa   :  { %17336 = vmatprep.mubr.bf16.mxu1 %v16579_v41  ;;  %22113 = vmatprep.subr.bf16.mxu1 %v25243_v54  ;;  %v25289_v46 = vld [vmem:[%s32842_s14 + $0x320] sm:$0xff]   ;;  %v25293_v41 = vld [vmem:[%s32842_s14 + $0x318] sm:$0xff]   ;;  %p25342_p3 = por %p25341_p2, %p25340_p1 }
0x12fb   :  { %22147 = vmatprep.subr.bf16.mxu0 %v25244_v44 }
0x12fc   :  { %p25343_p4 = pnand %p25342_p3, %p25336_p0 }
0x12fd   :  { %22114 = vmatpush3.bf16.msra.mxu1 %v25245_v58  ;;  %22148 = vmatpush3.bf16.msra.mxu0 %v25246_v48 }
0x12fe   :  { %21921 = vmatprep.subr.msk.bf16.mxu0 %vm16481_vm3, %v32361_v55  ;;  %22115 = vmatprep.subr.bf16.mxu1 %v25247_v39  ;;  %v25252_v55 = vld [vmem:[%s32842_s14 + $0x98] sm:$0xff]  }
0x1301   :  { %22116 = vmatpush3.bf16.msra.mxu1 %v25248_v5 }
0x1302   :  { %22117 = vmatprep.subr.bf16.mxu1 %v25249_v11 }
0x1305   :  { %22118 = vmatpush3.bf16.msra.mxu1 %v25250_v25 }
0x1306   :  { %22119 = vmatprep.subr.bf16.mxu1 %v25251_v31 }
0x1309   :  { %22120 = vmatpush3.bf16.msra.mxu1 %v25252_v55 }
0x130a   :  { %22121 = vmatprep.subr.bf16.mxu1 %v25253_v35 }
0x130d   :  { %22122 = vmatpush3.bf16.msra.mxu1 %v25254_v50 }
0x130e   :  { %22123 = vmatprep.subr.bf16.mxu1 %v25255_v20 }
0x1311   :  { %22124 = vmatpush3.bf16.msra.mxu1 %v25256_v43 }
0x1312   :  { %22125 = vmatprep.subr.bf16.mxu1 %v25257_v21 }
0x1315   :  { %22126 = vmatpush3.bf16.msra.mxu1 %v25258_v47 }
0x1316   :  { %21822 = vmatprep.subr.msk.bf16.mxu1 %vm16481_vm3, %v32417_v8 }
0x1318   :  { %17337 = vmatmul.mubr.bf16.vlgmr.msra.gmra.mxu1 %v16578_v18  ;;  %v25276_v18 = vld [vmem:[%s32842_s14 + $0x3f8] sm:$0xff]  }
0x1319   :  { %17405 = vmatpush1.bf16.msra.mxu1 %v32422_v61  ;;  %17422 = vmatprep.mubr.bf16.mxu1 %v25357_v2 }
0x131a   :  { %22155 = vmatprep.subr.bf16.mxu1 %v25259_v27 }
0x1320   :  { %21823 = vmatmul.mubr.msk.bf16.vlgmr.msra.gmra.mxu1 %vm16477_vm4, %v32558_v9 }
0x1321   :  { %22156 = vmatpush3.bf16.msra.mxu1 %v25260_v34  ;;  %v25278_v34 = vld [vmem:[%s32842_s14 + $0x3b8] sm:$0xff]  }
0x1322   :  { %22157 = vmatprep.subr.bf16.mxu1 %v25261_v26  ;;  %v25280_v26 = vld [vmem:[%s32842_s14 + $0x3f0] sm:$0xff]  }
0x1325   :  { %22158 = vmatpush3.bf16.msra.mxu1 %v25262_v59  ;;  %v25282_v59 = vld [vmem:[%s32842_s14 + $0x3b0] sm:$0xff]  }
0x1326   :  { %22159 = vmatprep.subr.bf16.mxu1 %v25263_v24  ;;  %v25288_v24 = vld [vmem:[%s32842_s14 + $0x3e0] sm:$0xff]  }
0x1329   :  { %22160 = vmatpush3.bf16.msra.mxu1 %v25264_v7  ;;  %v25290_v7 = vld [vmem:[%s32842_s14 + $0x3a0] sm:$0xff]  }
0x132a   :  { %22161 = vmatprep.subr.bf16.mxu1 %v25265_v23  ;;  %v25292_v23 = vld [vmem:[%s32842_s14 + $0x3d8] sm:$0xff]  }
0x132d   :  { %22162 = vmatpush3.bf16.msra.mxu1 %v25266_v36  ;;  %v25294_v36 = vld [vmem:[%s32842_s14 + $0x398] sm:$0xff]  }
0x132e   :  { %22163 = vmatprep.subr.bf16.mxu1 %v25267_v62  ;;  %v25295_v62 = vld [vmem:[%s32842_s14 + $0x350] sm:$0xff]  }
0x1331   :  { %22164 = vmatpush3.bf16.msra.mxu1 %v25268_v63  ;;  %v25297_v63 = vld [vmem:[%s32842_s14 + $0x310] sm:$0xff]  }
0x1332   :  { %22165 = vmatprep.subr.bf16.mxu1 %v25269_v37  ;;  %v25299_v37 = vld [vmem:[%s32842_s14 + $0x348] sm:$0xff]  }
0x1335   :  { %22166 = vmatpush3.bf16.msra.mxu1 %v25270_v4  ;;  %v25301_v4 = vld [vmem:[%s32842_s14 + $0x308] sm:$0xff]  }
0x1336   :  { %22167 = vmatprep.subr.bf16.mxu1 %v25271_v42  ;;  %v25303_v42 = vld [vmem:[%s32842_s14 + $0x340] sm:$0xff]  }
0x1339   :  { %22168 = vmatpush3.bf16.msra.mxu1 %v25272_v38  ;;  %v25296_v38 = vld [vmem:[%s32842_s14 + $0x3d0] sm:$0xff]  }
0x133a   :  { %22169 = vmatprep.subr.bf16.mxu1 %v25273_v22  ;;  %v25305_v22 = vld [vmem:[%s32842_s14 + $0x300] sm:$0xff]  }
0x133d   :  { %22170 = vmatpush3.bf16.msra.mxu1 %v25274_v17  ;;  %v25298_v17 = vld [vmem:[%s32842_s14 + $0x390] sm:$0xff]  }
0x133e   :  { %21923 = vmatprep.subr.msk.bf16.mxu1 %vm16481_vm3, %v32417_v8 }
0x1378   :  { %v22061_v51 = vpop.f32.mrf.mxu0 }
0x137a   :  { %v22062_v9 = vpop.f32.mrf.mxu0 }
0x137b   :  { %v22063_v19 = vadd.f32 %v22062_v9, %v22061_v51  ;;  %v25300_v51 = vld [vmem:[%s32842_s14 + $0x3c8] sm:$0xff]  }
0x137c   :  { %v22064_v15 = vpop.f32.mrf.mxu0  ;;  %v25302_v9 = vld [vmem:[%s32842_s14 + $0x388] sm:$0xff]  }
0x137d   :  { %v25306_v15 = vld [vmem:[%s32842_s14 + $0x380] sm:$0xff]  }
0x137e   :  { %v22065_v14 = vpop.f32.mrf.mxu0 }
0x1398   :  { %v22105_v16 = vpop.f32.mrf.mxu0 }
0x139a   :  { %v22106_v57 = vpop.f32.mrf.mxu0 }
0x139b   :  { %v22107_v60 = vadd.f32 %v22106_v57, %v22105_v16 }
0x139c   :  { %v22108_v56 = vpop.f32.mrf.mxu0 }
0x139e   :  { %v22109_v28 = vpop.f32.mrf.mxu0 }
0x13a0   :  { %v17383_v45 = vpop.f32.mrf.mxu0 }
0x13a1   :  { %v17431_v1 = vpack.c.bf16 %v17383_v45, %v17383_v45 }
0x13a2   :  { %v17385_v49 = vpop.f32.mrf.mxu0 }
0x13a3   :  { %v17432_v10 = vpack.c.bf16 %v17385_v49, %v17385_v49 }
0x13a4   :  { %v17387_v6 = vpop.f32.mrf.mxu0 }
0x13a5   :  { %17724 = vmatprep.mubr.bf16.mxu0 %v17432_v10 }
0x13a6   :  { %17725 = vmatmul.mubr.bf16.vlgmr.msra.gmra.mxu0 %v17431_v1  ;;  %v17388_v8 = vpop.f32.mrf.mxu0 }
0x13a7   :  { %17793 = vmatpush1.bf16.msra.mxu0 %v32366_v40  ;;  %17810 = vmatprep.mubr.bf16.mxu0 %v25357_v2  ;;  %v25281_v40 = vld [vmem:[%s32842_s14 + $0x330] sm:$0xff]  }
0x13a8   :  { %22177 = vmatprep.subr.bf16.mxu0 %v25275_v0 }
0x13ae   :  { %21922 = vmatmul.mubr.msk.bf16.vlgmr.msra.gmra.mxu0 %vm16477_vm4, %v21920_v32 }
0x13af   :  { %22178 = vmatpush3.bf16.msra.mxu0 %v25277_v29 }
0x13b0   :  { %22179 = vmatprep.subr.bf16.mxu0 %v25279_v3 }
0x13b3   :  { %22180 = vmatpush3.bf16.msra.mxu0 %v25281_v40 }
0x13b4   :  { %22181 = vmatprep.subr.bf16.mxu0 %v25283_v33 }
0x13b7   :  { %22182 = vmatpush3.bf16.msra.mxu0 %v25285_v53 }
0x13b8   :  { %v22083_v52 = vpop.f32.mrf.mxu1  ;;  %22183 = vmatprep.subr.bf16.mxu0 %v25287_v12 }
0x13ba   :  { %v22084_v54 = vpop.f32.mrf.mxu1 }
0x13bb   :  { %v22085_v44 = vadd.f32 %v22084_v54, %v22083_v52  ;;  %22184 = vmatpush3.bf16.msra.mxu0 %v25289_v46 }
0x13bc   :  { %v22086_v13 = vpop.f32.mrf.mxu1  ;;  %22185 = vmatprep.subr.bf16.mxu0 %v25291_v30 }
0x13bd   :  { %v17067_v58 = vadd.f32 %v22085_v44, %v22063_v19  ;;  %v25304_v19 = vld [vmem:[%s32842_s14 + $0x3c0] sm:$0xff]  }
0x13be   :  { %v22087_v48 = vpop.f32.mrf.mxu1 }
0x13bf   :  { %v17299_v39 = vadd.f32 %v22107_v60, %v17067_v58  ;;  %22186 = vmatpush3.bf16.msra.mxu0 %v25293_v41 }
0x13c0   :  { %22187 = vmatprep.subr.bf16.mxu0 %v25295_v62 }
0x13c3   :  { %22188 = vmatpush3.bf16.msra.mxu0 %v25297_v63 }
0x13c4   :  { %22189 = vmatprep.subr.bf16.mxu0 %v25299_v37 }
0x13c7   :  { %22190 = vmatpush3.bf16.msra.mxu0 %v25301_v4 }
0x13c8   :  { %22191 = vmatprep.subr.bf16.mxu0 %v25303_v42 }
0x13cb   :  { %22192 = vmatpush3.bf16.msra.mxu0 %v25305_v22 }
0x13d8   :  { %v22127_v5 = vpop.f32.mrf.mxu1 }
0x13da   :  { %v22128_v11 = vpop.f32.mrf.mxu1 }
0x13db   :  { %v22129_v25 = vadd.f32 %v22128_v11, %v22127_v5 }
0x13dc   :  { %v22130_v31 = vpop.f32.mrf.mxu1 }
0x13dd   :  { %v32750_v55 = vadd.f32 %v22129_v25, %v17299_v39 }
0x13de   :  { %v22131_v35 = vpop.f32.mrf.mxu1 }
0x13e0   :  { %v17424_v50 = vpop.f32.mrf.mxu1 }
0x13e1   :  { %v17433_v21 = vpack.c.bf16 %v17424_v50, %v17424_v50 }
0x13e2   :  { %v17426_v20 = vpop.f32.mrf.mxu1 }
0x13e3   :  { %v17434_v43 = vpack.c.bf16 %v17426_v20, %v17426_v20 }
0x13e4   :  { %v17428_v47 = vpop.f32.mrf.mxu1 }
0x13e5   :  { %17764 = vmatprep.mubr.bf16.mxu1 %v17434_v43 }
0x13e6   :  { %17765 = vmatmul.mubr.bf16.vlgmr.msra.gmra.mxu1 %v17433_v21  ;;  %v17429_v27 = vpop.f32.mrf.mxu1 }
0x13e7   :  { %17834 = vmatpush1.bf16.msra.mxu1 %v32422_v61  ;;  %17851 = vmatprep.mubr.bf16.mxu1 %v25357_v2  ;;  %v25284_v2 = vld [vmem:[%s32842_s14 + $0x3e8] sm:$0xff]  }
0x13e8   :  { %22199 = vmatprep.subr.bf16.mxu1 %v25276_v18  ;;  %v25286_v61 = vld [vmem:[%s32842_s14 + $0x3a8] sm:$0xff]  }
0x13ee   :  { %21924 = vmatmul.mubr.msk.bf16.vlgmr.msra.gmra.mxu1 %vm16477_vm4, %v21920_v32 }
0x13ef   :  { %22200 = vmatpush3.bf16.msra.mxu1 %v25278_v34 }
0x13f0   :  { %22201 = vmatprep.subr.bf16.mxu1 %v25280_v26 }
0x13f3   :  { %22202 = vmatpush3.bf16.msra.mxu1 %v25282_v59 }
0x13f4   :  { %22203 = vmatprep.subr.bf16.mxu1 %v25284_v2 }
0x13f7   :  { %22204 = vmatpush3.bf16.msra.mxu1 %v25286_v61 }
0x13f8   :  { %22205 = vmatprep.subr.bf16.mxu1 %v25288_v24 }
0x13fb   :  { %22206 = vmatpush3.bf16.msra.mxu1 %v25290_v7 }
0x13fc   :  { %22207 = vmatprep.subr.bf16.mxu1 %v25292_v23 }
0x13ff   :  { %22208 = vmatpush3.bf16.msra.mxu1 %v25294_v36 }
0x1400   :  { %22209 = vmatprep.subr.bf16.mxu1 %v25296_v38 }
0x1403   :  { %22210 = vmatpush3.bf16.msra.mxu1 %v25298_v17 }
0x1404   :  { %22211 = vmatprep.subr.bf16.mxu1 %v25300_v51 }
0x1407   :  { %22212 = vmatpush3.bf16.msra.mxu1 %v25302_v9 }
0x1408   :  { %22213 = vmatprep.subr.bf16.mxu1 %v25304_v19 }
0x140b   :  { %22214 = vmatpush3.bf16.msra.mxu1 %v25306_v15 }
0x1466   :  { %v22149_v14 = vpop.f32.mrf.mxu0 }
0x1468   :  { %v22150_v16 = vpop.f32.mrf.mxu0 }
0x1469   :  { %v22151_v57 = vadd.f32 %v22150_v16, %v22149_v14 }
0x146a   :  { %v22152_v60 = vpop.f32.mrf.mxu0 }
0x146c   :  { %v22153_v56 = vpop.f32.mrf.mxu0 }
0x146e   :  { %v17812_v28 = vpop.f32.mrf.mxu0 }
0x146f   :  { %v17860_v45 = vpack.c.bf16 %v17812_v28, %v17812_v28 }
0x1470   :  { %v17814_v1 = vpop.f32.mrf.mxu0 }
0x1471   :  { %v17861_v49 = vpack.c.bf16 %v17814_v1, %v17814_v1 }
0x1472   :  { %v17816_v10 = vpop.f32.mrf.mxu0 }
0x1473   :  { %18153 = vmatprep.mubr.bf16.mxu0 %v17861_v49 }
0x1474   :  { %18154 = vmatmul.mubr.bf16.vlgmr.msra.gmra.mxu0 %v17860_v45  ;;  %v17817_v6 = vpop.f32.mrf.mxu0 }
0x14a6   :  { %v22171_v0 = vpop.f32.mrf.mxu1 }
0x14a8   :  { %v22172_v8 = vpop.f32.mrf.mxu1 }
0x14a9   :  { %v22173_v32 = vadd.f32 %v22172_v8, %v22171_v0 }
0x14aa   :  { %v22174_v29 = vpop.f32.mrf.mxu1 }
0x14ab   :  { %v17767_v3 = vadd.f32 %v22173_v32, %v22151_v57 }
0x14ac   :  { %v22175_v40 = vpop.f32.mrf.mxu1 }
0x14ad   :  { %v17772_v33 = vadd.f32 %v17767_v3, %v32750_v55  ;;  %v18202_v55 = vld [vmem:[%s32843_s15] sm:$0x1] }
0x14ae   :  { %v17853_v53 = vpop.f32.mrf.mxu1 }
0x14af   :  { %v17862_v52 = vpack.c.bf16 %v17853_v53, %v17853_v53 }
0x14b0   :  { %v17855_v12 = vpop.f32.mrf.mxu1 }
0x14b1   :  { %v17863_v46 = vpack.c.bf16 %v17855_v12, %v17855_v12 }
0x14b2   :  { %v17857_v30 = vpop.f32.mrf.mxu1 }
0x14b3   :  { %18193 = vmatprep.mubr.bf16.mxu1 %v17863_v46 }
0x14b4   :  { %18194 = vmatmul.mubr.bf16.vlgmr.msra.gmra.mxu1 %v17862_v52  ;;  %v17858_v54 = vpop.f32.mrf.mxu1 }
0x1534   :  { %v22193_v44 = vpop.f32.mrf.mxu0 }
0x1536   :  { %v22194_v41 = vpop.f32.mrf.mxu0 }
0x1537   :  { %v22195_v13 = vadd.f32 %v22194_v41, %v22193_v44 }
0x1538   :  { %v22196_v58 = vpop.f32.mrf.mxu0 }
0x153a   :  { %v22197_v48 = vpop.f32.mrf.mxu0 }
0x1574   :  { %v22215_v39 = vpop.f32.mrf.mxu1 }
0x1576   :  { %v22216_v5 = vpop.f32.mrf.mxu1 }
0x1577   :  { %v22217_v11 = vadd.f32 %v22216_v5, %v22215_v39 }
0x1578   :  { %v22218_v25 = vpop.f32.mrf.mxu1 }
0x1579   :  { %v18196_v31 = vadd.f32 %v22217_v11, %v22195_v13 }
0x157a   :  { %v22219_v35 = vpop.f32.mrf.mxu1 }
0x157b   :  { %v18201_v50 = vadd.f32 %v18196_v31, %v17772_v33 }
0x157d   :  { %v18203_v20 = vadd.f32 %v18202_v55, %v18201_v50 }
0x157f   :  { %v18204_v43 = vsub.f32 0.0, %v18203_v20 }
0x1581   :  { %v18205_v21 = vmul.f32 1.442695, %v18204_v43 }
0x1583   :  { %25307 = vpow2.f32 %v18205_v21 }
0x1590   :  { %v25308_v47 = vpop.eup %25307 }
0x1591   :  { %v18207_v18 = vadd.f32 1.0, %v25308_v47 }
0x1593   :  { %25309 = vrcp.f32 %v18207_v18 }
0x15a0   :  { %v25310_v27 = vpop.eup %25309 }
0x15a1   :  { %18211 = vst.msk [vmem:[#allocation2] sm:$0x1] %vm18210_vm7, %v25310_v27 }
0x15a2   :  { %25346 = shalt.err (!%p25343_p4)
}
0x15a3   :  { %18221 = dma.vmem_to_hbm [thread:$0]  %s18219_s13, 16, %s32844_s16, [#allocation3]  }
0x15a4   :  { %25355 = dma.done.wait [#allocation3], 16  }
0x15a5   :  { %25356 = vsyncadd [#allocation3], 4294967280 }
0x15a6   :  { %18225 = vsyncpa [#allocation3], 1 }

</bundles_post_ra>
